<compile_context>
chip_gen: v7x
topology: tpu7x:2x2x1
jax: 0.10.0
libtpu: 0.0.40
codegen_flags: <defaults>
</compile_context>

<pallas_src>
import functools

import numpy as np
import jax
import jax.numpy as jnp
from jax.experimental import pallas as pl
from jax.experimental.pallas import tpu as pltpu


# ----------------------------------------------------------------------------
# In-kernel helpers (operate on VMEM refs / values only)
# ----------------------------------------------------------------------------
def _conv3x3(pad_ref, w_ref, H, W):
    """3x3 'same' conv reading a zero-haloed (H+2, W+2, Cin) VMEM scratch.

    w_ref block: (1, 9, Cin, Cout).  Returns (H*W, Cout) f32.
    """
    cin = pad_ref.shape[-1]
    cout = w_ref.shape[-1]
    acc = jnp.zeros((H * W, cout), jnp.float32)
    for kh in range(3):
        for kw in range(3):
            tap = pad_ref[kh:kh + H, kw:kw + W, :].reshape(H * W, cin)
            acc = acc + jnp.dot(tap, w_ref[0, kh * 3 + kw],
                                preferred_element_type=jnp.float32)
    return acc


def _basic_unit_3x3(x, pad_in, pad_mid, w1_ref, w2_ref, H, W):
    """Conv3x3 -> ReLU -> Conv3x3 (no bias), all VMEM resident.

    x: (H*W, Cin) value.  pad_in / pad_mid: zero-haloed scratches whose halo
    is already zero; only the interior is overwritten here.
    """
    pad_in[1:1 + H, 1:1 + W, :] = x.reshape(H, W, x.shape[-1])
    mid = jnp.maximum(_conv3x3(pad_in, w1_ref, H, W), 0.0)
    pad_mid[1:1 + H, 1:1 + W, :] = mid.reshape(H, W, mid.shape[-1])
    return _conv3x3(pad_mid, w2_ref, H, W)


def _basic_unit_1x1(x, w1, w2):
    """Conv1x1 -> ReLU -> Conv1x1 (no bias) == two plain matmuls."""
    mid = jnp.maximum(jnp.dot(x, w1, preferred_element_type=jnp.float32), 0.0)
    return jnp.dot(mid, w2, preferred_element_type=jnp.float32)


# ----------------------------------------------------------------------------
# The fused whole-network kernel
# ----------------------------------------------------------------------------
def _make_gppnn_kernel(M, N, m, n):
    def kernel(ms_ref, pan_ref, rup_ref, rdn_ref,
               lr_lr_w1, lr_lr_w2, lr_res_w1, lr_res_w2, lr_prox_w1, lr_prox_w2,
               pan_pan_w1, pan_pan_w2, pan_res_w1, pan_res_w2,
               pan_prox_w1, pan_prox_w2,
               o_ref,
               hr_ref, pad_hr_in, pad_hr_mid, pad_lr_in, pad_lr_mid):
        layer = pl.program_id(1)

        @pl.when(layer == 0)
        def _init():
            # Zero the haloed scratches once per batch item; interiors are
            # overwritten every layer so the halo stays zero afterwards.
            pad_hr_in[...] = jnp.zeros_like(pad_hr_in)
            pad_hr_mid[...] = jnp.zeros_like(pad_hr_mid)
            pad_lr_in[...] = jnp.zeros_like(pad_lr_in)
            pad_lr_mid[...] = jnp.zeros_like(pad_lr_mid)
            # HR = bicubic_upsample(ms): one kron'd interpolation matmul.
            hr_ref[...] = jnp.dot(rup_ref[...], ms_ref[0],
                                  preferred_element_type=jnp.float32)

        hr = hr_ref[...]                                        # (M*N, C)

        # ----------------------------- LRBlock (3x3 convs) ------------------
        t = _basic_unit_3x3(hr, pad_hr_in, pad_hr_mid, lr_lr_w1, lr_lr_w2, M, N)
        lr_hat = jnp.dot(rdn_ref[...], t,
                         preferred_element_type=jnp.float32)    # (m*n, C) downsample
        lr_resid = ms_ref[0] - lr_hat
        u = _basic_unit_3x3(lr_resid, pad_lr_in, pad_lr_mid,
                            lr_res_w1, lr_res_w2, m, n)
        hr_resid = jnp.dot(rup_ref[...], u,
                           preferred_element_type=jnp.float32)  # (M*N, C) upsample
        hr = _basic_unit_3x3(hr + hr_resid, pad_hr_in, pad_hr_mid,
                             lr_prox_w1, lr_prox_w2, M, N)

        # ----------------------------- PANBlock (1x1 convs) -----------------
        pan_hat = _basic_unit_1x1(hr, pan_pan_w1[0], pan_pan_w2[0])   # (M*N, 1)
        pan_resid = pan_ref[0] - pan_hat
        hr_resid2 = _basic_unit_1x1(pan_resid, pan_res_w1[0], pan_res_w2[0])
        hr_new = _basic_unit_1x1(hr + hr_resid2,
                                 pan_prox_w1[0], pan_prox_w2[0])      # (M*N, C)

        hr_ref[...] = hr_new

        @pl.when(layer == pl.num_programs(1) - 1)
        def _write_out():
            o_ref[0] = hr_new

    return kernel


# ----------------------------------------------------------------------------
# Bicubic (align_corners=True) interpolation matrices (host-side, Keys A=-0.75)
# ----------------------------------------------------------------------------
@functools.lru_cache(maxsize=None)
def _bicubic_matrix(out_size, in_size):
    A = -0.75

    def cubic(t):
        t = abs(float(t))
        if t <= 1.0:
            return (A + 2.0) * t ** 3 - (A + 3.0) * t ** 2 + 1.0
        if t < 2.0:
            return A * t ** 3 - 5.0 * A * t ** 2 + 8.0 * A * t - 4.0 * A
        return 0.0

    W = np.zeros((out_size, in_size), np.float32)
    scale = 0.0 if out_size <= 1 else (in_size - 1) / (out_size - 1)
    for i in range(out_size):
        x = i * scale
        x0 = int(np.floor(x))
        t = x - x0
        for k in range(-1, 3):
            idx = min(max(x0 + k, 0), in_size - 1)
            W[i, idx] += cubic(k - t)
    return W


# ----------------------------------------------------------------------------
# Parameters (stored in matmul-ready layouts, stacked over layers)
# ----------------------------------------------------------------------------
def _init_basic_unit(key, cin, cmid, cout, k):
    k1, k2 = jax.random.split(key)
    b1 = 1.0 / np.sqrt(cin * k * k)
    b2 = 1.0 / np.sqrt(cmid * k * k)
    w1 = jax.random.uniform(k1, (k, k, cin, cmid), jnp.float32, -b1, b1)
    w2 = jax.random.uniform(k2, (k, k, cmid, cout), jnp.float32, -b2, b2)
    if k == 1:
        return w1.reshape(cin, cmid), w2.reshape(cmid, cout)
    return w1.reshape(k * k, cin, cmid), w2.reshape(k * k, cmid, cout)


def init_gppnn(key, in_channels=5, out_channels=4, n_feat=64, n_layer=8):
    del out_channels  # (unused, as in the reference GPPNN)
    ms_ch = in_channels - 1
    specs = {
        "lr_lr":    (ms_ch, n_feat, ms_ch, 3),
        "lr_res":   (ms_ch, n_feat, ms_ch, 3),
        "lr_prox":  (ms_ch, n_feat, ms_ch, 3),
        "pan_pan":  (ms_ch, n_feat, 1, 1),
        "pan_res":  (1, n_feat, ms_ch, 1),
        "pan_prox": (ms_ch, n_feat, ms_ch, 1),
    }
    params = {}
    for name, (cin, cmid, cout, k) in specs.items():
        w1s, w2s = [], []
        for _ in range(n_layer):
            key, sub = jax.random.split(key)
            w1, w2 = _init_basic_unit(sub, cin, cmid, cout, k)
            w1s.append(w1)
            w2s.append(w2)
        params[name + "_w1"] = jnp.stack(w1s)
        params[name + "_w2"] = jnp.stack(w2s)
    return params


_W_NAMES = ("lr_lr_w1", "lr_lr_w2", "lr_res_w1", "lr_res_w2",
            "lr_prox_w1", "lr_prox_w2",
            "pan_pan_w1", "pan_pan_w2", "pan_res_w1", "pan_res_w2",
            "pan_prox_w1", "pan_prox_w2")


# ----------------------------------------------------------------------------
# Forward pass (single fused pallas_call)
# ----------------------------------------------------------------------------
def gppnn_forward(params, ms, pan):
    """ms: (B, m, n, C) NHWC multispectral; pan: (B, M, N, 1) NHWC pan."""
    B, m, n, C = ms.shape
    _, M, N, _ = pan.shape
    L = params["lr_lr_w1"].shape[0]
    nf = params["lr_lr_w1"].shape[-1]

    # Bicubic resize == one dense interpolation matmul on the flattened
    # spatial axis (separable row/col matrices kron'd on the host).
    rup = jnp.asarray(np.kron(_bicubic_matrix(M, m), _bicubic_matrix(N, n)))
    rdn = jnp.asarray(np.kron(_bicubic_matrix(m, M), _bicubic_matrix(n, N)))

    ms_flat = ms.reshape(B, m * n, C)
    pan_flat = pan.reshape(B, M * N, 1)
    ws = [params[k] for k in _W_NAMES]

    def _w_spec(w):
        zeros = (0,) * (w.ndim - 1)
        return pl.BlockSpec((1,) + w.shape[1:], lambda b, l, z=zeros: (l,) + z)

    kernel = _make_gppnn_kernel(M, N, m, n)
    out = pl.pallas_call(
        kernel,
        out_shape=jax.ShapeDtypeStruct((B, M * N, C), jnp.float32),
        grid=(B, L),
        in_specs=[
            pl.BlockSpec((1, m * n, C), lambda b, l: (b, 0, 0)),
            pl.BlockSpec((1, M * N, 1), lambda b, l: (b, 0, 0)),
            pl.BlockSpec((M * N, m * n), lambda b, l: (0, 0)),
            pl.BlockSpec((m * n, M * N), lambda b, l: (0, 0)),
            *[_w_spec(w) for w in ws],
        ],
        out_specs=pl.BlockSpec((1, M * N, C), lambda b, l: (b, 0, 0)),
        scratch_shapes=[
            pltpu.VMEM((M * N, C), jnp.float32),          # HR state (resident)
            pltpu.VMEM((M + 2, N + 2, C), jnp.float32),   # zero-haloed HR conv input
            pltpu.VMEM((M + 2, N + 2, nf), jnp.float32),  # zero-haloed HR conv mid
            pltpu.VMEM((m + 2, n + 2, C), jnp.float32),   # zero-haloed LR conv input
            pltpu.VMEM((m + 2, n + 2, nf), jnp.float32),  # zero-haloed LR conv mid
        ],
        compiler_params=pltpu.CompilerParams(
            dimension_semantics=("parallel", "arbitrary")),
    )(ms_flat, pan_flat, rup, rdn, *ws)
    return out.reshape(B, M, N, C)


# ----------------------------------------------------------------------------
if __name__ == "__main__":
    key = jax.random.PRNGKey(0)
    kp, kms, kpan = jax.random.split(key, 3)

    # GPPNN(in_channels=5, out_channels=4): ms has 4 channels, pan has 1.
    params = init_gppnn(kp, in_channels=5, out_channels=4, n_feat=64, n_layer=8)

    # NHWC inputs (PyTorch NCHW equivalents: ms (2,4,8,8), pan (2,1,16,16)).
    ms = jax.random.normal(kms, (2, 8, 8, 4), jnp.float32)
    pan = jax.random.normal(kpan, (2, 16, 16, 1), jnp.float32)

    fwd = jax.jit(gppnn_forward)
    out = jax.block_until_ready(fwd(params, ms, pan))

    assert out.shape == (2, 16, 16, 4), out.shape
    assert bool(jnp.all(jnp.isfinite(out)))
    print("KERNEL_OK")
</pallas_src>

<mosaic_0001>
module attributes {stable_mosaic.version = 11 : i64} {
  func.func @kernel(%arg0: i32, %arg1: i32, %arg2: memref<1x64x4xf32, #tpu.memory_space<vmem>>, %arg3: memref<1x256x1xf32, #tpu.memory_space<vmem>>, %arg4: memref<256x64xf32, #tpu.memory_space<vmem>>, %arg5: memref<64x256xf32, #tpu.memory_space<vmem>>, %arg6: memref<1x9x4x64xf32, #tpu.memory_space<vmem>>, %arg7: memref<1x9x64x4xf32, #tpu.memory_space<vmem>>, %arg8: memref<1x9x4x64xf32, #tpu.memory_space<vmem>>, %arg9: memref<1x9x64x4xf32, #tpu.memory_space<vmem>>, %arg10: memref<1x9x4x64xf32, #tpu.memory_space<vmem>>, %arg11: memref<1x9x64x4xf32, #tpu.memory_space<vmem>>, %arg12: memref<1x4x64xf32, #tpu.memory_space<vmem>>, %arg13: memref<1x64x1xf32, #tpu.memory_space<vmem>>, %arg14: memref<1x1x64xf32, #tpu.memory_space<vmem>>, %arg15: memref<1x64x4xf32, #tpu.memory_space<vmem>>, %arg16: memref<1x4x64xf32, #tpu.memory_space<vmem>>, %arg17: memref<1x64x4xf32, #tpu.memory_space<vmem>>, %arg18: memref<1x256x4xf32, #tpu.memory_space<vmem>>, %arg19: memref<256x4xf32, #tpu.memory_space<vmem>>, %arg20: memref<18x18x4xf32, #tpu.memory_space<vmem>>, %arg21: memref<18x18x64xf32, #tpu.memory_space<vmem>>, %arg22: memref<10x10x4xf32, #tpu.memory_space<vmem>>, %arg23: memref<10x10x64xf32, #tpu.memory_space<vmem>>) attributes {dimension_semantics = [#tpu.dimension_semantics<parallel>, #tpu.dimension_semantics<arbitrary>], iteration_bounds = array<i64: 2, 8>, scalar_prefetch = 0 : i64, scratch_operands = 5 : i64, tpu.core_type = #tpu.core_type<tc>, window_params = [{transform_indices = @transform_0, window_bounds = array<i64: 1, 64, 4>}, {transform_indices = @transform_1, window_bounds = array<i64: 1, 256, 1>}, {pipeline_mode = #tpu.pipeline_mode<synchronous>, transform_indices = @transform_2, window_bounds = array<i64: 256, 64>}, {pipeline_mode = #tpu.pipeline_mode<synchronous>, transform_indices = @transform_3, window_bounds = array<i64: 64, 256>}, {transform_indices = @transform_4, window_bounds = array<i64: 1, 9, 4, 64>}, {transform_indices = @transform_5, window_bounds = array<i64: 1, 9, 64, 4>}, {transform_indices = @transform_6, window_bounds = array<i64: 1, 9, 4, 64>}, {transform_indices = @transform_7, window_bounds = array<i64: 1, 9, 64, 4>}, {transform_indices = @transform_8, window_bounds = array<i64: 1, 9, 4, 64>}, {transform_indices = @transform_9, window_bounds = array<i64: 1, 9, 64, 4>}, {transform_indices = @transform_10, window_bounds = array<i64: 1, 4, 64>}, {transform_indices = @transform_11, window_bounds = array<i64: 1, 64, 1>}, {transform_indices = @transform_12, window_bounds = array<i64: 1, 1, 64>}, {transform_indices = @transform_13, window_bounds = array<i64: 1, 64, 4>}, {transform_indices = @transform_14, window_bounds = array<i64: 1, 4, 64>}, {transform_indices = @transform_15, window_bounds = array<i64: 1, 64, 4>}, {transform_indices = @transform_16, window_bounds = array<i64: 1, 256, 4>}]} {
    %c0_i32 = arith.constant 0 : i32
    %0 = arith.cmpi eq, %arg1, %c0_i32 : i32
    %1 = arith.extui %0 : i1 to i32
    %c0_i32_0 = arith.constant 0 : i32
    %2 = arith.cmpi ne, %1, %c0_i32_0 : i32
    scf.if %2 {
      %cst_494 = arith.constant 0.000000e+00 : f32
      %392 = vector.broadcast %cst_494 : f32 to vector<18x18x4xf32>
      %c0_495 = arith.constant 0 : index
      %c0_496 = arith.constant 0 : index
      %c0_497 = arith.constant 0 : index
      %393 = vector.load %arg20[%c0_495, %c0_496, %c0_497] : memref<18x18x4xf32, #tpu.memory_space<vmem>>, vector<18x18x4xf32>
      tpu.vector_store %arg20[%c0_495, %c0_496, %c0_497], %392 {strides = array<i32>} : memref<18x18x4xf32, #tpu.memory_space<vmem>>, vector<18x18x4xf32>,
      %cst_498 = arith.constant 0.000000e+00 : f32
      %394 = vector.broadcast %cst_498 : f32 to vector<18x18x64xf32>
      %c0_499 = arith.constant 0 : index
      %c0_500 = arith.constant 0 : index
      %c0_501 = arith.constant 0 : index
      %395 = vector.load %arg21[%c0_499, %c0_500, %c0_501] : memref<18x18x64xf32, #tpu.memory_space<vmem>>, vector<18x18x64xf32>
      tpu.vector_store %arg21[%c0_499, %c0_500, %c0_501], %394 {strides = array<i32>} : memref<18x18x64xf32, #tpu.memory_space<vmem>>, vector<18x18x64xf32>,
      %cst_502 = arith.constant 0.000000e+00 : f32
      %396 = vector.broadcast %cst_502 : f32 to vector<10x10x4xf32>
      %c0_503 = arith.constant 0 : index
      %c0_504 = arith.constant 0 : index
      %c0_505 = arith.constant 0 : index
      %397 = vector.load %arg22[%c0_503, %c0_504, %c0_505] : memref<10x10x4xf32, #tpu.memory_space<vmem>>, vector<10x10x4xf32>
      tpu.vector_store %arg22[%c0_503, %c0_504, %c0_505], %396 {strides = array<i32>} : memref<10x10x4xf32, #tpu.memory_space<vmem>>, vector<10x10x4xf32>,
      %cst_506 = arith.constant 0.000000e+00 : f32
      %398 = vector.broadcast %cst_506 : f32 to vector<10x10x64xf32>
      %c0_507 = arith.constant 0 : index
      %c0_508 = arith.constant 0 : index
      %c0_509 = arith.constant 0 : index
      %399 = vector.load %arg23[%c0_507, %c0_508, %c0_509] : memref<10x10x64xf32, #tpu.memory_space<vmem>>, vector<10x10x64xf32>
      tpu.vector_store %arg23[%c0_507, %c0_508, %c0_509], %398 {strides = array<i32>} : memref<10x10x64xf32, #tpu.memory_space<vmem>>, vector<10x10x64xf32>,
      %c0_510 = arith.constant 0 : index
      %c0_511 = arith.constant 0 : index
      %400 = vector.load %arg4[%c0_510, %c0_511] : memref<256x64xf32, #tpu.memory_space<vmem>>, vector<256x64xf32>
      %c0_512 = arith.constant 0 : index
      %c0_513 = arith.constant 0 : index
      %c0_514 = arith.constant 0 : index
      %401 = vector.load %arg2[%c0_512, %c0_513, %c0_514] : memref<1x64x4xf32, #tpu.memory_space<vmem>>, vector<1x64x4xf32>
      %402 = vector.shape_cast %401 : vector<1x64x4xf32> to vector<64x4xf32>
      %cst_515 = arith.constant dense<0.000000e+00> : vector<256x4xf32>
      %403 = tpu.matmul %400, %402, %cst_515 {dimension_numbers = #tpu.dot_dimension_numbers<[1], [0], [0], [1], [0, 0, 1, 1], [], []>} : vector<256x64xf32>, vector<64x4xf32>, vector<256x4xf32> -> vector<256x4xf32>
      %c0_516 = arith.constant 0 : index
      %c0_517 = arith.constant 0 : index
      %404 = vector.load %arg19[%c0_516, %c0_517] : memref<256x4xf32, #tpu.memory_space<vmem>>, vector<256x4xf32>
      tpu.vector_store %arg19[%c0_516, %c0_517], %403 {strides = array<i32>} : memref<256x4xf32, #tpu.memory_space<vmem>>, vector<256x4xf32>,
    } else {
    }
    %c0 = arith.constant 0 : index
    %c0_1 = arith.constant 0 : index
    %3 = vector.load %arg19[%c0, %c0_1] : memref<256x4xf32, #tpu.memory_space<vmem>>, vector<256x4xf32>
    %4 = vector.shape_cast %3 : vector<256x4xf32> to vector<16x16x4xf32>
    %c1 = arith.constant 1 : index
    %c1_2 = arith.constant 1 : index
    %c0_3 = arith.constant 0 : index
    %5 = vector.load %arg20[%c1, %c1_2, %c0_3] : memref<18x18x4xf32, #tpu.memory_space<vmem>>, vector<16x16x4xf32>
    tpu.vector_store %arg20[%c1, %c1_2, %c0_3], %4 {strides = array<i32>} : memref<18x18x4xf32, #tpu.memory_space<vmem>>, vector<16x16x4xf32>,
    %cst = arith.constant 0.000000e+00 : f32
    %6 = vector.broadcast %cst : f32 to vector<256x64xf32>
    %c0_4 = arith.constant 0 : index
    %c0_5 = arith.constant 0 : index
    %c0_6 = arith.constant 0 : index
    %7 = vector.load %arg20[%c0_4, %c0_5, %c0_6] : memref<18x18x4xf32, #tpu.memory_space<vmem>>, vector<16x16x4xf32>
    %8 = vector.shape_cast %7 : vector<16x16x4xf32> to vector<256x4xf32>
    %c0_7 = arith.constant 0 : index
    %c0_8 = arith.constant 0 : index
    %c0_9 = arith.constant 0 : index
    %c0_10 = arith.constant 0 : index
    %9 = vector.load %arg6[%c0_7, %c0_8, %c0_9, %c0_10] : memref<1x9x4x64xf32, #tpu.memory_space<vmem>>, vector<1x1x4x64xf32>
    %10 = vector.shape_cast %9 : vector<1x1x4x64xf32> to vector<4x64xf32>
    %cst_11 = arith.constant dense<0.000000e+00> : vector<256x64xf32>
    %11 = tpu.matmul %8, %10, %cst_11 {dimension_numbers = #tpu.dot_dimension_numbers<[1], [0], [0], [1], [0, 0, 1, 1], [], []>} : vector<256x4xf32>, vector<4x64xf32>, vector<256x64xf32> -> vector<256x64xf32>
    %12 = arith.addf %6, %11 : vector<256x64xf32>
    %c0_12 = arith.constant 0 : index
    %c1_13 = arith.constant 1 : index
    %c0_14 = arith.constant 0 : index
    %13 = vector.load %arg20[%c0_12, %c1_13, %c0_14] : memref<18x18x4xf32, #tpu.memory_space<vmem>>, vector<16x16x4xf32>
    %14 = vector.shape_cast %13 : vector<16x16x4xf32> to vector<256x4xf32>
    %c0_15 = arith.constant 0 : index
    %c1_16 = arith.constant 1 : index
    %c0_17 = arith.constant 0 : index
    %c0_18 = arith.constant 0 : index
    %15 = vector.load %arg6[%c0_15, %c1_16, %c0_17, %c0_18] : memref<1x9x4x64xf32, #tpu.memory_space<vmem>>, vector<1x1x4x64xf32>
    %16 = vector.shape_cast %15 : vector<1x1x4x64xf32> to vector<4x64xf32>
    %cst_19 = arith.constant dense<0.000000e+00> : vector<256x64xf32>
    %17 = tpu.matmul %14, %16, %cst_19 {dimension_numbers = #tpu.dot_dimension_numbers<[1], [0], [0], [1], [0, 0, 1, 1], [], []>} : vector<256x4xf32>, vector<4x64xf32>, vector<256x64xf32> -> vector<256x64xf32>
    %18 = arith.addf %12, %17 : vector<256x64xf32>
    %c0_20 = arith.constant 0 : index
    %c2 = arith.constant 2 : index
    %c0_21 = arith.constant 0 : index
    %19 = vector.load %arg20[%c0_20, %c2, %c0_21] : memref<18x18x4xf32, #tpu.memory_space<vmem>>, vector<16x16x4xf32>
    %20 = vector.shape_cast %19 : vector<16x16x4xf32> to vector<256x4xf32>
    %c0_22 = arith.constant 0 : index
    %c2_23 = arith.constant 2 : index
    %c0_24 = arith.constant 0 : index
    %c0_25 = arith.constant 0 : index
    %21 = vector.load %arg6[%c0_22, %c2_23, %c0_24, %c0_25] : memref<1x9x4x64xf32, #tpu.memory_space<vmem>>, vector<1x1x4x64xf32>
    %22 = vector.shape_cast %21 : vector<1x1x4x64xf32> to vector<4x64xf32>
    %cst_26 = arith.constant dense<0.000000e+00> : vector<256x64xf32>
    %23 = tpu.matmul %20, %22, %cst_26 {dimension_numbers = #tpu.dot_dimension_numbers<[1], [0], [0], [1], [0, 0, 1, 1], [], []>} : vector<256x4xf32>, vector<4x64xf32>, vector<256x64xf32> -> vector<256x64xf32>
    %24 = arith.addf %18, %23 : vector<256x64xf32>
    %c1_27 = arith.constant 1 : index
    %c0_28 = arith.constant 0 : index
    %c0_29 = arith.constant 0 : index
    %25 = vector.load %arg20[%c1_27, %c0_28, %c0_29] : memref<18x18x4xf32, #tpu.memory_space<vmem>>, vector<16x16x4xf32>
    %26 = vector.shape_cast %25 : vector<16x16x4xf32> to vector<256x4xf32>
    %c0_30 = arith.constant 0 : index
    %c3 = arith.constant 3 : index
    %c0_31 = arith.constant 0 : index
    %c0_32 = arith.constant 0 : index
    %27 = vector.load %arg6[%c0_30, %c3, %c0_31, %c0_32] : memref<1x9x4x64xf32, #tpu.memory_space<vmem>>, vector<1x1x4x64xf32>
    %28 = vector.shape_cast %27 : vector<1x1x4x64xf32> to vector<4x64xf32>
    %cst_33 = arith.constant dense<0.000000e+00> : vector<256x64xf32>
    %29 = tpu.matmul %26, %28, %cst_33 {dimension_numbers = #tpu.dot_dimension_numbers<[1], [0], [0], [1], [0, 0, 1, 1], [], []>} : vector<256x4xf32>, vector<4x64xf32>, vector<256x64xf32> -> vector<256x64xf32>
    %30 = arith.addf %24, %29 : vector<256x64xf32>
    %c1_34 = arith.constant 1 : index
    %c1_35 = arith.constant 1 : index
    %c0_36 = arith.constant 0 : index
    %31 = vector.load %arg20[%c1_34, %c1_35, %c0_36] : memref<18x18x4xf32, #tpu.memory_space<vmem>>, vector<16x16x4xf32>
    %32 = vector.shape_cast %31 : vector<16x16x4xf32> to vector<256x4xf32>
    %c0_37 = arith.constant 0 : index
    %c4 = arith.constant 4 : index
    %c0_38 = arith.constant 0 : index
    %c0_39 = arith.constant 0 : index
    %33 = vector.load %arg6[%c0_37, %c4, %c0_38, %c0_39] : memref<1x9x4x64xf32, #tpu.memory_space<vmem>>, vector<1x1x4x64xf32>
    %34 = vector.shape_cast %33 : vector<1x1x4x64xf32> to vector<4x64xf32>
    %cst_40 = arith.constant dense<0.000000e+00> : vector<256x64xf32>
    %35 = tpu.matmul %32, %34, %cst_40 {dimension_numbers = #tpu.dot_dimension_numbers<[1], [0], [0], [1], [0, 0, 1, 1], [], []>} : vector<256x4xf32>, vector<4x64xf32>, vector<256x64xf32> -> vector<256x64xf32>
    %36 = arith.addf %30, %35 : vector<256x64xf32>
    %c1_41 = arith.constant 1 : index
    %c2_42 = arith.constant 2 : index
    %c0_43 = arith.constant 0 : index
    %37 = vector.load %arg20[%c1_41, %c2_42, %c0_43] : memref<18x18x4xf32, #tpu.memory_space<vmem>>, vector<16x16x4xf32>
    %38 = vector.shape_cast %37 : vector<16x16x4xf32> to vector<256x4xf32>
    %c0_44 = arith.constant 0 : index
    %c5 = arith.constant 5 : index
    %c0_45 = arith.constant 0 : index
    %c0_46 = arith.constant 0 : index
    %39 = vector.load %arg6[%c0_44, %c5, %c0_45, %c0_46] : memref<1x9x4x64xf32, #tpu.memory_space<vmem>>, vector<1x1x4x64xf32>
    %40 = vector.shape_cast %39 : vector<1x1x4x64xf32> to vector<4x64xf32>
    %cst_47 = arith.constant dense<0.000000e+00> : vector<256x64xf32>
    %41 = tpu.matmul %38, %40, %cst_47 {dimension_numbers = #tpu.dot_dimension_numbers<[1], [0], [0], [1], [0, 0, 1, 1], [], []>} : vector<256x4xf32>, vector<4x64xf32>, vector<256x64xf32> -> vector<256x64xf32>
    %42 = arith.addf %36, %41 : vector<256x64xf32>
    %c2_48 = arith.constant 2 : index
    %c0_49 = arith.constant 0 : index
    %c0_50 = arith.constant 0 : index
    %43 = vector.load %arg20[%c2_48, %c0_49, %c0_50] : memref<18x18x4xf32, #tpu.memory_space<vmem>>, vector<16x16x4xf32>
    %44 = vector.shape_cast %43 : vector<16x16x4xf32> to vector<256x4xf32>
    %c0_51 = arith.constant 0 : index
    %c6 = arith.constant 6 : index
    %c0_52 = arith.constant 0 : index
    %c0_53 = arith.constant 0 : index
    %45 = vector.load %arg6[%c0_51, %c6, %c0_52, %c0_53] : memref<1x9x4x64xf32, #tpu.memory_space<vmem>>, vector<1x1x4x64xf32>
    %46 = vector.shape_cast %45 : vector<1x1x4x64xf32> to vector<4x64xf32>
    %cst_54 = arith.constant dense<0.000000e+00> : vector<256x64xf32>
    %47 = tpu.matmul %44, %46, %cst_54 {dimension_numbers = #tpu.dot_dimension_numbers<[1], [0], [0], [1], [0, 0, 1, 1], [], []>} : vector<256x4xf32>, vector<4x64xf32>, vector<256x64xf32> -> vector<256x64xf32>
    %48 = arith.addf %42, %47 : vector<256x64xf32>
    %c2_55 = arith.constant 2 : index
    %c1_56 = arith.constant 1 : index
    %c0_57 = arith.constant 0 : index
    %49 = vector.load %arg20[%c2_55, %c1_56, %c0_57] : memref<18x18x4xf32, #tpu.memory_space<vmem>>, vector<16x16x4xf32>
    %50 = vector.shape_cast %49 : vector<16x16x4xf32> to vector<256x4xf32>
    %c0_58 = arith.constant 0 : index
    %c7 = arith.constant 7 : index
    %c0_59 = arith.constant 0 : index
    %c0_60 = arith.constant 0 : index
    %51 = vector.load %arg6[%c0_58, %c7, %c0_59, %c0_60] : memref<1x9x4x64xf32, #tpu.memory_space<vmem>>, vector<1x1x4x64xf32>
    %52 = vector.shape_cast %51 : vector<1x1x4x64xf32> to vector<4x64xf32>
    %cst_61 = arith.constant dense<0.000000e+00> : vector<256x64xf32>
    %53 = tpu.matmul %50, %52, %cst_61 {dimension_numbers = #tpu.dot_dimension_numbers<[1], [0], [0], [1], [0, 0, 1, 1], [], []>} : vector<256x4xf32>, vector<4x64xf32>, vector<256x64xf32> -> vector<256x64xf32>
    %54 = arith.addf %48, %53 : vector<256x64xf32>
    %c2_62 = arith.constant 2 : index
    %c2_63 = arith.constant 2 : index
    %c0_64 = arith.constant 0 : index
    %55 = vector.load %arg20[%c2_62, %c2_63, %c0_64] : memref<18x18x4xf32, #tpu.memory_space<vmem>>, vector<16x16x4xf32>
    %56 = vector.shape_cast %55 : vector<16x16x4xf32> to vector<256x4xf32>
    %c0_65 = arith.constant 0 : index
    %c8 = arith.constant 8 : index
    %c0_66 = arith.constant 0 : index
    %c0_67 = arith.constant 0 : index
    %57 = vector.load %arg6[%c0_65, %c8, %c0_66, %c0_67] : memref<1x9x4x64xf32, #tpu.memory_space<vmem>>, vector<1x1x4x64xf32>
    %58 = vector.shape_cast %57 : vector<1x1x4x64xf32> to vector<4x64xf32>
    %cst_68 = arith.constant dense<0.000000e+00> : vector<256x64xf32>
    %59 = tpu.matmul %56, %58, %cst_68 {dimension_numbers = #tpu.dot_dimension_numbers<[1], [0], [0], [1], [0, 0, 1, 1], [], []>} : vector<256x4xf32>, vector<4x64xf32>, vector<256x64xf32> -> vector<256x64xf32>
    %60 = arith.addf %54, %59 : vector<256x64xf32>
    %cst_69 = arith.constant 0.000000e+00 : f32
    %61 = vector.broadcast %cst_69 : f32 to vector<256x64xf32>
    %62 = arith.maximumf %60, %61 : vector<256x64xf32>
    %63 = vector.shape_cast %62 : vector<256x64xf32> to vector<16x16x64xf32>
    %c1_70 = arith.constant 1 : index
    %c1_71 = arith.constant 1 : index
    %c0_72 = arith.constant 0 : index
    %64 = vector.load %arg21[%c1_70, %c1_71, %c0_72] : memref<18x18x64xf32, #tpu.memory_space<vmem>>, vector<16x16x64xf32>
    tpu.vector_store %arg21[%c1_70, %c1_71, %c0_72], %63 {strides = array<i32>} : memref<18x18x64xf32, #tpu.memory_space<vmem>>, vector<16x16x64xf32>,
    %cst_73 = arith.constant 0.000000e+00 : f32
    %65 = vector.broadcast %cst_73 : f32 to vector<256x4xf32>
    %c0_74 = arith.constant 0 : index
    %c0_75 = arith.constant 0 : index
    %c0_76 = arith.constant 0 : index
    %66 = vector.load %arg21[%c0_74, %c0_75, %c0_76] : memref<18x18x64xf32, #tpu.memory_space<vmem>>, vector<16x16x64xf32>
    %67 = vector.shape_cast %66 : vector<16x16x64xf32> to vector<256x64xf32>
    %c0_77 = arith.constant 0 : index
    %c0_78 = arith.constant 0 : index
    %c0_79 = arith.constant 0 : index
    %c0_80 = arith.constant 0 : index
    %68 = vector.load %arg7[%c0_77, %c0_78, %c0_79, %c0_80] : memref<1x9x64x4xf32, #tpu.memory_space<vmem>>, vector<1x1x64x4xf32>
    %69 = vector.shape_cast %68 : vector<1x1x64x4xf32> to vector<64x4xf32>
    %cst_81 = arith.constant dense<0.000000e+00> : vector<256x4xf32>
    %70 = tpu.matmul %67, %69, %cst_81 {dimension_numbers = #tpu.dot_dimension_numbers<[1], [0], [0], [1], [0, 0, 1, 1], [], []>} : vector<256x64xf32>, vector<64x4xf32>, vector<256x4xf32> -> vector<256x4xf32>
    %71 = arith.addf %65, %70 : vector<256x4xf32>
    %c0_82 = arith.constant 0 : index
    %c1_83 = arith.constant 1 : index
    %c0_84 = arith.constant 0 : index
    %72 = vector.load %arg21[%c0_82, %c1_83, %c0_84] : memref<18x18x64xf32, #tpu.memory_space<vmem>>, vector<16x16x64xf32>
    %73 = vector.shape_cast %72 : vector<16x16x64xf32> to vector<256x64xf32>
    %c0_85 = arith.constant 0 : index
    %c1_86 = arith.constant 1 : index
    %c0_87 = arith.constant 0 : index
    %c0_88 = arith.constant 0 : index
    %74 = vector.load %arg7[%c0_85, %c1_86, %c0_87, %c0_88] : memref<1x9x64x4xf32, #tpu.memory_space<vmem>>, vector<1x1x64x4xf32>
    %75 = vector.shape_cast %74 : vector<1x1x64x4xf32> to vector<64x4xf32>
    %cst_89 = arith.constant dense<0.000000e+00> : vector<256x4xf32>
    %76 = tpu.matmul %73, %75, %cst_89 {dimension_numbers = #tpu.dot_dimension_numbers<[1], [0], [0], [1], [0, 0, 1, 1], [], []>} : vector<256x64xf32>, vector<64x4xf32>, vector<256x4xf32> -> vector<256x4xf32>
    %77 = arith.addf %71, %76 : vector<256x4xf32>
    %c0_90 = arith.constant 0 : index
    %c2_91 = arith.constant 2 : index
    %c0_92 = arith.constant 0 : index
    %78 = vector.load %arg21[%c0_90, %c2_91, %c0_92] : memref<18x18x64xf32, #tpu.memory_space<vmem>>, vector<16x16x64xf32>
    %79 = vector.shape_cast %78 : vector<16x16x64xf32> to vector<256x64xf32>
    %c0_93 = arith.constant 0 : index
    %c2_94 = arith.constant 2 : index
    %c0_95 = arith.constant 0 : index
    %c0_96 = arith.constant 0 : index
    %80 = vector.load %arg7[%c0_93, %c2_94, %c0_95, %c0_96] : memref<1x9x64x4xf32, #tpu.memory_space<vmem>>, vector<1x1x64x4xf32>
    %81 = vector.shape_cast %80 : vector<1x1x64x4xf32> to vector<64x4xf32>
    %cst_97 = arith.constant dense<0.000000e+00> : vector<256x4xf32>
    %82 = tpu.matmul %79, %81, %cst_97 {dimension_numbers = #tpu.dot_dimension_numbers<[1], [0], [0], [1], [0, 0, 1, 1], [], []>} : vector<256x64xf32>, vector<64x4xf32>, vector<256x4xf32> -> vector<256x4xf32>
    %83 = arith.addf %77, %82 : vector<256x4xf32>
    %c1_98 = arith.constant 1 : index
    %c0_99 = arith.constant 0 : index
    %c0_100 = arith.constant 0 : index
    %84 = vector.load %arg21[%c1_98, %c0_99, %c0_100] : memref<18x18x64xf32, #tpu.memory_space<vmem>>, vector<16x16x64xf32>
    %85 = vector.shape_cast %84 : vector<16x16x64xf32> to vector<256x64xf32>
    %c0_101 = arith.constant 0 : index
    %c3_102 = arith.constant 3 : index
    %c0_103 = arith.constant 0 : index
    %c0_104 = arith.constant 0 : index
    %86 = vector.load %arg7[%c0_101, %c3_102, %c0_103, %c0_104] : memref<1x9x64x4xf32, #tpu.memory_space<vmem>>, vector<1x1x64x4xf32>
    %87 = vector.shape_cast %86 : vector<1x1x64x4xf32> to vector<64x4xf32>
    %cst_105 = arith.constant dense<0.000000e+00> : vector<256x4xf32>
    %88 = tpu.matmul %85, %87, %cst_105 {dimension_numbers = #tpu.dot_dimension_numbers<[1], [0], [0], [1], [0, 0, 1, 1], [], []>} : vector<256x64xf32>, vector<64x4xf32>, vector<256x4xf32> -> vector<256x4xf32>
    %89 = arith.addf %83, %88 : vector<256x4xf32>
    %c1_106 = arith.constant 1 : index
    %c1_107 = arith.constant 1 : index
    %c0_108 = arith.constant 0 : index
    %90 = vector.load %arg21[%c1_106, %c1_107, %c0_108] : memref<18x18x64xf32, #tpu.memory_space<vmem>>, vector<16x16x64xf32>
    %91 = vector.shape_cast %90 : vector<16x16x64xf32> to vector<256x64xf32>
    %c0_109 = arith.constant 0 : index
    %c4_110 = arith.constant 4 : index
    %c0_111 = arith.constant 0 : index
    %c0_112 = arith.constant 0 : index
    %92 = vector.load %arg7[%c0_109, %c4_110, %c0_111, %c0_112] : memref<1x9x64x4xf32, #tpu.memory_space<vmem>>, vector<1x1x64x4xf32>
    %93 = vector.shape_cast %92 : vector<1x1x64x4xf32> to vector<64x4xf32>
    %cst_113 = arith.constant dense<0.000000e+00> : vector<256x4xf32>
    %94 = tpu.matmul %91, %93, %cst_113 {dimension_numbers = #tpu.dot_dimension_numbers<[1], [0], [0], [1], [0, 0, 1, 1], [], []>} : vector<256x64xf32>, vector<64x4xf32>, vector<256x4xf32> -> vector<256x4xf32>
    %95 = arith.addf %89, %94 : vector<256x4xf32>
    %c1_114 = arith.constant 1 : index
    %c2_115 = arith.constant 2 : index
    %c0_116 = arith.constant 0 : index
    %96 = vector.load %arg21[%c1_114, %c2_115, %c0_116] : memref<18x18x64xf32, #tpu.memory_space<vmem>>, vector<16x16x64xf32>
    %97 = vector.shape_cast %96 : vector<16x16x64xf32> to vector<256x64xf32>
    %c0_117 = arith.constant 0 : index
    %c5_118 = arith.constant 5 : index
    %c0_119 = arith.constant 0 : index
    %c0_120 = arith.constant 0 : index
    %98 = vector.load %arg7[%c0_117, %c5_118, %c0_119, %c0_120] : memref<1x9x64x4xf32, #tpu.memory_space<vmem>>, vector<1x1x64x4xf32>
    %99 = vector.shape_cast %98 : vector<1x1x64x4xf32> to vector<64x4xf32>
    %cst_121 = arith.constant dense<0.000000e+00> : vector<256x4xf32>
    %100 = tpu.matmul %97, %99, %cst_121 {dimension_numbers = #tpu.dot_dimension_numbers<[1], [0], [0], [1], [0, 0, 1, 1], [], []>} : vector<256x64xf32>, vector<64x4xf32>, vector<256x4xf32> -> vector<256x4xf32>
    %101 = arith.addf %95, %100 : vector<256x4xf32>
    %c2_122 = arith.constant 2 : index
    %c0_123 = arith.constant 0 : index
    %c0_124 = arith.constant 0 : index
    %102 = vector.load %arg21[%c2_122, %c0_123, %c0_124] : memref<18x18x64xf32, #tpu.memory_space<vmem>>, vector<16x16x64xf32>
    %103 = vector.shape_cast %102 : vector<16x16x64xf32> to vector<256x64xf32>
    %c0_125 = arith.constant 0 : index
    %c6_126 = arith.constant 6 : index
    %c0_127 = arith.constant 0 : index
    %c0_128 = arith.constant 0 : index
    %104 = vector.load %arg7[%c0_125, %c6_126, %c0_127, %c0_128] : memref<1x9x64x4xf32, #tpu.memory_space<vmem>>, vector<1x1x64x4xf32>
    %105 = vector.shape_cast %104 : vector<1x1x64x4xf32> to vector<64x4xf32>
    %cst_129 = arith.constant dense<0.000000e+00> : vector<256x4xf32>
    %106 = tpu.matmul %103, %105, %cst_129 {dimension_numbers = #tpu.dot_dimension_numbers<[1], [0], [0], [1], [0, 0, 1, 1], [], []>} : vector<256x64xf32>, vector<64x4xf32>, vector<256x4xf32> -> vector<256x4xf32>
    %107 = arith.addf %101, %106 : vector<256x4xf32>
    %c2_130 = arith.constant 2 : index
    %c1_131 = arith.constant 1 : index
    %c0_132 = arith.constant 0 : index
    %108 = vector.load %arg21[%c2_130, %c1_131, %c0_132] : memref<18x18x64xf32, #tpu.memory_space<vmem>>, vector<16x16x64xf32>
    %109 = vector.shape_cast %108 : vector<16x16x64xf32> to vector<256x64xf32>
    %c0_133 = arith.constant 0 : index
    %c7_134 = arith.constant 7 : index
    %c0_135 = arith.constant 0 : index
    %c0_136 = arith.constant 0 : index
    %110 = vector.load %arg7[%c0_133, %c7_134, %c0_135, %c0_136] : memref<1x9x64x4xf32, #tpu.memory_space<vmem>>, vector<1x1x64x4xf32>
    %111 = vector.shape_cast %110 : vector<1x1x64x4xf32> to vector<64x4xf32>
    %cst_137 = arith.constant dense<0.000000e+00> : vector<256x4xf32>
    %112 = tpu.matmul %109, %111, %cst_137 {dimension_numbers = #tpu.dot_dimension_numbers<[1], [0], [0], [1], [0, 0, 1, 1], [], []>} : vector<256x64xf32>, vector<64x4xf32>, vector<256x4xf32> -> vector<256x4xf32>
    %113 = arith.addf %107, %112 : vector<256x4xf32>
    %c2_138 = arith.constant 2 : index
    %c2_139 = arith.constant 2 : index
    %c0_140 = arith.constant 0 : index
    %114 = vector.load %arg21[%c2_138, %c2_139, %c0_140] : memref<18x18x64xf32, #tpu.memory_space<vmem>>, vector<16x16x64xf32>
    %115 = vector.shape_cast %114 : vector<16x16x64xf32> to vector<256x64xf32>
    %c0_141 = arith.constant 0 : index
    %c8_142 = arith.constant 8 : index
    %c0_143 = arith.constant 0 : index
    %c0_144 = arith.constant 0 : index
    %116 = vector.load %arg7[%c0_141, %c8_142, %c0_143, %c0_144] : memref<1x9x64x4xf32, #tpu.memory_space<vmem>>, vector<1x1x64x4xf32>
    %117 = vector.shape_cast %116 : vector<1x1x64x4xf32> to vector<64x4xf32>
    %cst_145 = arith.constant dense<0.000000e+00> : vector<256x4xf32>
    %118 = tpu.matmul %115, %117, %cst_145 {dimension_numbers = #tpu.dot_dimension_numbers<[1], [0], [0], [1], [0, 0, 1, 1], [], []>} : vector<256x64xf32>, vector<64x4xf32>, vector<256x4xf32> -> vector<256x4xf32>
    %119 = arith.addf %113, %118 : vector<256x4xf32>
    %c0_146 = arith.constant 0 : index
    %c0_147 = arith.constant 0 : index
    %120 = vector.load %arg5[%c0_146, %c0_147] : memref<64x256xf32, #tpu.memory_space<vmem>>, vector<64x256xf32>
    %cst_148 = arith.constant dense<0.000000e+00> : vector<64x4xf32>
    %121 = tpu.matmul %120, %119, %cst_148 {dimension_numbers = #tpu.dot_dimension_numbers<[1], [0], [0], [1], [0, 0, 1, 1], [], []>} : vector<64x256xf32>, vector<256x4xf32>, vector<64x4xf32> -> vector<64x4xf32>
    %c0_149 = arith.constant 0 : index
    %c0_150 = arith.constant 0 : index
    %c0_151 = arith.constant 0 : index
    %122 = vector.load %arg2[%c0_149, %c0_150, %c0_151] : memref<1x64x4xf32, #tpu.memory_space<vmem>>, vector<1x64x4xf32>
    %123 = vector.shape_cast %122 : vector<1x64x4xf32> to vector<64x4xf32>
    %124 = arith.subf %123, %121 : vector<64x4xf32>
    %125 = vector.shape_cast %124 : vector<64x4xf32> to vector<8x8x4xf32>
    %c1_152 = arith.constant 1 : index
    %c1_153 = arith.constant 1 : index
    %c0_154 = arith.constant 0 : index
    %126 = vector.load %arg22[%c1_152, %c1_153, %c0_154] : memref<10x10x4xf32, #tpu.memory_space<vmem>>, vector<8x8x4xf32>
    tpu.vector_store %arg22[%c1_152, %c1_153, %c0_154], %125 {strides = array<i32>} : memref<10x10x4xf32, #tpu.memory_space<vmem>>, vector<8x8x4xf32>,
    %cst_155 = arith.constant 0.000000e+00 : f32
    %127 = vector.broadcast %cst_155 : f32 to vector<64x64xf32>
    %c0_156 = arith.constant 0 : index
    %c0_157 = arith.constant 0 : index
    %c0_158 = arith.constant 0 : index
    %128 = vector.load %arg22[%c0_156, %c0_157, %c0_158] : memref<10x10x4xf32, #tpu.memory_space<vmem>>, vector<8x8x4xf32>
    %129 = vector.shape_cast %128 : vector<8x8x4xf32> to vector<64x4xf32>
    %c0_159 = arith.constant 0 : index
    %c0_160 = arith.constant 0 : index
    %c0_161 = arith.constant 0 : index
    %c0_162 = arith.constant 0 : index
    %130 = vector.load %arg8[%c0_159, %c0_160, %c0_161, %c0_162] : memref<1x9x4x64xf32, #tpu.memory_space<vmem>>, vector<1x1x4x64xf32>
    %131 = vector.shape_cast %130 : vector<1x1x4x64xf32> to vector<4x64xf32>
    %cst_163 = arith.constant dense<0.000000e+00> : vector<64x64xf32>
    %132 = tpu.matmul %129, %131, %cst_163 {dimension_numbers = #tpu.dot_dimension_numbers<[1], [0], [0], [1], [0, 0, 1, 1], [], []>} : vector<64x4xf32>, vector<4x64xf32>, vector<64x64xf32> -> vector<64x64xf32>
    %133 = arith.addf %127, %132 : vector<64x64xf32>
    %c0_164 = arith.constant 0 : index
    %c1_165 = arith.constant 1 : index
    %c0_166 = arith.constant 0 : index
    %134 = vector.load %arg22[%c0_164, %c1_165, %c0_166] : memref<10x10x4xf32, #tpu.memory_space<vmem>>, vector<8x8x4xf32>
    %135 = vector.shape_cast %134 : vector<8x8x4xf32> to vector<64x4xf32>
    %c0_167 = arith.constant 0 : index
    %c1_168 = arith.constant 1 : index
    %c0_169 = arith.constant 0 : index
    %c0_170 = arith.constant 0 : index
    %136 = vector.load %arg8[%c0_167, %c1_168, %c0_169, %c0_170] : memref<1x9x4x64xf32, #tpu.memory_space<vmem>>, vector<1x1x4x64xf32>
    %137 = vector.shape_cast %136 : vector<1x1x4x64xf32> to vector<4x64xf32>
    %cst_171 = arith.constant dense<0.000000e+00> : vector<64x64xf32>
    %138 = tpu.matmul %135, %137, %cst_171 {dimension_numbers = #tpu.dot_dimension_numbers<[1], [0], [0], [1], [0, 0, 1, 1], [], []>} : vector<64x4xf32>, vector<4x64xf32>, vector<64x64xf32> -> vector<64x64xf32>
    %139 = arith.addf %133, %138 : vector<64x64xf32>
    %c0_172 = arith.constant 0 : index
    %c2_173 = arith.constant 2 : index
    %c0_174 = arith.constant 0 : index
    %140 = vector.load %arg22[%c0_172, %c2_173, %c0_174] : memref<10x10x4xf32, #tpu.memory_space<vmem>>, vector<8x8x4xf32>
    %141 = vector.shape_cast %140 : vector<8x8x4xf32> to vector<64x4xf32>
    %c0_175 = arith.constant 0 : index
    %c2_176 = arith.constant 2 : index
    %c0_177 = arith.constant 0 : index
    %c0_178 = arith.constant 0 : index
    %142 = vector.load %arg8[%c0_175, %c2_176, %c0_177, %c0_178] : memref<1x9x4x64xf32, #tpu.memory_space<vmem>>, vector<1x1x4x64xf32>
    %143 = vector.shape_cast %142 : vector<1x1x4x64xf32> to vector<4x64xf32>
    %cst_179 = arith.constant dense<0.000000e+00> : vector<64x64xf32>
    %144 = tpu.matmul %141, %143, %cst_179 {dimension_numbers = #tpu.dot_dimension_numbers<[1], [0], [0], [1], [0, 0, 1, 1], [], []>} : vector<64x4xf32>, vector<4x64xf32>, vector<64x64xf32> -> vector<64x64xf32>
    %145 = arith.addf %139, %144 : vector<64x64xf32>
    %c1_180 = arith.constant 1 : index
    %c0_181 = arith.constant 0 : index
    %c0_182 = arith.constant 0 : index
    %146 = vector.load %arg22[%c1_180, %c0_181, %c0_182] : memref<10x10x4xf32, #tpu.memory_space<vmem>>, vector<8x8x4xf32>
    %147 = vector.shape_cast %146 : vector<8x8x4xf32> to vector<64x4xf32>
    %c0_183 = arith.constant 0 : index
    %c3_184 = arith.constant 3 : index
    %c0_185 = arith.constant 0 : index
    %c0_186 = arith.constant 0 : index
    %148 = vector.load %arg8[%c0_183, %c3_184, %c0_185, %c0_186] : memref<1x9x4x64xf32, #tpu.memory_space<vmem>>, vector<1x1x4x64xf32>
    %149 = vector.shape_cast %148 : vector<1x1x4x64xf32> to vector<4x64xf32>
    %cst_187 = arith.constant dense<0.000000e+00> : vector<64x64xf32>
    %150 = tpu.matmul %147, %149, %cst_187 {dimension_numbers = #tpu.dot_dimension_numbers<[1], [0], [0], [1], [0, 0, 1, 1], [], []>} : vector<64x4xf32>, vector<4x64xf32>, vector<64x64xf32> -> vector<64x64xf32>
    %151 = arith.addf %145, %150 : vector<64x64xf32>
    %c1_188 = arith.constant 1 : index
    %c1_189 = arith.constant 1 : index
    %c0_190 = arith.constant 0 : index
    %152 = vector.load %arg22[%c1_188, %c1_189, %c0_190] : memref<10x10x4xf32, #tpu.memory_space<vmem>>, vector<8x8x4xf32>
    %153 = vector.shape_cast %152 : vector<8x8x4xf32> to vector<64x4xf32>
    %c0_191 = arith.constant 0 : index
    %c4_192 = arith.constant 4 : index
    %c0_193 = arith.constant 0 : index
    %c0_194 = arith.constant 0 : index
    %154 = vector.load %arg8[%c0_191, %c4_192, %c0_193, %c0_194] : memref<1x9x4x64xf32, #tpu.memory_space<vmem>>, vector<1x1x4x64xf32>
    %155 = vector.shape_cast %154 : vector<1x1x4x64xf32> to vector<4x64xf32>
    %cst_195 = arith.constant dense<0.000000e+00> : vector<64x64xf32>
    %156 = tpu.matmul %153, %155, %cst_195 {dimension_numbers = #tpu.dot_dimension_numbers<[1], [0], [0], [1], [0, 0, 1, 1], [], []>} : vector<64x4xf32>, vector<4x64xf32>, vector<64x64xf32> -> vector<64x64xf32>
    %157 = arith.addf %151, %156 : vector<64x64xf32>
    %c1_196 = arith.constant 1 : index
    %c2_197 = arith.constant 2 : index
    %c0_198 = arith.constant 0 : index
    %158 = vector.load %arg22[%c1_196, %c2_197, %c0_198] : memref<10x10x4xf32, #tpu.memory_space<vmem>>, vector<8x8x4xf32>
    %159 = vector.shape_cast %158 : vector<8x8x4xf32> to vector<64x4xf32>
    %c0_199 = arith.constant 0 : index
    %c5_200 = arith.constant 5 : index
    %c0_201 = arith.constant 0 : index
    %c0_202 = arith.constant 0 : index
    %160 = vector.load %arg8[%c0_199, %c5_200, %c0_201, %c0_202] : memref<1x9x4x64xf32, #tpu.memory_space<vmem>>, vector<1x1x4x64xf32>
    %161 = vector.shape_cast %160 : vector<1x1x4x64xf32> to vector<4x64xf32>
    %cst_203 = arith.constant dense<0.000000e+00> : vector<64x64xf32>
    %162 = tpu.matmul %159, %161, %cst_203 {dimension_numbers = #tpu.dot_dimension_numbers<[1], [0], [0], [1], [0, 0, 1, 1], [], []>} : vector<64x4xf32>, vector<4x64xf32>, vector<64x64xf32> -> vector<64x64xf32>
    %163 = arith.addf %157, %162 : vector<64x64xf32>
    %c2_204 = arith.constant 2 : index
    %c0_205 = arith.constant 0 : index
    %c0_206 = arith.constant 0 : index
    %164 = vector.load %arg22[%c2_204, %c0_205, %c0_206] : memref<10x10x4xf32, #tpu.memory_space<vmem>>, vector<8x8x4xf32>
    %165 = vector.shape_cast %164 : vector<8x8x4xf32> to vector<64x4xf32>
    %c0_207 = arith.constant 0 : index
    %c6_208 = arith.constant 6 : index
    %c0_209 = arith.constant 0 : index
    %c0_210 = arith.constant 0 : index
    %166 = vector.load %arg8[%c0_207, %c6_208, %c0_209, %c0_210] : memref<1x9x4x64xf32, #tpu.memory_space<vmem>>, vector<1x1x4x64xf32>
    %167 = vector.shape_cast %166 : vector<1x1x4x64xf32> to vector<4x64xf32>
    %cst_211 = arith.constant dense<0.000000e+00> : vector<64x64xf32>
    %168 = tpu.matmul %165, %167, %cst_211 {dimension_numbers = #tpu.dot_dimension_numbers<[1], [0], [0], [1], [0, 0, 1, 1], [], []>} : vector<64x4xf32>, vector<4x64xf32>, vector<64x64xf32> -> vector<64x64xf32>
    %169 = arith.addf %163, %168 : vector<64x64xf32>
    %c2_212 = arith.constant 2 : index
    %c1_213 = arith.constant 1 : index
    %c0_214 = arith.constant 0 : index
    %170 = vector.load %arg22[%c2_212, %c1_213, %c0_214] : memref<10x10x4xf32, #tpu.memory_space<vmem>>, vector<8x8x4xf32>
    %171 = vector.shape_cast %170 : vector<8x8x4xf32> to vector<64x4xf32>
    %c0_215 = arith.constant 0 : index
    %c7_216 = arith.constant 7 : index
    %c0_217 = arith.constant 0 : index
    %c0_218 = arith.constant 0 : index
    %172 = vector.load %arg8[%c0_215, %c7_216, %c0_217, %c0_218] : memref<1x9x4x64xf32, #tpu.memory_space<vmem>>, vector<1x1x4x64xf32>
    %173 = vector.shape_cast %172 : vector<1x1x4x64xf32> to vector<4x64xf32>
    %cst_219 = arith.constant dense<0.000000e+00> : vector<64x64xf32>
    %174 = tpu.matmul %171, %173, %cst_219 {dimension_numbers = #tpu.dot_dimension_numbers<[1], [0], [0], [1], [0, 0, 1, 1], [], []>} : vector<64x4xf32>, vector<4x64xf32>, vector<64x64xf32> -> vector<64x64xf32>
    %175 = arith.addf %169, %174 : vector<64x64xf32>
    %c2_220 = arith.constant 2 : index
    %c2_221 = arith.constant 2 : index
    %c0_222 = arith.constant 0 : index
    %176 = vector.load %arg22[%c2_220, %c2_221, %c0_222] : memref<10x10x4xf32, #tpu.memory_space<vmem>>, vector<8x8x4xf32>
    %177 = vector.shape_cast %176 : vector<8x8x4xf32> to vector<64x4xf32>
    %c0_223 = arith.constant 0 : index
    %c8_224 = arith.constant 8 : index
    %c0_225 = arith.constant 0 : index
    %c0_226 = arith.constant 0 : index
    %178 = vector.load %arg8[%c0_223, %c8_224, %c0_225, %c0_226] : memref<1x9x4x64xf32, #tpu.memory_space<vmem>>, vector<1x1x4x64xf32>
    %179 = vector.shape_cast %178 : vector<1x1x4x64xf32> to vector<4x64xf32>
    %cst_227 = arith.constant dense<0.000000e+00> : vector<64x64xf32>
    %180 = tpu.matmul %177, %179, %cst_227 {dimension_numbers = #tpu.dot_dimension_numbers<[1], [0], [0], [1], [0, 0, 1, 1], [], []>} : vector<64x4xf32>, vector<4x64xf32>, vector<64x64xf32> -> vector<64x64xf32>
    %181 = arith.addf %175, %180 : vector<64x64xf32>
    %cst_228 = arith.constant 0.000000e+00 : f32
    %182 = vector.broadcast %cst_228 : f32 to vector<64x64xf32>
    %183 = arith.maximumf %181, %182 : vector<64x64xf32>
    %184 = vector.shape_cast %183 : vector<64x64xf32> to vector<8x8x64xf32>
    %c1_229 = arith.constant 1 : index
    %c1_230 = arith.constant 1 : index
    %c0_231 = arith.constant 0 : index
    %185 = vector.load %arg23[%c1_229, %c1_230, %c0_231] : memref<10x10x64xf32, #tpu.memory_space<vmem>>, vector<8x8x64xf32>
    tpu.vector_store %arg23[%c1_229, %c1_230, %c0_231], %184 {strides = array<i32>} : memref<10x10x64xf32, #tpu.memory_space<vmem>>, vector<8x8x64xf32>,
    %cst_232 = arith.constant 0.000000e+00 : f32
    %186 = vector.broadcast %cst_232 : f32 to vector<64x4xf32>
    %c0_233 = arith.constant 0 : index
    %c0_234 = arith.constant 0 : index
    %c0_235 = arith.constant 0 : index
    %187 = vector.load %arg23[%c0_233, %c0_234, %c0_235] : memref<10x10x64xf32, #tpu.memory_space<vmem>>, vector<8x8x64xf32>
    %188 = vector.shape_cast %187 : vector<8x8x64xf32> to vector<64x64xf32>
    %c0_236 = arith.constant 0 : index
    %c0_237 = arith.constant 0 : index
    %c0_238 = arith.constant 0 : index
    %c0_239 = arith.constant 0 : index
    %189 = vector.load %arg9[%c0_236, %c0_237, %c0_238, %c0_239] : memref<1x9x64x4xf32, #tpu.memory_space<vmem>>, vector<1x1x64x4xf32>
    %190 = vector.shape_cast %189 : vector<1x1x64x4xf32> to vector<64x4xf32>
    %cst_240 = arith.constant dense<0.000000e+00> : vector<64x4xf32>
    %191 = tpu.matmul %188, %190, %cst_240 {dimension_numbers = #tpu.dot_dimension_numbers<[1], [0], [0], [1], [0, 0, 1, 1], [], []>} : vector<64x64xf32>, vector<64x4xf32>, vector<64x4xf32> -> vector<64x4xf32>
    %192 = arith.addf %186, %191 : vector<64x4xf32>
    %c0_241 = arith.constant 0 : index
    %c1_242 = arith.constant 1 : index
    %c0_243 = arith.constant 0 : index
    %193 = vector.load %arg23[%c0_241, %c1_242, %c0_243] : memref<10x10x64xf32, #tpu.memory_space<vmem>>, vector<8x8x64xf32>
    %194 = vector.shape_cast %193 : vector<8x8x64xf32> to vector<64x64xf32>
    %c0_244 = arith.constant 0 : index
    %c1_245 = arith.constant 1 : index
    %c0_246 = arith.constant 0 : index
    %c0_247 = arith.constant 0 : index
    %195 = vector.load %arg9[%c0_244, %c1_245, %c0_246, %c0_247] : memref<1x9x64x4xf32, #tpu.memory_space<vmem>>, vector<1x1x64x4xf32>
    %196 = vector.shape_cast %195 : vector<1x1x64x4xf32> to vector<64x4xf32>
    %cst_248 = arith.constant dense<0.000000e+00> : vector<64x4xf32>
    %197 = tpu.matmul %194, %196, %cst_248 {dimension_numbers = #tpu.dot_dimension_numbers<[1], [0], [0], [1], [0, 0, 1, 1], [], []>} : vector<64x64xf32>, vector<64x4xf32>, vector<64x4xf32> -> vector<64x4xf32>
    %198 = arith.addf %192, %197 : vector<64x4xf32>
    %c0_249 = arith.constant 0 : index
    %c2_250 = arith.constant 2 : index
    %c0_251 = arith.constant 0 : index
    %199 = vector.load %arg23[%c0_249, %c2_250, %c0_251] : memref<10x10x64xf32, #tpu.memory_space<vmem>>, vector<8x8x64xf32>
    %200 = vector.shape_cast %199 : vector<8x8x64xf32> to vector<64x64xf32>
    %c0_252 = arith.constant 0 : index
    %c2_253 = arith.constant 2 : index
    %c0_254 = arith.constant 0 : index
    %c0_255 = arith.constant 0 : index
    %201 = vector.load %arg9[%c0_252, %c2_253, %c0_254, %c0_255] : memref<1x9x64x4xf32, #tpu.memory_space<vmem>>, vector<1x1x64x4xf32>
    %202 = vector.shape_cast %201 : vector<1x1x64x4xf32> to vector<64x4xf32>
    %cst_256 = arith.constant dense<0.000000e+00> : vector<64x4xf32>
    %203 = tpu.matmul %200, %202, %cst_256 {dimension_numbers = #tpu.dot_dimension_numbers<[1], [0], [0], [1], [0, 0, 1, 1], [], []>} : vector<64x64xf32>, vector<64x4xf32>, vector<64x4xf32> -> vector<64x4xf32>
    %204 = arith.addf %198, %203 : vector<64x4xf32>
    %c1_257 = arith.constant 1 : index
    %c0_258 = arith.constant 0 : index
    %c0_259 = arith.constant 0 : index
    %205 = vector.load %arg23[%c1_257, %c0_258, %c0_259] : memref<10x10x64xf32, #tpu.memory_space<vmem>>, vector<8x8x64xf32>
    %206 = vector.shape_cast %205 : vector<8x8x64xf32> to vector<64x64xf32>
    %c0_260 = arith.constant 0 : index
    %c3_261 = arith.constant 3 : index
    %c0_262 = arith.constant 0 : index
    %c0_263 = arith.constant 0 : index
    %207 = vector.load %arg9[%c0_260, %c3_261, %c0_262, %c0_263] : memref<1x9x64x4xf32, #tpu.memory_space<vmem>>, vector<1x1x64x4xf32>
    %208 = vector.shape_cast %207 : vector<1x1x64x4xf32> to vector<64x4xf32>
    %cst_264 = arith.constant dense<0.000000e+00> : vector<64x4xf32>
    %209 = tpu.matmul %206, %208, %cst_264 {dimension_numbers = #tpu.dot_dimension_numbers<[1], [0], [0], [1], [0, 0, 1, 1], [], []>} : vector<64x64xf32>, vector<64x4xf32>, vector<64x4xf32> -> vector<64x4xf32>
    %210 = arith.addf %204, %209 : vector<64x4xf32>
    %c1_265 = arith.constant 1 : index
    %c1_266 = arith.constant 1 : index
    %c0_267 = arith.constant 0 : index
    %211 = vector.load %arg23[%c1_265, %c1_266, %c0_267] : memref<10x10x64xf32, #tpu.memory_space<vmem>>, vector<8x8x64xf32>
    %212 = vector.shape_cast %211 : vector<8x8x64xf32> to vector<64x64xf32>
    %c0_268 = arith.constant 0 : index
    %c4_269 = arith.constant 4 : index
    %c0_270 = arith.constant 0 : index
    %c0_271 = arith.constant 0 : index
    %213 = vector.load %arg9[%c0_268, %c4_269, %c0_270, %c0_271] : memref<1x9x64x4xf32, #tpu.memory_space<vmem>>, vector<1x1x64x4xf32>
    %214 = vector.shape_cast %213 : vector<1x1x64x4xf32> to vector<64x4xf32>
    %cst_272 = arith.constant dense<0.000000e+00> : vector<64x4xf32>
    %215 = tpu.matmul %212, %214, %cst_272 {dimension_numbers = #tpu.dot_dimension_numbers<[1], [0], [0], [1], [0, 0, 1, 1], [], []>} : vector<64x64xf32>, vector<64x4xf32>, vector<64x4xf32> -> vector<64x4xf32>
    %216 = arith.addf %210, %215 : vector<64x4xf32>
    %c1_273 = arith.constant 1 : index
    %c2_274 = arith.constant 2 : index
    %c0_275 = arith.constant 0 : index
    %217 = vector.load %arg23[%c1_273, %c2_274, %c0_275] : memref<10x10x64xf32, #tpu.memory_space<vmem>>, vector<8x8x64xf32>
    %218 = vector.shape_cast %217 : vector<8x8x64xf32> to vector<64x64xf32>
    %c0_276 = arith.constant 0 : index
    %c5_277 = arith.constant 5 : index
    %c0_278 = arith.constant 0 : index
    %c0_279 = arith.constant 0 : index
    %219 = vector.load %arg9[%c0_276, %c5_277, %c0_278, %c0_279] : memref<1x9x64x4xf32, #tpu.memory_space<vmem>>, vector<1x1x64x4xf32>
    %220 = vector.shape_cast %219 : vector<1x1x64x4xf32> to vector<64x4xf32>
    %cst_280 = arith.constant dense<0.000000e+00> : vector<64x4xf32>
    %221 = tpu.matmul %218, %220, %cst_280 {dimension_numbers = #tpu.dot_dimension_numbers<[1], [0], [0], [1], [0, 0, 1, 1], [], []>} : vector<64x64xf32>, vector<64x4xf32>, vector<64x4xf32> -> vector<64x4xf32>
    %222 = arith.addf %216, %221 : vector<64x4xf32>
    %c2_281 = arith.constant 2 : index
    %c0_282 = arith.constant 0 : index
    %c0_283 = arith.constant 0 : index
    %223 = vector.load %arg23[%c2_281, %c0_282, %c0_283] : memref<10x10x64xf32, #tpu.memory_space<vmem>>, vector<8x8x64xf32>
    %224 = vector.shape_cast %223 : vector<8x8x64xf32> to vector<64x64xf32>
    %c0_284 = arith.constant 0 : index
    %c6_285 = arith.constant 6 : index
    %c0_286 = arith.constant 0 : index
    %c0_287 = arith.constant 0 : index
    %225 = vector.load %arg9[%c0_284, %c6_285, %c0_286, %c0_287] : memref<1x9x64x4xf32, #tpu.memory_space<vmem>>, vector<1x1x64x4xf32>
    %226 = vector.shape_cast %225 : vector<1x1x64x4xf32> to vector<64x4xf32>
    %cst_288 = arith.constant dense<0.000000e+00> : vector<64x4xf32>
    %227 = tpu.matmul %224, %226, %cst_288 {dimension_numbers = #tpu.dot_dimension_numbers<[1], [0], [0], [1], [0, 0, 1, 1], [], []>} : vector<64x64xf32>, vector<64x4xf32>, vector<64x4xf32> -> vector<64x4xf32>
    %228 = arith.addf %222, %227 : vector<64x4xf32>
    %c2_289 = arith.constant 2 : index
    %c1_290 = arith.constant 1 : index
    %c0_291 = arith.constant 0 : index
    %229 = vector.load %arg23[%c2_289, %c1_290, %c0_291] : memref<10x10x64xf32, #tpu.memory_space<vmem>>, vector<8x8x64xf32>
    %230 = vector.shape_cast %229 : vector<8x8x64xf32> to vector<64x64xf32>
    %c0_292 = arith.constant 0 : index
    %c7_293 = arith.constant 7 : index
    %c0_294 = arith.constant 0 : index
    %c0_295 = arith.constant 0 : index
    %231 = vector.load %arg9[%c0_292, %c7_293, %c0_294, %c0_295] : memref<1x9x64x4xf32, #tpu.memory_space<vmem>>, vector<1x1x64x4xf32>
    %232 = vector.shape_cast %231 : vector<1x1x64x4xf32> to vector<64x4xf32>
    %cst_296 = arith.constant dense<0.000000e+00> : vector<64x4xf32>
    %233 = tpu.matmul %230, %232, %cst_296 {dimension_numbers = #tpu.dot_dimension_numbers<[1], [0], [0], [1], [0, 0, 1, 1], [], []>} : vector<64x64xf32>, vector<64x4xf32>, vector<64x4xf32> -> vector<64x4xf32>
    %234 = arith.addf %228, %233 : vector<64x4xf32>
    %c2_297 = arith.constant 2 : index
    %c2_298 = arith.constant 2 : index
    %c0_299 = arith.constant 0 : index
    %235 = vector.load %arg23[%c2_297, %c2_298, %c0_299] : memref<10x10x64xf32, #tpu.memory_space<vmem>>, vector<8x8x64xf32>
    %236 = vector.shape_cast %235 : vector<8x8x64xf32> to vector<64x64xf32>
    %c0_300 = arith.constant 0 : index
    %c8_301 = arith.constant 8 : index
    %c0_302 = arith.constant 0 : index
    %c0_303 = arith.constant 0 : index
    %237 = vector.load %arg9[%c0_300, %c8_301, %c0_302, %c0_303] : memref<1x9x64x4xf32, #tpu.memory_space<vmem>>, vector<1x1x64x4xf32>
    %238 = vector.shape_cast %237 : vector<1x1x64x4xf32> to vector<64x4xf32>
    %cst_304 = arith.constant dense<0.000000e+00> : vector<64x4xf32>
    %239 = tpu.matmul %236, %238, %cst_304 {dimension_numbers = #tpu.dot_dimension_numbers<[1], [0], [0], [1], [0, 0, 1, 1], [], []>} : vector<64x64xf32>, vector<64x4xf32>, vector<64x4xf32> -> vector<64x4xf32>
    %240 = arith.addf %234, %239 : vector<64x4xf32>
    %c0_305 = arith.constant 0 : index
    %c0_306 = arith.constant 0 : index
    %241 = vector.load %arg4[%c0_305, %c0_306] : memref<256x64xf32, #tpu.memory_space<vmem>>, vector<256x64xf32>
    %cst_307 = arith.constant dense<0.000000e+00> : vector<256x4xf32>
    %242 = tpu.matmul %241, %240, %cst_307 {dimension_numbers = #tpu.dot_dimension_numbers<[1], [0], [0], [1], [0, 0, 1, 1], [], []>} : vector<256x64xf32>, vector<64x4xf32>, vector<256x4xf32> -> vector<256x4xf32>
    %243 = arith.addf %3, %242 : vector<256x4xf32>
    %244 = vector.shape_cast %243 : vector<256x4xf32> to vector<16x16x4xf32>
    %c1_308 = arith.constant 1 : index
    %c1_309 = arith.constant 1 : index
    %c0_310 = arith.constant 0 : index
    %245 = vector.load %arg20[%c1_308, %c1_309, %c0_310] : memref<18x18x4xf32, #tpu.memory_space<vmem>>, vector<16x16x4xf32>
    tpu.vector_store %arg20[%c1_308, %c1_309, %c0_310], %244 {strides = array<i32>} : memref<18x18x4xf32, #tpu.memory_space<vmem>>, vector<16x16x4xf32>,
    %cst_311 = arith.constant 0.000000e+00 : f32
    %246 = vector.broadcast %cst_311 : f32 to vector<256x64xf32>
    %c0_312 = arith.constant 0 : index
    %c0_313 = arith.constant 0 : index
    %c0_314 = arith.constant 0 : index
    %247 = vector.load %arg20[%c0_312, %c0_313, %c0_314] : memref<18x18x4xf32, #tpu.memory_space<vmem>>, vector<16x16x4xf32>
    %248 = vector.shape_cast %247 : vector<16x16x4xf32> to vector<256x4xf32>
    %c0_315 = arith.constant 0 : index
    %c0_316 = arith.constant 0 : index
    %c0_317 = arith.constant 0 : index
    %c0_318 = arith.constant 0 : index
    %249 = vector.load %arg10[%c0_315, %c0_316, %c0_317, %c0_318] : memref<1x9x4x64xf32, #tpu.memory_space<vmem>>, vector<1x1x4x64xf32>
    %250 = vector.shape_cast %249 : vector<1x1x4x64xf32> to vector<4x64xf32>
    %cst_319 = arith.constant dense<0.000000e+00> : vector<256x64xf32>
    %251 = tpu.matmul %248, %250, %cst_319 {dimension_numbers = #tpu.dot_dimension_numbers<[1], [0], [0], [1], [0, 0, 1, 1], [], []>} : vector<256x4xf32>, vector<4x64xf32>, vector<256x64xf32> -> vector<256x64xf32>
    %252 = arith.addf %246, %251 : vector<256x64xf32>
    %c0_320 = arith.constant 0 : index
    %c1_321 = arith.constant 1 : index
    %c0_322 = arith.constant 0 : index
    %253 = vector.load %arg20[%c0_320, %c1_321, %c0_322] : memref<18x18x4xf32, #tpu.memory_space<vmem>>, vector<16x16x4xf32>
    %254 = vector.shape_cast %253 : vector<16x16x4xf32> to vector<256x4xf32>
    %c0_323 = arith.constant 0 : index
    %c1_324 = arith.constant 1 : index
    %c0_325 = arith.constant 0 : index
    %c0_326 = arith.constant 0 : index
    %255 = vector.load %arg10[%c0_323, %c1_324, %c0_325, %c0_326] : memref<1x9x4x64xf32, #tpu.memory_space<vmem>>, vector<1x1x4x64xf32>
    %256 = vector.shape_cast %255 : vector<1x1x4x64xf32> to vector<4x64xf32>
    %cst_327 = arith.constant dense<0.000000e+00> : vector<256x64xf32>
    %257 = tpu.matmul %254, %256, %cst_327 {dimension_numbers = #tpu.dot_dimension_numbers<[1], [0], [0], [1], [0, 0, 1, 1], [], []>} : vector<256x4xf32>, vector<4x64xf32>, vector<256x64xf32> -> vector<256x64xf32>
    %258 = arith.addf %252, %257 : vector<256x64xf32>
    %c0_328 = arith.constant 0 : index
    %c2_329 = arith.constant 2 : index
    %c0_330 = arith.constant 0 : index
    %259 = vector.load %arg20[%c0_328, %c2_329, %c0_330] : memref<18x18x4xf32, #tpu.memory_space<vmem>>, vector<16x16x4xf32>
    %260 = vector.shape_cast %259 : vector<16x16x4xf32> to vector<256x4xf32>
    %c0_331 = arith.constant 0 : index
    %c2_332 = arith.constant 2 : index
    %c0_333 = arith.constant 0 : index
    %c0_334 = arith.constant 0 : index
    %261 = vector.load %arg10[%c0_331, %c2_332, %c0_333, %c0_334] : memref<1x9x4x64xf32, #tpu.memory_space<vmem>>, vector<1x1x4x64xf32>
    %262 = vector.shape_cast %261 : vector<1x1x4x64xf32> to vector<4x64xf32>
    %cst_335 = arith.constant dense<0.000000e+00> : vector<256x64xf32>
    %263 = tpu.matmul %260, %262, %cst_335 {dimension_numbers = #tpu.dot_dimension_numbers<[1], [0], [0], [1], [0, 0, 1, 1], [], []>} : vector<256x4xf32>, vector<4x64xf32>, vector<256x64xf32> -> vector<256x64xf32>
    %264 = arith.addf %258, %263 : vector<256x64xf32>
    %c1_336 = arith.constant 1 : index
    %c0_337 = arith.constant 0 : index
    %c0_338 = arith.constant 0 : index
    %265 = vector.load %arg20[%c1_336, %c0_337, %c0_338] : memref<18x18x4xf32, #tpu.memory_space<vmem>>, vector<16x16x4xf32>
    %266 = vector.shape_cast %265 : vector<16x16x4xf32> to vector<256x4xf32>
    %c0_339 = arith.constant 0 : index
    %c3_340 = arith.constant 3 : index
    %c0_341 = arith.constant 0 : index
    %c0_342 = arith.constant 0 : index
    %267 = vector.load %arg10[%c0_339, %c3_340, %c0_341, %c0_342] : memref<1x9x4x64xf32, #tpu.memory_space<vmem>>, vector<1x1x4x64xf32>
    %268 = vector.shape_cast %267 : vector<1x1x4x64xf32> to vector<4x64xf32>
    %cst_343 = arith.constant dense<0.000000e+00> : vector<256x64xf32>
    %269 = tpu.matmul %266, %268, %cst_343 {dimension_numbers = #tpu.dot_dimension_numbers<[1], [0], [0], [1], [0, 0, 1, 1], [], []>} : vector<256x4xf32>, vector<4x64xf32>, vector<256x64xf32> -> vector<256x64xf32>
    %270 = arith.addf %264, %269 : vector<256x64xf32>
    %c1_344 = arith.constant 1 : index
    %c1_345 = arith.constant 1 : index
    %c0_346 = arith.constant 0 : index
    %271 = vector.load %arg20[%c1_344, %c1_345, %c0_346] : memref<18x18x4xf32, #tpu.memory_space<vmem>>, vector<16x16x4xf32>
    %272 = vector.shape_cast %271 : vector<16x16x4xf32> to vector<256x4xf32>
    %c0_347 = arith.constant 0 : index
    %c4_348 = arith.constant 4 : index
    %c0_349 = arith.constant 0 : index
    %c0_350 = arith.constant 0 : index
    %273 = vector.load %arg10[%c0_347, %c4_348, %c0_349, %c0_350] : memref<1x9x4x64xf32, #tpu.memory_space<vmem>>, vector<1x1x4x64xf32>
    %274 = vector.shape_cast %273 : vector<1x1x4x64xf32> to vector<4x64xf32>
    %cst_351 = arith.constant dense<0.000000e+00> : vector<256x64xf32>
    %275 = tpu.matmul %272, %274, %cst_351 {dimension_numbers = #tpu.dot_dimension_numbers<[1], [0], [0], [1], [0, 0, 1, 1], [], []>} : vector<256x4xf32>, vector<4x64xf32>, vector<256x64xf32> -> vector<256x64xf32>
    %276 = arith.addf %270, %275 : vector<256x64xf32>
    %c1_352 = arith.constant 1 : index
    %c2_353 = arith.constant 2 : index
    %c0_354 = arith.constant 0 : index
    %277 = vector.load %arg20[%c1_352, %c2_353, %c0_354] : memref<18x18x4xf32, #tpu.memory_space<vmem>>, vector<16x16x4xf32>
    %278 = vector.shape_cast %277 : vector<16x16x4xf32> to vector<256x4xf32>
    %c0_355 = arith.constant 0 : index
    %c5_356 = arith.constant 5 : index
    %c0_357 = arith.constant 0 : index
    %c0_358 = arith.constant 0 : index
    %279 = vector.load %arg10[%c0_355, %c5_356, %c0_357, %c0_358] : memref<1x9x4x64xf32, #tpu.memory_space<vmem>>, vector<1x1x4x64xf32>
    %280 = vector.shape_cast %279 : vector<1x1x4x64xf32> to vector<4x64xf32>
    %cst_359 = arith.constant dense<0.000000e+00> : vector<256x64xf32>
    %281 = tpu.matmul %278, %280, %cst_359 {dimension_numbers = #tpu.dot_dimension_numbers<[1], [0], [0], [1], [0, 0, 1, 1], [], []>} : vector<256x4xf32>, vector<4x64xf32>, vector<256x64xf32> -> vector<256x64xf32>
    %282 = arith.addf %276, %281 : vector<256x64xf32>
    %c2_360 = arith.constant 2 : index
    %c0_361 = arith.constant 0 : index
    %c0_362 = arith.constant 0 : index
    %283 = vector.load %arg20[%c2_360, %c0_361, %c0_362] : memref<18x18x4xf32, #tpu.memory_space<vmem>>, vector<16x16x4xf32>
    %284 = vector.shape_cast %283 : vector<16x16x4xf32> to vector<256x4xf32>
    %c0_363 = arith.constant 0 : index
    %c6_364 = arith.constant 6 : index
    %c0_365 = arith.constant 0 : index
    %c0_366 = arith.constant 0 : index
    %285 = vector.load %arg10[%c0_363, %c6_364, %c0_365, %c0_366] : memref<1x9x4x64xf32, #tpu.memory_space<vmem>>, vector<1x1x4x64xf32>
    %286 = vector.shape_cast %285 : vector<1x1x4x64xf32> to vector<4x64xf32>
    %cst_367 = arith.constant dense<0.000000e+00> : vector<256x64xf32>
    %287 = tpu.matmul %284, %286, %cst_367 {dimension_numbers = #tpu.dot_dimension_numbers<[1], [0], [0], [1], [0, 0, 1, 1], [], []>} : vector<256x4xf32>, vector<4x64xf32>, vector<256x64xf32> -> vector<256x64xf32>
    %288 = arith.addf %282, %287 : vector<256x64xf32>
    %c2_368 = arith.constant 2 : index
    %c1_369 = arith.constant 1 : index
    %c0_370 = arith.constant 0 : index
    %289 = vector.load %arg20[%c2_368, %c1_369, %c0_370] : memref<18x18x4xf32, #tpu.memory_space<vmem>>, vector<16x16x4xf32>
    %290 = vector.shape_cast %289 : vector<16x16x4xf32> to vector<256x4xf32>
    %c0_371 = arith.constant 0 : index
    %c7_372 = arith.constant 7 : index
    %c0_373 = arith.constant 0 : index
    %c0_374 = arith.constant 0 : index
    %291 = vector.load %arg10[%c0_371, %c7_372, %c0_373, %c0_374] : memref<1x9x4x64xf32, #tpu.memory_space<vmem>>, vector<1x1x4x64xf32>
    %292 = vector.shape_cast %291 : vector<1x1x4x64xf32> to vector<4x64xf32>
    %cst_375 = arith.constant dense<0.000000e+00> : vector<256x64xf32>
    %293 = tpu.matmul %290, %292, %cst_375 {dimension_numbers = #tpu.dot_dimension_numbers<[1], [0], [0], [1], [0, 0, 1, 1], [], []>} : vector<256x4xf32>, vector<4x64xf32>, vector<256x64xf32> -> vector<256x64xf32>
    %294 = arith.addf %288, %293 : vector<256x64xf32>
    %c2_376 = arith.constant 2 : index
    %c2_377 = arith.constant 2 : index
    %c0_378 = arith.constant 0 : index
    %295 = vector.load %arg20[%c2_376, %c2_377, %c0_378] : memref<18x18x4xf32, #tpu.memory_space<vmem>>, vector<16x16x4xf32>
    %296 = vector.shape_cast %295 : vector<16x16x4xf32> to vector<256x4xf32>
    %c0_379 = arith.constant 0 : index
    %c8_380 = arith.constant 8 : index
    %c0_381 = arith.constant 0 : index
    %c0_382 = arith.constant 0 : index
    %297 = vector.load %arg10[%c0_379, %c8_380, %c0_381, %c0_382] : memref<1x9x4x64xf32, #tpu.memory_space<vmem>>, vector<1x1x4x64xf32>
    %298 = vector.shape_cast %297 : vector<1x1x4x64xf32> to vector<4x64xf32>
    %cst_383 = arith.constant dense<0.000000e+00> : vector<256x64xf32>
    %299 = tpu.matmul %296, %298, %cst_383 {dimension_numbers = #tpu.dot_dimension_numbers<[1], [0], [0], [1], [0, 0, 1, 1], [], []>} : vector<256x4xf32>, vector<4x64xf32>, vector<256x64xf32> -> vector<256x64xf32>
    %300 = arith.addf %294, %299 : vector<256x64xf32>
    %cst_384 = arith.constant 0.000000e+00 : f32
    %301 = vector.broadcast %cst_384 : f32 to vector<256x64xf32>
    %302 = arith.maximumf %300, %301 : vector<256x64xf32>
    %303 = vector.shape_cast %302 : vector<256x64xf32> to vector<16x16x64xf32>
    %c1_385 = arith.constant 1 : index
    %c1_386 = arith.constant 1 : index
    %c0_387 = arith.constant 0 : index
    %304 = vector.load %arg21[%c1_385, %c1_386, %c0_387] : memref<18x18x64xf32, #tpu.memory_space<vmem>>, vector<16x16x64xf32>
    tpu.vector_store %arg21[%c1_385, %c1_386, %c0_387], %303 {strides = array<i32>} : memref<18x18x64xf32, #tpu.memory_space<vmem>>, vector<16x16x64xf32>,
    %cst_388 = arith.constant 0.000000e+00 : f32
    %305 = vector.broadcast %cst_388 : f32 to vector<256x4xf32>
    %c0_389 = arith.constant 0 : index
    %c0_390 = arith.constant 0 : index
    %c0_391 = arith.constant 0 : index
    %306 = vector.load %arg21[%c0_389, %c0_390, %c0_391] : memref<18x18x64xf32, #tpu.memory_space<vmem>>, vector<16x16x64xf32>
    %307 = vector.shape_cast %306 : vector<16x16x64xf32> to vector<256x64xf32>
    %c0_392 = arith.constant 0 : index
    %c0_393 = arith.constant 0 : index
    %c0_394 = arith.constant 0 : index
    %c0_395 = arith.constant 0 : index
    %308 = vector.load %arg11[%c0_392, %c0_393, %c0_394, %c0_395] : memref<1x9x64x4xf32, #tpu.memory_space<vmem>>, vector<1x1x64x4xf32>
    %309 = vector.shape_cast %308 : vector<1x1x64x4xf32> to vector<64x4xf32>
    %cst_396 = arith.constant dense<0.000000e+00> : vector<256x4xf32>
    %310 = tpu.matmul %307, %309, %cst_396 {dimension_numbers = #tpu.dot_dimension_numbers<[1], [0], [0], [1], [0, 0, 1, 1], [], []>} : vector<256x64xf32>, vector<64x4xf32>, vector<256x4xf32> -> vector<256x4xf32>
    %311 = arith.addf %305, %310 : vector<256x4xf32>
    %c0_397 = arith.constant 0 : index
    %c1_398 = arith.constant 1 : index
    %c0_399 = arith.constant 0 : index
    %312 = vector.load %arg21[%c0_397, %c1_398, %c0_399] : memref<18x18x64xf32, #tpu.memory_space<vmem>>, vector<16x16x64xf32>
    %313 = vector.shape_cast %312 : vector<16x16x64xf32> to vector<256x64xf32>
    %c0_400 = arith.constant 0 : index
    %c1_401 = arith.constant 1 : index
    %c0_402 = arith.constant 0 : index
    %c0_403 = arith.constant 0 : index
    %314 = vector.load %arg11[%c0_400, %c1_401, %c0_402, %c0_403] : memref<1x9x64x4xf32, #tpu.memory_space<vmem>>, vector<1x1x64x4xf32>
    %315 = vector.shape_cast %314 : vector<1x1x64x4xf32> to vector<64x4xf32>
    %cst_404 = arith.constant dense<0.000000e+00> : vector<256x4xf32>
    %316 = tpu.matmul %313, %315, %cst_404 {dimension_numbers = #tpu.dot_dimension_numbers<[1], [0], [0], [1], [0, 0, 1, 1], [], []>} : vector<256x64xf32>, vector<64x4xf32>, vector<256x4xf32> -> vector<256x4xf32>
    %317 = arith.addf %311, %316 : vector<256x4xf32>
    %c0_405 = arith.constant 0 : index
    %c2_406 = arith.constant 2 : index
    %c0_407 = arith.constant 0 : index
    %318 = vector.load %arg21[%c0_405, %c2_406, %c0_407] : memref<18x18x64xf32, #tpu.memory_space<vmem>>, vector<16x16x64xf32>
    %319 = vector.shape_cast %318 : vector<16x16x64xf32> to vector<256x64xf32>
    %c0_408 = arith.constant 0 : index
    %c2_409 = arith.constant 2 : index
    %c0_410 = arith.constant 0 : index
    %c0_411 = arith.constant 0 : index
    %320 = vector.load %arg11[%c0_408, %c2_409, %c0_410, %c0_411] : memref<1x9x64x4xf32, #tpu.memory_space<vmem>>, vector<1x1x64x4xf32>
    %321 = vector.shape_cast %320 : vector<1x1x64x4xf32> to vector<64x4xf32>
    %cst_412 = arith.constant dense<0.000000e+00> : vector<256x4xf32>
    %322 = tpu.matmul %319, %321, %cst_412 {dimension_numbers = #tpu.dot_dimension_numbers<[1], [0], [0], [1], [0, 0, 1, 1], [], []>} : vector<256x64xf32>, vector<64x4xf32>, vector<256x4xf32> -> vector<256x4xf32>
    %323 = arith.addf %317, %322 : vector<256x4xf32>
    %c1_413 = arith.constant 1 : index
    %c0_414 = arith.constant 0 : index
    %c0_415 = arith.constant 0 : index
    %324 = vector.load %arg21[%c1_413, %c0_414, %c0_415] : memref<18x18x64xf32, #tpu.memory_space<vmem>>, vector<16x16x64xf32>
    %325 = vector.shape_cast %324 : vector<16x16x64xf32> to vector<256x64xf32>
    %c0_416 = arith.constant 0 : index
    %c3_417 = arith.constant 3 : index
    %c0_418 = arith.constant 0 : index
    %c0_419 = arith.constant 0 : index
    %326 = vector.load %arg11[%c0_416, %c3_417, %c0_418, %c0_419] : memref<1x9x64x4xf32, #tpu.memory_space<vmem>>, vector<1x1x64x4xf32>
    %327 = vector.shape_cast %326 : vector<1x1x64x4xf32> to vector<64x4xf32>
    %cst_420 = arith.constant dense<0.000000e+00> : vector<256x4xf32>
    %328 = tpu.matmul %325, %327, %cst_420 {dimension_numbers = #tpu.dot_dimension_numbers<[1], [0], [0], [1], [0, 0, 1, 1], [], []>} : vector<256x64xf32>, vector<64x4xf32>, vector<256x4xf32> -> vector<256x4xf32>
    %329 = arith.addf %323, %328 : vector<256x4xf32>
    %c1_421 = arith.constant 1 : index
    %c1_422 = arith.constant 1 : index
    %c0_423 = arith.constant 0 : index
    %330 = vector.load %arg21[%c1_421, %c1_422, %c0_423] : memref<18x18x64xf32, #tpu.memory_space<vmem>>, vector<16x16x64xf32>
    %331 = vector.shape_cast %330 : vector<16x16x64xf32> to vector<256x64xf32>
    %c0_424 = arith.constant 0 : index
    %c4_425 = arith.constant 4 : index
    %c0_426 = arith.constant 0 : index
    %c0_427 = arith.constant 0 : index
    %332 = vector.load %arg11[%c0_424, %c4_425, %c0_426, %c0_427] : memref<1x9x64x4xf32, #tpu.memory_space<vmem>>, vector<1x1x64x4xf32>
    %333 = vector.shape_cast %332 : vector<1x1x64x4xf32> to vector<64x4xf32>
    %cst_428 = arith.constant dense<0.000000e+00> : vector<256x4xf32>
    %334 = tpu.matmul %331, %333, %cst_428 {dimension_numbers = #tpu.dot_dimension_numbers<[1], [0], [0], [1], [0, 0, 1, 1], [], []>} : vector<256x64xf32>, vector<64x4xf32>, vector<256x4xf32> -> vector<256x4xf32>
    %335 = arith.addf %329, %334 : vector<256x4xf32>
    %c1_429 = arith.constant 1 : index
    %c2_430 = arith.constant 2 : index
    %c0_431 = arith.constant 0 : index
    %336 = vector.load %arg21[%c1_429, %c2_430, %c0_431] : memref<18x18x64xf32, #tpu.memory_space<vmem>>, vector<16x16x64xf32>
    %337 = vector.shape_cast %336 : vector<16x16x64xf32> to vector<256x64xf32>
    %c0_432 = arith.constant 0 : index
    %c5_433 = arith.constant 5 : index
    %c0_434 = arith.constant 0 : index
    %c0_435 = arith.constant 0 : index
    %338 = vector.load %arg11[%c0_432, %c5_433, %c0_434, %c0_435] : memref<1x9x64x4xf32, #tpu.memory_space<vmem>>, vector<1x1x64x4xf32>
    %339 = vector.shape_cast %338 : vector<1x1x64x4xf32> to vector<64x4xf32>
    %cst_436 = arith.constant dense<0.000000e+00> : vector<256x4xf32>
    %340 = tpu.matmul %337, %339, %cst_436 {dimension_numbers = #tpu.dot_dimension_numbers<[1], [0], [0], [1], [0, 0, 1, 1], [], []>} : vector<256x64xf32>, vector<64x4xf32>, vector<256x4xf32> -> vector<256x4xf32>
    %341 = arith.addf %335, %340 : vector<256x4xf32>
    %c2_437 = arith.constant 2 : index
    %c0_438 = arith.constant 0 : index
    %c0_439 = arith.constant 0 : index
    %342 = vector.load %arg21[%c2_437, %c0_438, %c0_439] : memref<18x18x64xf32, #tpu.memory_space<vmem>>, vector<16x16x64xf32>
    %343 = vector.shape_cast %342 : vector<16x16x64xf32> to vector<256x64xf32>
    %c0_440 = arith.constant 0 : index
    %c6_441 = arith.constant 6 : index
    %c0_442 = arith.constant 0 : index
    %c0_443 = arith.constant 0 : index
    %344 = vector.load %arg11[%c0_440, %c6_441, %c0_442, %c0_443] : memref<1x9x64x4xf32, #tpu.memory_space<vmem>>, vector<1x1x64x4xf32>
    %345 = vector.shape_cast %344 : vector<1x1x64x4xf32> to vector<64x4xf32>
    %cst_444 = arith.constant dense<0.000000e+00> : vector<256x4xf32>
    %346 = tpu.matmul %343, %345, %cst_444 {dimension_numbers = #tpu.dot_dimension_numbers<[1], [0], [0], [1], [0, 0, 1, 1], [], []>} : vector<256x64xf32>, vector<64x4xf32>, vector<256x4xf32> -> vector<256x4xf32>
    %347 = arith.addf %341, %346 : vector<256x4xf32>
    %c2_445 = arith.constant 2 : index
    %c1_446 = arith.constant 1 : index
    %c0_447 = arith.constant 0 : index
    %348 = vector.load %arg21[%c2_445, %c1_446, %c0_447] : memref<18x18x64xf32, #tpu.memory_space<vmem>>, vector<16x16x64xf32>
    %349 = vector.shape_cast %348 : vector<16x16x64xf32> to vector<256x64xf32>
    %c0_448 = arith.constant 0 : index
    %c7_449 = arith.constant 7 : index
    %c0_450 = arith.constant 0 : index
    %c0_451 = arith.constant 0 : index
    %350 = vector.load %arg11[%c0_448, %c7_449, %c0_450, %c0_451] : memref<1x9x64x4xf32, #tpu.memory_space<vmem>>, vector<1x1x64x4xf32>
    %351 = vector.shape_cast %350 : vector<1x1x64x4xf32> to vector<64x4xf32>
    %cst_452 = arith.constant dense<0.000000e+00> : vector<256x4xf32>
    %352 = tpu.matmul %349, %351, %cst_452 {dimension_numbers = #tpu.dot_dimension_numbers<[1], [0], [0], [1], [0, 0, 1, 1], [], []>} : vector<256x64xf32>, vector<64x4xf32>, vector<256x4xf32> -> vector<256x4xf32>
    %353 = arith.addf %347, %352 : vector<256x4xf32>
    %c2_453 = arith.constant 2 : index
    %c2_454 = arith.constant 2 : index
    %c0_455 = arith.constant 0 : index
    %354 = vector.load %arg21[%c2_453, %c2_454, %c0_455] : memref<18x18x64xf32, #tpu.memory_space<vmem>>, vector<16x16x64xf32>
    %355 = vector.shape_cast %354 : vector<16x16x64xf32> to vector<256x64xf32>
    %c0_456 = arith.constant 0 : index
    %c8_457 = arith.constant 8 : index
    %c0_458 = arith.constant 0 : index
    %c0_459 = arith.constant 0 : index
    %356 = vector.load %arg11[%c0_456, %c8_457, %c0_458, %c0_459] : memref<1x9x64x4xf32, #tpu.memory_space<vmem>>, vector<1x1x64x4xf32>
    %357 = vector.shape_cast %356 : vector<1x1x64x4xf32> to vector<64x4xf32>
    %cst_460 = arith.constant dense<0.000000e+00> : vector<256x4xf32>
    %358 = tpu.matmul %355, %357, %cst_460 {dimension_numbers = #tpu.dot_dimension_numbers<[1], [0], [0], [1], [0, 0, 1, 1], [], []>} : vector<256x64xf32>, vector<64x4xf32>, vector<256x4xf32> -> vector<256x4xf32>
    %359 = arith.addf %353, %358 : vector<256x4xf32>
    %c0_461 = arith.constant 0 : index
    %c0_462 = arith.constant 0 : index
    %c0_463 = arith.constant 0 : index
    %360 = vector.load %arg12[%c0_461, %c0_462, %c0_463] : memref<1x4x64xf32, #tpu.memory_space<vmem>>, vector<1x4x64xf32>
    %361 = vector.shape_cast %360 : vector<1x4x64xf32> to vector<4x64xf32>
    %c0_464 = arith.constant 0 : index
    %c0_465 = arith.constant 0 : index
    %c0_466 = arith.constant 0 : index
    %362 = vector.load %arg13[%c0_464, %c0_465, %c0_466] : memref<1x64x1xf32, #tpu.memory_space<vmem>>, vector<1x64x1xf32>
    %363 = vector.shape_cast %362 : vector<1x64x1xf32> to vector<64x1xf32>
    %cst_467 = arith.constant dense<0.000000e+00> : vector<256x64xf32>
    %364 = tpu.matmul %359, %361, %cst_467 {dimension_numbers = #tpu.dot_dimension_numbers<[1], [0], [0], [1], [0, 0, 1, 1], [], []>} : vector<256x4xf32>, vector<4x64xf32>, vector<256x64xf32> -> vector<256x64xf32>
    %cst_468 = arith.constant 0.000000e+00 : f32
    %365 = vector.broadcast %cst_468 : f32 to vector<256x64xf32>
    %366 = arith.maximumf %364, %365 : vector<256x64xf32>
    %cst_469 = arith.constant dense<0.000000e+00> : vector<256x1xf32>
    %367 = tpu.matmul %366, %363, %cst_469 {dimension_numbers = #tpu.dot_dimension_numbers<[1], [0], [0], [1], [0, 0, 1, 1], [], []>} : vector<256x64xf32>, vector<64x1xf32>, vector<256x1xf32> -> vector<256x1xf32>
    %c0_470 = arith.constant 0 : index
    %c0_471 = arith.constant 0 : index
    %c0_472 = arith.constant 0 : index
    %368 = vector.load %arg3[%c0_470, %c0_471, %c0_472] : memref<1x256x1xf32, #tpu.memory_space<vmem>>, vector<1x256x1xf32>
    %369 = vector.shape_cast %368 : vector<1x256x1xf32> to vector<256x1xf32>
    %370 = arith.subf %369, %367 : vector<256x1xf32>
    %c0_473 = arith.constant 0 : index
    %c0_474 = arith.constant 0 : index
    %c0_475 = arith.constant 0 : index
    %371 = vector.load %arg14[%c0_473, %c0_474, %c0_475] : memref<1x1x64xf32, #tpu.memory_space<vmem>>, vector<1x1x64xf32>
    %372 = vector.shape_cast %371 : vector<1x1x64xf32> to vector<1x64xf32>
    %c0_476 = arith.constant 0 : index
    %c0_477 = arith.constant 0 : index
    %c0_478 = arith.constant 0 : index
    %373 = vector.load %arg15[%c0_476, %c0_477, %c0_478] : memref<1x64x4xf32, #tpu.memory_space<vmem>>, vector<1x64x4xf32>
    %374 = vector.shape_cast %373 : vector<1x64x4xf32> to vector<64x4xf32>
    %cst_479 = arith.constant dense<0.000000e+00> : vector<256x64xf32>
    %375 = tpu.matmul %370, %372, %cst_479 {dimension_numbers = #tpu.dot_dimension_numbers<[1], [0], [0], [1], [0, 0, 1, 1], [], []>} : vector<256x1xf32>, vector<1x64xf32>, vector<256x64xf32> -> vector<256x64xf32>
    %cst_480 = arith.constant 0.000000e+00 : f32
    %376 = vector.broadcast %cst_480 : f32 to vector<256x64xf32>
    %377 = arith.maximumf %375, %376 : vector<256x64xf32>
    %cst_481 = arith.constant dense<0.000000e+00> : vector<256x4xf32>
    %378 = tpu.matmul %377, %374, %cst_481 {dimension_numbers = #tpu.dot_dimension_numbers<[1], [0], [0], [1], [0, 0, 1, 1], [], []>} : vector<256x64xf32>, vector<64x4xf32>, vector<256x4xf32> -> vector<256x4xf32>
    %379 = arith.addf %359, %378 : vector<256x4xf32>
    %c0_482 = arith.constant 0 : index
    %c0_483 = arith.constant 0 : index
    %c0_484 = arith.constant 0 : index
    %380 = vector.load %arg16[%c0_482, %c0_483, %c0_484] : memref<1x4x64xf32, #tpu.memory_space<vmem>>, vector<1x4x64xf32>
    %381 = vector.shape_cast %380 : vector<1x4x64xf32> to vector<4x64xf32>
    %c0_485 = arith.constant 0 : index
    %c0_486 = arith.constant 0 : index
    %c0_487 = arith.constant 0 : index
    %382 = vector.load %arg17[%c0_485, %c0_486, %c0_487] : memref<1x64x4xf32, #tpu.memory_space<vmem>>, vector<1x64x4xf32>
    %383 = vector.shape_cast %382 : vector<1x64x4xf32> to vector<64x4xf32>
    %cst_488 = arith.constant dense<0.000000e+00> : vector<256x64xf32>
    %384 = tpu.matmul %379, %381, %cst_488 {dimension_numbers = #tpu.dot_dimension_numbers<[1], [0], [0], [1], [0, 0, 1, 1], [], []>} : vector<256x4xf32>, vector<4x64xf32>, vector<256x64xf32> -> vector<256x64xf32>
    %cst_489 = arith.constant 0.000000e+00 : f32
    %385 = vector.broadcast %cst_489 : f32 to vector<256x64xf32>
    %386 = arith.maximumf %384, %385 : vector<256x64xf32>
    %cst_490 = arith.constant dense<0.000000e+00> : vector<256x4xf32>
    %387 = tpu.matmul %386, %383, %cst_490 {dimension_numbers = #tpu.dot_dimension_numbers<[1], [0], [0], [1], [0, 0, 1, 1], [], []>} : vector<256x64xf32>, vector<64x4xf32>, vector<256x4xf32> -> vector<256x4xf32>
    %c0_491 = arith.constant 0 : index
    %c0_492 = arith.constant 0 : index
    %388 = vector.load %arg19[%c0_491, %c0_492] : memref<256x4xf32, #tpu.memory_space<vmem>>, vector<256x4xf32>
    tpu.vector_store %arg19[%c0_491, %c0_492], %387 {strides = array<i32>} : memref<256x4xf32, #tpu.memory_space<vmem>>, vector<256x4xf32>,
    %c7_i32 = arith.constant 7 : i32
    %389 = arith.cmpi eq, %arg1, %c7_i32 : i32
    %390 = arith.extui %389 : i1 to i32
    %c0_i32_493 = arith.constant 0 : i32
    %391 = arith.cmpi ne, %390, %c0_i32_493 : i32
    scf.if %391 {
      %c0_494 = arith.constant 0 : index
      %c0_495 = arith.constant 0 : index
      %c0_496 = arith.constant 0 : index
      %392 = vector.load %arg18[%c0_494, %c0_495, %c0_496] : memref<1x256x4xf32, #tpu.memory_space<vmem>>, vector<1x256x4xf32>
      %393 = vector.shape_cast %392 : vector<1x256x4xf32> to vector<256x4xf32>
      %394 = vector.shape_cast %387 : vector<256x4xf32> to vector<1x256x4xf32>
      tpu.vector_store %arg18[%c0_494, %c0_495, %c0_496], %394 {strides = array<i32>} : memref<1x256x4xf32, #tpu.memory_space<vmem>>, vector<1x256x4xf32>,
    } else {
    }
    return
  }
  func.func @transform_0(%arg0: i32, %arg1: i32) -> (i32, i32, i32) {
    %c0_i32 = arith.constant 0 : i32
    %c0_i32_0 = arith.constant 0 : i32
    %c0_i32_1 = arith.constant 0 : i32
    return %arg0, %c0_i32, %c0_i32_0 : i32, i32, i32
  }
  func.func @transform_1(%arg0: i32, %arg1: i32) -> (i32, i32, i32) {
    %c0_i32 = arith.constant 0 : i32
    %c0_i32_0 = arith.constant 0 : i32
    %c0_i32_1 = arith.constant 0 : i32
    return %arg0, %c0_i32, %c0_i32_0 : i32, i32, i32
  }
  func.func @transform_2(%arg0: i32, %arg1: i32) -> (i32, i32) {
    %c0_i32 = arith.constant 0 : i32
    %c0_i32_0 = arith.constant 0 : i32
    %c0_i32_1 = arith.constant 0 : i32
    return %c0_i32, %c0_i32_0 : i32, i32
  }
  func.func @transform_3(%arg0: i32, %arg1: i32) -> (i32, i32) {
    %c0_i32 = arith.constant 0 : i32
    %c0_i32_0 = arith.constant 0 : i32
    %c0_i32_1 = arith.constant 0 : i32
    return %c0_i32, %c0_i32_0 : i32, i32
  }
  func.func @transform_4(%arg0: i32, %arg1: i32) -> (i32, i32, i32, i32) {
    %c0_i32 = arith.constant 0 : i32
    %c0_i32_0 = arith.constant 0 : i32
    %c0_i32_1 = arith.constant 0 : i32
    %c0_i32_2 = arith.constant 0 : i32
    return %arg1, %c0_i32, %c0_i32_0, %c0_i32_1 : i32, i32, i32, i32
  }
  func.func @transform_5(%arg0: i32, %arg1: i32) -> (i32, i32, i32, i32) {
    %c0_i32 = arith.constant 0 : i32
    %c0_i32_0 = arith.constant 0 : i32
    %c0_i32_1 = arith.constant 0 : i32
    %c0_i32_2 = arith.constant 0 : i32
    return %arg1, %c0_i32, %c0_i32_0, %c0_i32_1 : i32, i32, i32, i32
  }
  func.func @transform_6(%arg0: i32, %arg1: i32) -> (i32, i32, i32, i32) {
    %c0_i32 = arith.constant 0 : i32
    %c0_i32_0 = arith.constant 0 : i32
    %c0_i32_1 = arith.constant 0 : i32
    %c0_i32_2 = arith.constant 0 : i32
    return %arg1, %c0_i32, %c0_i32_0, %c0_i32_1 : i32, i32, i32, i32
  }
  func.func @transform_7(%arg0: i32, %arg1: i32) -> (i32, i32, i32, i32) {
    %c0_i32 = arith.constant 0 : i32
    %c0_i32_0 = arith.constant 0 : i32
    %c0_i32_1 = arith.constant 0 : i32
    %c0_i32_2 = arith.constant 0 : i32
    return %arg1, %c0_i32, %c0_i32_0, %c0_i32_1 : i32, i32, i32, i32
  }
  func.func @transform_8(%arg0: i32, %arg1: i32) -> (i32, i32, i32, i32) {
    %c0_i32 = arith.constant 0 : i32
    %c0_i32_0 = arith.constant 0 : i32
    %c0_i32_1 = arith.constant 0 : i32
    %c0_i32_2 = arith.constant 0 : i32
    return %arg1, %c0_i32, %c0_i32_0, %c0_i32_1 : i32, i32, i32, i32
  }
  func.func @transform_9(%arg0: i32, %arg1: i32) -> (i32, i32, i32, i32) {
    %c0_i32 = arith.constant 0 : i32
    %c0_i32_0 = arith.constant 0 : i32
    %c0_i32_1 = arith.constant 0 : i32
    %c0_i32_2 = arith.constant 0 : i32
    return %arg1, %c0_i32, %c0_i32_0, %c0_i32_1 : i32, i32, i32, i32
  }
  func.func @transform_10(%arg0: i32, %arg1: i32) -> (i32, i32, i32) {
    %c0_i32 = arith.constant 0 : i32
    %c0_i32_0 = arith.constant 0 : i32
    %c0_i32_1 = arith.constant 0 : i32
    return %arg1, %c0_i32, %c0_i32_0 : i32, i32, i32
  }
  func.func @transform_11(%arg0: i32, %arg1: i32) -> (i32, i32, i32) {
    %c0_i32 = arith.constant 0 : i32
    %c0_i32_0 = arith.constant 0 : i32
    %c0_i32_1 = arith.constant 0 : i32
    return %arg1, %c0_i32, %c0_i32_0 : i32, i32, i32
  }
  func.func @transform_12(%arg0: i32, %arg1: i32) -> (i32, i32, i32) {
    %c0_i32 = arith.constant 0 : i32
    %c0_i32_0 = arith.constant 0 : i32
    %c0_i32_1 = arith.constant 0 : i32
    return %arg1, %c0_i32, %c0_i32_0 : i32, i32, i32
  }
  func.func @transform_13(%arg0: i32, %arg1: i32) -> (i32, i32, i32) {
    %c0_i32 = arith.constant 0 : i32
    %c0_i32_0 = arith.constant 0 : i32
    %c0_i32_1 = arith.constant 0 : i32
    return %arg1, %c0_i32, %c0_i32_0 : i32, i32, i32
  }
  func.func @transform_14(%arg0: i32, %arg1: i32) -> (i32, i32, i32) {
    %c0_i32 = arith.constant 0 : i32
    %c0_i32_0 = arith.constant 0 : i32
    %c0_i32_1 = arith.constant 0 : i32
    return %arg1, %c0_i32, %c0_i32_0 : i32, i32, i32
  }
  func.func @transform_15(%arg0: i32, %arg1: i32) -> (i32, i32, i32) {
    %c0_i32 = arith.constant 0 : i32
    %c0_i32_0 = arith.constant 0 : i32
    %c0_i32_1 = arith.constant 0 : i32
    return %arg1, %c0_i32, %c0_i32_0 : i32, i32, i32
  }
  func.func @transform_16(%arg0: i32, %arg1: i32) -> (i32, i32, i32) {
    %c0_i32 = arith.constant 0 : i32
    %c0_i32_0 = arith.constant 0 : i32
    %c0_i32_1 = arith.constant 0 : i32
    return %arg0, %c0_i32, %c0_i32_0 : i32, i32, i32
  }
}

</mosaic_0001>

<bundles_post_ra>
// kernel: gppnn_forward.1
= control target key start
LH: loop header
LB: loop body
LE: loop exit
PB: predicated region body
PF: predicated region fallthrough
CT: control target
= control target key end

     0   :  { %s29617_s21 = smov 0   ;;  %s29619_s22 = smov 0   ;;  %s34826_s0 = inlined_call_operand.vmem [shape: f32[2,64,4], index: 0, kind: input, shape index: {}]   ;;  %s34827_s1 = inlined_call_operand.vmem [shape: f32[2,256,1], index: 1, kind: input, shape index: {}]   ;;  %s34828_s2 = inlined_call_operand.vmem [shape: f32[256,64], index: 2, kind: input, shape index: {}]   ;;  %s34829_s3 = inlined_call_operand.vmem [shape: f32[64,256], index: 3, kind: input, shape index: {}]   ;;  %s34830_s4 = inlined_call_operand.vmem [shape: f32[8,9,4,64], index: 4, kind: input, shape index: {}]   ;;  %s34831_s5 = inlined_call_operand.vmem [shape: f32[8,9,64,4], index: 5, kind: input, shape index: {}]   ;;  %s34832_s6 = inlined_call_operand.vmem [shape: f32[8,9,4,64], index: 6, kind: input, shape index: {}]   ;;  %s34833_s7 = inlined_call_operand.vmem [shape: f32[8,9,64,4], index: 7, kind: input, shape index: {}]   ;;  %s34834_s8 = inlined_call_operand.vmem [shape: f32[8,9,4,64], index: 8, kind: input, shape index: {}]   ;;  %s34835_s9 = inlined_call_operand.vmem [shape: f32[8,9,64,4], index: 9, kind: input, shape index: {}]   ;;  %s34836_s10 = inlined_call_operand.vmem [shape: f32[8,4,64], index: 10, kind: input, shape index: {}]   ;;  %s34837_s11 = inlined_call_operand.vmem [shape: f32[8,64,1], index: 11, kind: input, shape index: {}]   ;;  %s34838_s12 = inlined_call_operand.vmem [shape: f32[8,1,64], index: 12, kind: input, shape index: {}]   ;;  %s34839_s13 = inlined_call_operand.vmem [shape: f32[8,64,4], index: 13, kind: input, shape index: {}]   ;;  %s34840_s14 = inlined_call_operand.vmem [shape: f32[8,4,64], index: 14, kind: input, shape index: {}]   ;;  %s34841_s15 = inlined_call_operand.vmem [shape: f32[8,64,4], index: 15, kind: input, shape index: {}]   ;;  %s34842_s16 = inlined_call_operand.vmem [shape: f32[2,256,4], index: 16, kind: output, shape index: {}]  }
   0x1   :  { %35121 = sst [smem:[#allocation83_spill]] %s34826_s0  ;;  %s29621_s23 = smov 0  }
   0x2   :  { %35122 = sst [smem:[#allocation84_spill]] %s34827_s1  ;;  %s29623_s24 = smov 0  }
   0x3   :  { %35123 = sst [smem:[#allocation85_spill]] %s34828_s2  ;;  %s29625_s25 = smov 0  }
   0x4   :  { %35124 = sst [smem:[#allocation86_spill]] %s34829_s3 }
   0x5   :  { %35125 = sst [smem:[#allocation87_spill]] %s34830_s4 }
   0x6   :  { %35126 = sst [smem:[#allocation88_spill]] %s34831_s5 }
   0x7   :  { %35127 = sst [smem:[#allocation89_spill]] %s34832_s6 }
   0x8   :  { %35128 = sst [smem:[#allocation90_spill]] %s34833_s7 }
   0x9   :  { %35129 = sst [smem:[#allocation91_spill]] %s34834_s8 }
   0xa   :  { %35130 = sst [smem:[#allocation92_spill]] %s34835_s9 }
   0xb   :  { %35131 = sst [smem:[#allocation93_spill]] %s34836_s10 }
   0xc   :  { %35132 = sst [smem:[#allocation94_spill]] %s34841_s15 }
   0xd   :  { %35133 = sst [smem:[#allocation95_spill]] %s34842_s16 }
   0xe LB: > { %35134 = sst [smem:[#allocation7_spill]] %s29513_s21  ;;  %s35_s26 = sadd.s32 1, %s29521_s23  ;;  %s29529_s25 = sphi %s29625_s25, %s26_s25   ;;  %s29525_s24 = sphi %s29623_s24, %s35549_s24   ;;  %s29521_s23 = sphi %s29621_s23, %s35548_s23   ;;  %s29517_s22 = sphi %s29619_s22, %s35547_s22   ;;  %s29513_s21 = sphi %s29617_s21, %s35546_s21  }
   0xf   : > { %35135 = sst [smem:[#allocation8_spill]] %s29521_s23  ;;  %s38_s27 = sadd.s32 1, %s29525_s24 }
  0x10   : > { %35136 = sst [smem:[#allocation9_spill]] %s29525_s24  ;;  %p36_p0 = scmp.ge.s32.totalorder %s35_s26, 8 }
  0x11   : > { %35137 = sst [smem:[#allocation10_spill]] %s29529_s25  ;;  %p21113_p1 = scmp.ge.s32.totalorder %s29529_s25, 1 }
  0x12   : > { %p600_p2 = scmp.lt.s32.totalorder %s29529_s25, 17  ;;  %s35551_s26 = smov (%p36_p0, %s35_s26), 0 }
  0x13   : > { %35138 = sst [smem:[#allocation11_spill]] %s35551_s26  ;;  %s35553_s27 = smov (!%p36_p0, %s38_s27), %s29525_s24 }
  0x14   : > { %p601_p3 = pnand %p21113_p1, %p600_p2  ;;  %p40_p4 = scmp.ge.s32.totalorder %s35553_s27, 2 }
  0x16   : > { %s35555_s27 = smov (%p40_p4, %s35553_s27), 0  ;;  %604 = sbr.rel (%p601_p3) target bundleno = 5830 (0x16c6), region = 84 }
  0x17   : > { %35139 = sst [smem:[#allocation12_spill]] %s35555_s27 }
  0x1d   : > { %p711_p5 = scmp.lt.s32.totalorder %s29517_s22, 1  ;;  %p721_p6 = scmp.lt.s32.totalorder %s29513_s21, 7 }
  0x1e   : > { %s35140_s18 = sld [smem:[#allocation83_spill]]  ;;  %s35141_s1 = sld [smem:[#allocation84_spill]] }
  0x1f   : > { %s35557_s22 = smov (!%p711_p5, %s29517_s22), 1  ;;  %s35143_s10 = sld [smem:[#allocation93_spill]] }
  0x20   : > { %s29651_s28 = scalar_select %p721_p6, %s29513_s21, 7 }
  0x21   : > { %s22936_s29 = sshll.u32 %s35557_s22, 6  ;;  %s22937_s30 = sshll.u32 %s35557_s22, 8 }
  0x22   : > { %s29448_s24 = smul.u32 36, %s29651_s28  ;;  %s21124_s23 = sshll.u32 %s29651_s28, 2 }
  0x23   : > { %s29449_s25 = smul.u32 576, %s29651_s28  ;;  %s35145_s4 = sld [smem:[#allocation87_spill]] }
  0x24   : > { %s29656_s19 = scalar_lea.vmem %s35140_s18, %s22936_s29  ;;  %s29661_s26 = scalar_lea.vmem %s35141_s1, %s22937_s30 }
  0x25   : > { %35142 = sst [smem:[#allocation13_spill]] %s29661_s26  ;;  %s29669_s21 = scalar_lea.vmem %s35143_s10, %s21124_s23 }
  0x26   : > { %35144 = sst [smem:[#allocation14_spill]] %s29669_s21  ;;  %s35146_s6 = sld [smem:[#allocation89_spill]] }
  0x27   : > { %s35147_s5 = sld [smem:[#allocation88_spill]]  ;;  %s35148_s7 = sld [smem:[#allocation90_spill]] }
  0x28   : > { %s35149_s8 = sld [smem:[#allocation91_spill]]  ;;  %s35150_s9 = sld [smem:[#allocation92_spill]] }
  0x29   : > { %s29674_s15 = scalar_lea.vmem %s35145_s4, %s29448_s24  ;;  %s22938_s0 = sshll.u32 %s29651_s28, 6 }
  0x2a   : > { %s29709_s1 = scalar_lea.vmem %s34837_s11, %s22938_s0  ;;  %s29714_s10 = scalar_lea.vmem %s34839_s13, %s22938_s0 }
  0x2b   : > { %s29719_s4 = scalar_lea.vmem %s34840_s14, %s21124_s23 }
  0x2c   : > { %s29679_s17 = scalar_lea.vmem %s35146_s6, %s29448_s24 }
  0x2d   : > { %s29684_s20 = scalar_lea.vmem %s35147_s5, %s29449_s25  ;;  %s29689_s2 = scalar_lea.vmem %s35148_s7, %s29449_s25 }
  0x2e   : > { %s29694_s16 = scalar_lea.vmem %s35149_s8, %s29448_s24  ;;  %s29699_s29 = scalar_lea.vmem %s35150_s9, %s29449_s25 }
  0x2f   : > { %s35151_s8 = sld [smem:[#allocation94_spill]]  ;;  %s35152_s5 = sld [smem:[#allocation95_spill]] }
  0x30   : > { %s35153_s9 = sld [smem:[#allocation7_spill]] }
  0x35   : > { %s29724_s6 = scalar_lea.vmem %s35151_s8, %s22938_s0  ;;  %s29729_s21 = scalar_lea.vmem %s35152_s5, %s22937_s30 }
  0x36   : > { %p21134_p7 = scmp.ne.s32.totalorder %s35153_s9, 0 }
  0x37   : > { %vm789_vm0 = vcmask (!%p21134_p7), 25600   ;;  %vm845_vm1 = vcmask (!%p21134_p7), 517120   ;;  %v970_v0 = vld [vmem:[%s29656_s19] sm:$0xff] (!%p21134_p7)  ;;  %v971_v1 = vld [vmem:[%s29656_s19 + $0x8] sm:$0xff] (!%p21134_p7)  ;;  %v972_v2 = vld [vmem:[%s29656_s19 + $0x10] sm:$0xff] (!%p21134_p7)  ;;  %v29531_v3 = vmov (!%p21134_p7), 0.0  }
  0x38   : > { %785 = sbr.rel (%p21134_p7) target bundleno = 317 (0x13d), region = 88  ;;  %790 = vst.msk [vmem:[#allocation3 + $0x10] sm:$0x3] (!%p21134_p7), %vm789_vm0, %v29531_v3  ;;  %793 = vst.msk [vmem:[#allocation3 + $0x28] sm:$0x3] (!%p21134_p7), %vm789_vm0, %v29531_v3  ;;  %v29847_v4 = vpack.c.bf16 (!%p21134_p7), %v971_v1, %v970_v0  ;;  %v973_v5 = vld [vmem:[%s29656_s19 + $0x18] sm:$0xff] (!%p21134_p7) }
  0x39   : > { %796 = vst.msk [vmem:[#allocation3 + $0x40] sm:$0x3] (!%p21134_p7), %vm789_vm0, %v29531_v3  ;;  %799 = vst.msk [vmem:[#allocation3 + $0x58] sm:$0x3] (!%p21134_p7), %vm789_vm0, %v29531_v3  ;;  %vm842_vm2 = vcmask (!%p21134_p7), 523264   ;;  %vm786_vm3 = vcmask (!%p21134_p7), 31744   ;;  %v29850_v6 = vpack.c.bf16 (!%p21134_p7), %v973_v5, %v972_v2 }
  0x3a   : > { %802 = vst.msk [vmem:[#allocation3 + $0x70] sm:$0x3] (!%p21134_p7), %vm789_vm0, %v29531_v3  ;;  %805 = vst.msk [vmem:[#allocation3 + $0x88] sm:$0x3] (!%p21134_p7), %vm789_vm0, %v29531_v3  ;;  %v29853_v7 = vld [vmem:[%s29656_s19 + $0x20] sm:$0xff] (!%p21134_p7)  ;;  %v29856_v8 = vld [vmem:[%s29656_s19 + $0x28] sm:$0xff] (!%p21134_p7)  ;;  %27737 = vmatprep.subr.bf16.mxu0 (!%p21134_p7), %v29847_v4  ;;  %28280 = vmatprep.subr.bf16.mxu1 (!%p21134_p7), %v29847_v4 }
  0x3b   : > { %808 = vst.msk [vmem:[#allocation3 + $0xa0] sm:$0x3] (!%p21134_p7), %vm789_vm0, %v29531_v3  ;;  %811 = vst.msk [vmem:[#allocation3 + $0xb8] sm:$0x3] (!%p21134_p7), %vm789_vm0, %v29531_v3  ;;  %s35154_s9 = sld [smem:[#allocation85_spill]] (!%p21134_p7)  ;;  %27739 = vmatpush3.bf16.msra.mxu0 (!%p21134_p7), %v29847_v4  ;;  %28284 = vmatpush3.bf16.msra.mxu1 (!%p21134_p7), %v29847_v4  ;;  %v27744_v11 = vpack.c.bf16 (!%p21134_p7), %v29856_v8, %v29853_v7  ;;  %v976_v12 = vld [vmem:[%s29656_s19 + $0x30] sm:$0xff] (!%p21134_p7) }
  0x3c   : > { %814 = vst.msk [vmem:[#allocation3 + $0xd0] sm:$0x3] (!%p21134_p7), %vm789_vm0, %v29531_v3  ;;  %817 = vst.msk [vmem:[#allocation3 + $0xe8] sm:$0x3] (!%p21134_p7), %vm789_vm0, %v29531_v3  ;;  %27741 = vmatprep.subr.bf16.mxu0 (!%p21134_p7), %v29850_v6  ;;  %28281 = vmatprep.subr.bf16.mxu1 (!%p21134_p7), %v29850_v6  ;;  %v977_v13 = vld [vmem:[%s29656_s19 + $0x38] sm:$0xff] (!%p21134_p7) }
  0x3d   : > { %820 = vst.msk [vmem:[#allocation3 + $0x100] sm:$0x3] (!%p21134_p7), %vm789_vm0, %v29531_v3  ;;  %823 = vst.msk [vmem:[#allocation3 + $0x118] sm:$0x3] (!%p21134_p7), %vm789_vm0, %v29531_v3  ;;  %v27748_v14 = vpack.c.bf16 (!%p21134_p7), %v977_v13, %v976_v12 }
  0x3e   : > { %826 = vst.msk [vmem:[#allocation3 + $0x130] sm:$0x3] (!%p21134_p7), %vm789_vm0, %v29531_v3  ;;  %829 = vst.msk [vmem:[#allocation3 + $0x148] sm:$0x3] (!%p21134_p7), %vm789_vm0, %v29531_v3 }
  0x3f   : > { %832 = vst.msk [vmem:[#allocation3 + $0x160] sm:$0x3] %vm789_vm0, %v29531_v3  ;;  %835 = vst.msk [vmem:[#allocation3 + $0x178] sm:$0x3] %vm789_vm0, %v29531_v3  ;;  %27743 = vmatpush3.bf16.msra.mxu0 %v29850_v6  ;;  %28285 = vmatpush3.bf16.msra.mxu1 %v29850_v6 }
  0x40   : > { %838 = vst.msk [vmem:[#allocation3 + $0x190] sm:$0x3] %vm789_vm0, %v29531_v3  ;;  %841 = vst.msk [vmem:[#allocation3 + $0x1a8] sm:$0x3] %vm789_vm0, %v29531_v3  ;;  %27745 = vmatprep.subr.bf16.mxu0 %v27744_v11  ;;  %28282 = vmatprep.subr.bf16.mxu1 %v27744_v11 }
  0x41   : > { %846 = vst.msk [vmem:[#allocation4 + $0x10] sm:$0x3] %vm845_vm1, %v29531_v3  ;;  %849 = vst.msk [vmem:[#allocation4 + $0x28] sm:$0x3] %vm845_vm1, %v29531_v3  ;;  %v938_v9 = vld [vmem:[%s35154_s9] sm:$0xff]  ;;  %v939_v15 = vld [vmem:[%s35154_s9 + $0x8] sm:$0xff] }
  0x42   : > { %852 = vst.msk [vmem:[#allocation4 + $0x40] sm:$0x3] %vm845_vm1, %v29531_v3  ;;  %855 = vst.msk [vmem:[#allocation4 + $0x58] sm:$0x3] %vm845_vm1, %v29531_v3  ;;  %v954_v10 = vld [vmem:[%s35154_s9 + $0x80] sm:$0xff]  ;;  %24852 = vmatprep.mubr.msk.f32.mxu0 %vm842_vm2, %v938_v9  ;;  %v955_v16 = vld [vmem:[%s35154_s9 + $0x88] sm:$0xff] }
  0x43   : > { %858 = vst.msk [vmem:[#allocation4 + $0x70] sm:$0x3] %vm845_vm1, %v29531_v3  ;;  %861 = vst.msk [vmem:[#allocation4 + $0x88] sm:$0x3] %vm845_vm1, %v29531_v3  ;;  %24876 = vmatprep.mubr.msk.f32.mxu1 %vm842_vm2, %v954_v10  ;;  %27747 = vmatpush3.bf16.msra.mxu0 %v27744_v11  ;;  %v940_v17 = vld [vmem:[%s35154_s9 + $0x10] sm:$0xff]  ;;  %v941_v19 = vld [vmem:[%s35154_s9 + $0x18] sm:$0xff] }
  0x44   : > { %864 = vst.msk [vmem:[#allocation4 + $0xa0] sm:$0x3] %vm845_vm1, %v29531_v3  ;;  %867 = vst.msk [vmem:[#allocation4 + $0xb8] sm:$0x3] %vm845_vm1, %v29531_v3  ;;  %28286 = vmatpush3.bf16.msra.mxu1 %v27744_v11  ;;  %27749 = vmatprep.subr.bf16.mxu0 %v27748_v14  ;;  %v956_v18 = vld [vmem:[%s35154_s9 + $0x90] sm:$0xff]  ;;  %v957_v20 = vld [vmem:[%s35154_s9 + $0x98] sm:$0xff] }
  0x45   : > { %870 = vst.msk [vmem:[#allocation4 + $0xd0] sm:$0x3] %vm845_vm1, %v29531_v3  ;;  %873 = vst.msk [vmem:[#allocation4 + $0xe8] sm:$0x3] %vm845_vm1, %v29531_v3  ;;  %28283 = vmatprep.subr.bf16.mxu1 %v27748_v14  ;;  %v942_v21 = vld [vmem:[%s35154_s9 + $0x20] sm:$0xff]  ;;  %v943_v23 = vld [vmem:[%s35154_s9 + $0x28] sm:$0xff] }
  0x46   : > { %876 = vst.msk [vmem:[#allocation4 + $0x100] sm:$0x3] %vm845_vm1, %v29531_v3  ;;  %879 = vst.msk [vmem:[#allocation4 + $0x118] sm:$0x3] %vm845_vm1, %v29531_v3  ;;  %v958_v22 = vld [vmem:[%s35154_s9 + $0xa0] sm:$0xff]  ;;  %v959_v24 = vld [vmem:[%s35154_s9 + $0xa8] sm:$0xff] }
  0x47   : > { %882 = vst.msk [vmem:[#allocation4 + $0x130] sm:$0x3] %vm845_vm1, %v29531_v3  ;;  %885 = vst.msk [vmem:[#allocation4 + $0x148] sm:$0x3] %vm845_vm1, %v29531_v3  ;;  %27751 = vmatpush3.bf16.msra.mxu0 %v27748_v14  ;;  %v944_v25 = vld [vmem:[%s35154_s9 + $0x30] sm:$0xff]  ;;  %v945_v27 = vld [vmem:[%s35154_s9 + $0x38] sm:$0xff] }
  0x48   : > { %888 = vst.msk [vmem:[#allocation4 + $0x160] sm:$0x3] %vm845_vm1, %v29531_v3  ;;  %891 = vst.msk [vmem:[#allocation4 + $0x178] sm:$0x3] %vm845_vm1, %v29531_v3  ;;  %28287 = vmatpush3.bf16.msra.mxu1 %v27748_v14  ;;  %v960_v26 = vld [vmem:[%s35154_s9 + $0xb0] sm:$0xff]  ;;  %v961_v28 = vld [vmem:[%s35154_s9 + $0xb8] sm:$0xff] }
  0x49   : > { %894 = vst.msk [vmem:[#allocation4 + $0x190] sm:$0x3] %vm845_vm1, %v29531_v3  ;;  %897 = vst.msk [vmem:[#allocation4 + $0x1a8] sm:$0x3] %vm845_vm1, %v29531_v3  ;;  %v946_v29 = vld [vmem:[%s35154_s9 + $0x40] sm:$0xff]  ;;  %v947_v31 = vld [vmem:[%s35154_s9 + $0x48] sm:$0xff] }
  0x4a   : > { %899 = vst.msk [vmem:[#allocation5 + $0x8] sm:$0x3] %vm789_vm0, %v29531_v3  ;;  %901 = vst.msk [vmem:[#allocation5 + $0x18] sm:$0x3] %vm789_vm0, %v29531_v3  ;;  %24853 = vmatmul.mubr.msk.f32.vlgmr.msra.gmra.mrb[0].mxu0 %vm842_vm2, %v939_v15  ;;  %v962_v30 = vld [vmem:[%s35154_s9 + $0xc0] sm:$0xff]  ;;  %v963_v32 = vld [vmem:[%s35154_s9 + $0xc8] sm:$0xff] }
  0x4b   : > { %903 = vst.msk [vmem:[#allocation5 + $0x28] sm:$0x3] %vm789_vm0, %v29531_v3  ;;  %905 = vst.msk [vmem:[#allocation5 + $0x38] sm:$0x3] %vm789_vm0, %v29531_v3  ;;  %24877 = vmatmul.mubr.msk.f32.vlgmr.msra.gmra.mrb[0].mxu1 %vm842_vm2, %v955_v16  ;;  %24855 = vmatprep.mubr.msk.f32.mxu0 %vm842_vm2, %v940_v17  ;;  %v948_v33 = vld [vmem:[%s35154_s9 + $0x50] sm:$0xff]  ;;  %v949_v35 = vld [vmem:[%s35154_s9 + $0x58] sm:$0xff] }
  0x4c   : > { %907 = vst.msk [vmem:[#allocation5 + $0x48] sm:$0x3] %vm789_vm0, %v29531_v3  ;;  %909 = vst.msk [vmem:[#allocation5 + $0x58] sm:$0x3] %vm789_vm0, %v29531_v3  ;;  %24879 = vmatprep.mubr.msk.f32.mxu1 %vm842_vm2, %v956_v18  ;;  %v964_v34 = vld [vmem:[%s35154_s9 + $0xd0] sm:$0xff]  ;;  %v965_v36 = vld [vmem:[%s35154_s9 + $0xd8] sm:$0xff] }
  0x4d   : > { %911 = vst.msk [vmem:[#allocation5 + $0x68] sm:$0x3] %vm789_vm0, %v29531_v3  ;;  %913 = vst.msk [vmem:[#allocation5 + $0x78] sm:$0x3] %vm789_vm0, %v29531_v3  ;;  %v950_v37 = vld [vmem:[%s35154_s9 + $0x60] sm:$0xff]  ;;  %v951_v39 = vld [vmem:[%s35154_s9 + $0x68] sm:$0xff] }
  0x4e   : > { %915 = vst.msk [vmem:[#allocation5 + $0x88] sm:$0x3] %vm789_vm0, %v29531_v3  ;;  %917 = vst.msk [vmem:[#allocation5 + $0x98] sm:$0x3] %vm789_vm0, %v29531_v3  ;;  %24856 = vmatmul.mubr.msk.f32.gmra.mrb[2].mxu0 %vm842_vm2, %v941_v19  ;;  %v966_v38 = vld [vmem:[%s35154_s9 + $0xe0] sm:$0xff]  ;;  %v967_v40 = vld [vmem:[%s35154_s9 + $0xe8] sm:$0xff] }
  0x4f   : > { %919 = vst.msk [vmem:[#allocation6 + $0x8] sm:$0x3] %vm845_vm1, %v29531_v3  ;;  %921 = vst.msk [vmem:[#allocation6 + $0x18] sm:$0x3] %vm845_vm1, %v29531_v3  ;;  %24880 = vmatmul.mubr.msk.f32.gmra.mrb[2].mxu1 %vm842_vm2, %v957_v20  ;;  %24858 = vmatprep.mubr.msk.f32.mxu0 %vm842_vm2, %v942_v21  ;;  %v952_v41 = vld [vmem:[%s35154_s9 + $0x70] sm:$0xff]  ;;  %v953_v43 = vld [vmem:[%s35154_s9 + $0x78] sm:$0xff] }
  0x50   : > { %923 = vst.msk [vmem:[#allocation6 + $0x28] sm:$0x3] %vm845_vm1, %v29531_v3  ;;  %925 = vst.msk [vmem:[#allocation6 + $0x38] sm:$0x3] %vm845_vm1, %v29531_v3  ;;  %24882 = vmatprep.mubr.msk.f32.mxu1 %vm842_vm2, %v958_v22  ;;  %v968_v42 = vld [vmem:[%s35154_s9 + $0xf0] sm:$0xff]  ;;  %v969_v44 = vld [vmem:[%s35154_s9 + $0xf8] sm:$0xff] }
  0x51   : > { %927 = vst.msk [vmem:[#allocation6 + $0x48] sm:$0x3] %vm845_vm1, %v29531_v3  ;;  %929 = vst.msk [vmem:[#allocation6 + $0x58] sm:$0x3] %vm845_vm1, %v29531_v3 }
  0x52   : > { %931 = vst.msk [vmem:[#allocation6 + $0x68] sm:$0x3] %vm845_vm1, %v29531_v3  ;;  %933 = vst.msk [vmem:[#allocation6 + $0x78] sm:$0x3] %vm845_vm1, %v29531_v3  ;;  %24859 = vmatmul.mubr.msk.f32.gmra.mrb[4].mxu0 %vm842_vm2, %v943_v23 }
  0x53   : > { %935 = vst.msk [vmem:[#allocation6 + $0x88] sm:$0x3] %vm845_vm1, %v29531_v3  ;;  %937 = vst.msk [vmem:[#allocation6 + $0x98] sm:$0x3] %vm845_vm1, %v29531_v3  ;;  %24883 = vmatmul.mubr.msk.f32.gmra.mrb[4].mxu1 %vm842_vm2, %v959_v24  ;;  %24861 = vmatprep.mubr.msk.f32.mxu0 %vm842_vm2, %v944_v25 }
  0x54   : > { %843 = vst.msk [vmem:[#allocation4] sm:$0xff] %vm842_vm2, %v29531_v3  ;;  %844 = vst.msk [vmem:[#allocation4 + $0x8] sm:$0xff] %vm842_vm2, %v29531_v3  ;;  %24885 = vmatprep.mubr.msk.f32.mxu1 %vm842_vm2, %v960_v26 }
  0x55   : > { %847 = vst.msk [vmem:[#allocation4 + $0x18] sm:$0xff] %vm842_vm2, %v29531_v3  ;;  %848 = vst.msk [vmem:[#allocation4 + $0x20] sm:$0xff] %vm842_vm2, %v29531_v3 }
  0x56   : > { %850 = vst.msk [vmem:[#allocation4 + $0x30] sm:$0xff] %vm842_vm2, %v29531_v3  ;;  %851 = vst.msk [vmem:[#allocation4 + $0x38] sm:$0xff] %vm842_vm2, %v29531_v3  ;;  %24862 = vmatmul.mubr.msk.f32.gmra.mrb[6].mxu0 %vm842_vm2, %v945_v27 }
  0x57   : > { %853 = vst.msk [vmem:[#allocation4 + $0x48] sm:$0xff] %vm842_vm2, %v29531_v3  ;;  %854 = vst.msk [vmem:[#allocation4 + $0x50] sm:$0xff] %vm842_vm2, %v29531_v3  ;;  %24886 = vmatmul.mubr.msk.f32.gmra.mrb[6].mxu1 %vm842_vm2, %v961_v28  ;;  %24864 = vmatprep.mubr.msk.f32.mxu0 %vm842_vm2, %v946_v29 }
  0x58   : > { %856 = vst.msk [vmem:[#allocation4 + $0x60] sm:$0xff] %vm842_vm2, %v29531_v3  ;;  %857 = vst.msk [vmem:[#allocation4 + $0x68] sm:$0xff] %vm842_vm2, %v29531_v3  ;;  %24888 = vmatprep.mubr.msk.f32.mxu1 %vm842_vm2, %v962_v30 }
  0x59   : > { %859 = vst.msk [vmem:[#allocation4 + $0x78] sm:$0xff] %vm842_vm2, %v29531_v3  ;;  %860 = vst.msk [vmem:[#allocation4 + $0x80] sm:$0xff] %vm842_vm2, %v29531_v3 }
  0x5a   : > { %862 = vst.msk [vmem:[#allocation4 + $0x90] sm:$0xff] %vm842_vm2, %v29531_v3  ;;  %863 = vst.msk [vmem:[#allocation4 + $0x98] sm:$0xff] %vm842_vm2, %v29531_v3  ;;  %24865 = vmatmul.mubr.msk.f32.gmra.mrb[8].mxu0 %vm842_vm2, %v947_v31 }
  0x5b   : > { %865 = vst.msk [vmem:[#allocation4 + $0xa8] sm:$0xff] %vm842_vm2, %v29531_v3  ;;  %866 = vst.msk [vmem:[#allocation4 + $0xb0] sm:$0xff] %vm842_vm2, %v29531_v3  ;;  %24889 = vmatmul.mubr.msk.f32.gmra.mrb[8].mxu1 %vm842_vm2, %v963_v32  ;;  %24867 = vmatprep.mubr.msk.f32.mxu0 %vm842_vm2, %v948_v33 }
  0x5c   : > { %868 = vst.msk [vmem:[#allocation4 + $0xc0] sm:$0xff] %vm842_vm2, %v29531_v3  ;;  %869 = vst.msk [vmem:[#allocation4 + $0xc8] sm:$0xff] %vm842_vm2, %v29531_v3  ;;  %24891 = vmatprep.mubr.msk.f32.mxu1 %vm842_vm2, %v964_v34 }
  0x5d   : > { %871 = vst.msk [vmem:[#allocation4 + $0xd8] sm:$0xff] %vm842_vm2, %v29531_v3  ;;  %872 = vst.msk [vmem:[#allocation4 + $0xe0] sm:$0xff] %vm842_vm2, %v29531_v3 }
  0x5e   : > { %874 = vst.msk [vmem:[#allocation4 + $0xf0] sm:$0xff] %vm842_vm2, %v29531_v3  ;;  %875 = vst.msk [vmem:[#allocation4 + $0xf8] sm:$0xff] %vm842_vm2, %v29531_v3  ;;  %24868 = vmatmul.mubr.msk.f32.gmra.mrb[10].mxu0 %vm842_vm2, %v949_v35 }
  0x5f   : > { %877 = vst.msk [vmem:[#allocation4 + $0x108] sm:$0xff] %vm842_vm2, %v29531_v3  ;;  %878 = vst.msk [vmem:[#allocation4 + $0x110] sm:$0xff] %vm842_vm2, %v29531_v3  ;;  %24892 = vmatmul.mubr.msk.f32.gmra.mrb[10].mxu1 %vm842_vm2, %v965_v36  ;;  %24870 = vmatprep.mubr.msk.f32.mxu0 %vm842_vm2, %v950_v37 }
  0x60   : > { %880 = vst.msk [vmem:[#allocation4 + $0x120] sm:$0xff] %vm842_vm2, %v29531_v3  ;;  %881 = vst.msk [vmem:[#allocation4 + $0x128] sm:$0xff] %vm842_vm2, %v29531_v3  ;;  %24894 = vmatprep.mubr.msk.f32.mxu1 %vm842_vm2, %v966_v38 }
  0x61   : > { %883 = vst.msk [vmem:[#allocation4 + $0x138] sm:$0xff] %vm842_vm2, %v29531_v3  ;;  %884 = vst.msk [vmem:[#allocation4 + $0x140] sm:$0xff] %vm842_vm2, %v29531_v3 }
  0x62   : > { %886 = vst.msk [vmem:[#allocation4 + $0x150] sm:$0xff] %vm842_vm2, %v29531_v3  ;;  %887 = vst.msk [vmem:[#allocation4 + $0x158] sm:$0xff] %vm842_vm2, %v29531_v3  ;;  %24871 = vmatmul.mubr.msk.f32.gmra.mrb[12].mxu0 %vm842_vm2, %v951_v39 }
  0x63   : > { %889 = vst.msk [vmem:[#allocation4 + $0x168] sm:$0xff] %vm842_vm2, %v29531_v3  ;;  %890 = vst.msk [vmem:[#allocation4 + $0x170] sm:$0xff] %vm842_vm2, %v29531_v3  ;;  %24895 = vmatmul.mubr.msk.f32.gmra.mrb[12].mxu1 %vm842_vm2, %v967_v40  ;;  %24873 = vmatprep.mubr.msk.f32.mxu0 %vm842_vm2, %v952_v41 }
  0x64   : > { %892 = vst.msk [vmem:[#allocation4 + $0x180] sm:$0xff] %vm842_vm2, %v29531_v3  ;;  %893 = vst.msk [vmem:[#allocation4 + $0x188] sm:$0xff] %vm842_vm2, %v29531_v3  ;;  %24897 = vmatprep.mubr.msk.f32.mxu1 %vm842_vm2, %v968_v42 }
  0x65   : > { %895 = vst.msk [vmem:[#allocation4 + $0x198] sm:$0xff] %vm842_vm2, %v29531_v3  ;;  %896 = vst.msk [vmem:[#allocation4 + $0x1a0] sm:$0xff] %vm842_vm2, %v29531_v3 }
  0x66   : > { %918 = vst.msk [vmem:[#allocation6] sm:$0xff] %vm842_vm2, %v29531_v3  ;;  %920 = vst.msk [vmem:[#allocation6 + $0x10] sm:$0xff] %vm842_vm2, %v29531_v3  ;;  %24874 = vmatmul.mubr.msk.f32.gmra.mrb[14].mxu0 %vm842_vm2, %v953_v43 }
  0x67   : > { %922 = vst.msk [vmem:[#allocation6 + $0x20] sm:$0xff] %vm842_vm2, %v29531_v3  ;;  %924 = vst.msk [vmem:[#allocation6 + $0x30] sm:$0xff] %vm842_vm2, %v29531_v3  ;;  %24898 = vmatmul.mubr.msk.f32.gmra.mrb[14].mxu1 %vm842_vm2, %v969_v44 }
  0x68   : > { %926 = vst.msk [vmem:[#allocation6 + $0x40] sm:$0xff] %vm842_vm2, %v29531_v3  ;;  %928 = vst.msk [vmem:[#allocation6 + $0x50] sm:$0xff] %vm842_vm2, %v29531_v3 }
  0x69   : > { %930 = vst.msk [vmem:[#allocation6 + $0x60] sm:$0xff] %vm842_vm2, %v29531_v3  ;;  %932 = vst.msk [vmem:[#allocation6 + $0x70] sm:$0xff] %vm842_vm2, %v29531_v3 }
  0x6a   : > { %934 = vst.msk [vmem:[#allocation6 + $0x80] sm:$0xff] %vm842_vm2, %v29531_v3  ;;  %936 = vst.msk [vmem:[#allocation6 + $0x90] sm:$0xff] %vm842_vm2, %v29531_v3 }
  0x6b   : > { %787 = vst.msk [vmem:[#allocation3] sm:$0xff] %vm786_vm3, %v29531_v3  ;;  %788 = vst.msk [vmem:[#allocation3 + $0x8] sm:$0xff] %vm786_vm3, %v29531_v3 }
  0x6c   : > { %791 = vst.msk [vmem:[#allocation3 + $0x18] sm:$0xff] %vm786_vm3, %v29531_v3  ;;  %792 = vst.msk [vmem:[#allocation3 + $0x20] sm:$0xff] %vm786_vm3, %v29531_v3 }
  0x6d   : > { %794 = vst.msk [vmem:[#allocation3 + $0x30] sm:$0xff] %vm786_vm3, %v29531_v3  ;;  %795 = vst.msk [vmem:[#allocation3 + $0x38] sm:$0xff] %vm786_vm3, %v29531_v3 }
  0x6e   : > { %797 = vst.msk [vmem:[#allocation3 + $0x48] sm:$0xff] %vm786_vm3, %v29531_v3  ;;  %798 = vst.msk [vmem:[#allocation3 + $0x50] sm:$0xff] %vm786_vm3, %v29531_v3 }
  0x6f   : > { %800 = vst.msk [vmem:[#allocation3 + $0x60] sm:$0xff] %vm786_vm3, %v29531_v3  ;;  %801 = vst.msk [vmem:[#allocation3 + $0x68] sm:$0xff] %vm786_vm3, %v29531_v3 }
  0x70   : > { %803 = vst.msk [vmem:[#allocation3 + $0x78] sm:$0xff] %vm786_vm3, %v29531_v3  ;;  %804 = vst.msk [vmem:[#allocation3 + $0x80] sm:$0xff] %vm786_vm3, %v29531_v3 }
  0x71   : > { %806 = vst.msk [vmem:[#allocation3 + $0x90] sm:$0xff] %vm786_vm3, %v29531_v3  ;;  %807 = vst.msk [vmem:[#allocation3 + $0x98] sm:$0xff] %vm786_vm3, %v29531_v3 }
  0x72   : > { %809 = vst.msk [vmem:[#allocation3 + $0xa8] sm:$0xff] %vm786_vm3, %v29531_v3  ;;  %810 = vst.msk [vmem:[#allocation3 + $0xb0] sm:$0xff] %vm786_vm3, %v29531_v3 }
  0x73   : > { %812 = vst.msk [vmem:[#allocation3 + $0xc0] sm:$0xff] %vm786_vm3, %v29531_v3  ;;  %813 = vst.msk [vmem:[#allocation3 + $0xc8] sm:$0xff] %vm786_vm3, %v29531_v3 }
  0x74   : > { %815 = vst.msk [vmem:[#allocation3 + $0xd8] sm:$0xff] %vm786_vm3, %v29531_v3  ;;  %816 = vst.msk [vmem:[#allocation3 + $0xe0] sm:$0xff] %vm786_vm3, %v29531_v3 }
  0x75   : > { %818 = vst.msk [vmem:[#allocation3 + $0xf0] sm:$0xff] %vm786_vm3, %v29531_v3  ;;  %819 = vst.msk [vmem:[#allocation3 + $0xf8] sm:$0xff] %vm786_vm3, %v29531_v3 }
  0x76   : > { %821 = vst.msk [vmem:[#allocation3 + $0x108] sm:$0xff] %vm786_vm3, %v29531_v3  ;;  %822 = vst.msk [vmem:[#allocation3 + $0x110] sm:$0xff] %vm786_vm3, %v29531_v3 }
  0x77   : > { %824 = vst.msk [vmem:[#allocation3 + $0x120] sm:$0xff] %vm786_vm3, %v29531_v3  ;;  %825 = vst.msk [vmem:[#allocation3 + $0x128] sm:$0xff] %vm786_vm3, %v29531_v3 }
  0x78   : > { %827 = vst.msk [vmem:[#allocation3 + $0x138] sm:$0xff] %vm786_vm3, %v29531_v3  ;;  %828 = vst.msk [vmem:[#allocation3 + $0x140] sm:$0xff] %vm786_vm3, %v29531_v3 }
  0x79   : > { %830 = vst.msk [vmem:[#allocation3 + $0x150] sm:$0xff] %vm786_vm3, %v29531_v3  ;;  %831 = vst.msk [vmem:[#allocation3 + $0x158] sm:$0xff] %vm786_vm3, %v29531_v3 }
  0x7a   : > { %833 = vst.msk [vmem:[#allocation3 + $0x168] sm:$0xff] %vm786_vm3, %v29531_v3  ;;  %834 = vst.msk [vmem:[#allocation3 + $0x170] sm:$0xff] %vm786_vm3, %v29531_v3 }
  0x7b   : > { %836 = vst.msk [vmem:[#allocation3 + $0x180] sm:$0xff] %vm786_vm3, %v29531_v3  ;;  %837 = vst.msk [vmem:[#allocation3 + $0x188] sm:$0xff] %vm786_vm3, %v29531_v3 }
  0x7c   : > { %839 = vst.msk [vmem:[#allocation3 + $0x198] sm:$0xff] %vm786_vm3, %v29531_v3  ;;  %840 = vst.msk [vmem:[#allocation3 + $0x1a0] sm:$0xff] %vm786_vm3, %v29531_v3 }
  0x7d   : > { %898 = vst.msk [vmem:[#allocation5] sm:$0xff] %vm786_vm3, %v29531_v3  ;;  %900 = vst.msk [vmem:[#allocation5 + $0x10] sm:$0xff] %vm786_vm3, %v29531_v3 }
  0x7e   : > { %902 = vst.msk [vmem:[#allocation5 + $0x20] sm:$0xff] %vm786_vm3, %v29531_v3  ;;  %904 = vst.msk [vmem:[#allocation5 + $0x30] sm:$0xff] %vm786_vm3, %v29531_v3 }
  0x7f   : > { %906 = vst.msk [vmem:[#allocation5 + $0x40] sm:$0xff] %vm786_vm3, %v29531_v3  ;;  %908 = vst.msk [vmem:[#allocation5 + $0x50] sm:$0xff] %vm786_vm3, %v29531_v3 }
  0x80   : > { %910 = vst.msk [vmem:[#allocation5 + $0x60] sm:$0xff] %vm786_vm3, %v29531_v3  ;;  %912 = vst.msk [vmem:[#allocation5 + $0x70] sm:$0xff] %vm786_vm3, %v29531_v3 }
  0x81   : > { %914 = vst.msk [vmem:[#allocation5 + $0x80] sm:$0xff] %vm786_vm3, %v29531_v3  ;;  %916 = vst.msk [vmem:[#allocation5 + $0x90] sm:$0xff] %vm786_vm3, %v29531_v3 }
 0x11d   : > { %v24854_v45 = vpop.f32.mrb[0].mxu0 }
 0x11e   : > { %v24878_v46 = vpop.f32.mrb[0].mxu1  ;;  %1300 = vst.msk [vmem:[#allocation2 + $0x8] sm:$0xff] %vm786_vm3, %v24854_v45  ;;  %v1140_v47 = vpop.f32.mrb[1].mxu0 }
 0x11f   : > { %1316 = vst.msk [vmem:[#allocation2 + $0x88] sm:$0xff] %vm786_vm3, %v24878_v46  ;;  %v1220_v48 = vpop.f32.mrb[1].mxu1  ;;  %1299 = vst.msk [vmem:[#allocation2] sm:$0xff] %vm786_vm3, %v1140_v47 }
 0x120   : > { %1315 = vst.msk [vmem:[#allocation2 + $0x80] sm:$0xff] %vm786_vm3, %v1220_v48 }
 0x121   : > { %v24857_v49 = vpop.f32.mrb[2].mxu0 }
 0x122   : > { %v24881_v50 = vpop.f32.mrb[2].mxu1  ;;  %1302 = vst.msk [vmem:[#allocation2 + $0x18] sm:$0xff] %vm786_vm3, %v24857_v49  ;;  %v1150_v51 = vpop.f32.mrb[3].mxu0 }
 0x123   : > { %1318 = vst.msk [vmem:[#allocation2 + $0x98] sm:$0xff] %vm786_vm3, %v24881_v50  ;;  %v1230_v52 = vpop.f32.mrb[3].mxu1  ;;  %1301 = vst.msk [vmem:[#allocation2 + $0x10] sm:$0xff] %vm786_vm3, %v1150_v51 }
 0x124   : > { %1317 = vst.msk [vmem:[#allocation2 + $0x90] sm:$0xff] %vm786_vm3, %v1230_v52 }
 0x125   : > { %v24860_v53 = vpop.f32.mrb[4].mxu0 }
 0x126   : > { %v24884_v54 = vpop.f32.mrb[4].mxu1  ;;  %1304 = vst.msk [vmem:[#allocation2 + $0x28] sm:$0xff] %vm786_vm3, %v24860_v53  ;;  %v1160_v55 = vpop.f32.mrb[5].mxu0 }
 0x127   : > { %1320 = vst.msk [vmem:[#allocation2 + $0xa8] sm:$0xff] %vm786_vm3, %v24884_v54  ;;  %v1240_v56 = vpop.f32.mrb[5].mxu1  ;;  %1303 = vst.msk [vmem:[#allocation2 + $0x20] sm:$0xff] %vm786_vm3, %v1160_v55 }
 0x128   : > { %1319 = vst.msk [vmem:[#allocation2 + $0xa0] sm:$0xff] %vm786_vm3, %v1240_v56 }
 0x129   : > { %v24863_v57 = vpop.f32.mrb[6].mxu0 }
 0x12a   : > { %v24887_v58 = vpop.f32.mrb[6].mxu1  ;;  %1306 = vst.msk [vmem:[#allocation2 + $0x38] sm:$0xff] %vm786_vm3, %v24863_v57  ;;  %v1170_v59 = vpop.f32.mrb[7].mxu0 }
 0x12b   : > { %1322 = vst.msk [vmem:[#allocation2 + $0xb8] sm:$0xff] %vm786_vm3, %v24887_v58  ;;  %v1250_v60 = vpop.f32.mrb[7].mxu1  ;;  %1305 = vst.msk [vmem:[#allocation2 + $0x30] sm:$0xff] %vm786_vm3, %v1170_v59 }
 0x12c   : > { %1321 = vst.msk [vmem:[#allocation2 + $0xb0] sm:$0xff] %vm786_vm3, %v1250_v60 }
 0x12d   : > { %v24866_v61 = vpop.f32.mrb[8].mxu0 }
 0x12e   : > { %v24890_v62 = vpop.f32.mrb[8].mxu1  ;;  %1308 = vst.msk [vmem:[#allocation2 + $0x48] sm:$0xff] %vm786_vm3, %v24866_v61  ;;  %v1180_v63 = vpop.f32.mrb[9].mxu0 }
 0x12f   : > { %1324 = vst.msk [vmem:[#allocation2 + $0xc8] sm:$0xff] %vm786_vm3, %v24890_v62  ;;  %v1260_v0 = vpop.f32.mrb[9].mxu1  ;;  %1307 = vst.msk [vmem:[#allocation2 + $0x40] sm:$0xff] %vm786_vm3, %v1180_v63 }
 0x130   : > { %1323 = vst.msk [vmem:[#allocation2 + $0xc0] sm:$0xff] %vm786_vm3, %v1260_v0 }
 0x131   : > { %v24869_v1 = vpop.f32.mrb[10].mxu0 }
 0x132   : > { %v24893_v2 = vpop.f32.mrb[10].mxu1  ;;  %1310 = vst.msk [vmem:[#allocation2 + $0x58] sm:$0xff] %vm786_vm3, %v24869_v1  ;;  %v1190_v3 = vpop.f32.mrb[11].mxu0 }
 0x133   : > { %1326 = vst.msk [vmem:[#allocation2 + $0xd8] sm:$0xff] %vm786_vm3, %v24893_v2  ;;  %v1270_v4 = vpop.f32.mrb[11].mxu1  ;;  %1309 = vst.msk [vmem:[#allocation2 + $0x50] sm:$0xff] %vm786_vm3, %v1190_v3 }
 0x134   : > { %1325 = vst.msk [vmem:[#allocation2 + $0xd0] sm:$0xff] %vm786_vm3, %v1270_v4 }
 0x135   : > { %v24872_v5 = vpop.f32.mrb[12].mxu0 }
 0x136   : > { %v24896_v6 = vpop.f32.mrb[12].mxu1  ;;  %1312 = vst.msk [vmem:[#allocation2 + $0x68] sm:$0xff] %vm786_vm3, %v24872_v5  ;;  %v1200_v7 = vpop.f32.mrb[13].mxu0 }
 0x137   : > { %1328 = vst.msk [vmem:[#allocation2 + $0xe8] sm:$0xff] %vm786_vm3, %v24896_v6  ;;  %v1280_v8 = vpop.f32.mrb[13].mxu1  ;;  %1311 = vst.msk [vmem:[#allocation2 + $0x60] sm:$0xff] %vm786_vm3, %v1200_v7 }
 0x138   : > { %1327 = vst.msk [vmem:[#allocation2 + $0xe0] sm:$0xff] %vm786_vm3, %v1280_v8 }
 0x139   : > { %v24875_v9 = vpop.f32.mrb[14].mxu0 }
 0x13a   : > { %v24899_v10 = vpop.f32.mrb[14].mxu1  ;;  %1314 = vst.msk [vmem:[#allocation2 + $0x78] sm:$0xff] %vm786_vm3, %v24875_v9  ;;  %v1210_v11 = vpop.f32.mrb[15].mxu0 }
 0x13b   : > { %1330 = vst.msk [vmem:[#allocation2 + $0xf8] sm:$0xff] %vm786_vm3, %v24899_v10  ;;  %v1290_v12 = vpop.f32.mrb[15].mxu1  ;;  %1313 = vst.msk [vmem:[#allocation2 + $0x70] sm:$0xff] %vm786_vm3, %v1210_v11 }
 0x13c   : > { %1329 = vst.msk [vmem:[#allocation2 + $0xf0] sm:$0xff] %vm786_vm3, %v1290_v12 }
 0x13d PF: > { %v21167_v13 = vld [vmem:[%s29674_s15 + $0x4] sm:$0xf]  ;;  %vm1560_vm4 = vcmask 1043456   ;;  %vm1364_vm5 = vcmask 31744   ;;  %v1431_v15 = vld [vmem:[#allocation3 + $0x9] sm:$0xff]  ;;  %v30230_v19 = vld [vmem:[#allocation2 + $0x18] sm:$0xff]  ;;  %s35542_s22 = scalar_lea.vmem %s34838_s12, %s29651_s28 }
 0x13e   : > { %v1430_v14 = vld [vmem:[#allocation3 + $0x1] sm:$0xff]  ;;  %24900 = vmatprep.subr.msk.mxu0 %vm1560_vm4, %v21167_v13  ;;  %v30221_v18 = vld [vmem:[#allocation2 + $0x10] sm:$0xff]  ;;  %35158 = vst [vmem:[#allocation18_spill] sm:$0xff] %v30230_v19  ;;  %1368 = vst.msk [vmem:[#allocation3 + $0x39] sm:$0xff] %vm1364_vm5, %v30230_v19  ;;  %vm4877_vm6 = vcmask 523264   ;;  %s35350_s9 = sld [smem:[#allocation86_spill]] }
 0x13f   : > { %24902 = vmatprep.mubr.msk.f32.mxu0 %vm1364_vm5, %v1430_v14  ;;  %v30217_v16 = vld [vmem:[#allocation2] sm:$0xff]  ;;  %v30219_v17 = vld [vmem:[#allocation2 + $0x8] sm:$0xff]  ;;  %35157 = vst [vmem:[#allocation17_spill] sm:$0xff] %v30221_v18  ;;  %24901 = vmatpush3.msk.msra.mxu0 %vm1560_vm4, %v21167_v13  ;;  %1367 = vst.msk [vmem:[#allocation3 + $0x31] sm:$0xff] %vm1364_vm5, %v30221_v18  ;;  %vm19522_vm7 = vcmask 1040384   ;;  %s35543_s28 = sld [smem:[#allocation13_spill]] }
 0x140   : > { %35155 = vst [vmem:[#allocation15_spill] sm:$0xff] %v30217_v16  ;;  %35156 = vst [vmem:[#allocation16_spill] sm:$0xff] %v30219_v17  ;;  %v30232_v20 = vld [vmem:[#allocation2 + $0x20] sm:$0xff]  ;;  %v30234_v21 = vld [vmem:[#allocation2 + $0x28] sm:$0xff]  ;;  %24903 = vmatmul.mubr.msk.f32.vlgmr.msra.gmra.mrb[0].mxu0 %vm1364_vm5, %v1431_v15  ;;  %vm19425_vm8 = vcmask 7168  }
 0x141   : > { %1365 = vst.msk [vmem:[#allocation3 + $0x19] sm:$0xff] %vm1364_vm5, %v30217_v16  ;;  %1366 = vst.msk [vmem:[#allocation3 + $0x21] sm:$0xff] %vm1364_vm5, %v30219_v17  ;;  %v30243_v22 = vld [vmem:[#allocation2 + $0x30] sm:$0xff]  ;;  %v30245_v23 = vld [vmem:[#allocation2 + $0x38] sm:$0xff] }
 0x142   : > { %35159 = vst [vmem:[#allocation19_spill] sm:$0xff] %v30232_v20  ;;  %35160 = vst [vmem:[#allocation20_spill] sm:$0xff] %v30234_v21  ;;  %v30247_v24 = vld [vmem:[#allocation2 + $0x40] sm:$0xff]  ;;  %v30255_v25 = vld [vmem:[#allocation2 + $0x48] sm:$0xff] }
 0x143   : > { %1369 = vst.msk [vmem:[#allocation3 + $0x49] sm:$0xff] %vm1364_vm5, %v30232_v20  ;;  %1370 = vst.msk [vmem:[#allocation3 + $0x51] sm:$0xff] %vm1364_vm5, %v30234_v21  ;;  %v30257_v26 = vld [vmem:[#allocation2 + $0x50] sm:$0xff]  ;;  %v30259_v27 = vld [vmem:[#allocation2 + $0x58] sm:$0xff] }
 0x144   : > { %35161 = vst [vmem:[#allocation21_spill] sm:$0xff] %v30243_v22  ;;  %35162 = vst [vmem:[#allocation22_spill] sm:$0xff] %v30245_v23  ;;  %v30267_v28 = vld [vmem:[#allocation2 + $0x60] sm:$0xff]  ;;  %v30269_v29 = vld [vmem:[#allocation2 + $0x68] sm:$0xff] }
 0x145   : > { %35163 = vst [vmem:[#allocation23_spill] sm:$0xff] %v30247_v24  ;;  %1371 = vst.msk [vmem:[#allocation3 + $0x61] sm:$0xff] %vm1364_vm5, %v30243_v22  ;;  %v30271_v30 = vld [vmem:[#allocation2 + $0x70] sm:$0xff]  ;;  %v30279_v31 = vld [vmem:[#allocation2 + $0x78] sm:$0xff] }
 0x146   : > { %1372 = vst.msk [vmem:[#allocation3 + $0x69] sm:$0xff] %vm1364_vm5, %v30245_v23  ;;  %1373 = vst.msk [vmem:[#allocation3 + $0x79] sm:$0xff] %vm1364_vm5, %v30247_v24  ;;  %v1429_v32 = vld [vmem:[%s29674_s15] sm:$0xf]  ;;  %v30289_v34 = vld [vmem:[#allocation2 + $0x88] sm:$0xff] }
 0x147   : > { %35164 = vst [vmem:[#allocation24_spill] sm:$0xff] %v30255_v25  ;;  %35165 = vst [vmem:[#allocation25_spill] sm:$0xff] %v30257_v26  ;;  %v30282_v33 = vld [vmem:[#allocation2 + $0x80] sm:$0xff]  ;;  %24950 = vmatprep.subr.msk.mxu0 %vm1560_vm4, %v1429_v32  ;;  %v30291_v35 = vld [vmem:[#allocation2 + $0x90] sm:$0xff] }
 0x148   : > { %35166 = vst [vmem:[#allocation26_spill] sm:$0xff] %v30259_v27  ;;  %1374 = vst.msk [vmem:[#allocation3 + $0x81] sm:$0xff] %vm1364_vm5, %v30255_v25  ;;  %v30293_v36 = vld [vmem:[#allocation2 + $0x98] sm:$0xff]  ;;  %24951 = vmatpush3.msk.msra.mxu0 %vm1560_vm4, %v1429_v32  ;;  %v30302_v37 = vld [vmem:[#allocation2 + $0xa0] sm:$0xff] }
 0x149   : > { %1375 = vst.msk [vmem:[#allocation3 + $0x91] sm:$0xff] %vm1364_vm5, %v30257_v26  ;;  %1376 = vst.msk [vmem:[#allocation3 + $0x99] sm:$0xff] %vm1364_vm5, %v30259_v27  ;;  %v30304_v38 = vld [vmem:[#allocation2 + $0xa8] sm:$0xff]  ;;  %v30306_v39 = vld [vmem:[#allocation2 + $0xb0] sm:$0xff] }
 0x14a   : > { %35167 = vst [vmem:[#allocation27_spill] sm:$0xff] %v30267_v28  ;;  %35168 = vst [vmem:[#allocation28_spill] sm:$0xff] %v30269_v29  ;;  %v30308_v40 = vld [vmem:[#allocation3 + $0x19] sm:$0xff]  ;;  %v30310_v41 = vld [vmem:[#allocation3 + $0x21] sm:$0xff] }
 0x14b   : > { %35169 = vst [vmem:[#allocation29_spill] sm:$0xff] %v30271_v30  ;;  %1377 = vst.msk [vmem:[#allocation3 + $0xa9] sm:$0xff] %vm1364_vm5, %v30267_v28  ;;  %v30312_v42 = vld [vmem:[#allocation3 + $0x31] sm:$0xff]  ;;  %24905 = vmatprep.mubr.msk.f32.mxu0 %vm1364_vm5, %v30308_v40  ;;  %v30326_v43 = vld [vmem:[#allocation3 + $0x39] sm:$0xff] }
 0x14c   : > { %1378 = vst.msk [vmem:[#allocation3 + $0xb1] sm:$0xff] %vm1364_vm5, %v30269_v29  ;;  %1379 = vst.msk [vmem:[#allocation3 + $0xc1] sm:$0xff] %vm1364_vm5, %v30271_v30  ;;  %24906 = vmatmul.mubr.msk.f32.gmra.mrb[2].mxu0 %vm1364_vm5, %v30310_v41  ;;  %v30328_v44 = vld [vmem:[#allocation3 + $0x49] sm:$0xff]  ;;  %v30330_v45 = vld [vmem:[#allocation2 + $0xb8] sm:$0xff] }
 0x14d   : > { %35170 = vst [vmem:[#allocation30_spill] sm:$0xff] %v30279_v31  ;;  %35171 = vst [vmem:[#allocation31_spill] sm:$0xff] %v30282_v33  ;;  %24908 = vmatprep.mubr.msk.f32.mxu0 %vm1364_vm5, %v30312_v42  ;;  %v30338_v46 = vld [vmem:[#allocation3 + $0x51] sm:$0xff]  ;;  %v30340_v47 = vld [vmem:[#allocation3 + $0x61] sm:$0xff] }
 0x14e   : > { %1380 = vst.msk [vmem:[#allocation3 + $0xc9] sm:$0xff] %vm1364_vm5, %v30279_v31  ;;  %1381 = vst.msk [vmem:[#allocation3 + $0xd9] sm:$0xff] %vm1364_vm5, %v30282_v33  ;;  %v30342_v48 = vld [vmem:[#allocation2 + $0xc0] sm:$0xff]  ;;  %v30344_v49 = vld [vmem:[#allocation2 + $0xc8] sm:$0xff] }
 0x14f   : > { %35172 = vst [vmem:[#allocation32_spill] sm:$0xff] %v30289_v34  ;;  %35173 = vst [vmem:[#allocation33_spill] sm:$0xff] %v30291_v35  ;;  %v30346_v50 = vld [vmem:[#allocation2 + $0xd0] sm:$0xff]  ;;  %v30354_v51 = vld [vmem:[#allocation2 + $0xd8] sm:$0xff] }
 0x150   : > { %35174 = vst [vmem:[#allocation34_spill] sm:$0xff] %v30293_v36  ;;  %1382 = vst.msk [vmem:[#allocation3 + $0xe1] sm:$0xff] %vm1364_vm5, %v30289_v34  ;;  %24909 = vmatmul.mubr.msk.f32.gmra.mrb[4].mxu0 %vm1364_vm5, %v30326_v43  ;;  %v30356_v52 = vld [vmem:[#allocation2 + $0xe0] sm:$0xff]  ;;  %v30358_v53 = vld [vmem:[#allocation2 + $0xe8] sm:$0xff] }
 0x151   : > { %1383 = vst.msk [vmem:[#allocation3 + $0xf1] sm:$0xff] %vm1364_vm5, %v30291_v35  ;;  %1384 = vst.msk [vmem:[#allocation3 + $0xf9] sm:$0xff] %vm1364_vm5, %v30293_v36  ;;  %24911 = vmatprep.mubr.msk.f32.mxu0 %vm1364_vm5, %v30328_v44  ;;  %v30370_v54 = vld [vmem:[#allocation3 + $0x69] sm:$0xff]  ;;  %v30372_v55 = vld [vmem:[#allocation3 + $0x79] sm:$0xff] }
 0x152   : > { %35175 = vst [vmem:[#allocation35_spill] sm:$0xff] %v30302_v37  ;;  %35176 = vst [vmem:[#allocation36_spill] sm:$0xff] %v30304_v38  ;;  %v30378_v56 = vld [vmem:[#allocation3 + $0x81] sm:$0xff]  ;;  %v30380_v57 = vld [vmem:[#allocation3 + $0x91] sm:$0xff] }
 0x153   : > { %35177 = vst [vmem:[#allocation37_spill] sm:$0xff] %v30306_v39  ;;  %1385 = vst.msk [vmem:[#allocation3 + $0x109] sm:$0xff] %vm1364_vm5, %v30302_v37  ;;  %v21234_v58 = vld [vmem:[%s29674_s15 + $0x8] sm:$0xf]  ;;  %v30387_v59 = vld [vmem:[#allocation3 + $0x99] sm:$0xff] }
 0x154   : > { %1386 = vst.msk [vmem:[#allocation3 + $0x111] sm:$0xff] %vm1364_vm5, %v30304_v38  ;;  %1387 = vst.msk [vmem:[#allocation3 + $0x121] sm:$0xff] %vm1364_vm5, %v30306_v39  ;;  %24912 = vmatmul.mubr.msk.f32.gmra.mrb[6].mxu0 %vm1364_vm5, %v30338_v46  ;;  %25000 = vmatprep.subr.msk.mxu0 %vm1560_vm4, %v21234_v58  ;;  %v30390_v60 = vld [vmem:[#allocation3 + $0xa9] sm:$0xff]  ;;  %v30396_v61 = vld [vmem:[#allocation3 + $0xb1] sm:$0xff] }
 0x155   : > { %35178 = vst [vmem:[#allocation38_spill] sm:$0xff] %v30330_v45  ;;  %1388 = vst.msk [vmem:[#allocation3 + $0x129] sm:$0xff] %vm1364_vm5, %v30330_v45  ;;  %24914 = vmatprep.mubr.msk.f32.mxu0 %vm1364_vm5, %v30340_v47  ;;  %v30398_v62 = vld [vmem:[#allocation3 + $0xc1] sm:$0xff]  ;;  %v30404_v63 = vld [vmem:[#allocation3 + $0xc9] sm:$0xff] }
 0x156   : > { %35179 = vst [vmem:[#allocation39_spill] sm:$0xff] %v30342_v48  ;;  %35180 = vst [vmem:[#allocation40_spill] sm:$0xff] %v30344_v49  ;;  %v30406_v0 = vld [vmem:[#allocation3 + $0xd9] sm:$0xff]  ;;  %v1398_v15 = vld [vmem:[#allocation3 + $0x8] sm:$0xff] }
 0x157   : > { %35181 = vst [vmem:[#allocation41_spill] sm:$0xff] %v30346_v50  ;;  %1389 = vst.msk [vmem:[#allocation3 + $0x139] sm:$0xff] %vm1364_vm5, %v30342_v48  ;;  %v30412_v1 = vld [vmem:[#allocation3 + $0xe1] sm:$0xff]  ;;  %v30465_v32 = vld [vmem:[#allocation3 + $0x18] sm:$0xff] }
 0x158   : > { %1390 = vst.msk [vmem:[#allocation3 + $0x141] sm:$0xff] %vm1364_vm5, %v30344_v49  ;;  %1391 = vst.msk [vmem:[#allocation3 + $0x151] sm:$0xff] %vm1364_vm5, %v30346_v50  ;;  %24915 = vmatmul.mubr.msk.f32.gmra.mrb[8].mxu0 %vm1364_vm5, %v30370_v54  ;;  %v30414_v2 = vld [vmem:[#allocation3 + $0xf1] sm:$0xff]  ;;  %v30420_v3 = vld [vmem:[#allocation3 + $0xf9] sm:$0xff] }
 0x159   : > { %35182 = vst [vmem:[#allocation42_spill] sm:$0xff] %v30354_v51  ;;  %35183 = vst [vmem:[#allocation43_spill] sm:$0xff] %v30356_v52  ;;  %24917 = vmatprep.mubr.msk.f32.mxu0 %vm1364_vm5, %v30372_v55  ;;  %v1397_v14 = vld [vmem:[#allocation3] sm:$0xff]  ;;  %v30476_v50 = vld [vmem:[#allocation3 + $0x30] sm:$0xff] }
 0x15a   : > { %35184 = vst [vmem:[#allocation44_spill] sm:$0xff] %v30358_v53  ;;  %1392 = vst.msk [vmem:[#allocation3 + $0x159] sm:$0xff] %vm1364_vm5, %v30354_v51  ;;  %v30422_v4 = vld [vmem:[#allocation3 + $0x109] sm:$0xff]  ;;  %v30494_v51 = vld [vmem:[#allocation3 + $0x60] sm:$0xff] }
 0x15b   : > { %1393 = vst.msk [vmem:[#allocation3 + $0x169] sm:$0xff] %vm1364_vm5, %v30356_v52  ;;  %1394 = vst.msk [vmem:[#allocation3 + $0x171] sm:$0xff] %vm1364_vm5, %v30358_v53  ;;  %v30428_v5 = vld [vmem:[#allocation3 + $0x111] sm:$0xff]  ;;  %v30430_v6 = vld [vmem:[#allocation3 + $0x121] sm:$0xff] }
 0x15c   : > { %24918 = vmatmul.mubr.msk.f32.gmra.mrb[10].mxu0 %vm1364_vm5, %v30378_v56  ;;  %v30436_v7 = vld [vmem:[#allocation3 + $0x129] sm:$0xff]  ;;  %v30473_v53 = vld [vmem:[#allocation3 + $0x20] sm:$0xff]  ;;  %v30502_v49 = vld [vmem:[#allocation3 + $0x78] sm:$0xff] }
 0x15d   : > { %24920 = vmatprep.mubr.msk.f32.mxu0 %vm1364_vm5, %v30380_v57  ;;  %v30468_v52 = vld [vmem:[%s29674_s15 + $0xc] sm:$0xf]  ;;  %v30508_v39 = vld [vmem:[#allocation3 + $0x80] sm:$0xff]  ;;  %v30510_v45 = vld [vmem:[#allocation3 + $0x90] sm:$0xff] }
 0x15e   : > { %v30438_v8 = vld [vmem:[#allocation3 + $0x139] sm:$0xff]  ;;  %v30500_v48 = vld [vmem:[#allocation3 + $0x68] sm:$0xff]  ;;  %v30524_v35 = vld [vmem:[#allocation3 + $0xb0] sm:$0xff] }
 0x15f   : > { %v30444_v9 = vld [vmem:[#allocation3 + $0x141] sm:$0xff]  ;;  %v30446_v10 = vld [vmem:[#allocation3 + $0x151] sm:$0xff] }
 0x160   : > { %24921 = vmatmul.mubr.msk.f32.gmra.mrb[12].mxu0 %vm1364_vm5, %v30387_v59  ;;  %35185 = vst [vmem:[#allocation45_spill] sm:$0xff] %v30446_v10  ;;  %v30516_v37 = vld [vmem:[#allocation3 + $0x98] sm:$0xff]  ;;  %v30518_v38 = vld [vmem:[#allocation3 + $0xa8] sm:$0xff]  ;;  %v30526_v24 = vld [vmem:[#allocation3 + $0xc0] sm:$0xff] }
 0x161   : > { %24923 = vmatprep.mubr.msk.f32.mxu0 %vm1364_vm5, %v30390_v60  ;;  %v30452_v11 = vld [vmem:[#allocation3 + $0x159] sm:$0xff]  ;;  %v30532_v36 = vld [vmem:[#allocation3 + $0xc8] sm:$0xff]  ;;  %v30542_v22 = vld [vmem:[#allocation3 + $0xf0] sm:$0xff] }
 0x162   : > { %35186 = vst [vmem:[#allocation46_spill] sm:$0xff] %v30452_v11  ;;  %v30454_v12 = vld [vmem:[#allocation3 + $0x169] sm:$0xff]  ;;  %v30460_v13 = vld [vmem:[#allocation3 + $0x171] sm:$0xff]  ;;  %v30540_v33 = vld [vmem:[#allocation3 + $0xe0] sm:$0xff] }
 0x163   : > { %35187 = vst [vmem:[#allocation47_spill] sm:$0xff] %v30454_v12  ;;  %35188 = vst [vmem:[#allocation48_spill] sm:$0xff] %v30460_v13  ;;  %v30534_v25 = vld [vmem:[#allocation3 + $0xd8] sm:$0xff]  ;;  %v30550_v23 = vld [vmem:[#allocation3 + $0x108] sm:$0xff] }
 0x164   : > { %24924 = vmatmul.mubr.msk.f32.gmra.mrb[14].mxu0 %vm1364_vm5, %v30396_v61  ;;  %v30548_v34 = vld [vmem:[#allocation3 + $0xf8] sm:$0xff]  ;;  %v30556_v30 = vld [vmem:[#allocation3 + $0x110] sm:$0xff]  ;;  %v30558_v20 = vld [vmem:[#allocation3 + $0x120] sm:$0xff] }
 0x165   : > { %24926 = vmatprep.mubr.msk.f32.mxu0 %vm1364_vm5, %v30398_v62  ;;  %v30564_v31 = vld [vmem:[#allocation3 + $0x128] sm:$0xff]  ;;  %v30566_v21 = vld [vmem:[#allocation3 + $0x138] sm:$0xff]  ;;  %v30572_v28 = vld [vmem:[#allocation3 + $0x140] sm:$0xff] }
 0x166   : > { %v30574_v18 = vld [vmem:[#allocation3 + $0x150] sm:$0xff]  ;;  %v30580_v19 = vld [vmem:[#allocation2 + $0xf8] sm:$0xff]  ;;  %v30590_v16 = vld [vmem:[#allocation3 + $0x168] sm:$0xff] }
 0x167   : > { %v30576_v29 = vld [vmem:[#allocation2 + $0xf0] sm:$0xff]  ;;  %35190 = vst [vmem:[#allocation50_spill] sm:$0xff] %v30580_v19  ;;  %1396 = vst.msk [vmem:[#allocation3 + $0x189] sm:$0xff] %vm1364_vm5, %v30580_v19  ;;  %v30588_v26 = vld [vmem:[#allocation3 + $0x158] sm:$0xff] }
 0x168   : > { %24927 = vmatmul.mubr.msk.f32.gmra.mrb[16].mxu0 %vm1364_vm5, %v30404_v63  ;;  %35189 = vst [vmem:[#allocation49_spill] sm:$0xff] %v30576_v29  ;;  %1395 = vst.msk [vmem:[#allocation3 + $0x181] sm:$0xff] %vm1364_vm5, %v30576_v29  ;;  %v30596_v29 = vld [vmem:[#allocation3 + $0x170] sm:$0xff]  ;;  %v2113_v27 = vld [vmem:[#allocation3 + $0x2] sm:$0xff] }
 0x169   : > { %24929 = vmatprep.mubr.msk.f32.mxu0 %vm1364_vm5, %v30406_v0  ;;  %v2114_v19 = vld [vmem:[#allocation3 + $0xa] sm:$0xff]  ;;  %v30601_v17 = vld [vmem:[#allocation3 + $0x1a] sm:$0xff] }
 0x16a   : > { %35191 = vst [vmem:[#allocation51_spill] sm:$0xff] %v30601_v17 }
 0x16c   : > { %24930 = vmatmul.mubr.msk.f32.gmra.mrb[18].mxu0 %vm1364_vm5, %v30412_v1 }
 0x16d   : > { %24932 = vmatprep.mubr.msk.f32.mxu0 %vm1364_vm5, %v30414_v2 }
 0x170   : > { %24933 = vmatmul.mubr.msk.f32.gmra.mrb[20].mxu0 %vm1364_vm5, %v30420_v3 }
 0x171   : > { %24935 = vmatprep.mubr.msk.f32.mxu0 %vm1364_vm5, %v30422_v4 }
 0x174   : > { %24936 = vmatmul.mubr.msk.f32.gmra.mrb[22].mxu0 %vm1364_vm5, %v30428_v5 }
 0x175   : > { %24938 = vmatprep.mubr.msk.f32.mxu0 %vm1364_vm5, %v30430_v6 }
 0x178   : > { %24939 = vmatmul.mubr.msk.f32.gmra.mrb[24].mxu0 %vm1364_vm5, %v30436_v7 }
 0x179   : > { %24941 = vmatprep.mubr.msk.f32.mxu0 %vm1364_vm5, %v30438_v8 }
 0x17c   : > { %24942 = vmatmul.mubr.msk.f32.gmra.mrb[26].mxu0 %vm1364_vm5, %v30444_v9 }
 0x17d   : > { %24944 = vmatprep.mubr.msk.f32.mxu0 %vm1364_vm5, %v30446_v10 }
 0x180   : > { %24945 = vmatmul.mubr.msk.f32.gmra.mrb[28].mxu0 %vm1364_vm5, %v30452_v11  ;;  %v30613_v11 = vld [vmem:[#allocation3 + $0x32] sm:$0xff] }
 0x181   : > { %24947 = vmatprep.mubr.msk.f32.mxu0 %vm1364_vm5, %v30454_v12  ;;  %v30609_v12 = vld [vmem:[#allocation3 + $0x22] sm:$0xff]  ;;  %35193 = vst [vmem:[#allocation53_spill] sm:$0xff] %v30613_v11 }
 0x182   : > { %35192 = vst [vmem:[#allocation52_spill] sm:$0xff] %v30609_v12 }
 0x184   : > { %24948 = vmatmul.mubr.msk.f32.gmra.mrb[30].mxu0 %vm1364_vm5, %v30460_v13  ;;  %v30604_v13 = vld [vmem:[%s29674_s15 + $0x10] sm:$0xf] }
 0x185   : > { %24952 = vmatprep.mubr.msk.f32.mxu0 %vm1364_vm5, %v1397_v14  ;;  %v30484_v14 = vld [vmem:[#allocation3 + $0x38] sm:$0xff] }
 0x188   : > { %24953 = vmatmul.mubr.msk.f32.vlgmr.msra.gmra.mrb[0].mxu0 %vm1364_vm5, %v1398_v15  ;;  %v30486_v15 = vld [vmem:[#allocation3 + $0x48] sm:$0xff] }
 0x189   : > { %24955 = vmatprep.mubr.msk.f32.mxu0 %vm1364_vm5, %v30465_v32  ;;  %25001 = vmatpush3.msk.msra.mxu0 %vm1560_vm4, %v21234_v58  ;;  %v30492_v58 = vld [vmem:[#allocation3 + $0x50] sm:$0xff] }
 0x18a   : > { %25050 = vmatprep.subr.msk.mxu0 %vm1560_vm4, %v30468_v52 }
 0x18c   : > { %24956 = vmatmul.mubr.msk.f32.gmra.mrb[2].mxu0 %vm1364_vm5, %v30473_v53 }
 0x18d   : > { %24958 = vmatprep.mubr.msk.f32.mxu0 %vm1364_vm5, %v30476_v50 }
 0x190   : > { %24959 = vmatmul.mubr.msk.f32.gmra.mrb[4].mxu0 %vm1364_vm5, %v30484_v14 }
 0x191   : > { %24961 = vmatprep.mubr.msk.f32.mxu0 %vm1364_vm5, %v30486_v15 }
 0x194   : > { %24962 = vmatmul.mubr.msk.f32.gmra.mrb[6].mxu0 %vm1364_vm5, %v30492_v58 }
 0x195   : > { %24964 = vmatprep.mubr.msk.f32.mxu0 %vm1364_vm5, %v30494_v51 }
 0x198   : > { %24965 = vmatmul.mubr.msk.f32.gmra.mrb[8].mxu0 %vm1364_vm5, %v30500_v48 }
 0x199   : > { %24967 = vmatprep.mubr.msk.f32.mxu0 %vm1364_vm5, %v30502_v49 }
 0x19c   : > { %24968 = vmatmul.mubr.msk.f32.gmra.mrb[10].mxu0 %vm1364_vm5, %v30508_v39 }
 0x19d   : > { %24970 = vmatprep.mubr.msk.f32.mxu0 %vm1364_vm5, %v30510_v45 }
 0x1a0   : > { %24971 = vmatmul.mubr.msk.f32.gmra.mrb[12].mxu0 %vm1364_vm5, %v30516_v37 }
 0x1a1   : > { %24973 = vmatprep.mubr.msk.f32.mxu0 %vm1364_vm5, %v30518_v38 }
 0x1a4   : > { %24974 = vmatmul.mubr.msk.f32.gmra.mrb[14].mxu0 %vm1364_vm5, %v30524_v35 }
 0x1a5   : > { %24976 = vmatprep.mubr.msk.f32.mxu0 %vm1364_vm5, %v30526_v24 }
 0x1a8   : > { %24977 = vmatmul.mubr.msk.f32.gmra.mrb[16].mxu0 %vm1364_vm5, %v30532_v36 }
 0x1a9   : > { %24979 = vmatprep.mubr.msk.f32.mxu0 %vm1364_vm5, %v30534_v25 }
 0x1ac   : > { %24980 = vmatmul.mubr.msk.f32.gmra.mrb[18].mxu0 %vm1364_vm5, %v30540_v33 }
 0x1ad   : > { %24982 = vmatprep.mubr.msk.f32.mxu0 %vm1364_vm5, %v30542_v22 }
 0x1b0   : > { %24983 = vmatmul.mubr.msk.f32.gmra.mrb[20].mxu0 %vm1364_vm5, %v30548_v34 }
 0x1b1   : > { %24985 = vmatprep.mubr.msk.f32.mxu0 %vm1364_vm5, %v30550_v23 }
 0x1b4   : > { %24986 = vmatmul.mubr.msk.f32.gmra.mrb[22].mxu0 %vm1364_vm5, %v30556_v30 }
 0x1b5   : > { %24988 = vmatprep.mubr.msk.f32.mxu0 %vm1364_vm5, %v30558_v20 }
 0x1b8   : > { %24989 = vmatmul.mubr.msk.f32.gmra.mrb[24].mxu0 %vm1364_vm5, %v30564_v31 }
 0x1b9   : > { %24991 = vmatprep.mubr.msk.f32.mxu0 %vm1364_vm5, %v30566_v21 }
 0x1bc   : > { %24992 = vmatmul.mubr.msk.f32.gmra.mrb[26].mxu0 %vm1364_vm5, %v30572_v28 }
 0x1bd   : > { %24994 = vmatprep.mubr.msk.f32.mxu0 %vm1364_vm5, %v30574_v18 }
 0x1c0   : > { %24995 = vmatmul.mubr.msk.f32.gmra.mrb[28].mxu0 %vm1364_vm5, %v30588_v26 }
 0x1c1   : > { %24997 = vmatprep.mubr.msk.f32.mxu0 %vm1364_vm5, %v30590_v16 }
 0x1c4   : > { %24998 = vmatmul.mubr.msk.f32.gmra.mrb[30].mxu0 %vm1364_vm5, %v30596_v29 }
 0x1c5   : > { %25002 = vmatprep.mubr.msk.f32.mxu0 %vm1364_vm5, %v2113_v27  ;;  %v30623_v27 = vld [vmem:[#allocation3 + $0x4a] sm:$0xff] }
 0x1c6   : > { %35195 = vst [vmem:[#allocation55_spill] sm:$0xff] %v30623_v27 }
 0x1c8   : > { %25003 = vmatmul.mubr.msk.f32.vlgmr.msra.gmra.mrb[0].mxu0 %vm1364_vm5, %v2114_v19  ;;  %v30621_v19 = vld [vmem:[#allocation3 + $0x3a] sm:$0xff] }
 0x1c9   : > { %25005 = vmatprep.mubr.msk.f32.mxu0 %vm1364_vm5, %v30601_v17  ;;  %25051 = vmatpush3.msk.msra.mxu0 %vm1560_vm4, %v30468_v52  ;;  %35194 = vst [vmem:[#allocation54_spill] sm:$0xff] %v30621_v19  ;;  %v30629_v52 = vld [vmem:[#allocation3 + $0x52] sm:$0xff]  ;;  %v30631_v17 = vld [vmem:[#allocation3 + $0x62] sm:$0xff] }
 0x1ca   : > { %25100 = vmatprep.subr.msk.mxu0 %vm1560_vm4, %v30604_v13  ;;  %35196 = vst [vmem:[#allocation56_spill] sm:$0xff] %v30629_v52  ;;  %35197 = vst [vmem:[#allocation57_spill] sm:$0xff] %v30631_v17 }
 0x1cc   : > { %25006 = vmatmul.mubr.msk.f32.gmra.mrb[2].mxu0 %vm1364_vm5, %v30609_v12  ;;  %v30639_v12 = vld [vmem:[#allocation3 + $0x7a] sm:$0xff] }
 0x1cd   : > { %25008 = vmatprep.mubr.msk.f32.mxu0 %vm1364_vm5, %v30613_v11  ;;  %v30637_v11 = vld [vmem:[#allocation3 + $0x6a] sm:$0xff]  ;;  %35199 = vst [vmem:[#allocation59_spill] sm:$0xff] %v30639_v12 }
 0x1ce   : > { %35198 = vst [vmem:[#allocation58_spill] sm:$0xff] %v30637_v11 }
 0x1d0   : > { %25009 = vmatmul.mubr.msk.f32.gmra.mrb[4].mxu0 %vm1364_vm5, %v30621_v19  ;;  %v30647_v19 = vld [vmem:[#allocation3 + $0x92] sm:$0xff] }
 0x1d1   : > { %25011 = vmatprep.mubr.msk.f32.mxu0 %vm1364_vm5, %v30623_v27  ;;  %v30645_v27 = vld [vmem:[#allocation3 + $0x82] sm:$0xff]  ;;  %35201 = vst [vmem:[#allocation61_spill] sm:$0xff] %v30647_v19 }
 0x1d2   : > { %35200 = vst [vmem:[#allocation60_spill] sm:$0xff] %v30645_v27 }
 0x1d4   : > { %25012 = vmatmul.mubr.msk.f32.gmra.mrb[6].mxu0 %vm1364_vm5, %v30629_v52  ;;  %v30655_v52 = vld [vmem:[#allocation3 + $0xaa] sm:$0xff] }
 0x1d5   : > { %25014 = vmatprep.mubr.msk.f32.mxu0 %vm1364_vm5, %v30631_v17  ;;  %v30653_v17 = vld [vmem:[#allocation3 + $0x9a] sm:$0xff]  ;;  %35203 = vst [vmem:[#allocation63_spill] sm:$0xff] %v30655_v52 }
 0x1d6   : > { %35202 = vst [vmem:[#allocation62_spill] sm:$0xff] %v30653_v17 }
 0x1d8   : > { %25015 = vmatmul.mubr.msk.f32.gmra.mrb[8].mxu0 %vm1364_vm5, %v30637_v11  ;;  %v30663_v11 = vld [vmem:[#allocation3 + $0xc2] sm:$0xff] }
 0x1d9   : > { %25017 = vmatprep.mubr.msk.f32.mxu0 %vm1364_vm5, %v30639_v12  ;;  %v30661_v12 = vld [vmem:[#allocation3 + $0xb2] sm:$0xff]  ;;  %35205 = vst [vmem:[#allocation65_spill] sm:$0xff] %v30663_v11 }
 0x1da   : > { %35204 = vst [vmem:[#allocation64_spill] sm:$0xff] %v30661_v12 }
 0x1dc   : > { %25018 = vmatmul.mubr.msk.f32.gmra.mrb[10].mxu0 %vm1364_vm5, %v30645_v27  ;;  %v30671_v27 = vld [vmem:[#allocation3 + $0xda] sm:$0xff] }
 0x1dd   : > { %25020 = vmatprep.mubr.msk.f32.mxu0 %vm1364_vm5, %v30647_v19  ;;  %v30669_v19 = vld [vmem:[#allocation3 + $0xca] sm:$0xff]  ;;  %35207 = vst [vmem:[#allocation67_spill] sm:$0xff] %v30671_v27 }
 0x1de   : > { %35206 = vst [vmem:[#allocation66_spill] sm:$0xff] %v30669_v19 }
 0x1e0   : > { %25021 = vmatmul.mubr.msk.f32.gmra.mrb[12].mxu0 %vm1364_vm5, %v30653_v17  ;;  %v30679_v17 = vld [vmem:[#allocation3 + $0xf2] sm:$0xff] }
 0x1e1   : > { %25023 = vmatprep.mubr.msk.f32.mxu0 %vm1364_vm5, %v30655_v52  ;;  %v30677_v52 = vld [vmem:[#allocation3 + $0xe2] sm:$0xff]  ;;  %35209 = vst [vmem:[#allocation69_spill] sm:$0xff] %v30679_v17 }
 0x1e2   : > { %35208 = vst [vmem:[#allocation68_spill] sm:$0xff] %v30677_v52 }
 0x1e4   : > { %25024 = vmatmul.mubr.msk.f32.gmra.mrb[14].mxu0 %vm1364_vm5, %v30661_v12  ;;  %v30687_v12 = vld [vmem:[#allocation3 + $0x10a] sm:$0xff] }
 0x1e5   : > { %25026 = vmatprep.mubr.msk.f32.mxu0 %vm1364_vm5, %v30663_v11  ;;  %v30685_v11 = vld [vmem:[#allocation3 + $0xfa] sm:$0xff]  ;;  %35211 = vst [vmem:[#allocation71_spill] sm:$0xff] %v30687_v12 }
 0x1e6   : > { %35210 = vst [vmem:[#allocation70_spill] sm:$0xff] %v30685_v11 }
 0x1e8   : > { %25027 = vmatmul.mubr.msk.f32.gmra.mrb[16].mxu0 %vm1364_vm5, %v30669_v19  ;;  %v30695_v19 = vld [vmem:[#allocation3 + $0x122] sm:$0xff] }
 0x1e9   : > { %25029 = vmatprep.mubr.msk.f32.mxu0 %vm1364_vm5, %v30671_v27  ;;  %v30693_v27 = vld [vmem:[#allocation3 + $0x112] sm:$0xff]  ;;  %35213 = vst [vmem:[#allocation73_spill] sm:$0xff] %v30695_v19 }
 0x1ea   : > { %35212 = vst [vmem:[#allocation72_spill] sm:$0xff] %v30693_v27 }
 0x1ec   : > { %25030 = vmatmul.mubr.msk.f32.gmra.mrb[18].mxu0 %vm1364_vm5, %v30677_v52  ;;  %v30703_v52 = vld [vmem:[#allocation3 + $0x13a] sm:$0xff] }
 0x1ed   : > { %25032 = vmatprep.mubr.msk.f32.mxu0 %vm1364_vm5, %v30679_v17  ;;  %v30701_v17 = vld [vmem:[#allocation3 + $0x12a] sm:$0xff]  ;;  %35214 = vst [vmem:[#allocation74_spill] sm:$0xff] %v30703_v52 }
 0x1f0   : > { %25033 = vmatmul.mubr.msk.f32.gmra.mrb[20].mxu0 %vm1364_vm5, %v30685_v11  ;;  %v30711_v11 = vld [vmem:[#allocation3 + $0x152] sm:$0xff] }
 0x1f1   : > { %25035 = vmatprep.mubr.msk.f32.mxu0 %vm1364_vm5, %v30687_v12  ;;  %v30709_v12 = vld [vmem:[#allocation3 + $0x142] sm:$0xff] }
 0x1f2   : > { %35215 = vst [vmem:[#allocation75_spill] sm:$0xff] %v30709_v12 }
 0x1f4   : > { %25036 = vmatmul.mubr.msk.f32.gmra.mrb[22].mxu0 %vm1364_vm5, %v30693_v27  ;;  %v30719_v27 = vld [vmem:[#allocation3 + $0x16a] sm:$0xff] }
 0x1f5   : > { %25038 = vmatprep.mubr.msk.f32.mxu0 %vm1364_vm5, %v30695_v19  ;;  %v30717_v19 = vld [vmem:[#allocation3 + $0x15a] sm:$0xff] }
 0x1f6   : > { %35216 = vst [vmem:[#allocation76_spill] sm:$0xff] %v30717_v19 }
 0x1f8   : > { %25039 = vmatmul.mubr.msk.f32.gmra.mrb[24].mxu0 %vm1364_vm5, %v30701_v17 }
 0x1f9   : > { %25041 = vmatprep.mubr.msk.f32.mxu0 %vm1364_vm5, %v30703_v52  ;;  %v30725_v52 = vld [vmem:[#allocation3 + $0x172] sm:$0xff] }
 0x1fc   : > { %25042 = vmatmul.mubr.msk.f32.gmra.mrb[26].mxu0 %vm1364_vm5, %v30709_v12  ;;  %v21336_v12 = vld [vmem:[%s29674_s15 + $0x14] sm:$0xf] }
 0x1fd   : > { %25044 = vmatprep.mubr.msk.f32.mxu0 %vm1364_vm5, %v30711_v11 }
 0x200   : > { %25045 = vmatmul.mubr.msk.f32.gmra.mrb[28].mxu0 %vm1364_vm5, %v30717_v19 }
 0x201   : > { %25047 = vmatprep.mubr.msk.f32.mxu0 %vm1364_vm5, %v30719_v27 }
 0x204   : > { %25048 = vmatmul.mubr.msk.f32.gmra.mrb[30].mxu0 %vm1364_vm5, %v30725_v52 }
 0x205   : > { %25052 = vmatprep.mubr.msk.f32.mxu0 %vm1364_vm5, %v30465_v32  ;;  %v21370_v32 = vld [vmem:[%s29674_s15 + $0x18] sm:$0xf] }
 0x208   : > { %25053 = vmatmul.mubr.msk.f32.vlgmr.msra.gmra.mrb[0].mxu0 %vm1364_vm5, %v30473_v53  ;;  %v30791_v53 = vld [vmem:[#allocation3 + $0x180] sm:$0xff] }
 0x209   : > { %25055 = vmatprep.mubr.msk.f32.mxu0 %vm1364_vm5, %v30476_v50  ;;  %25101 = vmatpush3.msk.msra.mxu0 %vm1560_vm4, %v30604_v13  ;;  %v30797_v13 = vld [vmem:[#allocation3 + $0x188] sm:$0xff] }
 0x20a   : > { %25150 = vmatprep.subr.msk.mxu0 %vm1560_vm4, %v21336_v12 }
 0x20c   : > { %25056 = vmatmul.mubr.msk.f32.gmra.mrb[2].mxu0 %vm1364_vm5, %v30484_v14 }
 0x20d   : > { %25058 = vmatprep.mubr.msk.f32.mxu0 %vm1364_vm5, %v30486_v15 }
 0x210   : > { %25059 = vmatmul.mubr.msk.f32.gmra.mrb[4].mxu0 %vm1364_vm5, %v30492_v58 }
 0x211   : > { %25061 = vmatprep.mubr.msk.f32.mxu0 %vm1364_vm5, %v30494_v51 }
 0x214   : > { %25062 = vmatmul.mubr.msk.f32.gmra.mrb[6].mxu0 %vm1364_vm5, %v30500_v48 }
 0x215   : > { %25064 = vmatprep.mubr.msk.f32.mxu0 %vm1364_vm5, %v30502_v49 }
 0x218   : > { %25065 = vmatmul.mubr.msk.f32.gmra.mrb[8].mxu0 %vm1364_vm5, %v30508_v39 }
 0x219   : > { %25067 = vmatprep.mubr.msk.f32.mxu0 %vm1364_vm5, %v30510_v45 }
 0x21c   : > { %25068 = vmatmul.mubr.msk.f32.gmra.mrb[10].mxu0 %vm1364_vm5, %v30516_v37 }
 0x21d   : > { %25070 = vmatprep.mubr.msk.f32.mxu0 %vm1364_vm5, %v30518_v38 }
 0x220   : > { %25071 = vmatmul.mubr.msk.f32.gmra.mrb[12].mxu0 %vm1364_vm5, %v30524_v35 }
 0x221   : > { %25073 = vmatprep.mubr.msk.f32.mxu0 %vm1364_vm5, %v30526_v24 }
 0x224   : > { %25074 = vmatmul.mubr.msk.f32.gmra.mrb[14].mxu0 %vm1364_vm5, %v30532_v36 }
 0x225   : > { %25076 = vmatprep.mubr.msk.f32.mxu0 %vm1364_vm5, %v30534_v25 }
 0x228   : > { %25077 = vmatmul.mubr.msk.f32.gmra.mrb[16].mxu0 %vm1364_vm5, %v30540_v33 }
 0x229   : > { %25079 = vmatprep.mubr.msk.f32.mxu0 %vm1364_vm5, %v30542_v22 }
 0x22c   : > { %25080 = vmatmul.mubr.msk.f32.gmra.mrb[18].mxu0 %vm1364_vm5, %v30548_v34 }
 0x22d   : > { %25082 = vmatprep.mubr.msk.f32.mxu0 %vm1364_vm5, %v30550_v23 }
 0x230   : > { %25083 = vmatmul.mubr.msk.f32.gmra.mrb[20].mxu0 %vm1364_vm5, %v30556_v30 }
 0x231   : > { %25085 = vmatprep.mubr.msk.f32.mxu0 %vm1364_vm5, %v30558_v20 }
 0x234   : > { %25086 = vmatmul.mubr.msk.f32.gmra.mrb[22].mxu0 %vm1364_vm5, %v30564_v31 }
 0x235   : > { %25088 = vmatprep.mubr.msk.f32.mxu0 %vm1364_vm5, %v30566_v21 }
 0x238   : > { %25089 = vmatmul.mubr.msk.f32.gmra.mrb[24].mxu0 %vm1364_vm5, %v30572_v28 }
 0x239   : > { %25091 = vmatprep.mubr.msk.f32.mxu0 %vm1364_vm5, %v30574_v18 }
 0x23c   : > { %25092 = vmatmul.mubr.msk.f32.gmra.mrb[26].mxu0 %vm1364_vm5, %v30588_v26 }
 0x23d   : > { %25094 = vmatprep.mubr.msk.f32.mxu0 %vm1364_vm5, %v30590_v16 }
 0x240   : > { %25095 = vmatmul.mubr.msk.f32.gmra.mrb[28].mxu0 %vm1364_vm5, %v30596_v29 }
 0x241   : > { %25097 = vmatprep.mubr.msk.f32.mxu0 %vm1364_vm5, %v30791_v53 }
 0x244   : > { %25098 = vmatmul.mubr.msk.f32.gmra.mrb[30].mxu0 %vm1364_vm5, %v30797_v13 }
 0x245   : > { %25102 = vmatprep.mubr.msk.f32.mxu0 %vm1364_vm5, %v30308_v40  ;;  %v35217_v40 = vld [vmem:[#allocation46_spill] sm:$0xff] }
 0x248   : > { %25103 = vmatmul.mubr.msk.f32.vlgmr.msra.gmra.mrb[0].mxu0 %vm1364_vm5, %v30310_v41  ;;  %v35218_v41 = vld [vmem:[#allocation47_spill] sm:$0xff] }
 0x249   : > { %25105 = vmatprep.mubr.msk.f32.mxu0 %vm1364_vm5, %v30312_v42  ;;  %25151 = vmatpush3.msk.msra.mxu0 %vm1560_vm4, %v21336_v12  ;;  %v30862_v42 = vld [vmem:[#allocation3 + $0x181] sm:$0xff]  ;;  %v21404_v12 = vld [vmem:[%s29674_s15 + $0x1c] sm:$0xf] }
 0x24a   : > { %25200 = vmatprep.subr.msk.mxu0 %vm1560_vm4, %v21370_v32  ;;  %35219 = vst [vmem:[#allocation77_spill] sm:$0xff] %v30862_v42 }
 0x24c   : > { %25106 = vmatmul.mubr.msk.f32.gmra.mrb[2].mxu0 %vm1364_vm5, %v30326_v43  ;;  %v35220_v43 = vld [vmem:[#allocation48_spill] sm:$0xff] }
 0x24d   : > { %25108 = vmatprep.mubr.msk.f32.mxu0 %vm1364_vm5, %v30328_v44  ;;  %v30868_v44 = vld [vmem:[#allocation3 + $0x189] sm:$0xff] }
 0x24e   : > { %35221 = vst [vmem:[#allocation78_spill] sm:$0xff] %v30868_v44 }
 0x250   : > { %25109 = vmatmul.mubr.msk.f32.gmra.mrb[4].mxu0 %vm1364_vm5, %v30338_v46  ;;  %v35222_v46 = vld [vmem:[#allocation51_spill] sm:$0xff] }
 0x251   : > { %25111 = vmatprep.mubr.msk.f32.mxu0 %vm1364_vm5, %v30340_v47 }
 0x254   : > { %25112 = vmatmul.mubr.msk.f32.gmra.mrb[6].mxu0 %vm1364_vm5, %v30370_v54 }
 0x255   : > { %25114 = vmatprep.mubr.msk.f32.mxu0 %vm1364_vm5, %v30372_v55 }
 0x258   : > { %25115 = vmatmul.mubr.msk.f32.gmra.mrb[8].mxu0 %vm1364_vm5, %v30378_v56 }
 0x259   : > { %25117 = vmatprep.mubr.msk.f32.mxu0 %vm1364_vm5, %v30380_v57 }
 0x25c   : > { %25118 = vmatmul.mubr.msk.f32.gmra.mrb[10].mxu0 %vm1364_vm5, %v30387_v59 }
 0x25d   : > { %25120 = vmatprep.mubr.msk.f32.mxu0 %vm1364_vm5, %v30390_v60 }
 0x260   : > { %25121 = vmatmul.mubr.msk.f32.gmra.mrb[12].mxu0 %vm1364_vm5, %v30396_v61 }
 0x261   : > { %25123 = vmatprep.mubr.msk.f32.mxu0 %vm1364_vm5, %v30398_v62 }
 0x264   : > { %25124 = vmatmul.mubr.msk.f32.gmra.mrb[14].mxu0 %vm1364_vm5, %v30404_v63 }
 0x265   : > { %25126 = vmatprep.mubr.msk.f32.mxu0 %vm1364_vm5, %v30406_v0 }
 0x268   : > { %25127 = vmatmul.mubr.msk.f32.gmra.mrb[16].mxu0 %vm1364_vm5, %v30412_v1 }
 0x269   : > { %25129 = vmatprep.mubr.msk.f32.mxu0 %vm1364_vm5, %v30414_v2 }
 0x26c   : > { %25130 = vmatmul.mubr.msk.f32.gmra.mrb[18].mxu0 %vm1364_vm5, %v30420_v3 }
 0x26d   : > { %25132 = vmatprep.mubr.msk.f32.mxu0 %vm1364_vm5, %v30422_v4 }
 0x270   : > { %25133 = vmatmul.mubr.msk.f32.gmra.mrb[20].mxu0 %vm1364_vm5, %v30428_v5 }
 0x271   : > { %25135 = vmatprep.mubr.msk.f32.mxu0 %vm1364_vm5, %v30430_v6 }
 0x274   : > { %25136 = vmatmul.mubr.msk.f32.gmra.mrb[22].mxu0 %vm1364_vm5, %v30436_v7 }
 0x275   : > { %25138 = vmatprep.mubr.msk.f32.mxu0 %vm1364_vm5, %v30438_v8 }
 0x278   : > { %25139 = vmatmul.mubr.msk.f32.gmra.mrb[24].mxu0 %vm1364_vm5, %v30444_v9 }
 0x279   : > { %25141 = vmatprep.mubr.msk.f32.mxu0 %vm1364_vm5, %v30446_v10  ;;  %v35232_v10 = vld [vmem:[#allocation61_spill] sm:$0xff] }
 0x27c   : > { %25142 = vmatmul.mubr.msk.f32.gmra.mrb[26].mxu0 %vm1364_vm5, %v35217_v40  ;;  %v35223_v40 = vld [vmem:[#allocation52_spill] sm:$0xff] }
 0x27d   : > { %25144 = vmatprep.mubr.msk.f32.mxu0 %vm1364_vm5, %v35218_v41  ;;  %v35224_v41 = vld [vmem:[#allocation53_spill] sm:$0xff] }
 0x280   : > { %25145 = vmatmul.mubr.msk.f32.gmra.mrb[28].mxu0 %vm1364_vm5, %v35220_v43  ;;  %v35226_v43 = vld [vmem:[#allocation55_spill] sm:$0xff] }
 0x281   : > { %25147 = vmatprep.mubr.msk.f32.mxu0 %vm1364_vm5, %v30862_v42  ;;  %v35225_v42 = vld [vmem:[#allocation54_spill] sm:$0xff] }
 0x284   : > { %25148 = vmatmul.mubr.msk.f32.gmra.mrb[30].mxu0 %vm1364_vm5, %v30868_v44  ;;  %v35227_v44 = vld [vmem:[#allocation56_spill] sm:$0xff] }
 0x285   : > { %25152 = vmatprep.mubr.msk.f32.mxu0 %vm1364_vm5, %v35222_v46  ;;  %v35228_v46 = vld [vmem:[#allocation57_spill] sm:$0xff] }
 0x288   : > { %25153 = vmatmul.mubr.msk.f32.vlgmr.msra.gmra.mrb[0].mxu0 %vm1364_vm5, %v35223_v40  ;;  %v35229_v40 = vld [vmem:[#allocation58_spill] sm:$0xff] }
 0x289   : > { %25155 = vmatprep.mubr.msk.f32.mxu0 %vm1364_vm5, %v35224_v41  ;;  %25201 = vmatpush3.msk.msra.mxu0 %vm1560_vm4, %v21370_v32  ;;  %v35230_v41 = vld [vmem:[#allocation59_spill] sm:$0xff]  ;;  %v35231_v32 = vld [vmem:[#allocation60_spill] sm:$0xff] }
 0x28a   : > { %25250 = vmatprep.subr.msk.mxu0 %vm1560_vm4, %v21404_v12 }
 0x28c   : > { %25156 = vmatmul.mubr.msk.f32.gmra.mrb[2].mxu0 %vm1364_vm5, %v35225_v42  ;;  %v35233_v42 = vld [vmem:[#allocation62_spill] sm:$0xff] }
 0x28d   : > { %25158 = vmatprep.mubr.msk.f32.mxu0 %vm1364_vm5, %v35226_v43  ;;  %v35234_v43 = vld [vmem:[#allocation63_spill] sm:$0xff] }
 0x290   : > { %25159 = vmatmul.mubr.msk.f32.gmra.mrb[4].mxu0 %vm1364_vm5, %v35227_v44  ;;  %v35235_v44 = vld [vmem:[#allocation64_spill] sm:$0xff] }
 0x291   : > { %25161 = vmatprep.mubr.msk.f32.mxu0 %vm1364_vm5, %v35228_v46  ;;  %v35236_v46 = vld [vmem:[#allocation65_spill] sm:$0xff] }
 0x294   : > { %25162 = vmatmul.mubr.msk.f32.gmra.mrb[6].mxu0 %vm1364_vm5, %v35229_v40  ;;  %v35237_v40 = vld [vmem:[#allocation66_spill] sm:$0xff] }
 0x295   : > { %25164 = vmatprep.mubr.msk.f32.mxu0 %vm1364_vm5, %v35230_v41  ;;  %v35238_v41 = vld [vmem:[#allocation67_spill] sm:$0xff] }
 0x298   : > { %25165 = vmatmul.mubr.msk.f32.gmra.mrb[8].mxu0 %vm1364_vm5, %v35231_v32  ;;  %v35239_v32 = vld [vmem:[#allocation68_spill] sm:$0xff] }
 0x299   : > { %25167 = vmatprep.mubr.msk.f32.mxu0 %vm1364_vm5, %v35232_v10  ;;  %v35240_v10 = vld [vmem:[#allocation69_spill] sm:$0xff] }
 0x29c   : > { %25168 = vmatmul.mubr.msk.f32.gmra.mrb[10].mxu0 %vm1364_vm5, %v35233_v42  ;;  %v35241_v42 = vld [vmem:[#allocation70_spill] sm:$0xff] }
 0x29d   : > { %25170 = vmatprep.mubr.msk.f32.mxu0 %vm1364_vm5, %v35234_v43  ;;  %v35242_v43 = vld [vmem:[#allocation71_spill] sm:$0xff] }
 0x2a0   : > { %25171 = vmatmul.mubr.msk.f32.gmra.mrb[12].mxu0 %vm1364_vm5, %v35235_v44 }
 0x2a1   : > { %25173 = vmatprep.mubr.msk.f32.mxu0 %vm1364_vm5, %v35236_v46  ;;  %v35243_v46 = vld [vmem:[#allocation72_spill] sm:$0xff] }
 0x2a4   : > { %25174 = vmatmul.mubr.msk.f32.gmra.mrb[14].mxu0 %vm1364_vm5, %v35237_v40  ;;  %v35244_v40 = vld [vmem:[#allocation73_spill] sm:$0xff] }
 0x2a5   : > { %25176 = vmatprep.mubr.msk.f32.mxu0 %vm1364_vm5, %v35238_v41 }
 0x2a8   : > { %25177 = vmatmul.mubr.msk.f32.gmra.mrb[16].mxu0 %vm1364_vm5, %v35239_v32  ;;  %v35245_v32 = vld [vmem:[#allocation74_spill] sm:$0xff] }
 0x2a9   : > { %25179 = vmatprep.mubr.msk.f32.mxu0 %vm1364_vm5, %v35240_v10  ;;  %v35246_v10 = vld [vmem:[#allocation75_spill] sm:$0xff] }
 0x2ac   : > { %25180 = vmatmul.mubr.msk.f32.gmra.mrb[18].mxu0 %vm1364_vm5, %v35241_v42 }
 0x2ad   : > { %25182 = vmatprep.mubr.msk.f32.mxu0 %vm1364_vm5, %v35242_v43 }
 0x2b0   : > { %25183 = vmatmul.mubr.msk.f32.gmra.mrb[20].mxu0 %vm1364_vm5, %v35243_v46  ;;  %v30933_v46 = vld [vmem:[#allocation3 + $0x182] sm:$0xff] }
 0x2b1   : > { %25185 = vmatprep.mubr.msk.f32.mxu0 %vm1364_vm5, %v35244_v40 }
 0x2b4   : > { %25186 = vmatmul.mubr.msk.f32.gmra.mrb[22].mxu0 %vm1364_vm5, %v30701_v17 }
 0x2b5   : > { %25188 = vmatprep.mubr.msk.f32.mxu0 %vm1364_vm5, %v35245_v32  ;;  %v30939_v32 = vld [vmem:[#allocation3 + $0x18a] sm:$0xff] }
 0x2b8   : > { %25189 = vmatmul.mubr.msk.f32.gmra.mrb[24].mxu0 %vm1364_vm5, %v35246_v10 }
 0x2b9   : > { %25191 = vmatprep.mubr.msk.f32.mxu0 %vm1364_vm5, %v30711_v11 }
 0x2bc   : > { %25192 = vmatmul.mubr.msk.f32.gmra.mrb[26].mxu0 %vm1364_vm5, %v30717_v19  ;;  %v21438_v19 = vld [vmem:[%s29674_s15 + $0x20] sm:$0xf] }
 0x2bd   : > { %25194 = vmatprep.mubr.msk.f32.mxu0 %vm1364_vm5, %v30719_v27 }
 0x2c0   : > { %25195 = vmatmul.mubr.msk.f32.gmra.mrb[28].mxu0 %vm1364_vm5, %v30725_v52 }
 0x2c1   : > { %25197 = vmatprep.mubr.msk.f32.mxu0 %vm1364_vm5, %v30933_v46 }
 0x2c4   : > { %25198 = vmatmul.mubr.msk.f32.gmra.mrb[30].mxu0 %vm1364_vm5, %v30939_v32 }
 0x2c5   : > { %25202 = vmatprep.mubr.msk.f32.mxu0 %vm1364_vm5, %v30476_v50  ;;  %v35257_v50 = vld [vmem:[#allocation57_spill] sm:$0xff] }
 0x2c8   : > { %25203 = vmatmul.mubr.msk.f32.vlgmr.msra.gmra.mrb[0].mxu0 %vm1364_vm5, %v30484_v14  ;;  %v4942_v14 = vld [vmem:[%s29684_s20] sm:$0xff] }
 0x2c9   : > { %25205 = vmatprep.mubr.msk.f32.mxu0 %vm1364_vm5, %v30486_v15  ;;  %25251 = vmatpush3.msk.msra.mxu0 %vm1560_vm4, %v21404_v12  ;;  %v4943_v15 = vld [vmem:[%s29684_s20 + $0x8] sm:$0xff]  ;;  %v21544_v12 = vld [vmem:[%s29684_s20 + $0x80] sm:$0xff] }
 0x2ca   : > { %25300 = vmatprep.subr.msk.mxu0 %vm1560_vm4, %v21438_v19 }
 0x2cc   : > { %25206 = vmatmul.mubr.msk.f32.gmra.mrb[2].mxu0 %vm1364_vm5, %v30492_v58  ;;  %v27768_v58 = vpack.c.bf16 %v4943_v15, %v4942_v14 }
 0x2cd   : > { %25208 = vmatprep.mubr.msk.f32.mxu0 %vm1364_vm5, %v30494_v51  ;;  %v35258_v51 = vld [vmem:[#allocation58_spill] sm:$0xff] }
 0x2d0   : > { %25209 = vmatmul.mubr.msk.f32.gmra.mrb[4].mxu0 %vm1364_vm5, %v30500_v48  ;;  %v35255_v48 = vld [vmem:[#allocation55_spill] sm:$0xff] }
 0x2d1   : > { %25211 = vmatprep.mubr.msk.f32.mxu0 %vm1364_vm5, %v30502_v49  ;;  %v35256_v49 = vld [vmem:[#allocation56_spill] sm:$0xff] }
 0x2d4   : > { %25212 = vmatmul.mubr.msk.f32.gmra.mrb[6].mxu0 %vm1364_vm5, %v30508_v39  ;;  %v4095_v39 = vld [vmem:[#allocation3 + $0x1a1] sm:$0xff] }
 0x2d5   : > { %25214 = vmatprep.mubr.msk.f32.mxu0 %vm1364_vm5, %v30510_v45  ;;  %v35253_v45 = vld [vmem:[#allocation53_spill] sm:$0xff] }
 0x2d8   : > { %25215 = vmatmul.mubr.msk.f32.gmra.mrb[8].mxu0 %vm1364_vm5, %v30516_v37  ;;  %v4094_v37 = vld [vmem:[#allocation3 + $0x199] sm:$0xff] }
 0x2d9   : > { %25217 = vmatprep.mubr.msk.f32.mxu0 %vm1364_vm5, %v30518_v38  ;;  %v35252_v38 = vld [vmem:[#allocation78_spill] sm:$0xff] }
 0x2dc   : > { %25218 = vmatmul.mubr.msk.f32.gmra.mrb[10].mxu0 %vm1364_vm5, %v30524_v35  ;;  %v35250_v35 = vld [vmem:[#allocation48_spill] sm:$0xff] }
 0x2dd   : > { %25220 = vmatprep.mubr.msk.f32.mxu0 %vm1364_vm5, %v30526_v24  ;;  %v21474_v24 = vld [vmem:[%s29684_s20 + $0x50] sm:$0xff] }
 0x2e0   : > { %25221 = vmatmul.mubr.msk.f32.gmra.mrb[12].mxu0 %vm1364_vm5, %v30532_v36  ;;  %v35251_v36 = vld [vmem:[#allocation77_spill] sm:$0xff] }
 0x2e1   : > { %25223 = vmatprep.mubr.msk.f32.mxu0 %vm1364_vm5, %v30534_v25 }
 0x2e4   : > { %25224 = vmatmul.mubr.msk.f32.gmra.mrb[14].mxu0 %vm1364_vm5, %v30540_v33  ;;  %v35248_v33 = vld [vmem:[#allocation46_spill] sm:$0xff] }
 0x2e5   : > { %25226 = vmatprep.mubr.msk.f32.mxu0 %vm1364_vm5, %v30542_v22  ;;  %v21472_v22 = vld [vmem:[%s29684_s20 + $0x40] sm:$0xff] }
 0x2e8   : > { %25227 = vmatmul.mubr.msk.f32.gmra.mrb[16].mxu0 %vm1364_vm5, %v30548_v34  ;;  %v35249_v34 = vld [vmem:[#allocation47_spill] sm:$0xff] }
 0x2e9   : > { %25229 = vmatprep.mubr.msk.f32.mxu0 %vm1364_vm5, %v30550_v23  ;;  %v21473_v23 = vld [vmem:[%s29684_s20 + $0x48] sm:$0xff] }
 0x2ea   : > { %v27752_v25 = vpack.c.bf16 %v21473_v23, %v21472_v22 }
 0x2ec   : > { %25230 = vmatmul.mubr.msk.f32.gmra.mrb[18].mxu0 %vm1364_vm5, %v30556_v30  ;;  %27753 = vmatprep.subr.bf16.mxu1 %v27752_v25  ;;  %v4067_v30 = vld [vmem:[#allocation3 + $0x51] sm:$0xff] }
 0x2ed   : > { %25232 = vmatprep.mubr.msk.f32.mxu0 %vm1364_vm5, %v30558_v20  ;;  %v3704_v20 = vld [vmem:[#allocation3 + $0x198] sm:$0xff]  ;;  %27755 = vmatpush3.bf16.msra.mxu1 %v27752_v25 }
 0x2f0   : > { %25233 = vmatmul.mubr.msk.f32.gmra.mrb[20].mxu0 %vm1364_vm5, %v30564_v31  ;;  %v35247_v31 = vld [vmem:[#allocation45_spill] sm:$0xff] }
 0x2f1   : > { %25235 = vmatprep.mubr.msk.f32.mxu0 %vm1364_vm5, %v30566_v21  ;;  %v4064_v21 = vld [vmem:[#allocation3 + $0x31] sm:$0xff] }
 0x2f4   : > { %25236 = vmatmul.mubr.msk.f32.gmra.mrb[22].mxu0 %vm1364_vm5, %v30572_v28  ;;  %v4066_v28 = vld [vmem:[#allocation3 + $0x49] sm:$0xff] }
 0x2f5   : > { %25238 = vmatprep.mubr.msk.f32.mxu0 %vm1364_vm5, %v30574_v18  ;;  %v3705_v18 = vld [vmem:[#allocation3 + $0x1a0] sm:$0xff] }
 0x2f8   : > { %25239 = vmatmul.mubr.msk.f32.gmra.mrb[24].mxu0 %vm1364_vm5, %v30588_v26  ;;  %v21475_v26 = vld [vmem:[%s29684_s20 + $0x58] sm:$0xff] }
 0x2f9   : > { %25241 = vmatprep.mubr.msk.f32.mxu0 %vm1364_vm5, %v30590_v16  ;;  %v4065_v16 = vld [vmem:[#allocation3 + $0x39] sm:$0xff] }
 0x2fc   : > { %25242 = vmatmul.mubr.msk.f32.gmra.mrb[26].mxu0 %vm1364_vm5, %v30596_v29  ;;  %v27756_v29 = vpack.c.bf16 %v21475_v26, %v21474_v24 }
 0x2fd   : > { %25244 = vmatprep.mubr.msk.f32.mxu0 %vm1364_vm5, %v30791_v53  ;;  %v4946_v53 = vld [vmem:[%s29684_s20 + $0x20] sm:$0xff] }
 0x2fe   : > { %27757 = vmatprep.subr.bf16.mxu1 %v27756_v29 }
 0x2ff   : > { %27759 = vmatpush3.bf16.msra.mxu1 %v27756_v29 }
 0x300   : > { %25245 = vmatmul.mubr.msk.f32.gmra.mrb[28].mxu0 %vm1364_vm5, %v30797_v13  ;;  %v4947_v13 = vld [vmem:[%s29684_s20 + $0x28] sm:$0xff] }
 0x301   : > { %25247 = vmatprep.mubr.msk.f32.mxu0 %vm1364_vm5, %v3704_v20 }
 0x304   : > { %25248 = vmatmul.mubr.msk.f32.gmra.mrb[30].mxu0 %vm1364_vm5, %v3705_v18 }
 0x305   : > { %25252 = vmatprep.mubr.msk.f32.mxu0 %vm1364_vm5, %v4064_v21 }
 0x308   : > { %25253 = vmatmul.mubr.msk.f32.vlgmr.msra.gmra.mrb[0].mxu0 %vm1364_vm5, %v4065_v16 }
 0x309   : > { %25255 = vmatprep.mubr.msk.f32.mxu0 %vm1364_vm5, %v4066_v28  ;;  %25301 = vmatpush3.msk.msra.mxu0 %vm1560_vm4, %v21438_v19  ;;  %v4944_v19 = vld [vmem:[%s29684_s20 + $0x10] sm:$0xff] }
 0x30c   : > { %25256 = vmatmul.mubr.msk.f32.gmra.mrb[2].mxu0 %vm1364_vm5, %v4067_v30 }
 0x30d   : > { %25258 = vmatprep.mubr.msk.f32.mxu0 %vm1364_vm5, %v30340_v47  ;;  %v35254_v47 = vld [vmem:[#allocation54_spill] sm:$0xff] }
 0x310   : > { %25259 = vmatmul.mubr.msk.f32.gmra.mrb[4].mxu0 %vm1364_vm5, %v30370_v54  ;;  %v35259_v54 = vld [vmem:[#allocation59_spill] sm:$0xff] }
 0x311   : > { %25261 = vmatprep.mubr.msk.f32.mxu0 %vm1364_vm5, %v30372_v55  ;;  %v35260_v55 = vld [vmem:[#allocation60_spill] sm:$0xff] }
 0x314   : > { %25262 = vmatmul.mubr.msk.f32.gmra.mrb[6].mxu0 %vm1364_vm5, %v30378_v56  ;;  %v35261_v56 = vld [vmem:[#allocation61_spill] sm:$0xff] }
 0x315   : > { %25264 = vmatprep.mubr.msk.f32.mxu0 %vm1364_vm5, %v30380_v57  ;;  %v35262_v57 = vld [vmem:[#allocation62_spill] sm:$0xff] }
 0x318   : > { %25265 = vmatmul.mubr.msk.f32.gmra.mrb[8].mxu0 %vm1364_vm5, %v30387_v59  ;;  %v35263_v59 = vld [vmem:[#allocation63_spill] sm:$0xff] }
 0x319   : > { %25267 = vmatprep.mubr.msk.f32.mxu0 %vm1364_vm5, %v30390_v60  ;;  %v35264_v60 = vld [vmem:[#allocation65_spill] sm:$0xff] }
 0x31c   : > { %25268 = vmatmul.mubr.msk.f32.gmra.mrb[10].mxu0 %vm1364_vm5, %v30396_v61  ;;  %v35265_v61 = vld [vmem:[#allocation66_spill] sm:$0xff] }
 0x31d   : > { %25270 = vmatprep.mubr.msk.f32.mxu0 %vm1364_vm5, %v30398_v62  ;;  %v35266_v62 = vld [vmem:[#allocation68_spill] sm:$0xff] }
 0x320   : > { %25271 = vmatmul.mubr.msk.f32.gmra.mrb[12].mxu0 %vm1364_vm5, %v30404_v63  ;;  %v35267_v63 = vld [vmem:[#allocation69_spill] sm:$0xff] }
 0x321   : > { %25273 = vmatprep.mubr.msk.f32.mxu0 %vm1364_vm5, %v30406_v0  ;;  %v35268_v0 = vld [vmem:[#allocation72_spill] sm:$0xff] }
 0x324   : > { %25274 = vmatmul.mubr.msk.f32.gmra.mrb[14].mxu0 %vm1364_vm5, %v30412_v1  ;;  %v35269_v1 = vld [vmem:[#allocation74_spill] sm:$0xff] }
 0x325   : > { %25276 = vmatprep.mubr.msk.f32.mxu0 %vm1364_vm5, %v30414_v2  ;;  %v35270_v2 = vld [vmem:[#allocation76_spill] sm:$0xff] }
 0x328   : > { %25277 = vmatmul.mubr.msk.f32.gmra.mrb[16].mxu0 %vm1364_vm5, %v30420_v3  ;;  %v4485_v3 = vld [vmem:[#allocation3 + $0x1a2] sm:$0xff] }
 0x329   : > { %25279 = vmatprep.mubr.msk.f32.mxu0 %vm1364_vm5, %v30422_v4  ;;  %v21476_v4 = vld [vmem:[%s29684_s20 + $0x60] sm:$0xff] }
 0x32c   : > { %25280 = vmatmul.mubr.msk.f32.gmra.mrb[18].mxu0 %vm1364_vm5, %v30428_v5  ;;  %v21477_v5 = vld [vmem:[%s29684_s20 + $0x68] sm:$0xff] }
 0x32d   : > { %25282 = vmatprep.mubr.msk.f32.mxu0 %vm1364_vm5, %v30430_v6  ;;  %v27760_v6 = vpack.c.bf16 %v21477_v5, %v21476_v4 }
 0x32f   : > { %27761 = vmatprep.subr.bf16.mxu1 %v27760_v6 }
 0x330   : > { %25283 = vmatmul.mubr.msk.f32.gmra.mrb[20].mxu0 %vm1364_vm5, %v30436_v7  ;;  %27763 = vmatpush3.bf16.msra.mxu1 %v27760_v6  ;;  %v21478_v7 = vld [vmem:[%s29684_s20 + $0x70] sm:$0xff] }
 0x331   : > { %25285 = vmatprep.mubr.msk.f32.mxu0 %vm1364_vm5, %v30438_v8  ;;  %v21479_v8 = vld [vmem:[%s29684_s20 + $0x78] sm:$0xff] }
 0x334   : > { %25286 = vmatmul.mubr.msk.f32.gmra.mrb[22].mxu0 %vm1364_vm5, %v30444_v9  ;;  %v27764_v9 = vpack.c.bf16 %v21479_v8, %v21478_v7 }
 0x335   : > { %25288 = vmatprep.mubr.msk.f32.mxu0 %vm1364_vm5, %v35247_v31 }
 0x336   : > { %27765 = vmatprep.subr.bf16.mxu1 %v27764_v9 }
 0x337   : > { %27767 = vmatpush3.bf16.msra.mxu1 %v27764_v9 }
 0x338   : > { %25289 = vmatmul.mubr.msk.f32.gmra.mrb[24].mxu0 %vm1364_vm5, %v35248_v33  ;;  %27769 = vmatprep.subr.bf16.mxu1 %v27768_v58 }
 0x339   : > { %25291 = vmatprep.mubr.msk.f32.mxu0 %vm1364_vm5, %v35249_v34 }
 0x33c   : > { %25292 = vmatmul.mubr.msk.f32.gmra.mrb[26].mxu0 %vm1364_vm5, %v35250_v35 }
 0x33d   : > { %25294 = vmatprep.mubr.msk.f32.mxu0 %vm1364_vm5, %v35251_v36 }
 0x340   : > { %25295 = vmatmul.mubr.msk.f32.gmra.mrb[28].mxu0 %vm1364_vm5, %v35252_v38 }
 0x341   : > { %25297 = vmatprep.mubr.msk.f32.mxu0 %vm1364_vm5, %v4094_v37 }
 0x344   : > { %25298 = vmatmul.mubr.msk.f32.gmra.mrb[30].mxu0 %vm1364_vm5, %v4095_v39 }
 0x345   : > { %25302 = vmatprep.mubr.msk.f32.mxu0 %vm1364_vm5, %v35253_v45 }
 0x348   : > { %25303 = vmatmul.mubr.msk.f32.vlgmr.msra.gmra.mrb[0].mxu0 %vm1364_vm5, %v35254_v47 }
 0x349   : > { %25305 = vmatprep.mubr.msk.f32.mxu0 %vm1364_vm5, %v35255_v48 }
 0x34c   : > { %25306 = vmatmul.mubr.msk.f32.gmra.mrb[2].mxu0 %vm1364_vm5, %v35256_v49 }
 0x34d   : > { %25308 = vmatprep.mubr.msk.f32.mxu0 %vm1364_vm5, %v35257_v50 }
 0x350   : > { %25309 = vmatmul.mubr.msk.f32.gmra.mrb[4].mxu0 %vm1364_vm5, %v35258_v51 }
 0x351   : > { %25311 = vmatprep.mubr.msk.f32.mxu0 %vm1364_vm5, %v35259_v54 }
 0x354   : > { %25312 = vmatmul.mubr.msk.f32.gmra.mrb[6].mxu0 %vm1364_vm5, %v35260_v55 }
 0x355   : > { %25314 = vmatprep.mubr.msk.f32.mxu0 %vm1364_vm5, %v35261_v56 }
 0x358   : > { %25315 = vmatmul.mubr.msk.f32.gmra.mrb[8].mxu0 %vm1364_vm5, %v35262_v57 }
 0x359   : > { %25317 = vmatprep.mubr.msk.f32.mxu0 %vm1364_vm5, %v35263_v59 }
 0x35c   : > { %25318 = vmatmul.mubr.msk.f32.gmra.mrb[10].mxu0 %vm1364_vm5, %v35235_v44 }
 0x35d   : > { %25320 = vmatprep.mubr.msk.f32.mxu0 %vm1364_vm5, %v35264_v60 }
 0x360   : > { %25321 = vmatmul.mubr.msk.f32.gmra.mrb[12].mxu0 %vm1364_vm5, %v35265_v61 }
 0x361   : > { %25323 = vmatprep.mubr.msk.f32.mxu0 %vm1364_vm5, %v35238_v41  ;;  %v27776_v41 = vpack.c.bf16 %v4947_v13, %v4946_v53 }
 0x364   : > { %25324 = vmatmul.mubr.msk.f32.gmra.mrb[14].mxu0 %vm1364_vm5, %v35266_v62 }
 0x365   : > { %25326 = vmatprep.mubr.msk.f32.mxu0 %vm1364_vm5, %v35267_v63 }
 0x368   : > { %25327 = vmatmul.mubr.msk.f32.gmra.mrb[16].mxu0 %vm1364_vm5, %v35241_v42  ;;  %v4948_v42 = vld [vmem:[%s29684_s20 + $0x30] sm:$0xff] }
 0x369   : > { %25329 = vmatprep.mubr.msk.f32.mxu0 %vm1364_vm5, %v35242_v43  ;;  %v4949_v43 = vld [vmem:[%s29684_s20 + $0x38] sm:$0xff] }
 0x36a   : > { %v27780_v44 = vpack.c.bf16 %v4949_v43, %v4948_v42 }
 0x36c   : > { %25330 = vmatmul.mubr.msk.f32.gmra.mrb[18].mxu0 %vm1364_vm5, %v35268_v0 }
 0x36d   : > { %25332 = vmatprep.mubr.msk.f32.mxu0 %vm1364_vm5, %v35244_v40 }
 0x370   : > { %25333 = vmatmul.mubr.msk.f32.gmra.mrb[20].mxu0 %vm1364_vm5, %v30701_v17  ;;  %v4484_v17 = vld [vmem:[#allocation3 + $0x19a] sm:$0xff] }
 0x371   : > { %25335 = vmatprep.mubr.msk.f32.mxu0 %vm1364_vm5, %v35269_v1 }
 0x374   : > { %25336 = vmatmul.mubr.msk.f32.gmra.mrb[22].mxu0 %vm1364_vm5, %v35246_v10  ;;  %v4950_v10 = vld [vmem:[#allocation4 + $0x1] sm:$0xff] }
 0x375   : > { %25338 = vmatprep.mubr.msk.f32.mxu0 %vm1364_vm5, %v30711_v11  ;;  %25366 = vmatprep.mubr.msk.f32.mxu1 %vm4877_vm6, %v4950_v10  ;;  %v4951_v11 = vld [vmem:[#allocation4 + $0x9] sm:$0xff] }
 0x376   : > { %25367 = vmatmul.mubr.msk.f32.vlgmr.msra.gmra.mrb[0].mxu1 %vm4877_vm6, %v4951_v11 }
 0x377   : > { %27771 = vmatpush3.bf16.msra.mxu1 %v27768_v58 }
 0x378   : > { %25339 = vmatmul.mubr.msk.f32.gmra.mrb[24].mxu0 %vm1364_vm5, %v35270_v2 }
 0x379   : > { %25341 = vmatprep.mubr.msk.f32.mxu0 %vm1364_vm5, %v30719_v27  ;;  %v4945_v27 = vld [vmem:[%s29684_s20 + $0x18] sm:$0xff] }
 0x37c   : > { %25342 = vmatmul.mubr.msk.f32.gmra.mrb[26].mxu0 %vm1364_vm5, %v30725_v52  ;;  %v27772_v52 = vpack.c.bf16 %v4945_v27, %v4944_v19 }
 0x37d   : > { %25344 = vmatprep.mubr.msk.f32.mxu0 %vm1364_vm5, %v30933_v46  ;;  %v21545_v46 = vld [vmem:[%s29684_s20 + $0x88] sm:$0xff] }
 0x37e   : > { %27773 = vmatprep.subr.bf16.mxu1 %v27772_v52  ;;  %v31149_v40 = vpack.c.bf16 %v21545_v46, %v21544_v12 }
 0x37f   : > { %27775 = vmatpush3.bf16.msra.mxu1 %v27772_v52 }
 0x380   : > { %25345 = vmatmul.mubr.msk.f32.gmra.mrb[28].mxu0 %vm1364_vm5, %v30939_v32  ;;  %27777 = vmatprep.subr.bf16.mxu1 %v27776_v41 }
 0x381   : > { %25347 = vmatprep.mubr.msk.f32.mxu0 %vm1364_vm5, %v4484_v17 }
 0x383   : > { %27779 = vmatpush3.bf16.msra.mxu1 %v27776_v41 }
 0x384   : > { %25348 = vmatmul.mubr.msk.f32.gmra.mrb[30].mxu0 %vm1364_vm5, %v4485_v3  ;;  %27781 = vmatprep.subr.bf16.mxu1 %v27780_v44 }
 0x387   : > { %27783 = vmatpush3.bf16.msra.mxu1 %v27780_v44 }
 0x388   : > { %27785 = vmatprep.subr.bf16.mxu1 %v31149_v40 }
 0x41b   : > { %v25304_v32 = vpop.f32.mrb[0].mxu0 }
 0x41c   : > { %v4845_v20 = vmax.f32 %v25304_v32, 0.0  ;;  %v4653_v18 = vpop.f32.mrb[1].mxu0 }
 0x41d   : > { %v4844_v21 = vmax.f32 %v4653_v18, 0.0 }
 0x41e   : > { %4879 = vst.msk [vmem:[#allocation4 + $0x21] sm:$0xff] %vm4877_vm6, %v4845_v20 }
 0x41f   : > { %4878 = vst.msk [vmem:[#allocation4 + $0x19] sm:$0xff] %vm4877_vm6, %v4844_v21  ;;  %v25307_v22 = vpop.f32.mrb[2].mxu0 }
 0x420   : > { %v4847_v23 = vmax.f32 %v25307_v22, 0.0  ;;  %v4663_v24 = vpop.f32.mrb[3].mxu0 }
 0x421   : > { %v4846_v16 = vmax.f32 %v4663_v24, 0.0 }
 0x422   : > { %4881 = vst.msk [vmem:[#allocation4 + $0x39] sm:$0xff] %vm4877_vm6, %v4847_v23 }
 0x423   : > { %4880 = vst.msk [vmem:[#allocation4 + $0x31] sm:$0xff] %vm4877_vm6, %v4846_v16  ;;  %v25310_v25 = vpop.f32.mrb[4].mxu0 }
 0x424   : > { %v4849_v26 = vmax.f32 %v25310_v25, 0.0  ;;  %v4673_v28 = vpop.f32.mrb[5].mxu0 }
 0x425   : > { %v4848_v29 = vmax.f32 %v4673_v28, 0.0  ;;  %v31162_v33 = vld [vmem:[#allocation4 + $0x21] sm:$0xff] }
 0x426   : > { %4883 = vst.msk [vmem:[#allocation4 + $0x51] sm:$0xff] %vm4877_vm6, %v4849_v26  ;;  %v31157_v30 = vld [vmem:[#allocation4 + $0x19] sm:$0xff] }
 0x427   : > { %4882 = vst.msk [vmem:[#allocation4 + $0x49] sm:$0xff] %vm4877_vm6, %v4848_v29  ;;  %v25313_v31 = vpop.f32.mrb[6].mxu0  ;;  %25369 = vmatprep.mubr.msk.f32.mxu1 %vm4877_vm6, %v31157_v30 }
 0x428   : > { %v4851_v34 = vmax.f32 %v25313_v31, 0.0  ;;  %v4683_v35 = vpop.f32.mrb[7].mxu0  ;;  %25370 = vmatmul.mubr.msk.f32.gmra.mrb[2].mxu1 %vm4877_vm6, %v31162_v33 }
 0x429   : > { %v4850_v36 = vmax.f32 %v4683_v35, 0.0  ;;  %v31172_v39 = vld [vmem:[#allocation4 + $0x39] sm:$0xff] }
 0x42a   : > { %4885 = vst.msk [vmem:[#allocation4 + $0x69] sm:$0xff] %vm4877_vm6, %v4851_v34  ;;  %v31167_v37 = vld [vmem:[#allocation4 + $0x31] sm:$0xff] }
 0x42b   : > { %4884 = vst.msk [vmem:[#allocation4 + $0x61] sm:$0xff] %vm4877_vm6, %v4850_v36  ;;  %v25316_v38 = vpop.f32.mrb[8].mxu0  ;;  %25372 = vmatprep.mubr.msk.f32.mxu1 %vm4877_vm6, %v31167_v37 }
 0x42c   : > { %v4853_v45 = vmax.f32 %v25316_v38, 0.0  ;;  %v4693_v47 = vpop.f32.mrb[9].mxu0  ;;  %25373 = vmatmul.mubr.msk.f32.gmra.mrb[4].mxu1 %vm4877_vm6, %v31172_v39 }
 0x42d   : > { %v4852_v48 = vmax.f32 %v4693_v47, 0.0  ;;  %v31182_v51 = vld [vmem:[#allocation4 + $0x51] sm:$0xff] }
 0x42e   : > { %4887 = vst.msk [vmem:[#allocation4 + $0x81] sm:$0xff] %vm4877_vm6, %v4853_v45  ;;  %v31177_v49 = vld [vmem:[#allocation4 + $0x49] sm:$0xff] }
 0x42f   : > { %4886 = vst.msk [vmem:[#allocation4 + $0x79] sm:$0xff] %vm4877_vm6, %v4852_v48  ;;  %v25319_v50 = vpop.f32.mrb[10].mxu0  ;;  %25375 = vmatprep.mubr.msk.f32.mxu1 %vm4877_vm6, %v31177_v49 }
 0x430   : > { %v4855_v54 = vmax.f32 %v25319_v50, 0.0  ;;  %v4703_v55 = vpop.f32.mrb[11].mxu0  ;;  %25376 = vmatmul.mubr.msk.f32.gmra.mrb[6].mxu1 %vm4877_vm6, %v31182_v51 }
 0x431   : > { %v4854_v56 = vmax.f32 %v4703_v55, 0.0  ;;  %v31192_v60 = vld [vmem:[#allocation4 + $0x69] sm:$0xff] }
 0x432   : > { %4889 = vst.msk [vmem:[#allocation4 + $0x99] sm:$0xff] %vm4877_vm6, %v4855_v54  ;;  %v31187_v57 = vld [vmem:[#allocation4 + $0x61] sm:$0xff] }
 0x433   : > { %4888 = vst.msk [vmem:[#allocation4 + $0x91] sm:$0xff] %vm4877_vm6, %v4854_v56  ;;  %v25322_v59 = vpop.f32.mrb[12].mxu0  ;;  %25378 = vmatprep.mubr.msk.f32.mxu1 %vm4877_vm6, %v31187_v57 }
 0x434   : > { %v4857_v61 = vmax.f32 %v25322_v59, 0.0  ;;  %v4713_v62 = vpop.f32.mrb[13].mxu0  ;;  %25379 = vmatmul.mubr.msk.f32.gmra.mrb[8].mxu1 %vm4877_vm6, %v31192_v60 }
 0x435   : > { %v4856_v63 = vmax.f32 %v4713_v62, 0.0  ;;  %v31202_v2 = vld [vmem:[#allocation4 + $0x81] sm:$0xff] }
 0x436   : > { %4891 = vst.msk [vmem:[#allocation4 + $0xb1] sm:$0xff] %vm4877_vm6, %v4857_v61  ;;  %v31197_v0 = vld [vmem:[#allocation4 + $0x79] sm:$0xff] }
 0x437   : > { %4890 = vst.msk [vmem:[#allocation4 + $0xa9] sm:$0xff] %vm4877_vm6, %v4856_v63  ;;  %v25325_v1 = vpop.f32.mrb[14].mxu0  ;;  %25381 = vmatprep.mubr.msk.f32.mxu1 %vm4877_vm6, %v31197_v0 }
 0x438   : > { %v4859_v17 = vmax.f32 %v25325_v1, 0.0  ;;  %v4723_v3 = vpop.f32.mrb[15].mxu0  ;;  %25382 = vmatmul.mubr.msk.f32.gmra.mrb[10].mxu1 %vm4877_vm6, %v31202_v2 }
 0x439   : > { %v4858_v4 = vmax.f32 %v4723_v3, 0.0  ;;  %v31212_v7 = vld [vmem:[#allocation4 + $0x99] sm:$0xff] }
 0x43a   : > { %4893 = vst.msk [vmem:[#allocation4 + $0xc9] sm:$0xff] %vm4877_vm6, %v4859_v17  ;;  %v31207_v5 = vld [vmem:[#allocation4 + $0x91] sm:$0xff]  ;;  %v4910_v3 = vld [vmem:[#allocation4] sm:$0xff] }
 0x43b   : > { %4892 = vst.msk [vmem:[#allocation4 + $0xc1] sm:$0xff] %vm4877_vm6, %v4858_v4  ;;  %v25328_v6 = vpop.f32.mrb[16].mxu0  ;;  %25384 = vmatprep.mubr.msk.f32.mxu1 %vm4877_vm6, %v31207_v5 }
 0x43c   : > { %v4861_v8 = vmax.f32 %v25328_v6, 0.0  ;;  %v4733_v9 = vpop.f32.mrb[17].mxu0  ;;  %25385 = vmatmul.mubr.msk.f32.gmra.mrb[12].mxu1 %vm4877_vm6, %v31212_v7  ;;  %v21546_v6 = vld [vmem:[%s29684_s20 + $0x90] sm:$0xff] }
 0x43d   : > { %v4860_v10 = vmax.f32 %v4733_v9, 0.0  ;;  %v31222_v15 = vld [vmem:[#allocation4 + $0xb1] sm:$0xff]  ;;  %v4911_v9 = vld [vmem:[#allocation4 + $0x8] sm:$0xff] }
 0x43e   : > { %4895 = vst.msk [vmem:[#allocation4 + $0xe1] sm:$0xff] %vm4877_vm6, %v4861_v8  ;;  %v31217_v11 = vld [vmem:[#allocation4 + $0xa9] sm:$0xff] }
 0x43f   : > { %4894 = vst.msk [vmem:[#allocation4 + $0xd9] sm:$0xff] %vm4877_vm6, %v4860_v10  ;;  %v25331_v14 = vpop.f32.mrb[18].mxu0  ;;  %25387 = vmatprep.mubr.msk.f32.mxu1 %vm4877_vm6, %v31217_v11  ;;  %v21547_v8 = vld [vmem:[%s29684_s20 + $0x98] sm:$0xff] }
 0x440   : > { %v4863_v58 = vmax.f32 %v25331_v14, 0.0  ;;  %v4743_v19 = vpop.f32.mrb[19].mxu0  ;;  %25388 = vmatmul.mubr.msk.f32.gmra.mrb[14].mxu1 %vm4877_vm6, %v31222_v15  ;;  %v27788_v10 = vpack.c.bf16 %v21547_v8, %v21546_v6  ;;  %v21548_v14 = vld [vmem:[%s29684_s20 + $0xa0] sm:$0xff] }
 0x441   : > { %v4862_v27 = vmax.f32 %v4743_v19, 0.0  ;;  %v31232_v13 = vld [vmem:[#allocation4 + $0xc9] sm:$0xff]  ;;  %v31310_v19 = vld [vmem:[#allocation4 + $0x18] sm:$0xff] }
 0x442   : > { %4897 = vst.msk [vmem:[#allocation4 + $0xf9] sm:$0xff] %vm4877_vm6, %v4863_v58  ;;  %v31227_v52 = vld [vmem:[#allocation4 + $0xc1] sm:$0xff]  ;;  %v21549_v58 = vld [vmem:[%s29684_s20 + $0xa8] sm:$0xff] }
 0x443   : > { %4896 = vst.msk [vmem:[#allocation4 + $0xf1] sm:$0xff] %vm4877_vm6, %v4862_v27  ;;  %v25334_v53 = vpop.f32.mrb[20].mxu0  ;;  %25390 = vmatprep.mubr.msk.f32.mxu1 %vm4877_vm6, %v31227_v52  ;;  %v27792_v27 = vpack.c.bf16 %v21549_v58, %v21548_v14 }
 0x444   : > { %v4865_v41 = vmax.f32 %v25334_v53, 0.0  ;;  %v4753_v42 = vpop.f32.mrb[21].mxu0  ;;  %25391 = vmatmul.mubr.msk.f32.gmra.mrb[16].mxu1 %vm4877_vm6, %v31232_v13  ;;  %v31315_v53 = vld [vmem:[#allocation4 + $0x20] sm:$0xff] }
 0x445   : > { %v4864_v43 = vmax.f32 %v4753_v42, 0.0  ;;  %v31242_v46 = vld [vmem:[#allocation4 + $0xe1] sm:$0xff] }
 0x446   : > { %4899 = vst.msk [vmem:[#allocation4 + $0x111] sm:$0xff] %vm4877_vm6, %v4865_v41  ;;  %v31237_v44 = vld [vmem:[#allocation4 + $0xd9] sm:$0xff]  ;;  %v21551_v42 = vld [vmem:[%s29684_s20 + $0xb8] sm:$0xff] }
 0x447   : > { %4898 = vst.msk [vmem:[#allocation4 + $0x109] sm:$0xff] %vm4877_vm6, %v4864_v43  ;;  %v25337_v12 = vpop.f32.mrb[22].mxu0  ;;  %25393 = vmatprep.mubr.msk.f32.mxu1 %vm4877_vm6, %v31237_v44  ;;  %v21550_v41 = vld [vmem:[%s29684_s20 + $0xb0] sm:$0xff]  ;;  %v31321_v43 = vld [vmem:[#allocation4 + $0x30] sm:$0xff] }
 0x448   : > { %v4867_v32 = vmax.f32 %v25337_v12, 0.0  ;;  %v4763_v20 = vpop.f32.mrb[23].mxu0  ;;  %25394 = vmatmul.mubr.msk.f32.gmra.mrb[18].mxu1 %vm4877_vm6, %v31242_v46  ;;  %v27796_v12 = vpack.c.bf16 %v21551_v42, %v21550_v41  ;;  %v5633_v42 = vld [vmem:[#allocation4 + $0x2] sm:$0xff] }
 0x449   : > { %v4866_v18 = vmax.f32 %v4763_v20, 0.0  ;;  %v31252_v23 = vld [vmem:[#allocation4 + $0xf9] sm:$0xff] }
 0x44a   : > { %4901 = vst.msk [vmem:[#allocation4 + $0x129] sm:$0xff] %vm4877_vm6, %v4867_v32  ;;  %v31247_v21 = vld [vmem:[#allocation4 + $0xf1] sm:$0xff] }
 0x44b   : > { %4900 = vst.msk [vmem:[#allocation4 + $0x121] sm:$0xff] %vm4877_vm6, %v4866_v18  ;;  %v25340_v22 = vpop.f32.mrb[24].mxu0  ;;  %25396 = vmatprep.mubr.msk.f32.mxu1 %vm4877_vm6, %v31247_v21  ;;  %v31325_v32 = vld [vmem:[#allocation4 + $0x38] sm:$0xff]  ;;  %v31331_v18 = vld [vmem:[#allocation4 + $0x48] sm:$0xff] }
 0x44c   : > { %v4869_v24 = vmax.f32 %v25340_v22, 0.0  ;;  %v4773_v16 = vpop.f32.mrb[25].mxu0  ;;  %25397 = vmatmul.mubr.msk.f32.gmra.mrb[20].mxu1 %vm4877_vm6, %v31252_v23  ;;  %v21585_v20 = vld [vmem:[%s29684_s20 + $0xc8] sm:$0xff] }
 0x44d   : > { %v4868_v25 = vmax.f32 %v4773_v16, 0.0  ;;  %v31262_v29 = vld [vmem:[#allocation4 + $0x111] sm:$0xff]  ;;  %v31341_v16 = vld [vmem:[#allocation4 + $0x60] sm:$0xff] }
 0x44e   : > { %4903 = vst.msk [vmem:[#allocation4 + $0x141] sm:$0xff] %vm4877_vm6, %v4869_v24  ;;  %v31257_v26 = vld [vmem:[#allocation4 + $0x109] sm:$0xff] }
 0x44f   : > { %4902 = vst.msk [vmem:[#allocation4 + $0x139] sm:$0xff] %vm4877_vm6, %v4868_v25  ;;  %v25343_v28 = vpop.f32.mrb[26].mxu0  ;;  %25399 = vmatprep.mubr.msk.f32.mxu1 %vm4877_vm6, %v31257_v26  ;;  %v31337_v24 = vld [vmem:[#allocation4 + $0x50] sm:$0xff]  ;;  %v31346_v25 = vld [vmem:[#allocation4 + $0x68] sm:$0xff] }
 0x450   : > { %v4871_v31 = vmax.f32 %v25343_v28, 0.0  ;;  %v4783_v34 = vpop.f32.mrb[27].mxu0  ;;  %25400 = vmatmul.mubr.msk.f32.gmra.mrb[22].mxu1 %vm4877_vm6, %v31262_v29  ;;  %v31350_v28 = vld [vmem:[#allocation4 + $0x78] sm:$0xff]  ;;  %v31402_v6 = vld [vmem:[#allocation4 + $0x110] sm:$0xff] }
 0x451   : > { %v4870_v35 = vmax.f32 %v4783_v34, 0.0  ;;  %v31272_v45 = vld [vmem:[#allocation4 + $0x129] sm:$0xff] }
 0x452   : > { %4905 = vst.msk [vmem:[#allocation4 + $0x159] sm:$0xff] %vm4877_vm6, %v4871_v31  ;;  %v31267_v36 = vld [vmem:[#allocation4 + $0x121] sm:$0xff]  ;;  %35272 = vst [vmem:[#allocation52_spill] sm:$0xff] %v31272_v45  ;;  %v31358_v34 = vld [vmem:[#allocation4 + $0x90] sm:$0xff] }
 0x453   : > { %35271 = vst [vmem:[#allocation51_spill] sm:$0xff] %v31267_v36  ;;  %4904 = vst.msk [vmem:[#allocation4 + $0x151] sm:$0xff] %vm4877_vm6, %v4870_v35  ;;  %v25346_v38 = vpop.f32.mrb[28].mxu0  ;;  %25402 = vmatprep.mubr.msk.f32.mxu1 %vm4877_vm6, %v31267_v36  ;;  %v31354_v31 = vld [vmem:[#allocation4 + $0x80] sm:$0xff]  ;;  %v31362_v35 = vld [vmem:[#allocation4 + $0x98] sm:$0xff] }
 0x454   : > { %v4873_v47 = vmax.f32 %v25346_v38, 0.0  ;;  %v4793_v48 = vpop.f32.mrb[29].mxu0  ;;  %25403 = vmatmul.mubr.msk.f32.gmra.mrb[24].mxu1 %vm4877_vm6, %v31272_v45  ;;  %v31366_v38 = vld [vmem:[#allocation4 + $0xa8] sm:$0xff]  ;;  %v31406_v8 = vld [vmem:[#allocation4 + $0x120] sm:$0xff] }
 0x455   : > { %v4872_v50 = vmax.f32 %v4793_v48, 0.0  ;;  %v31282_v56 = vld [vmem:[#allocation4 + $0x141] sm:$0xff] }
 0x456   : > { %4907 = vst.msk [vmem:[#allocation4 + $0x171] sm:$0xff] %vm4877_vm6, %v4873_v47  ;;  %v31277_v54 = vld [vmem:[#allocation4 + $0x139] sm:$0xff]  ;;  %35274 = vst [vmem:[#allocation67_spill] sm:$0xff] %v31282_v56  ;;  %v31370_v47 = vld [vmem:[#allocation4 + $0xb0] sm:$0xff] }
 0x457   : > { %35273 = vst [vmem:[#allocation64_spill] sm:$0xff] %v31277_v54  ;;  %4906 = vst.msk [vmem:[#allocation4 + $0x169] sm:$0xff] %vm4877_vm6, %v4872_v50  ;;  %v25349_v55 = vpop.f32.mrb[30].mxu0  ;;  %25405 = vmatprep.mubr.msk.f32.mxu1 %vm4877_vm6, %v31277_v54  ;;  %v31374_v48 = vld [vmem:[#allocation4 + $0xc0] sm:$0xff]  ;;  %v31378_v50 = vld [vmem:[#allocation4 + $0xc8] sm:$0xff] }
 0x458   : > { %v4875_v59 = vmax.f32 %v25349_v55, 0.0  ;;  %v4803_v61 = vpop.f32.mrb[31].mxu0  ;;  %25406 = vmatmul.mubr.msk.f32.gmra.mrb[26].mxu1 %vm4877_vm6, %v31282_v56  ;;  %v31382_v55 = vld [vmem:[#allocation4 + $0xd8] sm:$0xff]  ;;  %v31418_v14 = vld [vmem:[#allocation4 + $0x140] sm:$0xff]  ;;  %v21591_v36 = vld [vmem:[%s29684_s20 + $0xf8] sm:$0xff] }
 0x459   : > { %v4874_v62 = vmax.f32 %v4803_v61, 0.0  ;;  %v31292_v1 = vld [vmem:[#allocation4 + $0x159] sm:$0xff]  ;;  %v31390_v61 = vld [vmem:[#allocation4 + $0xf0] sm:$0xff]  ;;  %v31449_v45 = vld [vmem:[#allocation4 + $0x22] sm:$0xff] }
 0x45a   : > { %4909 = vst.msk [vmem:[#allocation4 + $0x189] sm:$0xff] %vm4877_vm6, %v4875_v59  ;;  %v31287_v63 = vld [vmem:[#allocation4 + $0x151] sm:$0xff]  ;;  %35276 = vst [vmem:[#allocation71_spill] sm:$0xff] %v31292_v1  ;;  %v31386_v59 = vld [vmem:[#allocation4 + $0xe0] sm:$0xff] }
 0x45b   : > { %35275 = vst [vmem:[#allocation70_spill] sm:$0xff] %v31287_v63  ;;  %4908 = vst.msk [vmem:[#allocation4 + $0x181] sm:$0xff] %vm4877_vm6, %v4874_v62  ;;  %25408 = vmatprep.mubr.msk.f32.mxu1 %vm4877_vm6, %v31287_v63  ;;  %v31394_v62 = vld [vmem:[#allocation4 + $0xf8] sm:$0xff]  ;;  %v31422_v58 = vld [vmem:[#allocation4 + $0x150] sm:$0xff] }
 0x45c   : > { %25409 = vmatmul.mubr.msk.f32.gmra.mrb[28].mxu1 %vm4877_vm6, %v31292_v1  ;;  %v21588_v1 = vld [vmem:[%s29684_s20 + $0xe0] sm:$0xff]  ;;  %v21589_v63 = vld [vmem:[%s29684_s20 + $0xe8] sm:$0xff]  ;;  %35280 = vst [vmem:[#allocation46_spill] sm:$0xff] %v31449_v45 }
 0x45d   : > { %v31300_v4 = vld [vmem:[#allocation4 + $0x171] sm:$0xff]  ;;  %v31444_v56 = vld [vmem:[#allocation4 + $0x1a] sm:$0xff]  ;;  %v27808_v54 = vpack.c.bf16 %v21589_v63, %v21588_v1 }
 0x45e   : > { %v31296_v17 = vld [vmem:[#allocation4 + $0x169] sm:$0xff]  ;;  %35278 = vst [vmem:[#allocation75_spill] sm:$0xff] %v31300_v4  ;;  %35279 = vst [vmem:[#allocation45_spill] sm:$0xff] %v31444_v56 }
 0x45f   : > { %35277 = vst [vmem:[#allocation73_spill] sm:$0xff] %v31296_v17  ;;  %25411 = vmatprep.mubr.msk.f32.mxu1 %vm4877_vm6, %v31296_v17  ;;  %v31430_v41 = vld [vmem:[#allocation4 + $0x168] sm:$0xff] }
 0x460   : > { %25412 = vmatmul.mubr.msk.f32.gmra.mrb[30].mxu1 %vm4877_vm6, %v31300_v4  ;;  %v5634_v4 = vld [vmem:[#allocation4 + $0xa] sm:$0xff] }
 0x461   : > { %25430 = vmatprep.mubr.msk.f32.mxu1 %vm4877_vm6, %v4910_v3  ;;  %v31398_v3 = vld [vmem:[#allocation4 + $0x108] sm:$0xff] }
 0x462   : > { %v31465_v63 = vld [vmem:[#allocation4 + $0x4a] sm:$0xff] }
 0x463   : > { %35281 = vst [vmem:[#allocation47_spill] sm:$0xff] %v31465_v63 }
 0x464   : > { %25431 = vmatmul.mubr.msk.f32.vlgmr.msra.gmra.mrb[0].mxu1 %vm4877_vm6, %v4911_v9  ;;  %v31410_v9 = vld [vmem:[#allocation4 + $0x128] sm:$0xff] }
 0x465   : > { %25433 = vmatprep.mubr.msk.f32.mxu1 %vm4877_vm6, %v31310_v19  ;;  %27787 = vmatpush3.bf16.msra.mxu1 %v31149_v40  ;;  %v21584_v40 = vld [vmem:[%s29684_s20 + $0xc0] sm:$0xff] }
 0x466   : > { %27789 = vmatprep.subr.bf16.mxu1 %v27788_v10  ;;  %v31335_v22 = vpack.c.bf16 %v21585_v20, %v21584_v40  ;;  %v21586_v40 = vld [vmem:[%s29684_s20 + $0xd0] sm:$0xff]  ;;  %v21587_v20 = vld [vmem:[%s29684_s20 + $0xd8] sm:$0xff] }
 0x467   : > { %v27804_v17 = vpack.c.bf16 %v21587_v20, %v21586_v40  ;;  %v31455_v40 = vld [vmem:[#allocation4 + $0x32] sm:$0xff]  ;;  %v31459_v20 = vld [vmem:[#allocation4 + $0x3a] sm:$0xff] }
 0x468   : > { %25434 = vmatmul.mubr.msk.f32.gmra.mrb[2].mxu1 %vm4877_vm6, %v31315_v53 }
 0x469   : > { %25436 = vmatprep.mubr.msk.f32.mxu1 %vm4877_vm6, %v31321_v43  ;;  %27791 = vmatpush3.bf16.msra.mxu1 %v27788_v10  ;;  %v31414_v10 = vld [vmem:[#allocation4 + $0x138] sm:$0xff] }
 0x46a   : > { %27793 = vmatprep.subr.bf16.mxu1 %v27792_v27 }
 0x46c   : > { %25437 = vmatmul.mubr.msk.f32.gmra.mrb[4].mxu1 %vm4877_vm6, %v31325_v32 }
 0x46d   : > { %25439 = vmatprep.mubr.msk.f32.mxu1 %vm4877_vm6, %v31331_v18  ;;  %27795 = vmatpush3.bf16.msra.mxu1 %v27792_v27  ;;  %v31426_v27 = vld [vmem:[#allocation4 + $0x158] sm:$0xff] }
 0x46e   : > { %27797 = vmatprep.subr.bf16.mxu1 %v27796_v12 }
 0x470   : > { %25440 = vmatmul.mubr.msk.f32.gmra.mrb[6].mxu1 %vm4877_vm6, %v31337_v24 }
 0x471   : > { %25442 = vmatprep.mubr.msk.f32.mxu1 %vm4877_vm6, %v31341_v16  ;;  %27799 = vmatpush3.bf16.msra.mxu1 %v27796_v12  ;;  %v31434_v12 = vld [vmem:[#allocation4 + $0x170] sm:$0xff] }
 0x472   : > { %27801 = vmatprep.subr.bf16.mxu1 %v31335_v22 }
 0x474   : > { %25443 = vmatmul.mubr.msk.f32.gmra.mrb[8].mxu1 %vm4877_vm6, %v31346_v25 }
 0x475   : > { %25445 = vmatprep.mubr.msk.f32.mxu1 %vm4877_vm6, %v31350_v28 }
 0x478   : > { %25446 = vmatmul.mubr.msk.f32.gmra.mrb[10].mxu1 %vm4877_vm6, %v31354_v31 }
 0x479   : > { %25448 = vmatprep.mubr.msk.f32.mxu1 %vm4877_vm6, %v31358_v34 }
 0x47c   : > { %25449 = vmatmul.mubr.msk.f32.gmra.mrb[12].mxu1 %vm4877_vm6, %v31362_v35 }
 0x47d   : > { %25451 = vmatprep.mubr.msk.f32.mxu1 %vm4877_vm6, %v31366_v38 }
 0x480   : > { %25452 = vmatmul.mubr.msk.f32.gmra.mrb[14].mxu1 %vm4877_vm6, %v31370_v47 }
 0x481   : > { %25454 = vmatprep.mubr.msk.f32.mxu1 %vm4877_vm6, %v31374_v48 }
 0x484   : > { %25455 = vmatmul.mubr.msk.f32.gmra.mrb[16].mxu1 %vm4877_vm6, %v31378_v50 }
 0x485   : > { %25457 = vmatprep.mubr.msk.f32.mxu1 %vm4877_vm6, %v31382_v55 }
 0x488   : > { %25458 = vmatmul.mubr.msk.f32.gmra.mrb[18].mxu1 %vm4877_vm6, %v31386_v59 }
 0x489   : > { %25460 = vmatprep.mubr.msk.f32.mxu1 %vm4877_vm6, %v31390_v61 }
 0x48c   : > { %25461 = vmatmul.mubr.msk.f32.gmra.mrb[20].mxu1 %vm4877_vm6, %v31394_v62 }
 0x48d   : > { %25463 = vmatprep.mubr.msk.f32.mxu1 %vm4877_vm6, %v31398_v3 }
 0x490   : > { %25464 = vmatmul.mubr.msk.f32.gmra.mrb[22].mxu1 %vm4877_vm6, %v31402_v6 }
 0x491   : > { %25466 = vmatprep.mubr.msk.f32.mxu1 %vm4877_vm6, %v31406_v8 }
 0x494   : > { %25467 = vmatmul.mubr.msk.f32.gmra.mrb[24].mxu1 %vm4877_vm6, %v31410_v9 }
 0x495   : > { %25469 = vmatprep.mubr.msk.f32.mxu1 %vm4877_vm6, %v31414_v10 }
 0x498   : > { %25470 = vmatmul.mubr.msk.f32.gmra.mrb[26].mxu1 %vm4877_vm6, %v31418_v14 }
 0x499   : > { %25472 = vmatprep.mubr.msk.f32.mxu1 %vm4877_vm6, %v31422_v58 }
 0x49c   : > { %25473 = vmatmul.mubr.msk.f32.gmra.mrb[28].mxu1 %vm4877_vm6, %v31426_v27 }
 0x49d   : > { %25475 = vmatprep.mubr.msk.f32.mxu1 %vm4877_vm6, %v31430_v41 }
 0x4a0   : > { %25476 = vmatmul.mubr.msk.f32.gmra.mrb[30].mxu1 %vm4877_vm6, %v31434_v12 }
 0x4a1   : > { %25494 = vmatprep.mubr.msk.f32.mxu1 %vm4877_vm6, %v5633_v42  ;;  %v21590_v42 = vld [vmem:[%s29684_s20 + $0xf0] sm:$0xff] }
 0x4a4   : > { %25495 = vmatmul.mubr.msk.f32.vlgmr.msra.gmra.mrb[0].mxu1 %vm4877_vm6, %v5634_v4  ;;  %v27812_v4 = vpack.c.bf16 %v21591_v36, %v21590_v42  ;;  %v31473_v36 = vld [vmem:[#allocation4 + $0x62] sm:$0xff]  ;;  %v31489_v42 = vld [vmem:[#allocation4 + $0x92] sm:$0xff] }
 0x4a5   : > { %25497 = vmatprep.mubr.msk.f32.mxu1 %vm4877_vm6, %v31444_v56  ;;  %27803 = vmatpush3.bf16.msra.mxu1 %v31335_v22  ;;  %v21624_v22 = vld [vmem:[%s29684_s20 + $0x100] sm:$0xff]  ;;  %v21625_v56 = vld [vmem:[%s29684_s20 + $0x108] sm:$0xff]  ;;  %35283 = vst [vmem:[#allocation77_spill] sm:$0xff] %v31473_v36  ;;  %35287 = vst [vmem:[#allocation55_spill] sm:$0xff] %v31489_v42 }
 0x4a6   : > { %27805 = vmatprep.subr.bf16.mxu1 %v27804_v17  ;;  %v27816_v1 = vpack.c.bf16 %v21625_v56, %v21624_v22  ;;  %v31485_v56 = vld [vmem:[#allocation4 + $0x82] sm:$0xff]  ;;  %v31497_v22 = vld [vmem:[#allocation4 + $0xaa] sm:$0xff] }
 0x4a7   : > { %35286 = vst [vmem:[#allocation54_spill] sm:$0xff] %v31485_v56  ;;  %35289 = vst [vmem:[#allocation57_spill] sm:$0xff] %v31497_v22 }
 0x4a8   : > { %25498 = vmatmul.mubr.msk.f32.gmra.mrb[2].mxu1 %vm4877_vm6, %v31449_v45  ;;  %v31469_v45 = vld [vmem:[#allocation4 + $0x52] sm:$0xff] }
 0x4a9   : > { %25500 = vmatprep.mubr.msk.f32.mxu1 %vm4877_vm6, %v31455_v40  ;;  %27807 = vmatpush3.bf16.msra.mxu1 %v27804_v17  ;;  %35282 = vst [vmem:[#allocation48_spill] sm:$0xff] %v31469_v45  ;;  %v31477_v17 = vld [vmem:[#allocation4 + $0x6a] sm:$0xff] }
 0x4aa   : > { %27809 = vmatprep.subr.bf16.mxu1 %v27808_v54  ;;  %35284 = vst [vmem:[#allocation78_spill] sm:$0xff] %v31477_v17 }
 0x4ac   : > { %25501 = vmatmul.mubr.msk.f32.gmra.mrb[4].mxu1 %vm4877_vm6, %v31459_v20 }
 0x4ad   : > { %25503 = vmatprep.mubr.msk.f32.mxu1 %vm4877_vm6, %v31465_v63  ;;  %27811 = vmatpush3.bf16.msra.mxu1 %v27808_v54  ;;  %v31481_v54 = vld [vmem:[#allocation4 + $0x7a] sm:$0xff]  ;;  %v21631_v63 = vld [vmem:[%s29684_s20 + $0x138] sm:$0xff] }
 0x4ae   : > { %27813 = vmatprep.subr.bf16.mxu1 %v27812_v4  ;;  %35285 = vst [vmem:[#allocation53_spill] sm:$0xff] %v31481_v54 }
 0x4b0   : > { %25504 = vmatmul.mubr.msk.f32.gmra.mrb[6].mxu1 %vm4877_vm6, %v31469_v45  ;;  %v21630_v45 = vld [vmem:[%s29684_s20 + $0x130] sm:$0xff] }
 0x4b1   : > { %25506 = vmatprep.mubr.msk.f32.mxu1 %vm4877_vm6, %v31473_v36  ;;  %27815 = vmatpush3.bf16.msra.mxu1 %v27812_v4  ;;  %v31493_v4 = vld [vmem:[#allocation4 + $0x9a] sm:$0xff] }
 0x4b2   : > { %27817 = vmatprep.subr.bf16.mxu1 %v27816_v1  ;;  %35288 = vst [vmem:[#allocation56_spill] sm:$0xff] %v31493_v4  ;;  %v21629_v36 = vld [vmem:[%s29684_s20 + $0x128] sm:$0xff] }
 0x4b4   : > { %25507 = vmatmul.mubr.msk.f32.gmra.mrb[8].mxu1 %vm4877_vm6, %v31477_v17  ;;  %v21627_v17 = vld [vmem:[%s29684_s20 + $0x118] sm:$0xff] }
 0x4b5   : > { %25509 = vmatprep.mubr.msk.f32.mxu1 %vm4877_vm6, %v31481_v54  ;;  %v31501_v54 = vld [vmem:[#allocation4 + $0xb2] sm:$0xff] }
 0x4b6   : > { %35290 = vst [vmem:[#allocation58_spill] sm:$0xff] %v31501_v54 }
 0x4b8   : > { %25510 = vmatmul.mubr.msk.f32.gmra.mrb[10].mxu1 %vm4877_vm6, %v31485_v56  ;;  %v31505_v56 = vld [vmem:[#allocation4 + $0xc2] sm:$0xff] }
 0x4b9   : > { %25512 = vmatprep.mubr.msk.f32.mxu1 %vm4877_vm6, %v31489_v42  ;;  %35291 = vst [vmem:[#allocation59_spill] sm:$0xff] %v31505_v56  ;;  %v31509_v42 = vld [vmem:[#allocation4 + $0xca] sm:$0xff] }
 0x4ba   : > { %35292 = vst [vmem:[#allocation60_spill] sm:$0xff] %v31509_v42 }
 0x4bc   : > { %25513 = vmatmul.mubr.msk.f32.gmra.mrb[12].mxu1 %vm4877_vm6, %v31493_v4  ;;  %v31513_v4 = vld [vmem:[#allocation4 + $0xda] sm:$0xff] }
 0x4bd   : > { %25515 = vmatprep.mubr.msk.f32.mxu1 %vm4877_vm6, %v31497_v22  ;;  %35293 = vst [vmem:[#allocation61_spill] sm:$0xff] %v31513_v4  ;;  %v31517_v22 = vld [vmem:[#allocation4 + $0xe2] sm:$0xff] }
 0x4be   : > { %35294 = vst [vmem:[#allocation62_spill] sm:$0xff] %v31517_v22 }
 0x4c0   : > { %25516 = vmatmul.mubr.msk.f32.gmra.mrb[14].mxu1 %vm4877_vm6, %v31501_v54  ;;  %v31521_v54 = vld [vmem:[#allocation4 + $0xf2] sm:$0xff] }
 0x4c1   : > { %25518 = vmatprep.mubr.msk.f32.mxu1 %vm4877_vm6, %v31505_v56  ;;  %35295 = vst [vmem:[#allocation63_spill] sm:$0xff] %v31521_v54  ;;  %v31525_v56 = vld [vmem:[#allocation4 + $0xfa] sm:$0xff] }
 0x4c2   : > { %35296 = vst [vmem:[#allocation65_spill] sm:$0xff] %v31525_v56 }
 0x4c4   : > { %25519 = vmatmul.mubr.msk.f32.gmra.mrb[16].mxu1 %vm4877_vm6, %v31509_v42  ;;  %v31529_v42 = vld [vmem:[#allocation4 + $0x10a] sm:$0xff] }
 0x4c5   : > { %25521 = vmatprep.mubr.msk.f32.mxu1 %vm4877_vm6, %v31513_v4  ;;  %35297 = vst [vmem:[#allocation66_spill] sm:$0xff] %v31529_v42  ;;  %v31533_v4 = vld [vmem:[#allocation4 + $0x112] sm:$0xff] }
 0x4c6   : > { %35298 = vst [vmem:[#allocation68_spill] sm:$0xff] %v31533_v4 }
 0x4c8   : > { %25522 = vmatmul.mubr.msk.f32.gmra.mrb[18].mxu1 %vm4877_vm6, %v31517_v22  ;;  %v31537_v22 = vld [vmem:[#allocation4 + $0x122] sm:$0xff] }
 0x4c9   : > { %25524 = vmatprep.mubr.msk.f32.mxu1 %vm4877_vm6, %v31521_v54  ;;  %35299 = vst [vmem:[#allocation69_spill] sm:$0xff] %v31537_v22  ;;  %v31541_v54 = vld [vmem:[#allocation4 + $0x12a] sm:$0xff] }
 0x4ca   : > { %35300 = vst [vmem:[#allocation72_spill] sm:$0xff] %v31541_v54 }
 0x4cc   : > { %25525 = vmatmul.mubr.msk.f32.gmra.mrb[20].mxu1 %vm4877_vm6, %v31525_v56  ;;  %v31545_v56 = vld [vmem:[#allocation4 + $0x13a] sm:$0xff] }
 0x4cd   : > { %25527 = vmatprep.mubr.msk.f32.mxu1 %vm4877_vm6, %v31529_v42  ;;  %35301 = vst [vmem:[#allocation74_spill] sm:$0xff] %v31545_v56  ;;  %v31553_v42 = vld [vmem:[#allocation4 + $0x152] sm:$0xff] }
 0x4ce   : > { %35303 = vst [vmem:[#allocation79_spill] sm:$0xff] %v31553_v42 }
 0x4d0   : > { %25528 = vmatmul.mubr.msk.f32.gmra.mrb[22].mxu1 %vm4877_vm6, %v31533_v4  ;;  %v31549_v4 = vld [vmem:[#allocation4 + $0x142] sm:$0xff] }
 0x4d1   : > { %25530 = vmatprep.mubr.msk.f32.mxu1 %vm4877_vm6, %v31537_v22  ;;  %35302 = vst [vmem:[#allocation76_spill] sm:$0xff] %v31549_v4  ;;  %v31557_v22 = vld [vmem:[#allocation4 + $0x15a] sm:$0xff] }
 0x4d2   : > { %35304 = vst [vmem:[#allocation80_spill] sm:$0xff] %v31557_v22 }
 0x4d4   : > { %25531 = vmatmul.mubr.msk.f32.gmra.mrb[24].mxu1 %vm4877_vm6, %v31541_v54  ;;  %v31561_v54 = vld [vmem:[#allocation4 + $0x16a] sm:$0xff] }
 0x4d5   : > { %25533 = vmatprep.mubr.msk.f32.mxu1 %vm4877_vm6, %v31545_v56  ;;  %35305 = vst [vmem:[#allocation81_spill] sm:$0xff] %v31561_v54  ;;  %v31565_v56 = vld [vmem:[#allocation4 + $0x172] sm:$0xff] }
 0x4d6   : > { %35306 = vst [vmem:[#allocation82_spill] sm:$0xff] %v31565_v56 }
 0x4d8   : > { %25534 = vmatmul.mubr.msk.f32.gmra.mrb[26].mxu1 %vm4877_vm6, %v31549_v4  ;;  %v21626_v4 = vld [vmem:[%s29684_s20 + $0x110] sm:$0xff] }
 0x4d9   : > { %25536 = vmatprep.mubr.msk.f32.mxu1 %vm4877_vm6, %v31553_v42  ;;  %v27820_v42 = vpack.c.bf16 %v21627_v17, %v21626_v4  ;;  %v21664_v17 = vld [vmem:[%s29684_s20 + $0x140] sm:$0xff]  ;;  %v21665_v4 = vld [vmem:[%s29684_s20 + $0x148] sm:$0xff] }
 0x4dc   : > { %25537 = vmatmul.mubr.msk.f32.gmra.mrb[28].mxu1 %vm4877_vm6, %v31557_v22  ;;  %v21628_v22 = vld [vmem:[%s29684_s20 + $0x120] sm:$0xff] }
 0x4dd   : > { %25539 = vmatprep.mubr.msk.f32.mxu1 %vm4877_vm6, %v31561_v54  ;;  %v27824_v54 = vpack.c.bf16 %v21629_v36, %v21628_v22  ;;  %v21667_v36 = vld [vmem:[%s29684_s20 + $0x158] sm:$0xff]  ;;  %v21669_v22 = vld [vmem:[%s29684_s20 + $0x168] sm:$0xff] }
 0x4e0   : > { %25540 = vmatmul.mubr.msk.f32.gmra.mrb[30].mxu1 %vm4877_vm6, %v31565_v56 }
 0x4e1   : > { %25558 = vmatprep.mubr.msk.f32.mxu1 %vm4877_vm6, %v31310_v19  ;;  %v27828_v19 = vpack.c.bf16 %v21631_v63, %v21630_v45  ;;  %v31637_v45 = vld [vmem:[#allocation4 + $0x180] sm:$0xff]  ;;  %v31641_v63 = vld [vmem:[#allocation4 + $0x188] sm:$0xff] }
 0x4e4   : > { %25559 = vmatmul.mubr.msk.f32.vlgmr.msra.gmra.mrb[0].mxu1 %vm4877_vm6, %v31315_v53  ;;  %v27832_v53 = vpack.c.bf16 %v21665_v4, %v21664_v17  ;;  %v21670_v17 = vld [vmem:[%s29684_s20 + $0x170] sm:$0xff]  ;;  %v21671_v4 = vld [vmem:[%s29684_s20 + $0x178] sm:$0xff] }
 0x4e5   : > { %25561 = vmatprep.mubr.msk.f32.mxu1 %vm4877_vm6, %v31321_v43  ;;  %27819 = vmatpush3.bf16.msra.mxu1 %v27816_v1  ;;  %v21666_v1 = vld [vmem:[%s29684_s20 + $0x150] sm:$0xff] }
 0x4e6   : > { %27821 = vmatprep.subr.bf16.mxu1 %v27820_v42 }
 0x4e8   : > { %25562 = vmatmul.mubr.msk.f32.gmra.mrb[2].mxu1 %vm4877_vm6, %v31325_v32 }
 0x4e9   : > { %25564 = vmatprep.mubr.msk.f32.mxu1 %vm4877_vm6, %v31331_v18  ;;  %27823 = vmatpush3.bf16.msra.mxu1 %v27820_v42  ;;  %v21668_v42 = vld [vmem:[%s29684_s20 + $0x160] sm:$0xff] }
 0x4ea   : > { %27825 = vmatprep.subr.bf16.mxu1 %v27824_v54 }
 0x4ec   : > { %25565 = vmatmul.mubr.msk.f32.gmra.mrb[4].mxu1 %vm4877_vm6, %v31337_v24 }
 0x4ed   : > { %25567 = vmatprep.mubr.msk.f32.mxu1 %vm4877_vm6, %v31341_v16  ;;  %27827 = vmatpush3.bf16.msra.mxu1 %v27824_v54  ;;  %v27836_v54 = vpack.c.bf16 %v21667_v36, %v21666_v1  ;;  %v21704_v1 = vld [vmem:[%s29684_s20 + $0x180] sm:$0xff]  ;;  %v21705_v36 = vld [vmem:[%s29684_s20 + $0x188] sm:$0xff] }
 0x4ee   : > { %27829 = vmatprep.subr.bf16.mxu1 %v27828_v19 }
 0x4f0   : > { %25568 = vmatmul.mubr.msk.f32.gmra.mrb[6].mxu1 %vm4877_vm6, %v31346_v25 }
 0x4f1   : > { %25570 = vmatprep.mubr.msk.f32.mxu1 %vm4877_vm6, %v31350_v28  ;;  %27831 = vmatpush3.bf16.msra.mxu1 %v27828_v19  ;;  %v27840_v19 = vpack.c.bf16 %v21669_v22, %v21668_v42  ;;  %v21744_v42 = vld [vmem:[%s29684_s20 + $0x1c0] sm:$0xff]  ;;  %v21745_v22 = vld [vmem:[%s29684_s20 + $0x1c8] sm:$0xff] }
 0x4f2   : > { %27833 = vmatprep.subr.bf16.mxu1 %v27832_v53 }
 0x4f4   : > { %25571 = vmatmul.mubr.msk.f32.gmra.mrb[8].mxu1 %vm4877_vm6, %v31354_v31 }
 0x4f5   : > { %25573 = vmatprep.mubr.msk.f32.mxu1 %vm4877_vm6, %v31358_v34 }
 0x4f8   : > { %25574 = vmatmul.mubr.msk.f32.gmra.mrb[10].mxu1 %vm4877_vm6, %v31362_v35 }
 0x4f9   : > { %25576 = vmatprep.mubr.msk.f32.mxu1 %vm4877_vm6, %v31366_v38 }
 0x4fc   : > { %25577 = vmatmul.mubr.msk.f32.gmra.mrb[12].mxu1 %vm4877_vm6, %v31370_v47 }
 0x4fd   : > { %25579 = vmatprep.mubr.msk.f32.mxu1 %vm4877_vm6, %v31374_v48 }
 0x500   : > { %25580 = vmatmul.mubr.msk.f32.gmra.mrb[14].mxu1 %vm4877_vm6, %v31378_v50 }
 0x501   : > { %25582 = vmatprep.mubr.msk.f32.mxu1 %vm4877_vm6, %v31382_v55 }
 0x504   : > { %25583 = vmatmul.mubr.msk.f32.gmra.mrb[16].mxu1 %vm4877_vm6, %v31386_v59 }
 0x505   : > { %25585 = vmatprep.mubr.msk.f32.mxu1 %vm4877_vm6, %v31390_v61 }
 0x508   : > { %25586 = vmatmul.mubr.msk.f32.gmra.mrb[18].mxu1 %vm4877_vm6, %v31394_v62 }
 0x509   : > { %25588 = vmatprep.mubr.msk.f32.mxu1 %vm4877_vm6, %v31398_v3 }
 0x50c   : > { %25589 = vmatmul.mubr.msk.f32.gmra.mrb[20].mxu1 %vm4877_vm6, %v31402_v6 }
 0x50d   : > { %25591 = vmatprep.mubr.msk.f32.mxu1 %vm4877_vm6, %v31406_v8 }
 0x510   : > { %25592 = vmatmul.mubr.msk.f32.gmra.mrb[22].mxu1 %vm4877_vm6, %v31410_v9 }
 0x511   : > { %25594 = vmatprep.mubr.msk.f32.mxu1 %vm4877_vm6, %v31414_v10 }
 0x514   : > { %25595 = vmatmul.mubr.msk.f32.gmra.mrb[24].mxu1 %vm4877_vm6, %v31418_v14 }
 0x515   : > { %25597 = vmatprep.mubr.msk.f32.mxu1 %vm4877_vm6, %v31422_v58 }
 0x518   : > { %25598 = vmatmul.mubr.msk.f32.gmra.mrb[26].mxu1 %vm4877_vm6, %v31426_v27 }
 0x519   : > { %25600 = vmatprep.mubr.msk.f32.mxu1 %vm4877_vm6, %v31430_v41 }
 0x51c   : > { %25601 = vmatmul.mubr.msk.f32.gmra.mrb[28].mxu1 %vm4877_vm6, %v31434_v12 }
 0x51d   : > { %25603 = vmatprep.mubr.msk.f32.mxu1 %vm4877_vm6, %v31637_v45 }
 0x520   : > { %25604 = vmatmul.mubr.msk.f32.gmra.mrb[30].mxu1 %vm4877_vm6, %v31641_v63 }
 0x521   : > { %25622 = vmatprep.mubr.msk.f32.mxu1 %vm4877_vm6, %v31157_v30  ;;  %v27844_v30 = vpack.c.bf16 %v21671_v4, %v21670_v17  ;;  %v35319_v17 = vld [vmem:[#allocation77_spill] sm:$0xff]  ;;  %v27864_v4 = vpack.c.bf16 %v21745_v22, %v21744_v42  ;;  %v31793_v42 = vld [vmem:[#allocation4 + $0x18a] sm:$0xff] }
 0x522   : > { %v21746_v22 = vld [vmem:[%s29684_s20 + $0x1d0] sm:$0xff] }
 0x524   : > { %25623 = vmatmul.mubr.msk.f32.vlgmr.msra.gmra.mrb[0].mxu1 %vm4877_vm6, %v31162_v33  ;;  %v27848_v33 = vpack.c.bf16 %v21705_v36, %v21704_v1  ;;  %v35321_v1 = vld [vmem:[#allocation53_spill] sm:$0xff]  ;;  %v35322_v36 = vld [vmem:[#allocation54_spill] sm:$0xff] }
 0x525   : > { %25625 = vmatprep.mubr.msk.f32.mxu1 %vm4877_vm6, %v31167_v37  ;;  %27835 = vmatpush3.bf16.msra.mxu1 %v27832_v53  ;;  %v35307_v37 = vld [vmem:[#allocation51_spill] sm:$0xff] }
 0x526   : > { %27837 = vmatprep.subr.bf16.mxu1 %v27836_v54  ;;  %v35317_v53 = vld [vmem:[#allocation47_spill] sm:$0xff] }
 0x528   : > { %25626 = vmatmul.mubr.msk.f32.gmra.mrb[2].mxu1 %vm4877_vm6, %v31172_v39  ;;  %v35308_v39 = vld [vmem:[#allocation52_spill] sm:$0xff] }
 0x529   : > { %25628 = vmatprep.mubr.msk.f32.mxu1 %vm4877_vm6, %v31177_v49  ;;  %27839 = vmatpush3.bf16.msra.mxu1 %v27836_v54  ;;  %v35309_v49 = vld [vmem:[#allocation64_spill] sm:$0xff] }
 0x52a   : > { %27841 = vmatprep.subr.bf16.mxu1 %v27840_v19 }
 0x52c   : > { %25629 = vmatmul.mubr.msk.f32.gmra.mrb[4].mxu1 %vm4877_vm6, %v31182_v51  ;;  %v35310_v51 = vld [vmem:[#allocation67_spill] sm:$0xff] }
 0x52d   : > { %25631 = vmatprep.mubr.msk.f32.mxu1 %vm4877_vm6, %v31187_v57  ;;  %27843 = vmatpush3.bf16.msra.mxu1 %v27840_v19  ;;  %v35311_v57 = vld [vmem:[#allocation70_spill] sm:$0xff]  ;;  %v35318_v19 = vld [vmem:[#allocation48_spill] sm:$0xff] }
 0x52e   : > { %27845 = vmatprep.subr.bf16.mxu1 %v27844_v30 }
 0x530   : > { %25632 = vmatmul.mubr.msk.f32.gmra.mrb[6].mxu1 %vm4877_vm6, %v31192_v60  ;;  %v35312_v60 = vld [vmem:[#allocation71_spill] sm:$0xff] }
 0x531   : > { %25634 = vmatprep.mubr.msk.f32.mxu1 %vm4877_vm6, %v31197_v0  ;;  %27847 = vmatpush3.bf16.msra.mxu1 %v27844_v30  ;;  %v35313_v0 = vld [vmem:[#allocation73_spill] sm:$0xff]  ;;  %v35320_v30 = vld [vmem:[#allocation78_spill] sm:$0xff] }
 0x532   : > { %27849 = vmatprep.subr.bf16.mxu1 %v27848_v33 }
 0x534   : > { %25635 = vmatmul.mubr.msk.f32.gmra.mrb[8].mxu1 %vm4877_vm6, %v31202_v2  ;;  %v35314_v2 = vld [vmem:[#allocation75_spill] sm:$0xff] }
 0x535   : > { %25637 = vmatprep.mubr.msk.f32.mxu1 %vm4877_vm6, %v31207_v5  ;;  %v31713_v5 = vld [vmem:[#allocation4 + $0x181] sm:$0xff] }
 0x538   : > { %25638 = vmatmul.mubr.msk.f32.gmra.mrb[10].mxu1 %vm4877_vm6, %v31212_v7  ;;  %v31717_v7 = vld [vmem:[#allocation4 + $0x189] sm:$0xff] }
 0x539   : > { %25640 = vmatprep.mubr.msk.f32.mxu1 %vm4877_vm6, %v31217_v11  ;;  %v21706_v11 = vld [vmem:[%s29684_s20 + $0x190] sm:$0xff] }
 0x53c   : > { %25641 = vmatmul.mubr.msk.f32.gmra.mrb[12].mxu1 %vm4877_vm6, %v31222_v15  ;;  %v21707_v15 = vld [vmem:[%s29684_s20 + $0x198] sm:$0xff] }
 0x53d   : > { %25643 = vmatprep.mubr.msk.f32.mxu1 %vm4877_vm6, %v31227_v52  ;;  %v35315_v52 = vld [vmem:[#allocation45_spill] sm:$0xff] }
 0x540   : > { %25644 = vmatmul.mubr.msk.f32.gmra.mrb[14].mxu1 %vm4877_vm6, %v31232_v13  ;;  %v27852_v13 = vpack.c.bf16 %v21707_v15, %v21706_v11  ;;  %v35332_v11 = vld [vmem:[#allocation65_spill] sm:$0xff]  ;;  %v35333_v15 = vld [vmem:[#allocation66_spill] sm:$0xff] }
 0x541   : > { %25646 = vmatprep.mubr.msk.f32.mxu1 %vm4877_vm6, %v31237_v44  ;;  %v21708_v44 = vld [vmem:[%s29684_s20 + $0x1a0] sm:$0xff] }
 0x544   : > { %25647 = vmatmul.mubr.msk.f32.gmra.mrb[16].mxu1 %vm4877_vm6, %v31242_v46  ;;  %v21709_v46 = vld [vmem:[%s29684_s20 + $0x1a8] sm:$0xff] }
 0x545   : > { %25649 = vmatprep.mubr.msk.f32.mxu1 %vm4877_vm6, %v31247_v21  ;;  %v35316_v21 = vld [vmem:[#allocation46_spill] sm:$0xff] }
 0x548   : > { %25650 = vmatmul.mubr.msk.f32.gmra.mrb[18].mxu1 %vm4877_vm6, %v31252_v23  ;;  %v27856_v23 = vpack.c.bf16 %v21709_v46, %v21708_v44  ;;  %v35336_v44 = vld [vmem:[#allocation72_spill] sm:$0xff]  ;;  %v35337_v46 = vld [vmem:[#allocation74_spill] sm:$0xff] }
 0x549   : > { %25652 = vmatprep.mubr.msk.f32.mxu1 %vm4877_vm6, %v31257_v26  ;;  %v21710_v26 = vld [vmem:[%s29684_s20 + $0x1b0] sm:$0xff] }
 0x54c   : > { %25653 = vmatmul.mubr.msk.f32.gmra.mrb[20].mxu1 %vm4877_vm6, %v31262_v29  ;;  %v21711_v29 = vld [vmem:[%s29684_s20 + $0x1b8] sm:$0xff] }
 0x54d   : > { %25655 = vmatprep.mubr.msk.f32.mxu1 %vm4877_vm6, %v35307_v37  ;;  %v27860_v54 = vpack.c.bf16 %v21711_v29, %v21710_v26  ;;  %v35324_v37 = vld [vmem:[#allocation56_spill] sm:$0xff]  ;;  %v35341_v29 = vld [vmem:[#allocation81_spill] sm:$0xff] }
 0x54e   : > { %v35340_v26 = vld [vmem:[#allocation80_spill] sm:$0xff] }
 0x550   : > { %25656 = vmatmul.mubr.msk.f32.gmra.mrb[22].mxu1 %vm4877_vm6, %v35308_v39  ;;  %v35325_v39 = vld [vmem:[#allocation57_spill] sm:$0xff] }
 0x551   : > { %25658 = vmatprep.mubr.msk.f32.mxu1 %vm4877_vm6, %v35309_v49  ;;  %v35326_v49 = vld [vmem:[#allocation58_spill] sm:$0xff] }
 0x554   : > { %25659 = vmatmul.mubr.msk.f32.gmra.mrb[24].mxu1 %vm4877_vm6, %v35310_v51  ;;  %v35327_v51 = vld [vmem:[#allocation59_spill] sm:$0xff] }
 0x555   : > { %25661 = vmatprep.mubr.msk.f32.mxu1 %vm4877_vm6, %v35311_v57  ;;  %v35328_v57 = vld [vmem:[#allocation60_spill] sm:$0xff] }
 0x558   : > { %25662 = vmatmul.mubr.msk.f32.gmra.mrb[26].mxu1 %vm4877_vm6, %v35312_v60  ;;  %v35329_v60 = vld [vmem:[#allocation61_spill] sm:$0xff] }
 0x559   : > { %25664 = vmatprep.mubr.msk.f32.mxu1 %vm4877_vm6, %v35313_v0  ;;  %v35330_v0 = vld [vmem:[#allocation62_spill] sm:$0xff] }
 0x55c   : > { %25665 = vmatmul.mubr.msk.f32.gmra.mrb[28].mxu1 %vm4877_vm6, %v35314_v2  ;;  %v35331_v2 = vld [vmem:[#allocation63_spill] sm:$0xff] }
 0x55d   : > { %25667 = vmatprep.mubr.msk.f32.mxu1 %vm4877_vm6, %v31713_v5 }
 0x560   : > { %25668 = vmatmul.mubr.msk.f32.gmra.mrb[30].mxu1 %vm4877_vm6, %v31717_v7 }
 0x561   : > { %25686 = vmatprep.mubr.msk.f32.mxu1 %vm4877_vm6, %v35315_v52  ;;  %v35334_v52 = vld [vmem:[#allocation68_spill] sm:$0xff] }
 0x564   : > { %25687 = vmatmul.mubr.msk.f32.vlgmr.msra.gmra.mrb[0].mxu1 %vm4877_vm6, %v35316_v21  ;;  %v35338_v21 = vld [vmem:[#allocation76_spill] sm:$0xff] }
 0x565   : > { %25689 = vmatprep.mubr.msk.f32.mxu1 %vm4877_vm6, %v31455_v40  ;;  %27851 = vmatpush3.bf16.msra.mxu1 %v27848_v33  ;;  %v35323_v33 = vld [vmem:[#allocation55_spill] sm:$0xff] }
 0x566   : > { %27853 = vmatprep.subr.bf16.mxu1 %v27852_v13 }
 0x568   : > { %25690 = vmatmul.mubr.msk.f32.gmra.mrb[2].mxu1 %vm4877_vm6, %v31459_v20 }
 0x569   : > { %25692 = vmatprep.mubr.msk.f32.mxu1 %vm4877_vm6, %v35317_v53  ;;  %27855 = vmatpush3.bf16.msra.mxu1 %v27852_v13  ;;  %v35335_v13 = vld [vmem:[#allocation69_spill] sm:$0xff] }
 0x56a   : > { %27857 = vmatprep.subr.bf16.mxu1 %v27856_v23 }
 0x56c   : > { %25693 = vmatmul.mubr.msk.f32.gmra.mrb[4].mxu1 %vm4877_vm6, %v35318_v19 }
 0x56d   : > { %25695 = vmatprep.mubr.msk.f32.mxu1 %vm4877_vm6, %v35319_v17  ;;  %27859 = vmatpush3.bf16.msra.mxu1 %v27856_v23  ;;  %v35339_v23 = vld [vmem:[#allocation79_spill] sm:$0xff] }
 0x56e   : > { %27861 = vmatprep.subr.bf16.mxu1 %v27860_v54 }
 0x570   : > { %25696 = vmatmul.mubr.msk.f32.gmra.mrb[6].mxu1 %vm4877_vm6, %v35320_v30 }
 0x571   : > { %25698 = vmatprep.mubr.msk.f32.mxu1 %vm4877_vm6, %v35321_v1  ;;  %27863 = vmatpush3.bf16.msra.mxu1 %v27860_v54  ;;  %v31789_v54 = vld [vmem:[#allocation4 + $0x182] sm:$0xff] }
 0x572   : > { %27865 = vmatprep.subr.bf16.mxu1 %v27864_v4  ;;  %35342 = vst [vmem:[#allocation51_spill] sm:$0xff] %v31789_v54 }
 0x574   : > { %25699 = vmatmul.mubr.msk.f32.gmra.mrb[8].mxu1 %vm4877_vm6, %v35322_v36 }
 0x575   : > { %25701 = vmatprep.mubr.msk.f32.mxu1 %vm4877_vm6, %v35323_v33 }
 0x578   : > { %25702 = vmatmul.mubr.msk.f32.gmra.mrb[10].mxu1 %vm4877_vm6, %v35324_v37 }
 0x579   : > { %25704 = vmatprep.mubr.msk.f32.mxu1 %vm4877_vm6, %v35325_v39 }
 0x57c   : > { %25705 = vmatmul.mubr.msk.f32.gmra.mrb[12].mxu1 %vm4877_vm6, %v35326_v49 }
 0x57d   : > { %25707 = vmatprep.mubr.msk.f32.mxu1 %vm4877_vm6, %v35327_v51 }
 0x580   : > { %25708 = vmatmul.mubr.msk.f32.gmra.mrb[14].mxu1 %vm4877_vm6, %v35328_v57 }
 0x581   : > { %25710 = vmatprep.mubr.msk.f32.mxu1 %vm4877_vm6, %v35329_v60 }
 0x584   : > { %25711 = vmatmul.mubr.msk.f32.gmra.mrb[16].mxu1 %vm4877_vm6, %v35330_v0 }
 0x585   : > { %25713 = vmatprep.mubr.msk.f32.mxu1 %vm4877_vm6, %v35331_v2 }
 0x588   : > { %25714 = vmatmul.mubr.msk.f32.gmra.mrb[18].mxu1 %vm4877_vm6, %v35332_v11 }
 0x589   : > { %25716 = vmatprep.mubr.msk.f32.mxu1 %vm4877_vm6, %v35333_v15 }
 0x58c   : > { %25717 = vmatmul.mubr.msk.f32.gmra.mrb[20].mxu1 %vm4877_vm6, %v35334_v52 }
 0x58d   : > { %25719 = vmatprep.mubr.msk.f32.mxu1 %vm4877_vm6, %v35335_v13 }
 0x590   : > { %25720 = vmatmul.mubr.msk.f32.gmra.mrb[22].mxu1 %vm4877_vm6, %v35336_v44 }
 0x591   : > { %25722 = vmatprep.mubr.msk.f32.mxu1 %vm4877_vm6, %v35337_v46  ;;  %v21751_v46 = vld [vmem:[%s29684_s20 + $0x1f8] sm:$0xff] }
 0x594   : > { %25723 = vmatmul.mubr.msk.f32.gmra.mrb[24].mxu1 %vm4877_vm6, %v35338_v21  ;;  %v21750_v21 = vld [vmem:[%s29684_s20 + $0x1f0] sm:$0xff] }
 0x595   : > { %25725 = vmatprep.mubr.msk.f32.mxu1 %vm4877_vm6, %v35339_v23  ;;  %v21747_v23 = vld [vmem:[%s29684_s20 + $0x1d8] sm:$0xff] }
 0x598   : > { %25726 = vmatmul.mubr.msk.f32.gmra.mrb[26].mxu1 %vm4877_vm6, %v35340_v26  ;;  %v21749_v26 = vld [vmem:[%s29684_s20 + $0x1e8] sm:$0xff] }
 0x599   : > { %25728 = vmatprep.mubr.msk.f32.mxu1 %vm4877_vm6, %v35341_v29  ;;  %v27868_v29 = vpack.c.bf16 %v21747_v23, %v21746_v22  ;;  %v21784_v23 = vld [vmem:[%s29684_s20 + $0x200] sm:$0xff]  ;;  %v21785_v22 = vld [vmem:[%s29684_s20 + $0x208] sm:$0xff] }
 0x59c   : > { %25729 = vmatmul.mubr.msk.f32.gmra.mrb[28].mxu1 %vm4877_vm6, %v31565_v56  ;;  %v21748_v56 = vld [vmem:[%s29684_s20 + $0x1e0] sm:$0xff] }
 0x59d   : > { %25731 = vmatprep.mubr.msk.f32.mxu1 %vm4877_vm6, %v31789_v54  ;;  %v27872_v54 = vpack.c.bf16 %v21749_v26, %v21748_v56  ;;  %v7619_v56 = vld [vmem:[#allocation4 + $0xe1] sm:$0xff]  ;;  %v7625_v26 = vld [vmem:[#allocation4 + $0x129] sm:$0xff] }
 0x5a0   : > { %25732 = vmatmul.mubr.msk.f32.gmra.mrb[30].mxu1 %vm4877_vm6, %v31793_v42 }
 0x5a1   : > { %25750 = vmatprep.mubr.msk.f32.mxu1 %vm4877_vm6, %v31321_v43  ;;  %v27876_v43 = vpack.c.bf16 %v21751_v46, %v21750_v21  ;;  %v7623_v46 = vld [vmem:[#allocation4 + $0x111] sm:$0xff]  ;;  %v7624_v21 = vld [vmem:[#allocation4 + $0x121] sm:$0xff] }
 0x5a4   : > { %25751 = vmatmul.mubr.msk.f32.vlgmr.msra.gmra.mrb[0].mxu1 %vm4877_vm6, %v31325_v32  ;;  %v27880_v32 = vpack.c.bf16 %v21785_v22, %v21784_v23  ;;  %v7629_v23 = vld [vmem:[#allocation4 + $0x159] sm:$0xff]  ;;  %v7630_v22 = vld [vmem:[#allocation4 + $0x169] sm:$0xff] }
 0x5a5   : > { %25753 = vmatprep.mubr.msk.f32.mxu1 %vm4877_vm6, %v31331_v18  ;;  %27867 = vmatpush3.bf16.msra.mxu1 %v27864_v4  ;;  %v7240_v18 = vld [vmem:[#allocation4 + $0x198] sm:$0xff]  ;;  %v7622_v4 = vld [vmem:[#allocation4 + $0x109] sm:$0xff] }
 0x5a6   : > { %27869 = vmatprep.subr.bf16.mxu1 %v27868_v29 }
 0x5a8   : > { %25754 = vmatmul.mubr.msk.f32.gmra.mrb[2].mxu1 %vm4877_vm6, %v31337_v24  ;;  %v7241_v24 = vld [vmem:[#allocation4 + $0x1a0] sm:$0xff] }
 0x5a9   : > { %25756 = vmatprep.mubr.msk.f32.mxu1 %vm4877_vm6, %v31341_v16  ;;  %27871 = vmatpush3.bf16.msra.mxu1 %v27868_v29  ;;  %v21786_v16 = vld [vmem:[%s29684_s20 + $0x210] sm:$0xff] }
 0x5aa   : > { %27873 = vmatprep.subr.bf16.mxu1 %v27872_v54  ;;  %v7626_v29 = vld [vmem:[#allocation4 + $0x139] sm:$0xff] }
 0x5ac   : > { %25757 = vmatmul.mubr.msk.f32.gmra.mrb[4].mxu1 %vm4877_vm6, %v31346_v25  ;;  %v21787_v25 = vld [vmem:[%s29684_s20 + $0x218] sm:$0xff] }
 0x5ad   : > { %25759 = vmatprep.mubr.msk.f32.mxu1 %vm4877_vm6, %v31350_v28  ;;  %27875 = vmatpush3.bf16.msra.mxu1 %v27872_v54  ;;  %v7604_v28 = vld [vmem:[#allocation4 + $0x31] sm:$0xff]  ;;  %v7627_v54 = vld [vmem:[#allocation4 + $0x141] sm:$0xff] }
 0x5ae   : > { %27877 = vmatprep.subr.bf16.mxu1 %v27876_v43 }
 0x5b0   : > { %25760 = vmatmul.mubr.msk.f32.gmra.mrb[6].mxu1 %vm4877_vm6, %v31354_v31  ;;  %v27884_v31 = vpack.c.bf16 %v21787_v25, %v21786_v16 }
 0x5b1   : > { %25762 = vmatprep.mubr.msk.f32.mxu1 %vm4877_vm6, %v31358_v34  ;;  %27879 = vmatpush3.bf16.msra.mxu1 %v27876_v43  ;;  %v7605_v34 = vld [vmem:[#allocation4 + $0x39] sm:$0xff]  ;;  %v7628_v43 = vld [vmem:[#allocation4 + $0x151] sm:$0xff] }
 0x5b2   : > { %27881 = vmatprep.subr.bf16.mxu1 %v27880_v32 }
 0x5b4   : > { %25763 = vmatmul.mubr.msk.f32.gmra.mrb[8].mxu1 %vm4877_vm6, %v31362_v35  ;;  %v21788_v35 = vld [vmem:[%s29684_s20 + $0x220] sm:$0xff] }
 0x5b5   : > { %25765 = vmatprep.mubr.msk.f32.mxu1 %vm4877_vm6, %v31366_v38  ;;  %v21789_v38 = vld [vmem:[%s29684_s20 + $0x228] sm:$0xff] }
 0x5b8   : > { %25766 = vmatmul.mubr.msk.f32.gmra.mrb[10].mxu1 %vm4877_vm6, %v31370_v47  ;;  %v7606_v47 = vld [vmem:[#allocation4 + $0x49] sm:$0xff] }
 0x5b9   : > { %25768 = vmatprep.mubr.msk.f32.mxu1 %vm4877_vm6, %v31374_v48  ;;  %v27888_v48 = vpack.c.bf16 %v21789_v38, %v21788_v35 }
 0x5bc   : > { %25769 = vmatmul.mubr.msk.f32.gmra.mrb[12].mxu1 %vm4877_vm6, %v31378_v50  ;;  %v7607_v50 = vld [vmem:[#allocation4 + $0x51] sm:$0xff] }
 0x5bd   : > { %25771 = vmatprep.mubr.msk.f32.mxu1 %vm4877_vm6, %v31382_v55  ;;  %v21790_v55 = vld [vmem:[%s29684_s20 + $0x230] sm:$0xff] }
 0x5c0   : > { %25772 = vmatmul.mubr.msk.f32.gmra.mrb[14].mxu1 %vm4877_vm6, %v31386_v59  ;;  %v21791_v59 = vld [vmem:[%s29684_s20 + $0x238] sm:$0xff] }
 0x5c1   : > { %25774 = vmatprep.mubr.msk.f32.mxu1 %vm4877_vm6, %v31390_v61  ;;  %v7608_v61 = vld [vmem:[#allocation4 + $0x61] sm:$0xff] }
 0x5c4   : > { %25775 = vmatmul.mubr.msk.f32.gmra.mrb[16].mxu1 %vm4877_vm6, %v31394_v62  ;;  %v27892_v62 = vpack.c.bf16 %v21791_v59, %v21790_v55 }
 0x5c5   : > { %25777 = vmatprep.mubr.msk.f32.mxu1 %vm4877_vm6, %v31398_v3  ;;  %v7609_v3 = vld [vmem:[#allocation4 + $0x69] sm:$0xff] }
 0x5c8   : > { %25778 = vmatmul.mubr.msk.f32.gmra.mrb[18].mxu1 %vm4877_vm6, %v31402_v6  ;;  %v7610_v6 = vld [vmem:[#allocation4 + $0x79] sm:$0xff] }
 0x5c9   : > { %25780 = vmatprep.mubr.msk.f32.mxu1 %vm4877_vm6, %v31406_v8  ;;  %v7611_v8 = vld [vmem:[#allocation4 + $0x81] sm:$0xff] }
 0x5cc   : > { %25781 = vmatmul.mubr.msk.f32.gmra.mrb[20].mxu1 %vm4877_vm6, %v31410_v9  ;;  %v7612_v9 = vld [vmem:[#allocation4 + $0x91] sm:$0xff] }
 0x5cd   : > { %25783 = vmatprep.mubr.msk.f32.mxu1 %vm4877_vm6, %v31414_v10  ;;  %v7613_v10 = vld [vmem:[#allocation4 + $0x99] sm:$0xff] }
 0x5d0   : > { %25784 = vmatmul.mubr.msk.f32.gmra.mrb[22].mxu1 %vm4877_vm6, %v31418_v14  ;;  %v7614_v14 = vld [vmem:[#allocation4 + $0xa9] sm:$0xff] }
 0x5d1   : > { %25786 = vmatprep.mubr.msk.f32.mxu1 %vm4877_vm6, %v31422_v58  ;;  %v7615_v58 = vld [vmem:[#allocation4 + $0xb1] sm:$0xff] }
 0x5d4   : > { %25787 = vmatmul.mubr.msk.f32.gmra.mrb[24].mxu1 %vm4877_vm6, %v31426_v27  ;;  %v7616_v27 = vld [vmem:[#allocation4 + $0xc1] sm:$0xff] }
 0x5d5   : > { %25789 = vmatprep.mubr.msk.f32.mxu1 %vm4877_vm6, %v31430_v41  ;;  %v7617_v41 = vld [vmem:[#allocation4 + $0xc9] sm:$0xff] }
 0x5d8   : > { %25790 = vmatmul.mubr.msk.f32.gmra.mrb[26].mxu1 %vm4877_vm6, %v31434_v12  ;;  %v7618_v12 = vld [vmem:[#allocation4 + $0xd9] sm:$0xff] }
 0x5d9   : > { %25792 = vmatprep.mubr.msk.f32.mxu1 %vm4877_vm6, %v31637_v45  ;;  %v7620_v45 = vld [vmem:[#allocation4 + $0xf1] sm:$0xff] }
 0x5dc   : > { %25793 = vmatmul.mubr.msk.f32.gmra.mrb[28].mxu1 %vm4877_vm6, %v31641_v63  ;;  %v7621_v63 = vld [vmem:[#allocation4 + $0xf9] sm:$0xff] }
 0x5dd   : > { %25795 = vmatprep.mubr.msk.f32.mxu1 %vm4877_vm6, %v7240_v18  ;;  %v7634_v18 = vld [vmem:[#allocation4 + $0x199] sm:$0xff] }
 0x5e0   : > { %25796 = vmatmul.mubr.msk.f32.gmra.mrb[30].mxu1 %vm4877_vm6, %v7241_v24  ;;  %v7635_v24 = vld [vmem:[#allocation4 + $0x1a1] sm:$0xff] }
 0x5e1   : > { %25814 = vmatprep.mubr.msk.f32.mxu1 %vm4877_vm6, %v7604_v28 }
 0x5e4   : > { %25815 = vmatmul.mubr.msk.f32.vlgmr.msra.gmra.mrb[0].mxu1 %vm4877_vm6, %v7605_v34 }
 0x5e5   : > { %25817 = vmatprep.mubr.msk.f32.mxu1 %vm4877_vm6, %v7606_v47  ;;  %27883 = vmatpush3.bf16.msra.mxu1 %v27880_v32  ;;  %v7631_v32 = vld [vmem:[#allocation4 + $0x171] sm:$0xff] }
 0x5e6   : > { %27885 = vmatprep.subr.bf16.mxu1 %v27884_v31 }
 0x5e8   : > { %25818 = vmatmul.mubr.msk.f32.gmra.mrb[2].mxu1 %vm4877_vm6, %v7607_v50 }
 0x5e9   : > { %25820 = vmatprep.mubr.msk.f32.mxu1 %vm4877_vm6, %v7608_v61  ;;  %27887 = vmatpush3.bf16.msra.mxu1 %v27884_v31 }
 0x5ea   : > { %27889 = vmatprep.subr.bf16.mxu1 %v27888_v48 }
 0x5ec   : > { %25821 = vmatmul.mubr.msk.f32.gmra.mrb[4].mxu1 %vm4877_vm6, %v7609_v3 }
 0x5ed   : > { %25823 = vmatprep.mubr.msk.f32.mxu1 %vm4877_vm6, %v7610_v6  ;;  %27891 = vmatpush3.bf16.msra.mxu1 %v27888_v48 }
 0x5ee   : > { %27893 = vmatprep.subr.bf16.mxu1 %v27892_v62 }
 0x5f0   : > { %25824 = vmatmul.mubr.msk.f32.gmra.mrb[6].mxu1 %vm4877_vm6, %v7611_v8 }
 0x5f1   : > { %25826 = vmatprep.mubr.msk.f32.mxu1 %vm4877_vm6, %v7612_v9  ;;  %27895 = vmatpush3.bf16.msra.mxu1 %v27892_v62 }
 0x5f4   : > { %25827 = vmatmul.mubr.msk.f32.gmra.mrb[8].mxu1 %vm4877_vm6, %v7613_v10 }
 0x5f5   : > { %25829 = vmatprep.mubr.msk.f32.mxu1 %vm4877_vm6, %v7614_v14 }
 0x5f8   : > { %25830 = vmatmul.mubr.msk.f32.gmra.mrb[10].mxu1 %vm4877_vm6, %v7615_v58 }
 0x5f9   : > { %25832 = vmatprep.mubr.msk.f32.mxu1 %vm4877_vm6, %v7616_v27 }
 0x5fc   : > { %25833 = vmatmul.mubr.msk.f32.gmra.mrb[12].mxu1 %vm4877_vm6, %v7617_v41 }
 0x5fd   : > { %25835 = vmatprep.mubr.msk.f32.mxu1 %vm4877_vm6, %v7618_v12 }
 0x600   : > { %25836 = vmatmul.mubr.msk.f32.gmra.mrb[14].mxu1 %vm4877_vm6, %v7619_v56 }
 0x601   : > { %25838 = vmatprep.mubr.msk.f32.mxu1 %vm4877_vm6, %v7620_v45 }
 0x604   : > { %25839 = vmatmul.mubr.msk.f32.gmra.mrb[16].mxu1 %vm4877_vm6, %v7621_v63 }
 0x605   : > { %25841 = vmatprep.mubr.msk.f32.mxu1 %vm4877_vm6, %v7622_v4 }
 0x608   : > { %25842 = vmatmul.mubr.msk.f32.gmra.mrb[18].mxu1 %vm4877_vm6, %v7623_v46 }
 0x609   : > { %25844 = vmatprep.mubr.msk.f32.mxu1 %vm4877_vm6, %v7624_v21 }
 0x60c   : > { %25845 = vmatmul.mubr.msk.f32.gmra.mrb[20].mxu1 %vm4877_vm6, %v7625_v26 }
 0x60d   : > { %25847 = vmatprep.mubr.msk.f32.mxu1 %vm4877_vm6, %v7626_v29 }
 0x610   : > { %25848 = vmatmul.mubr.msk.f32.gmra.mrb[22].mxu1 %vm4877_vm6, %v7627_v54 }
 0x611   : > { %25850 = vmatprep.mubr.msk.f32.mxu1 %vm4877_vm6, %v7628_v43 }
 0x614   : > { %25851 = vmatmul.mubr.msk.f32.gmra.mrb[24].mxu1 %vm4877_vm6, %v7629_v23  ;;  %v8392_v23 = vld [vmem:[%s35350_s9] sm:$0xff] }
 0x615   : > { %25853 = vmatprep.mubr.msk.f32.mxu1 %vm4877_vm6, %v7630_v22  ;;  %v8395_v22 = vld [vmem:[%s35350_s9 + $0x18] sm:$0xff] }
 0x618   : > { %25854 = vmatmul.mubr.msk.f32.gmra.mrb[26].mxu1 %vm4877_vm6, %v7631_v32  ;;  %v8394_v32 = vld [vmem:[%s35350_s9 + $0x10] sm:$0xff] }
 0x619   : > { %25856 = vmatprep.mubr.msk.f32.mxu1 %vm4877_vm6, %v31713_v5  ;;  %v35345_v5 = vld [vmem:[#allocation79_spill] sm:$0xff] }
 0x61c   : > { %25857 = vmatmul.mubr.msk.f32.gmra.mrb[28].mxu1 %vm4877_vm6, %v31717_v7  ;;  %v35346_v7 = vld [vmem:[#allocation80_spill] sm:$0xff] }
 0x61d   : > { %25859 = vmatprep.mubr.msk.f32.mxu1 %vm4877_vm6, %v7634_v18  ;;  %v8397_v18 = vld [vmem:[%s35350_s9 + $0x28] sm:$0xff] }
 0x620   : > { %25860 = vmatmul.mubr.msk.f32.gmra.mrb[30].mxu1 %vm4877_vm6, %v7635_v24  ;;  %v8396_v24 = vld [vmem:[%s35350_s9 + $0x20] sm:$0xff] }
 0x621   : > { %25878 = vmatprep.mubr.msk.f32.mxu1 %vm4877_vm6, %v31455_v40  ;;  %v35343_v40 = vld [vmem:[#allocation74_spill] sm:$0xff] }
 0x624   : > { %25879 = vmatmul.mubr.msk.f32.vlgmr.msra.gmra.mrb[0].mxu1 %vm4877_vm6, %v31459_v20  ;;  %v35344_v20 = vld [vmem:[#allocation76_spill] sm:$0xff] }
 0x625   : > { %25881 = vmatprep.mubr.msk.f32.mxu1 %vm4877_vm6, %v35317_v53  ;;  %v35347_v53 = vld [vmem:[#allocation81_spill] sm:$0xff] }
 0x628   : > { %25882 = vmatmul.mubr.msk.f32.gmra.mrb[2].mxu1 %vm4877_vm6, %v35318_v19  ;;  %v35348_v19 = vld [vmem:[#allocation82_spill] sm:$0xff] }
 0x629   : > { %25884 = vmatprep.mubr.msk.f32.mxu1 %vm4877_vm6, %v35319_v17  ;;  %v35349_v17 = vld [vmem:[#allocation51_spill] sm:$0xff] }
 0x62c   : > { %25885 = vmatmul.mubr.msk.f32.gmra.mrb[4].mxu1 %vm4877_vm6, %v35320_v30  ;;  %v8028_v30 = vld [vmem:[#allocation4 + $0x19a] sm:$0xff] }
 0x62d   : > { %25887 = vmatprep.mubr.msk.f32.mxu1 %vm4877_vm6, %v35321_v1  ;;  %v8029_v1 = vld [vmem:[#allocation4 + $0x1a2] sm:$0xff] }
 0x630   : > { %25888 = vmatmul.mubr.msk.f32.gmra.mrb[6].mxu1 %vm4877_vm6, %v35322_v36  ;;  %v8393_v36 = vld [vmem:[%s35350_s9 + $0x8] sm:$0xff] }
 0x631   : > { %25890 = vmatprep.mubr.msk.f32.mxu1 %vm4877_vm6, %v35323_v33  ;;  %8472 = vmatprep.mubr.f32.mxu0 %v8393_v36  ;;  %v21824_v33 = vld [vmem:[%s29679_s17 + $0x4] sm:$0xf]  ;;  %v8406_v36 = vld [vmem:[%s35350_s9 + $0x70] sm:$0xff] }
 0x632   : > { %25926 = vmatprep.subr.msk.mxu1 %vm1560_vm4, %v21824_v33 }
 0x633   : > { %25927 = vmatpush3.msk.msra.mxu1 %vm1560_vm4, %v21824_v33  ;;  %v8547_v33 = vld [vmem:[#allocation5 + $0x1] sm:$0xff] }
 0x634   : > { %25891 = vmatmul.mubr.msk.f32.gmra.mrb[8].mxu1 %vm4877_vm6, %v35324_v37 }
 0x635   : > { %25893 = vmatprep.mubr.msk.f32.mxu1 %vm4877_vm6, %v35325_v39 }
 0x638   : > { %25894 = vmatmul.mubr.msk.f32.gmra.mrb[10].mxu1 %vm4877_vm6, %v35326_v49 }
 0x639   : > { %25896 = vmatprep.mubr.msk.f32.mxu1 %vm4877_vm6, %v35327_v51 }
 0x63c   : > { %25897 = vmatmul.mubr.msk.f32.gmra.mrb[12].mxu1 %vm4877_vm6, %v35328_v57 }
 0x63d   : > { %25899 = vmatprep.mubr.msk.f32.mxu1 %vm4877_vm6, %v35329_v60 }
 0x640   : > { %25900 = vmatmul.mubr.msk.f32.gmra.mrb[14].mxu1 %vm4877_vm6, %v35330_v0 }
 0x641   : > { %25902 = vmatprep.mubr.msk.f32.mxu1 %vm4877_vm6, %v35331_v2 }
 0x644   : > { %25903 = vmatmul.mubr.msk.f32.gmra.mrb[16].mxu1 %vm4877_vm6, %v35332_v11 }
 0x645   : > { %25905 = vmatprep.mubr.msk.f32.mxu1 %vm4877_vm6, %v35333_v15 }
 0x648   : > { %25906 = vmatmul.mubr.msk.f32.gmra.mrb[18].mxu1 %vm4877_vm6, %v35334_v52 }
 0x649   : > { %25908 = vmatprep.mubr.msk.f32.mxu1 %vm4877_vm6, %v35335_v13 }
 0x64c   : > { %25909 = vmatmul.mubr.msk.f32.gmra.mrb[20].mxu1 %vm4877_vm6, %v35336_v44 }
 0x64d   : > { %25911 = vmatprep.mubr.msk.f32.mxu1 %vm4877_vm6, %v35343_v40  ;;  %v8399_v40 = vld [vmem:[%s35350_s9 + $0x38] sm:$0xff] }
 0x650   : > { %25912 = vmatmul.mubr.msk.f32.gmra.mrb[22].mxu1 %vm4877_vm6, %v35344_v20  ;;  %v8398_v20 = vld [vmem:[%s35350_s9 + $0x30] sm:$0xff] }
 0x651   : > { %25914 = vmatprep.mubr.msk.f32.mxu1 %vm4877_vm6, %v35345_v5  ;;  %v8401_v5 = vld [vmem:[%s35350_s9 + $0x48] sm:$0xff] }
 0x654   : > { %25915 = vmatmul.mubr.msk.f32.gmra.mrb[24].mxu1 %vm4877_vm6, %v35346_v7  ;;  %v8400_v7 = vld [vmem:[%s35350_s9 + $0x40] sm:$0xff] }
 0x655   : > { %25917 = vmatprep.mubr.msk.f32.mxu1 %vm4877_vm6, %v35347_v53  ;;  %v8403_v53 = vld [vmem:[%s35350_s9 + $0x58] sm:$0xff] }
 0x658   : > { %25918 = vmatmul.mubr.msk.f32.gmra.mrb[26].mxu1 %vm4877_vm6, %v35348_v19  ;;  %v8402_v19 = vld [vmem:[%s35350_s9 + $0x50] sm:$0xff] }
 0x659   : > { %25920 = vmatprep.mubr.msk.f32.mxu1 %vm4877_vm6, %v35349_v17  ;;  %v8405_v17 = vld [vmem:[%s35350_s9 + $0x68] sm:$0xff] }
 0x65c   : > { %25921 = vmatmul.mubr.msk.f32.gmra.mrb[28].mxu1 %vm4877_vm6, %v31793_v42 }
 0x65d   : > { %25923 = vmatprep.mubr.msk.f32.mxu1 %vm4877_vm6, %v8028_v30  ;;  %v8404_v30 = vld [vmem:[%s35350_s9 + $0x60] sm:$0xff] }
 0x660   : > { %25924 = vmatmul.mubr.msk.f32.gmra.mrb[30].mxu1 %vm4877_vm6, %v8029_v1  ;;  %v8407_v1 = vld [vmem:[%s35350_s9 + $0x78] sm:$0xff] }
 0x661   : > { %25928 = vmatprep.mubr.msk.f32.mxu1 %vm1364_vm5, %v8547_v33  ;;  %v21863_v33 = vld [vmem:[%s29679_s17 + $0x10] sm:$0xf] }
 0x6f7   : > { %v25880_v37 = vpop.f32.mrb[0].mxu1 }
 0x6f8   : > { %v8201_v39 = vpop.f32.mrb[1].mxu1 }
 0x6f9   : > { %v27898_v49 = vpack.c.bf16 %v25880_v37, %v8201_v39  ;;  %v8546_v37 = vld [vmem:[%s29679_s17] sm:$0xf] }
 0x6fa   : > { %25940 = vmatprep.subr.msk.mxu1 %vm1560_vm4, %v8546_v37 }
 0x6fb   : > { %v25883_v51 = vpop.f32.mrb[2].mxu1 }
 0x6fc   : > { %v8211_v57 = vpop.f32.mrb[3].mxu1 }
 0x6fd   : > { %v27902_v60 = vpack.c.bf16 %v25883_v51, %v8211_v57  ;;  %v8513_v51 = vld [vmem:[%s29656_s19] sm:$0xff] }
 0x6ff   : > { %v25886_v0 = vpop.f32.mrb[4].mxu1 }
 0x700   : > { %v8221_v2 = vpop.f32.mrb[5].mxu1 }
 0x701   : > { %v27906_v11 = vpack.c.bf16 %v25886_v0, %v8221_v2 }
 0x703   : > { %v25889_v15 = vpop.f32.mrb[6].mxu1 }
 0x704   : > { %v8231_v52 = vpop.f32.mrb[7].mxu1 }
 0x705   : > { %v27910_v13 = vpack.c.bf16 %v25889_v15, %v8231_v52 }
 0x707   : > { %v25892_v44 = vpop.f32.mrb[8].mxu1 }
 0x708   : > { %v8241_v42 = vpop.f32.mrb[9].mxu1 }
 0x709   : > { %v27914_v16 = vpack.c.bf16 %v25892_v44, %v8241_v42  ;;  %v8515_v42 = vld [vmem:[%s29656_s19 + $0x10] sm:$0xff] }
 0x70b   : > { %v25895_v25 = vpop.f32.mrb[10].mxu1 }
 0x70c   : > { %v8251_v28 = vpop.f32.mrb[11].mxu1 }
 0x70d   : > { %v27918_v31 = vpack.c.bf16 %v25895_v25, %v8251_v28 }
 0x70f   : > { %v25898_v34 = vpop.f32.mrb[12].mxu1 }
 0x710   : > { %v8261_v35 = vpop.f32.mrb[13].mxu1 }
 0x711   : > { %v27922_v38 = vpack.c.bf16 %v25898_v34, %v8261_v35  ;;  %v8516_v34 = vld [vmem:[%s29656_s19 + $0x18] sm:$0xff] }
 0x713   : > { %v25901_v47 = vpop.f32.mrb[14].mxu1 }
 0x714   : > { %v8271_v48 = vpop.f32.mrb[15].mxu1 }
 0x715   : > { %v27926_v50 = vpack.c.bf16 %v25901_v47, %v8271_v48 }
 0x717   : > { %v25904_v55 = vpop.f32.mrb[16].mxu1 }
 0x718   : > { %v8281_v59 = vpop.f32.mrb[17].mxu1 }
 0x719   : > { %v27896_v61 = vpack.c.bf16 %v25904_v55, %v8281_v59  ;;  %v8517_v59 = vld [vmem:[%s29656_s19 + $0x20] sm:$0xff] }
 0x71b   : > { %v25907_v62 = vpop.f32.mrb[18].mxu1  ;;  %27897 = vmatprep.subr.bf16.mxu0 %v27896_v61 }
 0x71c   : > { %v8291_v3 = vpop.f32.mrb[19].mxu1  ;;  %27899 = vmatpush3.bf16.msra.mxu0 %v27898_v49 }
 0x71d   : > { %v27900_v6 = vpack.c.bf16 %v25907_v62, %v8291_v3 }
 0x71f   : > { %v25910_v8 = vpop.f32.mrb[20].mxu1  ;;  %27901 = vmatprep.subr.bf16.mxu0 %v27900_v6 }
 0x720   : > { %v8301_v9 = vpop.f32.mrb[21].mxu1  ;;  %27903 = vmatpush3.bf16.msra.mxu0 %v27902_v60 }
 0x721   : > { %v27904_v10 = vpack.c.bf16 %v25910_v8, %v8301_v9  ;;  %v8518_v9 = vld [vmem:[%s29656_s19 + $0x28] sm:$0xff] }
 0x723   : > { %v25913_v14 = vpop.f32.mrb[22].mxu1  ;;  %27905 = vmatprep.subr.bf16.mxu0 %v27904_v10 }
 0x724   : > { %v8311_v58 = vpop.f32.mrb[23].mxu1  ;;  %27907 = vmatpush3.bf16.msra.mxu0 %v27906_v11  ;;  %v8514_v11 = vld [vmem:[%s29656_s19 + $0x8] sm:$0xff] }
 0x725   : > { %v27908_v27 = vpack.c.bf16 %v25913_v14, %v8311_v58 }
 0x727   : > { %v25916_v41 = vpop.f32.mrb[24].mxu1  ;;  %27909 = vmatprep.subr.bf16.mxu0 %v27908_v27 }
 0x728   : > { %v8321_v12 = vpop.f32.mrb[25].mxu1  ;;  %27911 = vmatpush3.bf16.msra.mxu0 %v27910_v13 }
 0x729   : > { %v27912_v56 = vpack.c.bf16 %v25916_v41, %v8321_v12  ;;  %v8519_v12 = vld [vmem:[%s29656_s19 + $0x30] sm:$0xff] }
 0x72b   : > { %v25919_v45 = vpop.f32.mrb[26].mxu1  ;;  %27913 = vmatprep.subr.bf16.mxu0 %v27912_v56 }
 0x72c   : > { %v8331_v63 = vpop.f32.mrb[27].mxu1  ;;  %27915 = vmatpush3.bf16.msra.mxu0 %v27914_v16 }
 0x72d   : > { %v27916_v4 = vpack.c.bf16 %v25919_v45, %v8331_v63 }
 0x72f   : > { %v25922_v46 = vpop.f32.mrb[28].mxu1  ;;  %27917 = vmatprep.subr.bf16.mxu0 %v27916_v4 }
 0x730   : > { %v8341_v21 = vpop.f32.mrb[29].mxu1  ;;  %27919 = vmatpush3.bf16.msra.mxu0 %v27918_v31 }
 0x731   : > { %v27920_v26 = vpack.c.bf16 %v25922_v46, %v8341_v21 }
 0x733   : > { %v25925_v29 = vpop.f32.mrb[30].mxu1  ;;  %27921 = vmatprep.subr.bf16.mxu0 %v27920_v26  ;;  %v8520_v26 = vld [vmem:[%s29656_s19 + $0x38] sm:$0xff] }
 0x734   : > { %v8351_v54 = vpop.f32.mrb[31].mxu1  ;;  %27923 = vmatpush3.bf16.msra.mxu0 %v27922_v38  ;;  %v21843_v38 = vld [vmem:[%s29679_s17 + $0x8] sm:$0xf] }
 0x735   : > { %v27924_v43 = vpack.c.bf16 %v25925_v29, %v8351_v54 }
 0x737   : > { %27925 = vmatprep.subr.bf16.mxu0 %v27924_v43 }
 0x738   : > { %27927 = vmatpush3.bf16.msra.mxu0 %v27926_v50 }
 0x73b   : > { %8473 = vmatmul.mubr.f32.vlgmr.msra.gmra.mrb[32].mxu0 %v8392_v23  ;;  %v8538_v23 = vld [vmem:[#allocation5] sm:$0xff] }
 0x73c   : > { %8477 = vmatprep.mubr.f32.mxu0 %v8395_v22 }
 0x73f   : > { %8478 = vmatmul.mubr.f32.gmra.mrb[34].mxu0 %v8394_v32  ;;  %v21913_v32 = vld [vmem:[%s29689_s2 + $0x40] sm:$0xff] }
 0x740   : > { %8482 = vmatprep.mubr.f32.mxu0 %v8397_v18  ;;  %v21914_v18 = vld [vmem:[%s29689_s2 + $0x48] sm:$0xff] }
 0x743   : > { %8483 = vmatmul.mubr.f32.gmra.mrb[36].mxu0 %v8396_v24  ;;  %v27928_v24 = vpack.c.bf16 %v21914_v18, %v21913_v32 }
 0x744   : > { %8487 = vmatprep.mubr.f32.mxu0 %v8399_v40 }
 0x745   : > { %27929 = vmatprep.subr.bf16.mxu0 %v27928_v24 }
 0x746   : > { %27931 = vmatpush3.bf16.msra.mxu0 %v27928_v24 }
 0x747   : > { %8488 = vmatmul.mubr.f32.gmra.mrb[38].mxu0 %v8398_v20  ;;  %v21853_v20 = vld [vmem:[%s29679_s17 + $0xc] sm:$0xf] }
 0x748   : > { %8492 = vmatprep.mubr.f32.mxu0 %v8401_v5 }
 0x74b   : > { %8493 = vmatmul.mubr.f32.gmra.mrb[40].mxu0 %v8400_v7 }
 0x74c   : > { %8497 = vmatprep.mubr.f32.mxu0 %v8403_v53 }
 0x74f   : > { %8498 = vmatmul.mubr.f32.gmra.mrb[42].mxu0 %v8402_v19 }
 0x750   : > { %8502 = vmatprep.mubr.f32.mxu0 %v8405_v17 }
 0x753   : > { %8503 = vmatmul.mubr.f32.gmra.mrb[44].mxu0 %v8404_v30  ;;  %v8821_v30 = vld [vmem:[#allocation5 + $0x2] sm:$0xff] }
 0x754   : > { %8507 = vmatprep.mubr.f32.mxu0 %v8407_v1 }
 0x757   : > { %8508 = vmatmul.mubr.f32.gmra.mrb[46].mxu0 %v8406_v36 }
 0x80e   : > { %v23671_v39 = vpop.f32.mrb[32].mxu0 }
 0x80f   : > { %v23672_v49 = vpop.f32.mrb[33].mxu0 }
 0x810   : > { %v23673_v57 = vadd.f32 %v23672_v49, %v23671_v39 }
 0x812   : > { %v8521_v60 = vsub.f32 %v8513_v51, %v23673_v57  ;;  %v23674_v0 = vpop.f32.mrb[34].mxu0 }
 0x813   : > { %v23675_v2 = vpop.f32.mrb[35].mxu0 }
 0x814   : > { %8530 = vst.msk [vmem:[#allocation5 + $0x11] sm:$0xff] %vm1364_vm5, %v8521_v60  ;;  %v23676_v15 = vadd.f32 %v23675_v2, %v23674_v0  ;;  %v21873_v0 = vld [vmem:[%s29679_s17 + $0x14] sm:$0xf] }
 0x816   : > { %v8522_v52 = vsub.f32 %v8514_v11, %v23676_v15  ;;  %v23677_v13 = vpop.f32.mrb[36].mxu0  ;;  %v21883_v11 = vld [vmem:[%s29679_s17 + $0x18] sm:$0xf] }
 0x817   : > { %v23678_v44 = vpop.f32.mrb[37].mxu0 }
 0x818   : > { %8531 = vst.msk [vmem:[#allocation5 + $0x21] sm:$0xff] %vm1364_vm5, %v8522_v52  ;;  %v23679_v16 = vadd.f32 %v23678_v44, %v23677_v13  ;;  %v21893_v52 = vld [vmem:[%s29679_s17 + $0x1c] sm:$0xf]  ;;  %v21903_v44 = vld [vmem:[%s29679_s17 + $0x20] sm:$0xf] }
 0x81a   : > { %v8523_v25 = vsub.f32 %v8515_v42, %v23679_v16  ;;  %v23680_v28 = vpop.f32.mrb[38].mxu0  ;;  %v9429_v42 = vld [vmem:[#allocation5 + $0x90] sm:$0xff] }
 0x81b   : > { %v23681_v31 = vpop.f32.mrb[39].mxu0  ;;  %v32029_v35 = vld [vmem:[#allocation5 + $0x11] sm:$0xff] }
 0x81c   : > { %8532 = vst.msk [vmem:[#allocation5 + $0x31] sm:$0xff] %vm1364_vm5, %v8523_v25  ;;  %v23682_v47 = vadd.f32 %v23681_v31, %v23680_v28  ;;  %25929 = vmatmul.mubr.msk.f32.vlgmr.msra.gmra.mrb[32].mxu1 %vm1364_vm5, %v32029_v35  ;;  %v8539_v40 = vld [vmem:[#allocation5 + $0x10] sm:$0xff]  ;;  %v21916_v31 = vld [vmem:[%s29689_s2 + $0x58] sm:$0xff] }
 0x81d   : > { %25941 = vmatpush3.msk.msra.mxu1 %vm1560_vm4, %v8546_v37  ;;  %v8822_v36 = vld [vmem:[#allocation5 + $0x12] sm:$0xff] }
 0x81e   : > { %v8524_v48 = vsub.f32 %v8516_v34, %v23682_v47  ;;  %v23683_v50 = vpop.f32.mrb[40].mxu0  ;;  %25954 = vmatprep.subr.msk.mxu1 %vm1560_vm4, %v21843_v38  ;;  %v9579_v16 = vld [vmem:[#allocation5 + $0x91] sm:$0xff] }
 0x81f   : > { %v23684_v55 = vpop.f32.mrb[41].mxu0  ;;  %v32038_v61 = vld [vmem:[#allocation5 + $0x21] sm:$0xff]  ;;  %v9729_v25 = vld [vmem:[#allocation5 + $0x92] sm:$0xff] }
 0x820   : > { %8533 = vst.msk [vmem:[#allocation5 + $0x41] sm:$0xff] %vm1364_vm5, %v8524_v48  ;;  %v23685_v62 = vadd.f32 %v23684_v55, %v23683_v50  ;;  %25931 = vmatprep.mubr.msk.f32.mxu1 %vm1364_vm5, %v32038_v61  ;;  %v32075_v5 = vld [vmem:[#allocation5 + $0x20] sm:$0xff]  ;;  %v21915_v28 = vld [vmem:[%s29689_s2 + $0x50] sm:$0xff]  ;;  %v21920_v50 = vld [vmem:[%s29689_s2 + $0x78] sm:$0xff] }
 0x821   : > { %v32104_v37 = vld [vmem:[#allocation5 + $0x22] sm:$0xff]  ;;  %v27932_v34 = vpack.c.bf16 %v21916_v31, %v21915_v28  ;;  %v21919_v48 = vld [vmem:[%s29689_s2 + $0x70] sm:$0xff] }
 0x822   : > { %v8525_v3 = vsub.f32 %v8517_v59, %v23685_v62  ;;  %v23686_v6 = vpop.f32.mrb[42].mxu0  ;;  %v27940_v55 = vpack.c.bf16 %v21920_v50, %v21919_v48  ;;  %v9897_v59 = vld [vmem:[%s29689_s2] sm:$0xff]  ;;  %v21954_v28 = vld [vmem:[%s29689_s2 + $0xc8] sm:$0xff]  ;;  %v21956_v48 = vld [vmem:[%s29689_s2 + $0xd8] sm:$0xff] }
 0x823   : > { %v23687_v8 = vpop.f32.mrb[43].mxu0  ;;  %v32044_v10 = vld [vmem:[#allocation5 + $0x31] sm:$0xff]  ;;  %27933 = vmatprep.subr.bf16.mxu0 %v27932_v34  ;;  %v9905_v62 = vld [vmem:[#allocation6 + $0x1] sm:$0xff] }
 0x824   : > { %8534 = vst.msk [vmem:[#allocation5 + $0x51] sm:$0xff] %vm1364_vm5, %v8525_v3  ;;  %v23688_v14 = vadd.f32 %v23687_v8, %v23686_v6  ;;  %25932 = vmatmul.mubr.msk.f32.gmra.mrb[34].mxu1 %vm1364_vm5, %v32044_v10  ;;  %v32081_v7 = vld [vmem:[#allocation5 + $0x30] sm:$0xff]  ;;  %27935 = vmatpush3.bf16.msra.mxu0 %v27932_v34  ;;  %v10180_v34 = vld [vmem:[#allocation6 + $0x2] sm:$0xff] }
 0x825   : > { %v32110_v39 = vld [vmem:[#allocation5 + $0x32] sm:$0xff]  ;;  %26068 = vmatprep.mubr.msk.f32.mxu0 %vm4877_vm6, %v9905_v62 }
 0x826   : > { %v8526_v58 = vsub.f32 %v8518_v9, %v23688_v14  ;;  %v23689_v27 = vpop.f32.mrb[44].mxu0 }
 0x827   : > { %v23690_v41 = vpop.f32.mrb[45].mxu0  ;;  %v32050_v56 = vld [vmem:[#allocation5 + $0x41] sm:$0xff] }
 0x828   : > { %8535 = vst.msk [vmem:[#allocation5 + $0x61] sm:$0xff] %vm1364_vm5, %v8526_v58  ;;  %v23691_v45 = vadd.f32 %v23690_v41, %v23689_v27  ;;  %25934 = vmatprep.mubr.msk.f32.mxu1 %vm1364_vm5, %v32050_v56  ;;  %v32085_v53 = vld [vmem:[#allocation5 + $0x40] sm:$0xff] }
 0x829   : > { %v32114_v49 = vld [vmem:[#allocation5 + $0x42] sm:$0xff] }
 0x82a   : > { %v8527_v63 = vsub.f32 %v8519_v12, %v23691_v45  ;;  %v23692_v4 = vpop.f32.mrb[46].mxu0  ;;  %v9899_v12 = vld [vmem:[%s29689_s2 + $0x10] sm:$0xff] }
 0x82b   : > { %v32055_v46 = vld [vmem:[#allocation5 + $0x51] sm:$0xff]  ;;  %v23693_v21 = vpop.f32.mrb[47].mxu0 }
 0x82c   : > { %8536 = vst.msk [vmem:[#allocation5 + $0x71] sm:$0xff] %vm1364_vm5, %v8527_v63  ;;  %25935 = vmatmul.mubr.msk.f32.gmra.mrb[36].mxu1 %vm1364_vm5, %v32055_v46  ;;  %v23694_v29 = vadd.f32 %v23693_v21, %v23692_v4  ;;  %v32089_v19 = vld [vmem:[#allocation5 + $0x50] sm:$0xff] }
 0x82d   : > { %v32118_v51 = vld [vmem:[#allocation5 + $0x52] sm:$0xff] }
 0x82e   : > { %v8528_v54 = vsub.f32 %v8520_v26, %v23694_v29  ;;  %v9901_v29 = vld [vmem:[%s29689_s2 + $0x20] sm:$0xff] }
 0x82f   : > { %v32061_v43 = vld [vmem:[#allocation5 + $0x61] sm:$0xff] }
 0x830   : > { %25937 = vmatprep.mubr.msk.f32.mxu1 %vm1364_vm5, %v32061_v43  ;;  %8537 = vst.msk [vmem:[#allocation5 + $0x81] sm:$0xff] %vm1364_vm5, %v8528_v54  ;;  %v32093_v17 = vld [vmem:[#allocation5 + $0x60] sm:$0xff]  ;;  %v9902_v54 = vld [vmem:[%s29689_s2 + $0x28] sm:$0xff] }
 0x831   : > { %v32122_v57 = vld [vmem:[#allocation5 + $0x62] sm:$0xff]  ;;  %v27952_v24 = vpack.c.bf16 %v9902_v54, %v9901_v29 }
 0x832   : > { %v21974_v29 = vld [vmem:[%s29689_s2 + $0x128] sm:$0xff] }
 0x833   : > { %v32066_v22 = vld [vmem:[#allocation5 + $0x71] sm:$0xff] }
 0x834   : > { %25938 = vmatmul.mubr.msk.f32.gmra.mrb[38].mxu1 %vm1364_vm5, %v32066_v22  ;;  %v32097_v1 = vld [vmem:[#allocation5 + $0x70] sm:$0xff] }
 0x835   : > { %25942 = vmatprep.mubr.msk.f32.mxu1 %vm1364_vm5, %v8538_v23  ;;  %v32126_v60 = vld [vmem:[#allocation5 + $0x72] sm:$0xff] }
 0x837   : > { %v8978_v2 = vld [vmem:[#allocation5 + $0x80] sm:$0xff] }
 0x838   : > { %25943 = vmatmul.mubr.msk.f32.vlgmr.msra.gmra.mrb[32].mxu1 %vm1364_vm5, %v8539_v40  ;;  %v9128_v15 = vld [vmem:[#allocation5 + $0x81] sm:$0xff] }
 0x839   : > { %25945 = vmatprep.mubr.msk.f32.mxu1 %vm1364_vm5, %v32075_v5  ;;  %25955 = vmatpush3.msk.msra.mxu1 %vm1560_vm4, %v21843_v38  ;;  %v9278_v13 = vld [vmem:[#allocation5 + $0x82] sm:$0xff] }
 0x83a   : > { %25968 = vmatprep.subr.msk.mxu1 %vm1560_vm4, %v21853_v20  ;;  %v21918_v38 = vld [vmem:[%s29689_s2 + $0x68] sm:$0xff] }
 0x83c   : > { %25946 = vmatmul.mubr.msk.f32.gmra.mrb[34].mxu1 %vm1364_vm5, %v32081_v7 }
 0x83d   : > { %25948 = vmatprep.mubr.msk.f32.mxu1 %vm1364_vm5, %v32085_v53 }
 0x840   : > { %25949 = vmatmul.mubr.msk.f32.gmra.mrb[36].mxu1 %vm1364_vm5, %v32089_v19 }
 0x841   : > { %25951 = vmatprep.mubr.msk.f32.mxu1 %vm1364_vm5, %v32093_v17 }
 0x844   : > { %25952 = vmatmul.mubr.msk.f32.gmra.mrb[38].mxu1 %vm1364_vm5, %v32097_v1 }
 0x845   : > { %25956 = vmatprep.mubr.msk.f32.mxu1 %vm1364_vm5, %v8821_v30  ;;  %v21938_v30 = vld [vmem:[%s29689_s2 + $0x88] sm:$0xff] }
 0x848   : > { %25957 = vmatmul.mubr.msk.f32.vlgmr.msra.gmra.mrb[32].mxu1 %vm1364_vm5, %v8822_v36 }
 0x849   : > { %25959 = vmatprep.mubr.msk.f32.mxu1 %vm1364_vm5, %v32104_v37  ;;  %25969 = vmatpush3.msk.msra.mxu1 %vm1560_vm4, %v21853_v20  ;;  %v9903_v20 = vld [vmem:[%s29689_s2 + $0x30] sm:$0xff] }
 0x84a   : > { %25982 = vmatprep.subr.msk.mxu1 %vm1560_vm4, %v21863_v33 }
 0x84c   : > { %25960 = vmatmul.mubr.msk.f32.gmra.mrb[34].mxu1 %vm1364_vm5, %v32110_v39 }
 0x84d   : > { %25962 = vmatprep.mubr.msk.f32.mxu1 %vm1364_vm5, %v32114_v49 }
 0x850   : > { %25963 = vmatmul.mubr.msk.f32.gmra.mrb[36].mxu1 %vm1364_vm5, %v32118_v51 }
 0x851   : > { %25965 = vmatprep.mubr.msk.f32.mxu1 %vm1364_vm5, %v32122_v57 }
 0x854   : > { %25966 = vmatmul.mubr.msk.f32.gmra.mrb[38].mxu1 %vm1364_vm5, %v32126_v60 }
 0x855   : > { %25970 = vmatprep.mubr.msk.f32.mxu1 %vm1364_vm5, %v8539_v40 }
 0x858   : > { %25971 = vmatmul.mubr.msk.f32.vlgmr.msra.gmra.mrb[32].mxu1 %vm1364_vm5, %v32075_v5 }
 0x859   : > { %25973 = vmatprep.mubr.msk.f32.mxu1 %vm1364_vm5, %v32081_v7  ;;  %25983 = vmatpush3.msk.msra.mxu1 %vm1560_vm4, %v21863_v33 }
 0x85a   : > { %25996 = vmatprep.subr.msk.mxu1 %vm1560_vm4, %v21873_v0 }
 0x85c   : > { %25974 = vmatmul.mubr.msk.f32.gmra.mrb[34].mxu1 %vm1364_vm5, %v32085_v53 }
 0x85d   : > { %25976 = vmatprep.mubr.msk.f32.mxu1 %vm1364_vm5, %v32089_v19 }
 0x860   : > { %25977 = vmatmul.mubr.msk.f32.gmra.mrb[36].mxu1 %vm1364_vm5, %v32093_v17 }
 0x861   : > { %25979 = vmatprep.mubr.msk.f32.mxu1 %vm1364_vm5, %v32097_v1 }
 0x864   : > { %25980 = vmatmul.mubr.msk.f32.gmra.mrb[38].mxu1 %vm1364_vm5, %v8978_v2 }
 0x865   : > { %25984 = vmatprep.mubr.msk.f32.mxu1 %vm1364_vm5, %v32029_v35  ;;  %v21917_v35 = vld [vmem:[%s29689_s2 + $0x60] sm:$0xff] }
 0x866   : > { %v27936_v47 = vpack.c.bf16 %v21918_v38, %v21917_v35 }
 0x868   : > { %25985 = vmatmul.mubr.msk.f32.vlgmr.msra.gmra.mrb[32].mxu1 %vm1364_vm5, %v32038_v61  ;;  %27937 = vmatprep.subr.bf16.mxu0 %v27936_v47 }
 0x869   : > { %25987 = vmatprep.mubr.msk.f32.mxu1 %vm1364_vm5, %v32044_v10  ;;  %25997 = vmatpush3.msk.msra.mxu1 %vm1560_vm4, %v21873_v0  ;;  %v21942_v0 = vld [vmem:[%s29689_s2 + $0xa8] sm:$0xff] }
 0x86a   : > { %26010 = vmatprep.subr.msk.mxu1 %vm1560_vm4, %v21883_v11  ;;  %27939 = vmatpush3.bf16.msra.mxu0 %v27936_v47  ;;  %v21955_v47 = vld [vmem:[%s29689_s2 + $0xd0] sm:$0xff] }
 0x86b   : > { %27941 = vmatprep.subr.bf16.mxu0 %v27940_v55  ;;  %v27980_v50 = vpack.c.bf16 %v21956_v48, %v21955_v47  ;;  %v22008_v47 = vld [vmem:[%s29689_s2 + $0x1b8] sm:$0xff] }
 0x86c   : > { %25988 = vmatmul.mubr.msk.f32.gmra.mrb[34].mxu1 %vm1364_vm5, %v32050_v56 }
 0x86d   : > { %25990 = vmatprep.mubr.msk.f32.mxu1 %vm1364_vm5, %v32055_v46 }
 0x86e   : > { %27943 = vmatpush3.bf16.msra.mxu0 %v27940_v55 }
 0x870   : > { %25991 = vmatmul.mubr.msk.f32.gmra.mrb[36].mxu1 %vm1364_vm5, %v32061_v43 }
 0x871   : > { %25993 = vmatprep.mubr.msk.f32.mxu1 %vm1364_vm5, %v32066_v22 }
 0x874   : > { %25994 = vmatmul.mubr.msk.f32.gmra.mrb[38].mxu1 %vm1364_vm5, %v9128_v15 }
 0x875   : > { %25998 = vmatprep.mubr.msk.f32.mxu1 %vm1364_vm5, %v8822_v36  ;;  %v9889_v36 = vld [vmem:[#allocation6] sm:$0xff] }
 0x878   : > { %25999 = vmatmul.mubr.msk.f32.vlgmr.msra.gmra.mrb[32].mxu1 %vm1364_vm5, %v32104_v37 }
 0x879   : > { %26001 = vmatprep.mubr.msk.f32.mxu1 %vm1364_vm5, %v32110_v39  ;;  %26011 = vmatpush3.msk.msra.mxu1 %vm1560_vm4, %v21883_v11 }
 0x87a   : > { %26024 = vmatprep.subr.msk.mxu1 %vm1560_vm4, %v21893_v52 }
 0x87c   : > { %26002 = vmatmul.mubr.msk.f32.gmra.mrb[34].mxu1 %vm1364_vm5, %v32114_v49 }
 0x87d   : > { %26004 = vmatprep.mubr.msk.f32.mxu1 %vm1364_vm5, %v32118_v51 }
 0x880   : > { %26005 = vmatmul.mubr.msk.f32.gmra.mrb[36].mxu1 %vm1364_vm5, %v32122_v57 }
 0x881   : > { %26007 = vmatprep.mubr.msk.f32.mxu1 %vm1364_vm5, %v32126_v60 }
 0x884   : > { %26008 = vmatmul.mubr.msk.f32.gmra.mrb[38].mxu1 %vm1364_vm5, %v9278_v13 }
 0x885   : > { %26012 = vmatprep.mubr.msk.f32.mxu1 %vm1364_vm5, %v32075_v5  ;;  %v9904_v5 = vld [vmem:[%s29689_s2 + $0x38] sm:$0xff] }
 0x888   : > { %26013 = vmatmul.mubr.msk.f32.vlgmr.msra.gmra.mrb[32].mxu1 %vm1364_vm5, %v32081_v7 }
 0x889   : > { %26015 = vmatprep.mubr.msk.f32.mxu1 %vm1364_vm5, %v32085_v53  ;;  %26025 = vmatpush3.msk.msra.mxu1 %vm1560_vm4, %v21893_v52  ;;  %v27956_v53 = vpack.c.bf16 %v9904_v5, %v9903_v20  ;;  %v21943_v52 = vld [vmem:[%s29689_s2 + $0xb0] sm:$0xff] }
 0x88a   : > { %26038 = vmatprep.subr.msk.mxu1 %vm1560_vm4, %v21903_v44 }
 0x88c   : > { %26016 = vmatmul.mubr.msk.f32.gmra.mrb[34].mxu1 %vm1364_vm5, %v32089_v19 }
 0x88d   : > { %26018 = vmatprep.mubr.msk.f32.mxu1 %vm1364_vm5, %v32093_v17  ;;  %v21937_v17 = vld [vmem:[%s29689_s2 + $0x80] sm:$0xff] }
 0x88e   : > { %v27960_v33 = vpack.c.bf16 %v21938_v30, %v21937_v17  ;;  %v21988_v17 = vld [vmem:[%s29689_s2 + $0x158] sm:$0xff] }
 0x890   : > { %26019 = vmatmul.mubr.msk.f32.gmra.mrb[36].mxu1 %vm1364_vm5, %v32097_v1 }
 0x891   : > { %26021 = vmatprep.mubr.msk.f32.mxu1 %vm1364_vm5, %v8978_v2 }
 0x894   : > { %26022 = vmatmul.mubr.msk.f32.gmra.mrb[38].mxu1 %vm1364_vm5, %v9429_v42 }
 0x895   : > { %26026 = vmatprep.mubr.msk.f32.mxu1 %vm1364_vm5, %v32038_v61  ;;  %v9898_v61 = vld [vmem:[%s29689_s2 + $0x8] sm:$0xff] }
 0x896   : > { %v27944_v3 = vpack.c.bf16 %v9898_v61, %v9897_v59  ;;  %v21957_v59 = vld [vmem:[%s29689_s2 + $0xe0] sm:$0xff]  ;;  %v21958_v61 = vld [vmem:[%s29689_s2 + $0xe8] sm:$0xff] }
 0x898   : > { %26027 = vmatmul.mubr.msk.f32.vlgmr.msra.gmra.mrb[32].mxu1 %vm1364_vm5, %v32044_v10  ;;  %27945 = vmatprep.subr.bf16.mxu0 %v27944_v3 }
 0x899   : > { %26029 = vmatprep.mubr.msk.f32.mxu1 %vm1364_vm5, %v32050_v56  ;;  %26039 = vmatpush3.msk.msra.mxu1 %vm1560_vm4, %v21903_v44  ;;  %v9900_v56 = vld [vmem:[%s29689_s2 + $0x18] sm:$0xff] }
 0x89a   : > { %v27948_v21 = vpack.c.bf16 %v9900_v56, %v9899_v12 }
 0x89c   : > { %26030 = vmatmul.mubr.msk.f32.gmra.mrb[34].mxu1 %vm1364_vm5, %v32055_v46 }
 0x89d   : > { %26032 = vmatprep.mubr.msk.f32.mxu1 %vm1364_vm5, %v32061_v43 }
 0x8a0   : > { %26033 = vmatmul.mubr.msk.f32.gmra.mrb[36].mxu1 %vm1364_vm5, %v32066_v22 }
 0x8a1   : > { %26035 = vmatprep.mubr.msk.f32.mxu1 %vm1364_vm5, %v9128_v15 }
 0x8a4   : > { %26036 = vmatmul.mubr.msk.f32.gmra.mrb[38].mxu1 %vm1364_vm5, %v9579_v16 }
 0x8a5   : > { %26040 = vmatprep.mubr.msk.f32.mxu1 %vm1364_vm5, %v32104_v37 }
 0x8a8   : > { %26041 = vmatmul.mubr.msk.f32.vlgmr.msra.gmra.mrb[32].mxu1 %vm1364_vm5, %v32110_v39  ;;  %v21939_v39 = vld [vmem:[%s29689_s2 + $0x90] sm:$0xff] }
 0x8a9   : > { %26043 = vmatprep.mubr.msk.f32.mxu1 %vm1364_vm5, %v32114_v49  ;;  %v21940_v49 = vld [vmem:[%s29689_s2 + $0x98] sm:$0xff] }
 0x8ac   : > { %26044 = vmatmul.mubr.msk.f32.gmra.mrb[34].mxu1 %vm1364_vm5, %v32118_v51  ;;  %v27964_v51 = vpack.c.bf16 %v21940_v49, %v21939_v39  ;;  %v21991_v49 = vld [vmem:[%s29689_s2 + $0x170] sm:$0xff] }
 0x8ad   : > { %26046 = vmatprep.mubr.msk.f32.mxu1 %vm1364_vm5, %v32122_v57 }
 0x8b0   : > { %26047 = vmatmul.mubr.msk.f32.gmra.mrb[36].mxu1 %vm1364_vm5, %v32126_v60  ;;  %v21941_v60 = vld [vmem:[%s29689_s2 + $0xa0] sm:$0xff] }
 0x8b1   : > { %26049 = vmatprep.mubr.msk.f32.mxu1 %vm1364_vm5, %v9278_v13  ;;  %v27968_v11 = vpack.c.bf16 %v21942_v0, %v21941_v60  ;;  %v21944_v13 = vld [vmem:[%s29689_s2 + $0xb8] sm:$0xff]  ;;  %v22002_v60 = vld [vmem:[%s29689_s2 + $0x188] sm:$0xff] }
 0x8b2   : > { %v27972_v42 = vpack.c.bf16 %v21944_v13, %v21943_v52  ;;  %v22003_v52 = vld [vmem:[%s29689_s2 + $0x190] sm:$0xff]  ;;  %v22004_v13 = vld [vmem:[%s29689_s2 + $0x198] sm:$0xff] }
 0x8b4   : > { %26050 = vmatmul.mubr.msk.f32.gmra.mrb[38].mxu1 %vm1364_vm5, %v9729_v25  ;;  %v21953_v25 = vld [vmem:[%s29689_s2 + $0xc0] sm:$0xff] }
 0x8b5   : > { %v27976_v35 = vpack.c.bf16 %v21954_v28, %v21953_v25  ;;  %v22005_v25 = vld [vmem:[%s29689_s2 + $0x1a0] sm:$0xff]  ;;  %v22006_v28 = vld [vmem:[%s29689_s2 + $0x1a8] sm:$0xff] }
 0x97b   : > { %v26042_v6 = vpop.f32.mrb[32].mxu1 }
 0x97c   : > { %v9873_v8 = vmax.f32 %v26042_v6, 0.0  ;;  %v9825_v9 = vpop.f32.mrb[33].mxu1 }
 0x97d   : > { %v9872_v10 = vmax.f32 %v9825_v9, 0.0  ;;  %v21960_v9 = vld [vmem:[%s29689_s2 + $0xf8] sm:$0xff] }
 0x97e   : > { %9882 = vst.msk [vmem:[#allocation6 + $0x21] sm:$0xff] %vm4877_vm6, %v9873_v8  ;;  %v21959_v8 = vld [vmem:[%s29689_s2 + $0xf0] sm:$0xff] }
 0x97f   : > { %9881 = vst.msk [vmem:[#allocation6 + $0x11] sm:$0xff] %vm4877_vm6, %v9872_v10  ;;  %v26045_v14 = vpop.f32.mrb[34].mxu1 }
 0x980   : > { %v9875_v58 = vmax.f32 %v26045_v14, 0.0  ;;  %v9835_v27 = vpop.f32.mrb[35].mxu1  ;;  %v27988_v14 = vpack.c.bf16 %v21960_v9, %v21959_v8  ;;  %v22020_v8 = vld [vmem:[%s29689_s2 + $0x1d8] sm:$0xff] }
 0x981   : > { %v9874_v41 = vmax.f32 %v9835_v27, 0.0  ;;  %v21969_v27 = vld [vmem:[%s29689_s2 + $0x100] sm:$0xff] }
 0x982   : > { %9884 = vst.msk [vmem:[#allocation6 + $0x41] sm:$0xff] %vm4877_vm6, %v9875_v58 }
 0x983   : > { %9883 = vst.msk [vmem:[#allocation6 + $0x31] sm:$0xff] %vm4877_vm6, %v9874_v41  ;;  %v26048_v45 = vpop.f32.mrb[36].mxu1  ;;  %v21970_v41 = vld [vmem:[%s29689_s2 + $0x108] sm:$0xff] }
 0x984   : > { %v9877_v63 = vmax.f32 %v26048_v45, 0.0  ;;  %v9845_v4 = vpop.f32.mrb[37].mxu1  ;;  %v27992_v56 = vpack.c.bf16 %v21970_v41, %v21969_v27  ;;  %v22022_v27 = vld [vmem:[%s29689_s2 + $0x1e8] sm:$0xff] }
 0x985   : > { %v9876_v46 = vmax.f32 %v9845_v4, 0.0  ;;  %v32251_v23 = vld [vmem:[#allocation6 + $0x21] sm:$0xff]  ;;  %v21972_v4 = vld [vmem:[%s29689_s2 + $0x118] sm:$0xff] }
 0x986   : > { %9886 = vst.msk [vmem:[#allocation6 + $0x61] sm:$0xff] %vm4877_vm6, %v9877_v63  ;;  %v32244_v26 = vld [vmem:[#allocation6 + $0x11] sm:$0xff]  ;;  %v32290_v2 = vld [vmem:[#allocation6 + $0x20] sm:$0xff] }
 0x987   : > { %9885 = vst.msk [vmem:[#allocation6 + $0x51] sm:$0xff] %vm4877_vm6, %v9876_v46  ;;  %v26051_v43 = vpop.f32.mrb[38].mxu1  ;;  %26069 = vmatmul.mubr.msk.f32.vlgmr.msra.gmra.mrb[48].mxu0 %vm4877_vm6, %v32244_v26  ;;  %v32284_v57 = vld [vmem:[#allocation6 + $0x10] sm:$0xff]  ;;  %v32327_v62 = vld [vmem:[#allocation6 + $0x22] sm:$0xff] }
 0x988   : > { %v9879_v22 = vmax.f32 %v26051_v43, 0.0  ;;  %v9855_v32 = vpop.f32.mrb[39].mxu1  ;;  %26071 = vmatprep.mubr.msk.f32.mxu0 %vm4877_vm6, %v32251_v23  ;;  %27947 = vmatpush3.bf16.msra.mxu0 %v27944_v3  ;;  %v32321_v55 = vld [vmem:[#allocation6 + $0x12] sm:$0xff]  ;;  %v27984_v3 = vpack.c.bf16 %v21958_v61, %v21957_v59 }
 0x989   : > { %v9878_v18 = vmax.f32 %v9855_v32, 0.0  ;;  %27949 = vmatprep.subr.bf16.mxu0 %v27948_v21  ;;  %v32263_v7 = vld [vmem:[#allocation6 + $0x41] sm:$0xff]  ;;  %v21971_v63 = vld [vmem:[%s29689_s2 + $0x110] sm:$0xff] }
 0x98a   : > { %9888 = vst.msk [vmem:[#allocation6 + $0x81] sm:$0xff] %vm4877_vm6, %v9879_v22  ;;  %v32256_v40 = vld [vmem:[#allocation6 + $0x31] sm:$0xff]  ;;  %v32300_v44 = vld [vmem:[#allocation6 + $0x40] sm:$0xff]  ;;  %v27996_v46 = vpack.c.bf16 %v21972_v4, %v21971_v63 }
 0x98b   : > { %9887 = vst.msk [vmem:[#allocation6 + $0x71] sm:$0xff] %vm4877_vm6, %v9878_v18  ;;  %26072 = vmatmul.mubr.msk.f32.gmra.mrb[50].mxu0 %vm4877_vm6, %v32256_v40  ;;  %v32294_v15 = vld [vmem:[#allocation6 + $0x30] sm:$0xff]  ;;  %v32337_v10 = vld [vmem:[#allocation6 + $0x42] sm:$0xff]  ;;  %v21976_v22 = vld [vmem:[%s29689_s2 + $0x138] sm:$0xff] }
 0x98c   : > { %26074 = vmatprep.mubr.msk.f32.mxu0 %vm4877_vm6, %v32263_v7  ;;  %27951 = vmatpush3.bf16.msra.mxu0 %v27948_v21  ;;  %v32331_v6 = vld [vmem:[#allocation6 + $0x32] sm:$0xff]  ;;  %v21973_v21 = vld [vmem:[%s29689_s2 + $0x120] sm:$0xff] }
 0x98d   : > { %27953 = vmatprep.subr.bf16.mxu0 %v27952_v24  ;;  %v32273_v1 = vld [vmem:[#allocation6 + $0x61] sm:$0xff]  ;;  %v28000_v54 = vpack.c.bf16 %v21974_v29, %v21973_v21  ;;  %v21975_v43 = vld [vmem:[%s29689_s2 + $0x130] sm:$0xff]  ;;  %v22024_v63 = vld [vmem:[%s29689_s2 + $0x1f8] sm:$0xff] }
 0x98e   : > { %v32267_v19 = vld [vmem:[#allocation6 + $0x51] sm:$0xff]  ;;  %v32310_v31 = vld [vmem:[#allocation6 + $0x60] sm:$0xff]  ;;  %v28004_v32 = vpack.c.bf16 %v21976_v22, %v21975_v43  ;;  %v22038_v29 = vld [vmem:[%s29689_s2 + $0x228] sm:$0xff] }
 0x98f   : > { %26075 = vmatmul.mubr.msk.f32.gmra.mrb[52].mxu0 %vm4877_vm6, %v32267_v19  ;;  %v32304_v16 = vld [vmem:[#allocation6 + $0x50] sm:$0xff]  ;;  %v32347_v12 = vld [vmem:[#allocation6 + $0x62] sm:$0xff]  ;;  %v22040_v22 = vld [vmem:[%s29689_s2 + $0x238] sm:$0xff] }
 0x990   : > { %26077 = vmatprep.mubr.msk.f32.mxu0 %vm4877_vm6, %v32273_v1  ;;  %27955 = vmatpush3.bf16.msra.mxu0 %v27952_v24  ;;  %v32341_v58 = vld [vmem:[#allocation6 + $0x52] sm:$0xff]  ;;  %v21985_v18 = vld [vmem:[%s29689_s2 + $0x140] sm:$0xff]  ;;  %v21986_v24 = vld [vmem:[%s29689_s2 + $0x148] sm:$0xff] }
 0x991   : > { %27957 = vmatprep.subr.bf16.mxu0 %v27956_v53  ;;  %v28008_v20 = vpack.c.bf16 %v21986_v24, %v21985_v18  ;;  %v32377_v5 = vld [vmem:[#allocation6 + $0x80] sm:$0xff]  ;;  %v10804_v4 = vld [vmem:[#allocation6 + $0x90] sm:$0xff] }
 0x992   : > { %v32277_v37 = vld [vmem:[#allocation6 + $0x71] sm:$0xff]  ;;  %v32429_v61 = vld [vmem:[#allocation6 + $0x82] sm:$0xff] }
 0x993   : > { %26078 = vmatmul.mubr.msk.f32.gmra.mrb[54].mxu0 %vm4877_vm6, %v32277_v37  ;;  %v32314_v38 = vld [vmem:[#allocation6 + $0x70] sm:$0xff] }
 0x994   : > { %27959 = vmatpush3.bf16.msra.mxu0 %v27956_v53  ;;  %26096 = vmatprep.mubr.msk.f32.mxu0 %vm4877_vm6, %v9889_v36  ;;  %v32351_v45 = vld [vmem:[#allocation6 + $0x72] sm:$0xff]  ;;  %v21989_v36 = vld [vmem:[%s29689_s2 + $0x160] sm:$0xff] }
 0x995   : > { %27961 = vmatprep.subr.bf16.mxu0 %v27960_v33  ;;  %v21987_v53 = vld [vmem:[%s29689_s2 + $0x150] sm:$0xff] }
 0x996   : > { %v28012_v30 = vpack.c.bf16 %v21988_v17, %v21987_v53  ;;  %v22039_v43 = vld [vmem:[%s29689_s2 + $0x230] sm:$0xff] }
 0x997   : > { %26097 = vmatmul.mubr.msk.f32.vlgmr.msra.gmra.mrb[48].mxu0 %vm4877_vm6, %v32284_v57 }
 0x998   : > { %26099 = vmatprep.mubr.msk.f32.mxu0 %vm4877_vm6, %v32290_v2  ;;  %27963 = vmatpush3.bf16.msra.mxu0 %v27960_v33  ;;  %v21990_v33 = vld [vmem:[%s29689_s2 + $0x168] sm:$0xff] }
 0x999   : > { %27965 = vmatprep.subr.bf16.mxu0 %v27964_v51  ;;  %v28016_v39 = vpack.c.bf16 %v21990_v33, %v21989_v36 }
 0x99b   : > { %26100 = vmatmul.mubr.msk.f32.gmra.mrb[50].mxu0 %vm4877_vm6, %v32294_v15 }
 0x99c   : > { %26102 = vmatprep.mubr.msk.f32.mxu0 %vm4877_vm6, %v32300_v44  ;;  %27967 = vmatpush3.bf16.msra.mxu0 %v27964_v51  ;;  %v21992_v51 = vld [vmem:[%s29689_s2 + $0x178] sm:$0xff] }
 0x99d   : > { %27969 = vmatprep.subr.bf16.mxu0 %v27968_v11 }
 0x99f   : > { %26103 = vmatmul.mubr.msk.f32.gmra.mrb[52].mxu0 %vm4877_vm6, %v32304_v16 }
 0x9a0   : > { %26105 = vmatprep.mubr.msk.f32.mxu0 %vm4877_vm6, %v32310_v31  ;;  %27971 = vmatpush3.bf16.msra.mxu0 %v27968_v11  ;;  %v32403_v11 = vld [vmem:[#allocation6 + $0x81] sm:$0xff] }
 0x9a1   : > { %27973 = vmatprep.subr.bf16.mxu0 %v27972_v42 }
 0x9a3   : > { %26106 = vmatmul.mubr.msk.f32.gmra.mrb[54].mxu0 %vm4877_vm6, %v32314_v38 }
 0x9a4   : > { %27975 = vmatpush3.bf16.msra.mxu0 %v27972_v42  ;;  %26124 = vmatprep.mubr.msk.f32.mxu0 %vm4877_vm6, %v10180_v34  ;;  %v28028_v42 = vpack.c.bf16 %v22004_v13, %v22003_v52  ;;  %v28032_v34 = vpack.c.bf16 %v22006_v28, %v22005_v25 }
 0x9a5   : > { %27977 = vmatprep.subr.bf16.mxu0 %v27976_v35 }
 0x9a7   : > { %26125 = vmatmul.mubr.msk.f32.vlgmr.msra.gmra.mrb[48].mxu0 %vm4877_vm6, %v32321_v55 }
 0x9a8   : > { %26127 = vmatprep.mubr.msk.f32.mxu0 %vm4877_vm6, %v32327_v62  ;;  %27979 = vmatpush3.bf16.msra.mxu0 %v27976_v35  ;;  %v22007_v35 = vld [vmem:[%s29689_s2 + $0x1b0] sm:$0xff] }
 0x9a9   : > { %27981 = vmatprep.subr.bf16.mxu0 %v27980_v50  ;;  %v28036_v48 = vpack.c.bf16 %v22008_v47, %v22007_v35 }
 0x9ab   : > { %26128 = vmatmul.mubr.msk.f32.gmra.mrb[50].mxu0 %vm4877_vm6, %v32331_v6 }
 0x9ac   : > { %26130 = vmatprep.mubr.msk.f32.mxu0 %vm4877_vm6, %v32337_v10  ;;  %27983 = vmatpush3.bf16.msra.mxu0 %v27980_v50  ;;  %v22017_v50 = vld [vmem:[%s29689_s2 + $0x1c0] sm:$0xff] }
 0x9ad   : > { %27985 = vmatprep.subr.bf16.mxu0 %v27984_v3 }
 0x9af   : > { %26131 = vmatmul.mubr.msk.f32.gmra.mrb[52].mxu0 %vm4877_vm6, %v32341_v58 }
 0x9b0   : > { %26133 = vmatprep.mubr.msk.f32.mxu0 %vm4877_vm6, %v32347_v12  ;;  %27987 = vmatpush3.bf16.msra.mxu0 %v27984_v3  ;;  %v22019_v3 = vld [vmem:[%s29689_s2 + $0x1d0] sm:$0xff] }
 0x9b1   : > { %27989 = vmatprep.subr.bf16.mxu0 %v27988_v14  ;;  %v28044_v9 = vpack.c.bf16 %v22020_v8, %v22019_v3 }
 0x9b3   : > { %26134 = vmatmul.mubr.msk.f32.gmra.mrb[54].mxu0 %vm4877_vm6, %v32351_v45 }
 0x9b4   : > { %27991 = vmatpush3.bf16.msra.mxu0 %v27988_v14  ;;  %26152 = vmatprep.mubr.msk.f32.mxu0 %vm4877_vm6, %v32284_v57  ;;  %v22001_v57 = vld [vmem:[%s29689_s2 + $0x180] sm:$0xff] }
 0x9b5   : > { %27993 = vmatprep.subr.bf16.mxu0 %v27992_v56  ;;  %v28024_v0 = vpack.c.bf16 %v22002_v60, %v22001_v57  ;;  %v22021_v14 = vld [vmem:[%s29689_s2 + $0x1e0] sm:$0xff] }
 0x9b6   : > { %v28048_v41 = vpack.c.bf16 %v22022_v27, %v22021_v14  ;;  %v11709_v14 = vld [vmem:[#allocation3 + $0x1] sm:$0xff]  ;;  %v11710_v27 = vld [vmem:[#allocation3 + $0x9] sm:$0xff] }
 0x9b7   : > { %26153 = vmatmul.mubr.msk.f32.vlgmr.msra.gmra.mrb[48].mxu0 %vm4877_vm6, %v32290_v2 }
 0x9b8   : > { %26155 = vmatprep.mubr.msk.f32.mxu0 %vm4877_vm6, %v32294_v15  ;;  %27995 = vmatpush3.bf16.msra.mxu0 %v27992_v56  ;;  %v22023_v56 = vld [vmem:[%s29689_s2 + $0x1f0] sm:$0xff] }
 0x9b9   : > { %27997 = vmatprep.subr.bf16.mxu0 %v27996_v46 }
 0x9bb   : > { %26156 = vmatmul.mubr.msk.f32.gmra.mrb[50].mxu0 %vm4877_vm6, %v32300_v44 }
 0x9bc   : > { %26158 = vmatprep.mubr.msk.f32.mxu0 %vm4877_vm6, %v32304_v16  ;;  %27999 = vmatpush3.bf16.msra.mxu0 %v27996_v46  ;;  %v22036_v46 = vld [vmem:[%s29689_s2 + $0x218] sm:$0xff] }
 0x9bd   : > { %28001 = vmatprep.subr.bf16.mxu0 %v28000_v54 }
 0x9bf   : > { %26159 = vmatmul.mubr.msk.f32.gmra.mrb[52].mxu0 %vm4877_vm6, %v32310_v31 }
 0x9c0   : > { %26161 = vmatprep.mubr.msk.f32.mxu0 %vm4877_vm6, %v32314_v38  ;;  %28003 = vmatpush3.bf16.msra.mxu0 %v28000_v54 }
 0x9c1   : > { %28005 = vmatprep.subr.bf16.mxu0 %v28004_v32 }
 0x9c3   : > { %26162 = vmatmul.mubr.msk.f32.gmra.mrb[54].mxu0 %vm4877_vm6, %v32377_v5 }
 0x9c4   : > { %28007 = vmatpush3.bf16.msra.mxu0 %v28004_v32  ;;  %26180 = vmatprep.mubr.msk.f32.mxu0 %vm4877_vm6, %v32244_v26  ;;  %v28020_v26 = vpack.c.bf16 %v21992_v51, %v21991_v49 }
 0x9c5   : > { %28009 = vmatprep.subr.bf16.mxu0 %v28008_v20 }
 0x9c7   : > { %26181 = vmatmul.mubr.msk.f32.vlgmr.msra.gmra.mrb[48].mxu0 %vm4877_vm6, %v32251_v23 }
 0x9c8   : > { %26183 = vmatprep.mubr.msk.f32.mxu0 %vm4877_vm6, %v32256_v40  ;;  %28011 = vmatpush3.bf16.msra.mxu0 %v28008_v20 }
 0x9c9   : > { %28013 = vmatprep.subr.bf16.mxu0 %v28012_v30 }
 0x9cb   : > { %26184 = vmatmul.mubr.msk.f32.gmra.mrb[50].mxu0 %vm4877_vm6, %v32263_v7 }
 0x9cc   : > { %26186 = vmatprep.mubr.msk.f32.mxu0 %vm4877_vm6, %v32267_v19  ;;  %28015 = vmatpush3.bf16.msra.mxu0 %v28012_v30 }
 0x9cd   : > { %28017 = vmatprep.subr.bf16.mxu0 %v28016_v39 }
 0x9cf   : > { %26187 = vmatmul.mubr.msk.f32.gmra.mrb[52].mxu0 %vm4877_vm6, %v32273_v1 }
 0x9d0   : > { %26189 = vmatprep.mubr.msk.f32.mxu0 %vm4877_vm6, %v32277_v37  ;;  %28019 = vmatpush3.bf16.msra.mxu0 %v28016_v39 }
 0x9d1   : > { %28021 = vmatprep.subr.bf16.mxu0 %v28020_v26 }
 0x9d3   : > { %26190 = vmatmul.mubr.msk.f32.gmra.mrb[54].mxu0 %vm4877_vm6, %v32403_v11 }
 0x9d4   : > { %28023 = vmatpush3.bf16.msra.mxu0 %v28020_v26  ;;  %26208 = vmatprep.mubr.msk.f32.mxu0 %vm4877_vm6, %v32321_v55  ;;  %v22018_v55 = vld [vmem:[%s29689_s2 + $0x1c8] sm:$0xff] }
 0x9d5   : > { %28025 = vmatprep.subr.bf16.mxu0 %v28024_v0  ;;  %v28040_v59 = vpack.c.bf16 %v22018_v55, %v22017_v50 }
 0x9d7   : > { %26209 = vmatmul.mubr.msk.f32.vlgmr.msra.gmra.mrb[48].mxu0 %vm4877_vm6, %v32327_v62 }
 0x9d8   : > { %26211 = vmatprep.mubr.msk.f32.mxu0 %vm4877_vm6, %v32331_v6  ;;  %28027 = vmatpush3.bf16.msra.mxu0 %v28024_v0 }
 0x9d9   : > { %28029 = vmatprep.subr.bf16.mxu0 %v28028_v42 }
 0x9db   : > { %26212 = vmatmul.mubr.msk.f32.gmra.mrb[50].mxu0 %vm4877_vm6, %v32337_v10 }
 0x9dc   : > { %26214 = vmatprep.mubr.msk.f32.mxu0 %vm4877_vm6, %v32341_v58  ;;  %28031 = vmatpush3.bf16.msra.mxu0 %v28028_v42 }
 0x9dd   : > { %28033 = vmatprep.subr.bf16.mxu0 %v28032_v34 }
 0x9df   : > { %26215 = vmatmul.mubr.msk.f32.gmra.mrb[52].mxu0 %vm4877_vm6, %v32347_v12 }
 0x9e0   : > { %26217 = vmatprep.mubr.msk.f32.mxu0 %vm4877_vm6, %v32351_v45  ;;  %28035 = vmatpush3.bf16.msra.mxu0 %v28032_v34 }
 0x9e1   : > { %28037 = vmatprep.subr.bf16.mxu0 %v28036_v48 }
 0x9e3   : > { %26218 = vmatmul.mubr.msk.f32.gmra.mrb[54].mxu0 %vm4877_vm6, %v32429_v61 }
 0x9e4   : > { %28039 = vmatpush3.bf16.msra.mxu0 %v28036_v48  ;;  %26236 = vmatprep.mubr.msk.f32.mxu0 %vm4877_vm6, %v32290_v2  ;;  %v28052_v2 = vpack.c.bf16 %v22024_v63, %v22023_v56  ;;  %v11708_v63 = vld [vmem:[%s29694_s16] sm:$0xf] }
 0x9e5   : > { %28041 = vmatprep.subr.bf16.mxu0 %v28040_v59 }
 0x9e7   : > { %26237 = vmatmul.mubr.msk.f32.vlgmr.msra.gmra.mrb[48].mxu0 %vm4877_vm6, %v32294_v15  ;;  %v22033_v15 = vld [vmem:[%s29689_s2 + $0x200] sm:$0xff] }
 0x9e8   : > { %26239 = vmatprep.mubr.msk.f32.mxu0 %vm4877_vm6, %v32300_v44  ;;  %28043 = vmatpush3.bf16.msra.mxu0 %v28040_v59  ;;  %v22034_v44 = vld [vmem:[%s29689_s2 + $0x208] sm:$0xff] }
 0x9e9   : > { %28045 = vmatprep.subr.bf16.mxu0 %v28044_v9 }
 0x9eb   : > { %26240 = vmatmul.mubr.msk.f32.gmra.mrb[50].mxu0 %vm4877_vm6, %v32304_v16  ;;  %v28056_v16 = vpack.c.bf16 %v22034_v44, %v22033_v15 }
 0x9ec   : > { %26242 = vmatprep.mubr.msk.f32.mxu0 %vm4877_vm6, %v32310_v31  ;;  %28047 = vmatpush3.bf16.msra.mxu0 %v28044_v9  ;;  %v22035_v31 = vld [vmem:[%s29689_s2 + $0x210] sm:$0xff]  ;;  %v22081_v9 = vld [vmem:[%s29694_s16 + $0x4] sm:$0xf] }
 0x9ed   : > { %28049 = vmatprep.subr.bf16.mxu0 %v28048_v41  ;;  %v28060_v21 = vpack.c.bf16 %v22036_v46, %v22035_v31  ;;  %v35353_v46 = vld [vmem:[#allocation26_spill] sm:$0xff] }
 0x9ef   : > { %26243 = vmatmul.mubr.msk.f32.gmra.mrb[52].mxu0 %vm4877_vm6, %v32314_v38  ;;  %v22037_v38 = vld [vmem:[%s29689_s2 + $0x220] sm:$0xff]  ;;  %s35351_s2 = sld [smem:[#allocation85_spill]] }
 0x9f0   : > { %26245 = vmatprep.mubr.msk.f32.mxu0 %vm4877_vm6, %v32377_v5  ;;  %28051 = vmatpush3.bf16.msra.mxu0 %v28048_v41  ;;  %v28064_v54 = vpack.c.bf16 %v22038_v29, %v22037_v38  ;;  %v35354_v29 = vld [vmem:[#allocation15_spill] sm:$0xff] }
 0x9f1   : > { %28053 = vmatprep.subr.bf16.mxu0 %v28052_v2 }
 0x9f3   : > { %26246 = vmatmul.mubr.msk.f32.gmra.mrb[54].mxu0 %vm4877_vm6, %v10804_v4  ;;  %v35352_v4 = vld [vmem:[#allocation16_spill] sm:$0xff] }
 0x9f4   : > { %28055 = vmatpush3.bf16.msra.mxu0 %v28052_v2  ;;  %26264 = vmatprep.mubr.msk.f32.mxu0 %vm4877_vm6, %v32251_v23  ;;  %v28068_v23 = vpack.c.bf16 %v22040_v22, %v22039_v43  ;;  %v32629_v2 = vld [vmem:[%s29694_s16 + $0x8] sm:$0xf]  ;;  %v35355_v43 = vld [vmem:[#allocation25_spill] sm:$0xff] }
 0x9f5   : > { %28057 = vmatprep.subr.bf16.mxu0 %v28056_v16  ;;  %v11260_v53 = vld [vmem:[%s35351_s2 + $0x8] sm:$0xff]  ;;  %v11270_v17 = vld [vmem:[%s35351_s2 + $0x58] sm:$0xff]  ;;  %v11261_v30 = vld [vmem:[%s35351_s2 + $0x10] sm:$0xff] }
 0x9f6   : > { %v11271_v36 = vld [vmem:[%s35351_s2 + $0x60] sm:$0xff]  ;;  %v11262_v33 = vld [vmem:[%s35351_s2 + $0x18] sm:$0xff]  ;;  %v11272_v39 = vld [vmem:[%s35351_s2 + $0x68] sm:$0xff] }
 0x9f7   : > { %26265 = vmatmul.mubr.msk.f32.vlgmr.msra.gmra.mrb[48].mxu0 %vm4877_vm6, %v32256_v40  ;;  %v10958_v40 = vld [vmem:[#allocation6 + $0x91] sm:$0xff]  ;;  %v11263_v49 = vld [vmem:[%s35351_s2 + $0x20] sm:$0xff]  ;;  %v11264_v26 = vld [vmem:[%s35351_s2 + $0x28] sm:$0xff] }
 0x9f8   : > { %26267 = vmatprep.mubr.msk.f32.mxu0 %vm4877_vm6, %v32263_v7  ;;  %28059 = vmatpush3.bf16.msra.mxu0 %v28056_v16  ;;  %v11112_v7 = vld [vmem:[#allocation6 + $0x92] sm:$0xff]  ;;  %v11275_v0 = vld [vmem:[%s35351_s2 + $0x80] sm:$0xff]  ;;  %v11276_v52 = vld [vmem:[%s35351_s2 + $0x88] sm:$0xff] }
 0x9f9   : > { %28061 = vmatprep.subr.bf16.mxu0 %v28060_v21  ;;  %v11273_v51 = vld [vmem:[%s35351_s2 + $0x70] sm:$0xff]  ;;  %v11274_v57 = vld [vmem:[%s35351_s2 + $0x78] sm:$0xff]  ;;  %v11267_v13 = vld [vmem:[%s35351_s2 + $0x40] sm:$0xff] }
 0x9fa   : > { %v11265_v60 = vld [vmem:[%s35351_s2 + $0x30] sm:$0xff]  ;;  %v11268_v25 = vld [vmem:[%s35351_s2 + $0x48] sm:$0xff]  ;;  %v11278_v28 = vld [vmem:[%s35351_s2 + $0x98] sm:$0xff] }
 0x9fb   : > { %26268 = vmatmul.mubr.msk.f32.gmra.mrb[50].mxu0 %vm4877_vm6, %v32267_v19  ;;  %v11259_v19 = vld [vmem:[%s35351_s2] sm:$0xff]  ;;  %v11277_v42 = vld [vmem:[%s35351_s2 + $0x90] sm:$0xff]  ;;  %v11280_v35 = vld [vmem:[%s35351_s2 + $0xa8] sm:$0xff] }
 0x9fc   : > { %26270 = vmatprep.mubr.msk.f32.mxu0 %vm4877_vm6, %v32273_v1  ;;  %28063 = vmatpush3.bf16.msra.mxu0 %v28060_v21  ;;  %v11269_v1 = vld [vmem:[%s35351_s2 + $0x50] sm:$0xff]  ;;  %v11279_v34 = vld [vmem:[%s35351_s2 + $0xa0] sm:$0xff]  ;;  %v11282_v48 = vld [vmem:[%s35351_s2 + $0xb8] sm:$0xff] }
 0x9fd   : > { %28065 = vmatprep.subr.bf16.mxu0 %v28064_v54  ;;  %26335 = vmatprep.mubr.msk.f32.mxu1 %vm4877_vm6, %v11269_v1  ;;  %v11281_v47 = vld [vmem:[%s35351_s2 + $0xb0] sm:$0xff]  ;;  %v11283_v50 = vld [vmem:[%s35351_s2 + $0xc0] sm:$0xff]  ;;  %v11284_v55 = vld [vmem:[%s35351_s2 + $0xc8] sm:$0xff] }
 0x9fe   : > { %v11285_v59 = vld [vmem:[%s35351_s2 + $0xd0] sm:$0xff]  ;;  %v11287_v3 = vld [vmem:[%s35351_s2 + $0xe0] sm:$0xff]  ;;  %v11288_v8 = vld [vmem:[%s35351_s2 + $0xe8] sm:$0xff] }
 0x9ff   : > { %26271 = vmatmul.mubr.msk.f32.gmra.mrb[52].mxu0 %vm4877_vm6, %v32277_v37  ;;  %v11289_v41 = vld [vmem:[%s35351_s2 + $0xf0] sm:$0xff]  ;;  %v11290_v56 = vld [vmem:[%s35351_s2 + $0xf8] sm:$0xff] }
 0xa00   : > { %26273 = vmatprep.mubr.msk.f32.mxu0 %vm4877_vm6, %v32403_v11  ;;  %28067 = vmatpush3.bf16.msra.mxu0 %v28064_v54  ;;  %v11266_v11 = vld [vmem:[%s35351_s2 + $0x38] sm:$0xff] }
 0xa01   : > { %28069 = vmatprep.subr.bf16.mxu0 %v28068_v23 }
 0xa03   : > { %26274 = vmatmul.mubr.msk.f32.gmra.mrb[54].mxu0 %vm4877_vm6, %v10958_v40 }
 0xa04   : > { %28071 = vmatpush3.bf16.msra.mxu0 %v28068_v23  ;;  %26292 = vmatprep.mubr.msk.f32.mxu0 %vm4877_vm6, %v32327_v62 }
 0xa07   : > { %26293 = vmatmul.mubr.msk.f32.vlgmr.msra.gmra.mrb[48].mxu0 %vm4877_vm6, %v32331_v6 }
 0xa08   : > { %26295 = vmatprep.mubr.msk.f32.mxu0 %vm4877_vm6, %v32337_v10 }
 0xa0b   : > { %26296 = vmatmul.mubr.msk.f32.gmra.mrb[50].mxu0 %vm4877_vm6, %v32341_v58 }
 0xa0c   : > { %26298 = vmatprep.mubr.msk.f32.mxu0 %vm4877_vm6, %v32347_v12 }
 0xa0f   : > { %26299 = vmatmul.mubr.msk.f32.gmra.mrb[52].mxu0 %vm4877_vm6, %v32351_v45 }
 0xa10   : > { %26301 = vmatprep.mubr.msk.f32.mxu0 %vm4877_vm6, %v32429_v61  ;;  %v11286_v61 = vld [vmem:[%s35351_s2 + $0xd8] sm:$0xff] }
 0xa13   : > { %26302 = vmatmul.mubr.msk.f32.gmra.mrb[54].mxu0 %vm4877_vm6, %v11112_v7  ;;  %v35356_v7 = vld [vmem:[#allocation18_spill] sm:$0xff] }
 0xa14   : > { %26320 = vmatprep.mubr.msk.f32.mxu0 %vm4877_vm6, %v11259_v19 }
 0xada   : > { %v26294_v37 = vpop.f32.mrb[48].mxu0 }
 0xadb   : > { %v11212_v62 = vpop.f32.mrb[49].mxu0 }
 0xadc   : > { %v28072_v6 = vpack.c.bf16 %v26294_v37, %v11212_v62  ;;  %v35357_v37 = vld [vmem:[#allocation28_spill] sm:$0xff] }
 0xade   : > { %v26297_v10 = vpop.f32.mrb[50].mxu0  ;;  %28073 = vmatprep.subr.bf16.mxu0 %v28072_v6  ;;  %28288 = vmatprep.subr.bf16.mxu1 %v28072_v6 }
 0xadf   : > { %v11222_v58 = vpop.f32.mrb[51].mxu0  ;;  %28075 = vmatpush3.bf16.msra.mxu0 %v28072_v6  ;;  %28292 = vmatpush3.bf16.msra.mxu1 %v28072_v6 }
 0xae0   : > { %v28076_v12 = vpack.c.bf16 %v26297_v10, %v11222_v58  ;;  %v35358_v10 = vld [vmem:[#allocation17_spill] sm:$0xff] }
 0xae2   : > { %v26300_v45 = vpop.f32.mrb[52].mxu0  ;;  %28077 = vmatprep.subr.bf16.mxu0 %v28076_v12  ;;  %28289 = vmatprep.subr.bf16.mxu1 %v28076_v12 }
 0xae3   : > { %v11232_v32 = vpop.f32.mrb[53].mxu0  ;;  %28079 = vmatpush3.bf16.msra.mxu0 %v28076_v12  ;;  %28293 = vmatpush3.bf16.msra.mxu1 %v28076_v12  ;;  %v35359_v12 = vld [vmem:[#allocation27_spill] sm:$0xff] }
 0xae4   : > { %v28080_v18 = vpack.c.bf16 %v26300_v45, %v11232_v32 }
 0xae6   : > { %v26303_v24 = vpop.f32.mrb[54].mxu0  ;;  %28081 = vmatprep.subr.bf16.mxu0 %v28080_v18  ;;  %28290 = vmatprep.subr.bf16.mxu1 %v28080_v18 }
 0xae7   : > { %v11242_v20 = vpop.f32.mrb[55].mxu0  ;;  %28083 = vmatpush3.bf16.msra.mxu0 %v28080_v18  ;;  %28294 = vmatpush3.bf16.msra.mxu1 %v28080_v18 }
 0xae8   : > { %v28084_v5 = vpack.c.bf16 %v26303_v24, %v11242_v20  ;;  %v35360_v24 = vld [vmem:[#allocation20_spill] sm:$0xff] }
 0xaea   : > { %28085 = vmatprep.subr.bf16.mxu0 %v28084_v5  ;;  %28291 = vmatprep.subr.bf16.mxu1 %v28084_v5 }
 0xaeb   : > { %28087 = vmatpush3.bf16.msra.mxu0 %v28084_v5  ;;  %28295 = vmatpush3.bf16.msra.mxu1 %v28084_v5 }
 0xaec   : > { %26368 = vmatprep.subr.msk.mxu0 %vm1560_vm4, %v22081_v9 }
 0xaee   : > { %26321 = vmatmul.mubr.msk.f32.vlgmr.msra.gmra.mrb[56].mxu0 %vm4877_vm6, %v11260_v53  ;;  %26336 = vmatmul.mubr.msk.f32.vlgmr.msra.gmra.mrb[40].mxu1 %vm4877_vm6, %v11270_v17  ;;  %v35361_v53 = vld [vmem:[#allocation30_spill] sm:$0xff] }
 0xaef   : > { %26323 = vmatprep.mubr.msk.f32.mxu0 %vm4877_vm6, %v11261_v30  ;;  %26338 = vmatprep.mubr.msk.f32.mxu1 %vm4877_vm6, %v11271_v36  ;;  %v35362_v36 = vld [vmem:[#allocation19_spill] sm:$0xff] }
 0xaf0   : > { %26369 = vmatpush3.msk.msra.mxu0 %vm1560_vm4, %v22081_v9  ;;  %v35369_v9 = vld [vmem:[#allocation34_spill] sm:$0xff] }
 0xaf1   : > { %26418 = vmatprep.subr.msk.mxu0 %vm1560_vm4, %v11708_v63 }
 0xaf2   : > { %26324 = vmatmul.mubr.msk.f32.gmra.mrb[58].mxu0 %vm4877_vm6, %v11262_v33  ;;  %26339 = vmatmul.mubr.msk.f32.gmra.mrb[42].mxu1 %vm4877_vm6, %v11272_v39  ;;  %v35363_v39 = vld [vmem:[#allocation29_spill] sm:$0xff] }
 0xaf3   : > { %26326 = vmatprep.mubr.msk.f32.mxu0 %vm4877_vm6, %v11263_v49  ;;  %26341 = vmatprep.mubr.msk.f32.mxu1 %vm4877_vm6, %v11273_v51 }
 0xaf6   : > { %26327 = vmatmul.mubr.msk.f32.gmra.mrb[60].mxu0 %vm4877_vm6, %v11264_v26  ;;  %26342 = vmatmul.mubr.msk.f32.gmra.mrb[44].mxu1 %vm4877_vm6, %v11274_v57 }
 0xaf7   : > { %26329 = vmatprep.mubr.msk.f32.mxu0 %vm4877_vm6, %v11265_v60  ;;  %26344 = vmatprep.mubr.msk.f32.mxu1 %vm4877_vm6, %v11275_v0  ;;  %v35364_v0 = vld [vmem:[#allocation22_spill] sm:$0xff] }
 0xafa   : > { %26330 = vmatmul.mubr.msk.f32.gmra.mrb[62].mxu0 %vm4877_vm6, %v11266_v11  ;;  %26345 = vmatmul.mubr.msk.f32.gmra.mrb[46].mxu1 %vm4877_vm6, %v11276_v52 }
 0xafb   : > { %26332 = vmatprep.mubr.msk.f32.mxu0 %vm4877_vm6, %v11267_v13  ;;  %26347 = vmatprep.mubr.msk.f32.mxu1 %vm4877_vm6, %v11277_v42  ;;  %v35365_v13 = vld [vmem:[#allocation32_spill] sm:$0xff] }
 0xafe   : > { %26333 = vmatmul.mubr.msk.f32.gmra.mrb[64].mxu0 %vm4877_vm6, %v11268_v25  ;;  %26348 = vmatmul.mubr.msk.f32.gmra.mrb[48].mxu1 %vm4877_vm6, %v11278_v28  ;;  %v35366_v28 = vld [vmem:[#allocation21_spill] sm:$0xff] }
 0xaff   : > { %26350 = vmatprep.mubr.msk.f32.mxu1 %vm4877_vm6, %v11279_v34  ;;  %26370 = vmatprep.mubr.msk.f32.mxu0 %vm1364_vm5, %v11709_v14 }
 0xb02   : > { %26351 = vmatmul.mubr.msk.f32.gmra.mrb[50].mxu1 %vm4877_vm6, %v11280_v35  ;;  %26371 = vmatmul.mubr.msk.f32.vlgmr.msra.gmra.mrb[66].mxu0 %vm1364_vm5, %v11710_v27  ;;  %v35367_v35 = vld [vmem:[#allocation31_spill] sm:$0xff] }
 0xb03   : > { %26353 = vmatprep.mubr.msk.f32.mxu1 %vm4877_vm6, %v11281_v47  ;;  %26419 = vmatpush3.msk.msra.mxu0 %vm1560_vm4, %v11708_v63  ;;  %v35371_v63 = vld [vmem:[#allocation33_spill] sm:$0xff] }
 0xb04   : > { %26468 = vmatprep.subr.msk.mxu0 %vm1560_vm4, %v32629_v2 }
 0xb06   : > { %26354 = vmatmul.mubr.msk.f32.gmra.mrb[52].mxu1 %vm4877_vm6, %v11282_v48 }
 0xb07   : > { %26356 = vmatprep.mubr.msk.f32.mxu1 %vm4877_vm6, %v11283_v50 }
 0xb0a   : > { %26357 = vmatmul.mubr.msk.f32.gmra.mrb[54].mxu1 %vm4877_vm6, %v11284_v55 }
 0xb0b   : > { %26359 = vmatprep.mubr.msk.f32.mxu1 %vm4877_vm6, %v11285_v59 }
 0xb0e   : > { %26360 = vmatmul.mubr.msk.f32.gmra.mrb[56].mxu1 %vm4877_vm6, %v11286_v61  ;;  %v35368_v61 = vld [vmem:[#allocation24_spill] sm:$0xff] }
 0xb0f   : > { %26362 = vmatprep.mubr.msk.f32.mxu1 %vm4877_vm6, %v11287_v3 }
 0xb12   : > { %26363 = vmatmul.mubr.msk.f32.gmra.mrb[58].mxu1 %vm4877_vm6, %v11288_v8 }
 0xb13   : > { %26365 = vmatprep.mubr.msk.f32.mxu1 %vm4877_vm6, %v11289_v41  ;;  %v35370_v41 = vld [vmem:[#allocation23_spill] sm:$0xff] }
 0xb16   : > { %26366 = vmatmul.mubr.msk.f32.gmra.mrb[60].mxu1 %vm4877_vm6, %v11290_v56 }
 0xbc1   : > { %v26322_v15 = vpop.f32.mrb[56].mxu0  ;;  %v26337_v44 = vpop.f32.mrb[40].mxu1 }
 0xbc2   : > { %v11613_v16 = vadd.f32 %v26322_v15, %v35352_v4  ;;  %v11453_v31 = vpop.f32.mrb[57].mxu0  ;;  %v11623_v21 = vadd.f32 %v26337_v44, %v35353_v46  ;;  %v11503_v38 = vpop.f32.mrb[41].mxu1 }
 0xbc3   : > { %v11612_v54 = vadd.f32 %v11453_v31, %v35354_v29  ;;  %v11622_v22 = vadd.f32 %v11503_v38, %v35355_v43  ;;  %v35372_v31 = vld [vmem:[#allocation36_spill] sm:$0xff]  ;;  %v35373_v38 = vld [vmem:[#allocation35_spill] sm:$0xff] }
 0xbc4   : > { %11645 = vst.msk [vmem:[#allocation3 + $0x21] sm:$0xff] %vm1364_vm5, %v11613_v16  ;;  %11655 = vst.msk [vmem:[#allocation3 + $0x99] sm:$0xff] %vm1364_vm5, %v11623_v21 }
 0xbc5   : > { %11644 = vst.msk [vmem:[#allocation3 + $0x19] sm:$0xff] %vm1364_vm5, %v11612_v54  ;;  %v26325_v23 = vpop.f32.mrb[58].mxu0  ;;  %11654 = vst.msk [vmem:[#allocation3 + $0x91] sm:$0xff] %vm1364_vm5, %v11622_v22  ;;  %v26340_v40 = vpop.f32.mrb[42].mxu1 }
 0xbc6   : > { %v11615_v19 = vadd.f32 %v26325_v23, %v35356_v7  ;;  %v11463_v1 = vpop.f32.mrb[59].mxu0  ;;  %v11625_v62 = vadd.f32 %v26340_v40, %v35357_v37  ;;  %v11513_v6 = vpop.f32.mrb[43].mxu1  ;;  %v35374_v23 = vld [vmem:[#allocation38_spill] sm:$0xff] }
 0xbc7   : > { %v11614_v58 = vadd.f32 %v11463_v1, %v35358_v10  ;;  %v11624_v45 = vadd.f32 %v11513_v6, %v35359_v12 }
 0xbc8   : > { %11647 = vst.msk [vmem:[#allocation3 + $0x39] sm:$0xff] %vm1364_vm5, %v11615_v19  ;;  %11657 = vst.msk [vmem:[#allocation3 + $0xb1] sm:$0xff] %vm1364_vm5, %v11625_v62  ;;  %v35375_v19 = vld [vmem:[#allocation37_spill] sm:$0xff] }
 0xbc9   : > { %11646 = vst.msk [vmem:[#allocation3 + $0x31] sm:$0xff] %vm1364_vm5, %v11614_v58  ;;  %v26328_v32 = vpop.f32.mrb[60].mxu0  ;;  %11656 = vst.msk [vmem:[#allocation3 + $0xa9] sm:$0xff] %vm1364_vm5, %v11624_v45  ;;  %v26343_v18 = vpop.f32.mrb[44].mxu1  ;;  %v35376_v58 = vld [vmem:[#allocation40_spill] sm:$0xff] }
 0xbca   : > { %v11617_v20 = vadd.f32 %v26328_v32, %v35360_v24  ;;  %v11473_v5 = vpop.f32.mrb[61].mxu0  ;;  %v11627_v17 = vadd.f32 %v26343_v18, %v35361_v53  ;;  %v11523_v30 = vpop.f32.mrb[45].mxu1  ;;  %v35377_v32 = vld [vmem:[#allocation39_spill] sm:$0xff]  ;;  %v35378_v53 = vld [vmem:[#allocation42_spill] sm:$0xff] }
 0xbcb   : > { %v11616_v33 = vadd.f32 %v11473_v5, %v35362_v36  ;;  %v11626_v49 = vadd.f32 %v11523_v30, %v35363_v39  ;;  %v32660_v57 = vld [vmem:[#allocation3 + $0x21] sm:$0xff]  ;;  %v35379_v36 = vld [vmem:[#allocation41_spill] sm:$0xff] }
 0xbcc   : > { %11649 = vst.msk [vmem:[#allocation3 + $0x51] sm:$0xff] %vm1364_vm5, %v11617_v20  ;;  %v32654_v51 = vld [vmem:[#allocation3 + $0x19] sm:$0xff]  ;;  %11659 = vst.msk [vmem:[#allocation3 + $0xc9] sm:$0xff] %vm1364_vm5, %v11627_v17  ;;  %v32713_v62 = vld [vmem:[#allocation3 + $0x91] sm:$0xff] }
 0xbcd   : > { %11648 = vst.msk [vmem:[#allocation3 + $0x49] sm:$0xff] %vm1364_vm5, %v11616_v33  ;;  %v26331_v26 = vpop.f32.mrb[62].mxu0  ;;  %26373 = vmatprep.mubr.msk.f32.mxu0 %vm1364_vm5, %v32654_v51  ;;  %11658 = vst.msk [vmem:[#allocation3 + $0xc1] sm:$0xff] %vm1364_vm5, %v11626_v49  ;;  %v26346_v60 = vpop.f32.mrb[46].mxu1  ;;  %v32730_v20 = vld [vmem:[#allocation3 + $0x99] sm:$0xff] }
 0xbce   : > { %v11619_v11 = vadd.f32 %v26331_v26, %v35364_v0  ;;  %v11483_v52 = vpop.f32.mrb[63].mxu0  ;;  %26374 = vmatmul.mubr.msk.f32.gmra.mrb[68].mxu0 %vm1364_vm5, %v32660_v57  ;;  %v11629_v42 = vadd.f32 %v26346_v60, %v35365_v13  ;;  %v11533_v25 = vpop.f32.mrb[47].mxu1  ;;  %v35380_v60 = vld [vmem:[#allocation44_spill] sm:$0xff] }
 0xbcf   : > { %v11618_v34 = vadd.f32 %v11483_v52, %v35366_v28  ;;  %v11628_v47 = vadd.f32 %v11533_v25, %v35367_v35  ;;  %v32676_v55 = vld [vmem:[#allocation3 + $0x39] sm:$0xff]  ;;  %v32742_v49 = vld [vmem:[#allocation3 + $0xb1] sm:$0xff] }
 0xbd0   : > { %11651 = vst.msk [vmem:[#allocation3 + $0x69] sm:$0xff] %vm1364_vm5, %v11619_v11  ;;  %v32670_v48 = vld [vmem:[#allocation3 + $0x31] sm:$0xff]  ;;  %11661 = vst.msk [vmem:[#allocation3 + $0xe1] sm:$0xff] %vm1364_vm5, %v11629_v42  ;;  %v32727_v24 = vld [vmem:[#allocation3 + $0xa9] sm:$0xff] }
 0xbd1   : > { %11650 = vst.msk [vmem:[#allocation3 + $0x61] sm:$0xff] %vm1364_vm5, %v11618_v34  ;;  %v26334_v50 = vpop.f32.mrb[64].mxu0  ;;  %26376 = vmatprep.mubr.msk.f32.mxu0 %vm1364_vm5, %v32670_v48  ;;  %11660 = vst.msk [vmem:[#allocation3 + $0xd9] sm:$0xff] %vm1364_vm5, %v11628_v47  ;;  %v26349_v59 = vpop.f32.mrb[48].mxu1  ;;  %v35381_v52 = vld [vmem:[#allocation43_spill] sm:$0xff] }
 0xbd2   : > { %v11621_v3 = vadd.f32 %v26334_v50, %v35368_v61  ;;  %v11493_v8 = vpop.f32.mrb[65].mxu0  ;;  %26377 = vmatmul.mubr.msk.f32.gmra.mrb[70].mxu0 %vm1364_vm5, %v32676_v55  ;;  %v11631_v14 = vadd.f32 %v26349_v59, %v35369_v9  ;;  %v11543_v27 = vpop.f32.mrb[49].mxu1 }
 0xbd3   : > { %v11620_v56 = vadd.f32 %v11493_v8, %v35370_v41  ;;  %v11630_v15 = vadd.f32 %v11543_v27, %v35371_v63  ;;  %v32692_v4 = vld [vmem:[#allocation3 + $0x51] sm:$0xff]  ;;  %v32754_v25 = vld [vmem:[#allocation3 + $0xc9] sm:$0xff]  ;;  %v11676_v41 = vld [vmem:[#allocation3] sm:$0xff] }
 0xbd4   : > { %11653 = vst.msk [vmem:[#allocation3 + $0x81] sm:$0xff] %vm1364_vm5, %v11621_v3  ;;  %v32686_v44 = vld [vmem:[#allocation3 + $0x49] sm:$0xff]  ;;  %11663 = vst.msk [vmem:[#allocation3 + $0xf9] sm:$0xff] %vm1364_vm5, %v11631_v14  ;;  %v32739_v39 = vld [vmem:[#allocation3 + $0xc1] sm:$0xff] }
 0xbd5   : > { %11652 = vst.msk [vmem:[#allocation3 + $0x79] sm:$0xff] %vm1364_vm5, %v11620_v56  ;;  %26379 = vmatprep.mubr.msk.f32.mxu0 %vm1364_vm5, %v32686_v44  ;;  %11662 = vst.msk [vmem:[#allocation3 + $0xf1] sm:$0xff] %vm1364_vm5, %v11630_v15  ;;  %v26352_v16 = vpop.f32.mrb[50].mxu1  ;;  %v11677_v63 = vld [vmem:[#allocation3 + $0x8] sm:$0xff] }
 0xbd6   : > { %26380 = vmatmul.mubr.msk.f32.gmra.mrb[72].mxu0 %vm1364_vm5, %v32692_v4  ;;  %v11633_v46 = vadd.f32 %v26352_v16, %v35372_v31  ;;  %v11553_v21 = vpop.f32.mrb[51].mxu1  ;;  %v32815_v15 = vld [vmem:[%s29694_s16 + $0xc] sm:$0xf]  ;;  %v32818_v16 = vld [vmem:[#allocation3 + $0x18] sm:$0xff]  ;;  %v32826_v31 = vld [vmem:[#allocation3 + $0x20] sm:$0xff] }
 0xbd7   : > { %v11632_v29 = vadd.f32 %v11553_v21, %v35373_v38  ;;  %v32704_v43 = vld [vmem:[#allocation3 + $0x69] sm:$0xff]  ;;  %v32763_v34 = vld [vmem:[#allocation3 + $0xe1] sm:$0xff]  ;;  %v32834_v21 = vld [vmem:[#allocation3 + $0x38] sm:$0xff] }
 0xbd8   : > { %v32699_v54 = vld [vmem:[#allocation3 + $0x61] sm:$0xff]  ;;  %11665 = vst.msk [vmem:[#allocation3 + $0x111] sm:$0xff] %vm1364_vm5, %v11633_v46  ;;  %v32751_v42 = vld [vmem:[#allocation3 + $0xd9] sm:$0xff]  ;;  %v32830_v46 = vld [vmem:[#allocation3 + $0x30] sm:$0xff] }
 0xbd9   : > { %26382 = vmatprep.mubr.msk.f32.mxu0 %vm1364_vm5, %v32699_v54  ;;  %11664 = vst.msk [vmem:[#allocation3 + $0x109] sm:$0xff] %vm1364_vm5, %v11632_v29  ;;  %v26355_v22 = vpop.f32.mrb[52].mxu1  ;;  %v32838_v38 = vld [vmem:[#allocation3 + $0x48] sm:$0xff]  ;;  %v32846_v29 = vld [vmem:[#allocation3 + $0x60] sm:$0xff] }
 0xbda   : > { %26383 = vmatmul.mubr.msk.f32.gmra.mrb[74].mxu0 %vm1364_vm5, %v32704_v43  ;;  %v11635_v40 = vadd.f32 %v26355_v22, %v35374_v23  ;;  %v11563_v7 = vpop.f32.mrb[53].mxu1  ;;  %v32850_v22 = vld [vmem:[#allocation3 + $0x68] sm:$0xff] }
 0xbdb   : > { %v11634_v1 = vadd.f32 %v11563_v7, %v35375_v19  ;;  %v32718_v6 = vld [vmem:[#allocation3 + $0x81] sm:$0xff]  ;;  %v32771_v47 = vld [vmem:[#allocation3 + $0xf9] sm:$0xff]  ;;  %v32862_v7 = vld [vmem:[#allocation3 + $0x90] sm:$0xff] }
 0xbdc   : > { %v32711_v37 = vld [vmem:[#allocation3 + $0x79] sm:$0xff]  ;;  %11667 = vst.msk [vmem:[#allocation3 + $0x129] sm:$0xff] %vm1364_vm5, %v11635_v40  ;;  %v32761_v28 = vld [vmem:[#allocation3 + $0xf1] sm:$0xff] }
 0xbdd   : > { %26385 = vmatprep.mubr.msk.f32.mxu0 %vm1364_vm5, %v32711_v37  ;;  %11666 = vst.msk [vmem:[#allocation3 + $0x121] sm:$0xff] %vm1364_vm5, %v11634_v1  ;;  %v26358_v10 = vpop.f32.mrb[54].mxu1  ;;  %v32854_v23 = vld [vmem:[#allocation3 + $0x78] sm:$0xff]  ;;  %v32858_v40 = vld [vmem:[#allocation3 + $0x80] sm:$0xff]  ;;  %v32870_v1 = vld [vmem:[#allocation3 + $0xa8] sm:$0xff] }
 0xbde   : > { %26386 = vmatmul.mubr.msk.f32.gmra.mrb[76].mxu0 %vm1364_vm5, %v32718_v6  ;;  %v11637_v12 = vadd.f32 %v26358_v10, %v35376_v58  ;;  %v11573_v45 = vpop.f32.mrb[55].mxu1  ;;  %v32866_v19 = vld [vmem:[#allocation3 + $0x98] sm:$0xff]  ;;  %v32874_v10 = vld [vmem:[#allocation3 + $0xb0] sm:$0xff]  ;;  %v32878_v58 = vld [vmem:[#allocation3 + $0xc0] sm:$0xff] }
 0xbdf   : > { %26388 = vmatprep.mubr.msk.f32.mxu0 %vm1364_vm5, %v32713_v62  ;;  %v11636_v18 = vadd.f32 %v11573_v45, %v35377_v32  ;;  %v32779_v59 = vld [vmem:[#allocation3 + $0x111] sm:$0xff]  ;;  %v32890_v32 = vld [vmem:[#allocation3 + $0xe0] sm:$0xff] }
 0xbe0   : > { %11669 = vst.msk [vmem:[#allocation3 + $0x141] sm:$0xff] %vm1364_vm5, %v11637_v12  ;;  %v32769_v35 = vld [vmem:[#allocation3 + $0x109] sm:$0xff]  ;;  %v32886_v45 = vld [vmem:[#allocation3 + $0xd8] sm:$0xff] }
 0xbe1   : > { %11668 = vst.msk [vmem:[#allocation3 + $0x139] sm:$0xff] %vm1364_vm5, %v11636_v18  ;;  %v26361_v5 = vpop.f32.mrb[56].mxu1  ;;  %v32882_v12 = vld [vmem:[#allocation3 + $0xc8] sm:$0xff]  ;;  %v32894_v18 = vld [vmem:[#allocation3 + $0xf0] sm:$0xff] }
 0xbe2   : > { %26389 = vmatmul.mubr.msk.f32.gmra.mrb[78].mxu0 %vm1364_vm5, %v32730_v20  ;;  %v11639_v17 = vadd.f32 %v26361_v5, %v35378_v53  ;;  %v11583_v30 = vpop.f32.mrb[57].mxu1  ;;  %v32898_v5 = vld [vmem:[#allocation3 + $0xf8] sm:$0xff]  ;;  %v32902_v53 = vld [vmem:[#allocation3 + $0x108] sm:$0xff] }
 0xbe3   : > { %26391 = vmatprep.mubr.msk.f32.mxu0 %vm1364_vm5, %v32727_v24  ;;  %v11638_v33 = vadd.f32 %v11583_v30, %v35379_v36  ;;  %v32787_v3 = vld [vmem:[#allocation3 + $0x129] sm:$0xff] }
 0xbe4   : > { %11671 = vst.msk [vmem:[#allocation3 + $0x159] sm:$0xff] %vm1364_vm5, %v11639_v17  ;;  %v32777_v50 = vld [vmem:[#allocation3 + $0x121] sm:$0xff]  ;;  %v32906_v17 = vld [vmem:[#allocation3 + $0x110] sm:$0xff] }
 0xbe5   : > { %11670 = vst.msk [vmem:[#allocation3 + $0x151] sm:$0xff] %vm1364_vm5, %v11638_v33  ;;  %v26364_v26 = vpop.f32.mrb[58].mxu1  ;;  %v32910_v30 = vld [vmem:[#allocation3 + $0x120] sm:$0xff]  ;;  %v35384_v33 = vld [vmem:[#allocation50_spill] sm:$0xff] }
 0xbe6   : > { %26392 = vmatmul.mubr.msk.f32.gmra.mrb[80].mxu0 %vm1364_vm5, %v32742_v49  ;;  %v11641_v0 = vadd.f32 %v26364_v26, %v35380_v60  ;;  %v11593_v11 = vpop.f32.mrb[59].mxu1 }
 0xbe7   : > { %26394 = vmatprep.mubr.msk.f32.mxu0 %vm1364_vm5, %v32739_v39  ;;  %v11640_v13 = vadd.f32 %v11593_v11, %v35381_v52  ;;  %v32795_v9 = vld [vmem:[#allocation3 + $0x141] sm:$0xff]  ;;  %v35385_v11 = vld [vmem:[#allocation49_spill] sm:$0xff] }
 0xbe8   : > { %11673 = vst.msk [vmem:[#allocation3 + $0x171] sm:$0xff] %vm1364_vm5, %v11641_v0  ;;  %v32785_v61 = vld [vmem:[#allocation3 + $0x139] sm:$0xff]  ;;  %v32915_v0 = vld [vmem:[#allocation3 + $0x128] sm:$0xff] }
 0xbe9   : > { %11672 = vst.msk [vmem:[#allocation3 + $0x169] sm:$0xff] %vm1364_vm5, %v11640_v13  ;;  %v26367_v36 = vpop.f32.mrb[60].mxu1  ;;  %v32920_v13 = vld [vmem:[#allocation3 + $0x138] sm:$0xff] }
 0xbea   : > { %26395 = vmatmul.mubr.msk.f32.gmra.mrb[82].mxu0 %vm1364_vm5, %v32754_v25  ;;  %v11643_v26 = vadd.f32 %v26367_v36, %v35384_v33  ;;  %v11603_v60 = vpop.f32.mrb[61].mxu1 }
 0xbeb   : > { %26397 = vmatprep.mubr.msk.f32.mxu0 %vm1364_vm5, %v32751_v42  ;;  %v32803_v27 = vld [vmem:[#allocation3 + $0x159] sm:$0xff]  ;;  %v11642_v52 = vadd.f32 %v11603_v60, %v35385_v11  ;;  %v12392_v11 = vld [vmem:[#allocation3 + $0xa] sm:$0xff] }
 0xbec   : > { %v32793_v8 = vld [vmem:[#allocation3 + $0x151] sm:$0xff]  ;;  %11675 = vst.msk [vmem:[#allocation3 + $0x189] sm:$0xff] %vm1364_vm5, %v11643_v26  ;;  %v12391_v26 = vld [vmem:[#allocation3 + $0x2] sm:$0xff] }
 0xbed   : > { %11674 = vst.msk [vmem:[#allocation3 + $0x181] sm:$0xff] %vm1364_vm5, %v11642_v52  ;;  %v32934_v36 = vld [vmem:[#allocation3 + $0x158] sm:$0xff]  ;;  %v32948_v52 = vld [vmem:[%s29694_s16 + $0x10] sm:$0xf] }
 0xbee   : > { %26398 = vmatmul.mubr.msk.f32.gmra.mrb[84].mxu0 %vm1364_vm5, %v32763_v34 }
 0xbef   : > { %26400 = vmatprep.mubr.msk.f32.mxu0 %vm1364_vm5, %v32761_v28  ;;  %v32809_v56 = vld [vmem:[#allocation3 + $0x171] sm:$0xff] }
 0xbf0   : > { %v32801_v14 = vld [vmem:[#allocation3 + $0x169] sm:$0xff]  ;;  %35383 = vst [vmem:[#allocation64_spill] sm:$0xff] %v32809_v56 }
 0xbf1   : > { %35382 = vst [vmem:[#allocation52_spill] sm:$0xff] %v32801_v14  ;;  %v32938_v33 = vld [vmem:[#allocation3 + $0x168] sm:$0xff]  ;;  %v32942_v60 = vld [vmem:[#allocation3 + $0x170] sm:$0xff] }
 0xbf2   : > { %26401 = vmatmul.mubr.msk.f32.gmra.mrb[86].mxu0 %vm1364_vm5, %v32771_v47 }
 0xbf3   : > { %26403 = vmatprep.mubr.msk.f32.mxu0 %vm1364_vm5, %v32769_v35 }
 0xbf6   : > { %26404 = vmatmul.mubr.msk.f32.gmra.mrb[88].mxu0 %vm1364_vm5, %v32779_v59 }
 0xbf7   : > { %26406 = vmatprep.mubr.msk.f32.mxu0 %vm1364_vm5, %v32777_v50 }
 0xbfa   : > { %26407 = vmatmul.mubr.msk.f32.gmra.mrb[90].mxu0 %vm1364_vm5, %v32787_v3 }
 0xbfb   : > { %26409 = vmatprep.mubr.msk.f32.mxu0 %vm1364_vm5, %v32785_v61 }
 0xbfe   : > { %26410 = vmatmul.mubr.msk.f32.gmra.mrb[92].mxu0 %vm1364_vm5, %v32795_v9 }
 0xbff   : > { %26412 = vmatprep.mubr.msk.f32.mxu0 %vm1364_vm5, %v32793_v8 }
 0xc02   : > { %26413 = vmatmul.mubr.msk.f32.gmra.mrb[94].mxu0 %vm1364_vm5, %v32803_v27 }
 0xc03   : > { %26415 = vmatprep.mubr.msk.f32.mxu0 %vm1364_vm5, %v32801_v14  ;;  %v32959_v14 = vld [vmem:[#allocation3 + $0x22] sm:$0xff] }
 0xc04   : > { %35387 = vst [vmem:[#allocation70_spill] sm:$0xff] %v32959_v14 }
 0xc06   : > { %26416 = vmatmul.mubr.msk.f32.gmra.mrb[96].mxu0 %vm1364_vm5, %v32809_v56  ;;  %v32951_v56 = vld [vmem:[#allocation3 + $0x1a] sm:$0xff] }
 0xc07   : > { %26420 = vmatprep.mubr.msk.f32.mxu0 %vm1364_vm5, %v11676_v41  ;;  %v32926_v41 = vld [vmem:[#allocation3 + $0x140] sm:$0xff]  ;;  %35386 = vst [vmem:[#allocation67_spill] sm:$0xff] %v32951_v56 }
 0xc0a   : > { %26421 = vmatmul.mubr.msk.f32.vlgmr.msra.gmra.mrb[66].mxu0 %vm1364_vm5, %v11677_v63  ;;  %v32930_v63 = vld [vmem:[#allocation3 + $0x150] sm:$0xff] }
 0xc0b   : > { %26423 = vmatprep.mubr.msk.f32.mxu0 %vm1364_vm5, %v32818_v16  ;;  %26469 = vmatpush3.msk.msra.mxu0 %vm1560_vm4, %v32629_v2  ;;  %v32842_v2 = vld [vmem:[#allocation3 + $0x50] sm:$0xff] }
 0xc0c   : > { %26518 = vmatprep.subr.msk.mxu0 %vm1560_vm4, %v32815_v15 }
 0xc0e   : > { %26424 = vmatmul.mubr.msk.f32.gmra.mrb[68].mxu0 %vm1364_vm5, %v32826_v31 }
 0xc0f   : > { %26426 = vmatprep.mubr.msk.f32.mxu0 %vm1364_vm5, %v32830_v46 }
 0xc12   : > { %26427 = vmatmul.mubr.msk.f32.gmra.mrb[70].mxu0 %vm1364_vm5, %v32834_v21 }
 0xc13   : > { %26429 = vmatprep.mubr.msk.f32.mxu0 %vm1364_vm5, %v32838_v38 }
 0xc16   : > { %26430 = vmatmul.mubr.msk.f32.gmra.mrb[72].mxu0 %vm1364_vm5, %v32842_v2 }
 0xc17   : > { %26432 = vmatprep.mubr.msk.f32.mxu0 %vm1364_vm5, %v32846_v29 }
 0xc1a   : > { %26433 = vmatmul.mubr.msk.f32.gmra.mrb[74].mxu0 %vm1364_vm5, %v32850_v22 }
 0xc1b   : > { %26435 = vmatprep.mubr.msk.f32.mxu0 %vm1364_vm5, %v32854_v23 }
 0xc1e   : > { %26436 = vmatmul.mubr.msk.f32.gmra.mrb[76].mxu0 %vm1364_vm5, %v32858_v40 }
 0xc1f   : > { %26438 = vmatprep.mubr.msk.f32.mxu0 %vm1364_vm5, %v32862_v7 }
 0xc22   : > { %26439 = vmatmul.mubr.msk.f32.gmra.mrb[78].mxu0 %vm1364_vm5, %v32866_v19 }
 0xc23   : > { %26441 = vmatprep.mubr.msk.f32.mxu0 %vm1364_vm5, %v32870_v1 }
 0xc26   : > { %26442 = vmatmul.mubr.msk.f32.gmra.mrb[80].mxu0 %vm1364_vm5, %v32874_v10 }
 0xc27   : > { %26444 = vmatprep.mubr.msk.f32.mxu0 %vm1364_vm5, %v32878_v58 }
 0xc2a   : > { %26445 = vmatmul.mubr.msk.f32.gmra.mrb[82].mxu0 %vm1364_vm5, %v32882_v12 }
 0xc2b   : > { %26447 = vmatprep.mubr.msk.f32.mxu0 %vm1364_vm5, %v32886_v45 }
 0xc2e   : > { %26448 = vmatmul.mubr.msk.f32.gmra.mrb[84].mxu0 %vm1364_vm5, %v32890_v32 }
 0xc2f   : > { %26450 = vmatprep.mubr.msk.f32.mxu0 %vm1364_vm5, %v32894_v18 }
 0xc32   : > { %26451 = vmatmul.mubr.msk.f32.gmra.mrb[86].mxu0 %vm1364_vm5, %v32898_v5 }
 0xc33   : > { %26453 = vmatprep.mubr.msk.f32.mxu0 %vm1364_vm5, %v32902_v53 }
 0xc36   : > { %26454 = vmatmul.mubr.msk.f32.gmra.mrb[88].mxu0 %vm1364_vm5, %v32906_v17 }
 0xc37   : > { %26456 = vmatprep.mubr.msk.f32.mxu0 %vm1364_vm5, %v32910_v30 }
 0xc3a   : > { %26457 = vmatmul.mubr.msk.f32.gmra.mrb[90].mxu0 %vm1364_vm5, %v32915_v0 }
 0xc3b   : > { %26459 = vmatprep.mubr.msk.f32.mxu0 %vm1364_vm5, %v32920_v13 }
 0xc3e   : > { %26460 = vmatmul.mubr.msk.f32.gmra.mrb[92].mxu0 %vm1364_vm5, %v32926_v41 }
 0xc3f   : > { %26462 = vmatprep.mubr.msk.f32.mxu0 %vm1364_vm5, %v32930_v63 }
 0xc42   : > { %26463 = vmatmul.mubr.msk.f32.gmra.mrb[94].mxu0 %vm1364_vm5, %v32934_v36 }
 0xc43   : > { %26465 = vmatprep.mubr.msk.f32.mxu0 %vm1364_vm5, %v32938_v33 }
 0xc46   : > { %26466 = vmatmul.mubr.msk.f32.gmra.mrb[96].mxu0 %vm1364_vm5, %v32942_v60 }
 0xc47   : > { %26470 = vmatprep.mubr.msk.f32.mxu0 %vm1364_vm5, %v12391_v26  ;;  %v32963_v26 = vld [vmem:[#allocation3 + $0x32] sm:$0xff] }
 0xc48   : > { %35388 = vst [vmem:[#allocation71_spill] sm:$0xff] %v32963_v26 }
 0xc4a   : > { %26471 = vmatmul.mubr.msk.f32.vlgmr.msra.gmra.mrb[66].mxu0 %vm1364_vm5, %v12392_v11  ;;  %v32967_v11 = vld [vmem:[#allocation3 + $0x3a] sm:$0xff] }
 0xc4b   : > { %26473 = vmatprep.mubr.msk.f32.mxu0 %vm1364_vm5, %v32951_v56  ;;  %26519 = vmatpush3.msk.msra.mxu0 %vm1560_vm4, %v32815_v15  ;;  %35389 = vst [vmem:[#allocation73_spill] sm:$0xff] %v32967_v11  ;;  %v32971_v56 = vld [vmem:[#allocation3 + $0x4a] sm:$0xff]  ;;  %v32975_v15 = vld [vmem:[#allocation3 + $0x52] sm:$0xff] }
 0xc4c   : > { %26568 = vmatprep.subr.msk.mxu0 %vm1560_vm4, %v32948_v52  ;;  %35390 = vst [vmem:[#allocation75_spill] sm:$0xff] %v32971_v56  ;;  %35391 = vst [vmem:[#allocation45_spill] sm:$0xff] %v32975_v15 }
 0xc4e   : > { %26474 = vmatmul.mubr.msk.f32.gmra.mrb[68].mxu0 %vm1364_vm5, %v32959_v14  ;;  %v32979_v14 = vld [vmem:[#allocation3 + $0x62] sm:$0xff] }
 0xc4f   : > { %26476 = vmatprep.mubr.msk.f32.mxu0 %vm1364_vm5, %v32963_v26  ;;  %35392 = vst [vmem:[#allocation46_spill] sm:$0xff] %v32979_v14  ;;  %v32983_v26 = vld [vmem:[#allocation3 + $0x6a] sm:$0xff] }
 0xc50   : > { %35393 = vst [vmem:[#allocation47_spill] sm:$0xff] %v32983_v26 }
 0xc52   : > { %26477 = vmatmul.mubr.msk.f32.gmra.mrb[70].mxu0 %vm1364_vm5, %v32967_v11  ;;  %v32987_v11 = vld [vmem:[#allocation3 + $0x7a] sm:$0xff] }
 0xc53   : > { %26479 = vmatprep.mubr.msk.f32.mxu0 %vm1364_vm5, %v32971_v56  ;;  %35394 = vst [vmem:[#allocation48_spill] sm:$0xff] %v32987_v11  ;;  %v32991_v56 = vld [vmem:[#allocation3 + $0x82] sm:$0xff] }
 0xc54   : > { %35395 = vst [vmem:[#allocation77_spill] sm:$0xff] %v32991_v56 }
 0xc56   : > { %26480 = vmatmul.mubr.msk.f32.gmra.mrb[72].mxu0 %vm1364_vm5, %v32975_v15  ;;  %v32995_v15 = vld [vmem:[#allocation3 + $0x92] sm:$0xff] }
 0xc57   : > { %26482 = vmatprep.mubr.msk.f32.mxu0 %vm1364_vm5, %v32979_v14  ;;  %35396 = vst [vmem:[#allocation78_spill] sm:$0xff] %v32995_v15  ;;  %v32999_v14 = vld [vmem:[#allocation3 + $0x9a] sm:$0xff] }
 0xc58   : > { %35397 = vst [vmem:[#allocation53_spill] sm:$0xff] %v32999_v14 }
 0xc5a   : > { %26483 = vmatmul.mubr.msk.f32.gmra.mrb[74].mxu0 %vm1364_vm5, %v32983_v26  ;;  %v33003_v26 = vld [vmem:[#allocation3 + $0xaa] sm:$0xff] }
 0xc5b   : > { %26485 = vmatprep.mubr.msk.f32.mxu0 %vm1364_vm5, %v32987_v11  ;;  %35398 = vst [vmem:[#allocation54_spill] sm:$0xff] %v33003_v26  ;;  %v33007_v11 = vld [vmem:[#allocation3 + $0xb2] sm:$0xff] }
 0xc5c   : > { %35399 = vst [vmem:[#allocation55_spill] sm:$0xff] %v33007_v11 }
 0xc5e   : > { %26486 = vmatmul.mubr.msk.f32.gmra.mrb[76].mxu0 %vm1364_vm5, %v32991_v56  ;;  %v33011_v56 = vld [vmem:[#allocation3 + $0xc2] sm:$0xff] }
 0xc5f   : > { %26488 = vmatprep.mubr.msk.f32.mxu0 %vm1364_vm5, %v32995_v15  ;;  %35400 = vst [vmem:[#allocation56_spill] sm:$0xff] %v33011_v56  ;;  %v33015_v15 = vld [vmem:[#allocation3 + $0xca] sm:$0xff] }
 0xc60   : > { %35401 = vst [vmem:[#allocation57_spill] sm:$0xff] %v33015_v15 }
 0xc62   : > { %26489 = vmatmul.mubr.msk.f32.gmra.mrb[78].mxu0 %vm1364_vm5, %v32999_v14  ;;  %v33019_v14 = vld [vmem:[#allocation3 + $0xda] sm:$0xff] }
 0xc63   : > { %26491 = vmatprep.mubr.msk.f32.mxu0 %vm1364_vm5, %v33003_v26  ;;  %35402 = vst [vmem:[#allocation58_spill] sm:$0xff] %v33019_v14  ;;  %v33023_v26 = vld [vmem:[#allocation3 + $0xe2] sm:$0xff] }
 0xc64   : > { %35403 = vst [vmem:[#allocation59_spill] sm:$0xff] %v33023_v26 }
 0xc66   : > { %26492 = vmatmul.mubr.msk.f32.gmra.mrb[80].mxu0 %vm1364_vm5, %v33007_v11  ;;  %v33027_v11 = vld [vmem:[#allocation3 + $0xf2] sm:$0xff] }
 0xc67   : > { %26494 = vmatprep.mubr.msk.f32.mxu0 %vm1364_vm5, %v33011_v56  ;;  %35404 = vst [vmem:[#allocation60_spill] sm:$0xff] %v33027_v11  ;;  %v33031_v56 = vld [vmem:[#allocation3 + $0xfa] sm:$0xff] }
 0xc68   : > { %35405 = vst [vmem:[#allocation61_spill] sm:$0xff] %v33031_v56 }
 0xc6a   : > { %26495 = vmatmul.mubr.msk.f32.gmra.mrb[82].mxu0 %vm1364_vm5, %v33015_v15  ;;  %v33035_v15 = vld [vmem:[#allocation3 + $0x10a] sm:$0xff] }
 0xc6b   : > { %26497 = vmatprep.mubr.msk.f32.mxu0 %vm1364_vm5, %v33019_v14  ;;  %35406 = vst [vmem:[#allocation62_spill] sm:$0xff] %v33035_v15  ;;  %v33039_v14 = vld [vmem:[#allocation3 + $0x112] sm:$0xff] }
 0xc6c   : > { %35407 = vst [vmem:[#allocation63_spill] sm:$0xff] %v33039_v14 }
 0xc6e   : > { %26498 = vmatmul.mubr.msk.f32.gmra.mrb[84].mxu0 %vm1364_vm5, %v33023_v26  ;;  %v33043_v26 = vld [vmem:[#allocation3 + $0x122] sm:$0xff] }
 0xc6f   : > { %26500 = vmatprep.mubr.msk.f32.mxu0 %vm1364_vm5, %v33027_v11  ;;  %35408 = vst [vmem:[#allocation65_spill] sm:$0xff] %v33043_v26  ;;  %v33047_v11 = vld [vmem:[#allocation3 + $0x12a] sm:$0xff] }
 0xc70   : > { %35409 = vst [vmem:[#allocation66_spill] sm:$0xff] %v33047_v11 }
 0xc72   : > { %26501 = vmatmul.mubr.msk.f32.gmra.mrb[86].mxu0 %vm1364_vm5, %v33031_v56  ;;  %v33051_v56 = vld [vmem:[#allocation3 + $0x13a] sm:$0xff] }
 0xc73   : > { %26503 = vmatprep.mubr.msk.f32.mxu0 %vm1364_vm5, %v33035_v15  ;;  %35410 = vst [vmem:[#allocation68_spill] sm:$0xff] %v33051_v56  ;;  %v33055_v15 = vld [vmem:[#allocation3 + $0x142] sm:$0xff] }
 0xc74   : > { %35411 = vst [vmem:[#allocation69_spill] sm:$0xff] %v33055_v15 }
 0xc76   : > { %26504 = vmatmul.mubr.msk.f32.gmra.mrb[88].mxu0 %vm1364_vm5, %v33039_v14  ;;  %v33059_v14 = vld [vmem:[#allocation3 + $0x152] sm:$0xff] }
 0xc77   : > { %26506 = vmatprep.mubr.msk.f32.mxu0 %vm1364_vm5, %v33043_v26  ;;  %v33063_v26 = vld [vmem:[#allocation3 + $0x15a] sm:$0xff] }
 0xc78   : > { %35412 = vst [vmem:[#allocation72_spill] sm:$0xff] %v33063_v26 }
 0xc7a   : > { %26507 = vmatmul.mubr.msk.f32.gmra.mrb[90].mxu0 %vm1364_vm5, %v33047_v11  ;;  %v33067_v11 = vld [vmem:[#allocation3 + $0x16a] sm:$0xff] }
 0xc7b   : > { %26509 = vmatprep.mubr.msk.f32.mxu0 %vm1364_vm5, %v33051_v56  ;;  %v33071_v56 = vld [vmem:[#allocation3 + $0x172] sm:$0xff] }
 0xc7e   : > { %26510 = vmatmul.mubr.msk.f32.gmra.mrb[92].mxu0 %vm1364_vm5, %v33055_v15  ;;  %v22250_v15 = vld [vmem:[%s29694_s16 + $0x14] sm:$0xf] }
 0xc7f   : > { %26512 = vmatprep.mubr.msk.f32.mxu0 %vm1364_vm5, %v33059_v14 }
 0xc82   : > { %26513 = vmatmul.mubr.msk.f32.gmra.mrb[94].mxu0 %vm1364_vm5, %v33063_v26 }
 0xc83   : > { %26515 = vmatprep.mubr.msk.f32.mxu0 %vm1364_vm5, %v33067_v11 }
 0xc86   : > { %26516 = vmatmul.mubr.msk.f32.gmra.mrb[96].mxu0 %vm1364_vm5, %v33071_v56 }
 0xc87   : > { %26520 = vmatprep.mubr.msk.f32.mxu0 %vm1364_vm5, %v32818_v16  ;;  %v33137_v16 = vld [vmem:[#allocation3 + $0x180] sm:$0xff] }
 0xc8a   : > { %26521 = vmatmul.mubr.msk.f32.vlgmr.msra.gmra.mrb[66].mxu0 %vm1364_vm5, %v32826_v31  ;;  %v33143_v31 = vld [vmem:[#allocation3 + $0x188] sm:$0xff] }
 0xc8b   : > { %26523 = vmatprep.mubr.msk.f32.mxu0 %vm1364_vm5, %v32830_v46  ;;  %26569 = vmatpush3.msk.msra.mxu0 %vm1560_vm4, %v32948_v52  ;;  %v22284_v52 = vld [vmem:[%s29694_s16 + $0x18] sm:$0xf] }
 0xc8c   : > { %26618 = vmatprep.subr.msk.mxu0 %vm1560_vm4, %v22250_v15 }
 0xc8e   : > { %26524 = vmatmul.mubr.msk.f32.gmra.mrb[68].mxu0 %vm1364_vm5, %v32834_v21 }
 0xc8f   : > { %26526 = vmatprep.mubr.msk.f32.mxu0 %vm1364_vm5, %v32838_v38 }
 0xc92   : > { %26527 = vmatmul.mubr.msk.f32.gmra.mrb[70].mxu0 %vm1364_vm5, %v32842_v2 }
 0xc93   : > { %26529 = vmatprep.mubr.msk.f32.mxu0 %vm1364_vm5, %v32846_v29 }
 0xc96   : > { %26530 = vmatmul.mubr.msk.f32.gmra.mrb[72].mxu0 %vm1364_vm5, %v32850_v22 }
 0xc97   : > { %26532 = vmatprep.mubr.msk.f32.mxu0 %vm1364_vm5, %v32854_v23 }
 0xc9a   : > { %26533 = vmatmul.mubr.msk.f32.gmra.mrb[74].mxu0 %vm1364_vm5, %v32858_v40 }
 0xc9b   : > { %26535 = vmatprep.mubr.msk.f32.mxu0 %vm1364_vm5, %v32862_v7 }
 0xc9e   : > { %26536 = vmatmul.mubr.msk.f32.gmra.mrb[76].mxu0 %vm1364_vm5, %v32866_v19 }
 0xc9f   : > { %26538 = vmatprep.mubr.msk.f32.mxu0 %vm1364_vm5, %v32870_v1 }
 0xca2   : > { %26539 = vmatmul.mubr.msk.f32.gmra.mrb[78].mxu0 %vm1364_vm5, %v32874_v10 }
 0xca3   : > { %26541 = vmatprep.mubr.msk.f32.mxu0 %vm1364_vm5, %v32878_v58 }
 0xca6   : > { %26542 = vmatmul.mubr.msk.f32.gmra.mrb[80].mxu0 %vm1364_vm5, %v32882_v12 }
 0xca7   : > { %26544 = vmatprep.mubr.msk.f32.mxu0 %vm1364_vm5, %v32886_v45 }
 0xcaa   : > { %26545 = vmatmul.mubr.msk.f32.gmra.mrb[82].mxu0 %vm1364_vm5, %v32890_v32 }
 0xcab   : > { %26547 = vmatprep.mubr.msk.f32.mxu0 %vm1364_vm5, %v32894_v18 }
 0xcae   : > { %26548 = vmatmul.mubr.msk.f32.gmra.mrb[84].mxu0 %vm1364_vm5, %v32898_v5 }
 0xcaf   : > { %26550 = vmatprep.mubr.msk.f32.mxu0 %vm1364_vm5, %v32902_v53 }
 0xcb2   : > { %26551 = vmatmul.mubr.msk.f32.gmra.mrb[86].mxu0 %vm1364_vm5, %v32906_v17 }
 0xcb3   : > { %26553 = vmatprep.mubr.msk.f32.mxu0 %vm1364_vm5, %v32910_v30 }
 0xcb6   : > { %26554 = vmatmul.mubr.msk.f32.gmra.mrb[88].mxu0 %vm1364_vm5, %v32915_v0 }
 0xcb7   : > { %26556 = vmatprep.mubr.msk.f32.mxu0 %vm1364_vm5, %v32920_v13 }
 0xcba   : > { %26557 = vmatmul.mubr.msk.f32.gmra.mrb[90].mxu0 %vm1364_vm5, %v32926_v41 }
 0xcbb   : > { %26559 = vmatprep.mubr.msk.f32.mxu0 %vm1364_vm5, %v32930_v63 }
 0xcbe   : > { %26560 = vmatmul.mubr.msk.f32.gmra.mrb[92].mxu0 %vm1364_vm5, %v32934_v36 }
 0xcbf   : > { %26562 = vmatprep.mubr.msk.f32.mxu0 %vm1364_vm5, %v32938_v33 }
 0xcc2   : > { %26563 = vmatmul.mubr.msk.f32.gmra.mrb[94].mxu0 %vm1364_vm5, %v32942_v60 }
 0xcc3   : > { %26565 = vmatprep.mubr.msk.f32.mxu0 %vm1364_vm5, %v33137_v16 }
 0xcc6   : > { %26566 = vmatmul.mubr.msk.f32.gmra.mrb[96].mxu0 %vm1364_vm5, %v33143_v31 }
 0xcc7   : > { %26570 = vmatprep.mubr.msk.f32.mxu0 %vm1364_vm5, %v32654_v51  ;;  %v35413_v51 = vld [vmem:[#allocation52_spill] sm:$0xff] }
 0xcca   : > { %26571 = vmatmul.mubr.msk.f32.vlgmr.msra.gmra.mrb[66].mxu0 %vm1364_vm5, %v32660_v57  ;;  %v35414_v57 = vld [vmem:[#allocation64_spill] sm:$0xff] }
 0xccb   : > { %26573 = vmatprep.mubr.msk.f32.mxu0 %vm1364_vm5, %v32670_v48  ;;  %26619 = vmatpush3.msk.msra.mxu0 %vm1560_vm4, %v22250_v15  ;;  %v33210_v48 = vld [vmem:[#allocation3 + $0x181] sm:$0xff]  ;;  %v35421_v15 = vld [vmem:[#allocation45_spill] sm:$0xff] }
 0xccc   : > { %26668 = vmatprep.subr.msk.mxu0 %vm1560_vm4, %v22284_v52 }
 0xcce   : > { %26574 = vmatmul.mubr.msk.f32.gmra.mrb[68].mxu0 %vm1364_vm5, %v32676_v55  ;;  %v33214_v55 = vld [vmem:[#allocation3 + $0x189] sm:$0xff] }
 0xccf   : > { %26576 = vmatprep.mubr.msk.f32.mxu0 %vm1364_vm5, %v32686_v44  ;;  %35415 = vst [vmem:[#allocation74_spill] sm:$0xff] %v33214_v55  ;;  %v35416_v44 = vld [vmem:[#allocation67_spill] sm:$0xff] }
 0xcd2   : > { %26577 = vmatmul.mubr.msk.f32.gmra.mrb[70].mxu0 %vm1364_vm5, %v32692_v4  ;;  %v22318_v4 = vld [vmem:[%s29694_s16 + $0x1c] sm:$0xf] }
 0xcd3   : > { %26579 = vmatprep.mubr.msk.f32.mxu0 %vm1364_vm5, %v32699_v54  ;;  %v35417_v54 = vld [vmem:[#allocation70_spill] sm:$0xff] }
 0xcd6   : > { %26580 = vmatmul.mubr.msk.f32.gmra.mrb[72].mxu0 %vm1364_vm5, %v32704_v43  ;;  %v35418_v43 = vld [vmem:[#allocation71_spill] sm:$0xff] }
 0xcd7   : > { %26582 = vmatprep.mubr.msk.f32.mxu0 %vm1364_vm5, %v32711_v37  ;;  %v35419_v37 = vld [vmem:[#allocation73_spill] sm:$0xff] }
 0xcda   : > { %26583 = vmatmul.mubr.msk.f32.gmra.mrb[74].mxu0 %vm1364_vm5, %v32718_v6  ;;  %v35420_v6 = vld [vmem:[#allocation75_spill] sm:$0xff] }
 0xcdb   : > { %26585 = vmatprep.mubr.msk.f32.mxu0 %vm1364_vm5, %v32713_v62 }
 0xcde   : > { %26586 = vmatmul.mubr.msk.f32.gmra.mrb[76].mxu0 %vm1364_vm5, %v32730_v20 }
 0xcdf   : > { %26588 = vmatprep.mubr.msk.f32.mxu0 %vm1364_vm5, %v32727_v24 }
 0xce2   : > { %26589 = vmatmul.mubr.msk.f32.gmra.mrb[78].mxu0 %vm1364_vm5, %v32742_v49 }
 0xce3   : > { %26591 = vmatprep.mubr.msk.f32.mxu0 %vm1364_vm5, %v32739_v39 }
 0xce6   : > { %26592 = vmatmul.mubr.msk.f32.gmra.mrb[80].mxu0 %vm1364_vm5, %v32754_v25 }
 0xce7   : > { %26594 = vmatprep.mubr.msk.f32.mxu0 %vm1364_vm5, %v32751_v42 }
 0xcea   : > { %26595 = vmatmul.mubr.msk.f32.gmra.mrb[82].mxu0 %vm1364_vm5, %v32763_v34 }
 0xceb   : > { %26597 = vmatprep.mubr.msk.f32.mxu0 %vm1364_vm5, %v32761_v28 }
 0xcee   : > { %26598 = vmatmul.mubr.msk.f32.gmra.mrb[84].mxu0 %vm1364_vm5, %v32771_v47 }
 0xcef   : > { %26600 = vmatprep.mubr.msk.f32.mxu0 %vm1364_vm5, %v32769_v35 }
 0xcf2   : > { %26601 = vmatmul.mubr.msk.f32.gmra.mrb[86].mxu0 %vm1364_vm5, %v32779_v59 }
 0xcf3   : > { %26603 = vmatprep.mubr.msk.f32.mxu0 %vm1364_vm5, %v32777_v50 }
 0xcf6   : > { %26604 = vmatmul.mubr.msk.f32.gmra.mrb[88].mxu0 %vm1364_vm5, %v32787_v3 }
 0xcf7   : > { %26606 = vmatprep.mubr.msk.f32.mxu0 %vm1364_vm5, %v32785_v61 }
 0xcfa   : > { %26607 = vmatmul.mubr.msk.f32.gmra.mrb[90].mxu0 %vm1364_vm5, %v32795_v9 }
 0xcfb   : > { %26609 = vmatprep.mubr.msk.f32.mxu0 %vm1364_vm5, %v32793_v8 }
 0xcfe   : > { %26610 = vmatmul.mubr.msk.f32.gmra.mrb[92].mxu0 %vm1364_vm5, %v32803_v27 }
 0xcff   : > { %26612 = vmatprep.mubr.msk.f32.mxu0 %vm1364_vm5, %v35413_v51 }
 0xd02   : > { %26613 = vmatmul.mubr.msk.f32.gmra.mrb[94].mxu0 %vm1364_vm5, %v35414_v57 }
 0xd03   : > { %26615 = vmatprep.mubr.msk.f32.mxu0 %vm1364_vm5, %v33210_v48 }
 0xd06   : > { %26616 = vmatmul.mubr.msk.f32.gmra.mrb[96].mxu0 %vm1364_vm5, %v33214_v55  ;;  %v35426_v55 = vld [vmem:[#allocation78_spill] sm:$0xff] }
 0xd07   : > { %26620 = vmatprep.mubr.msk.f32.mxu0 %vm1364_vm5, %v35416_v44  ;;  %v35422_v44 = vld [vmem:[#allocation46_spill] sm:$0xff] }
 0xd0a   : > { %26621 = vmatmul.mubr.msk.f32.vlgmr.msra.gmra.mrb[66].mxu0 %vm1364_vm5, %v35417_v54  ;;  %v35423_v54 = vld [vmem:[#allocation47_spill] sm:$0xff] }
 0xd0b   : > { %26623 = vmatprep.mubr.msk.f32.mxu0 %vm1364_vm5, %v35418_v43  ;;  %26669 = vmatpush3.msk.msra.mxu0 %vm1560_vm4, %v22284_v52  ;;  %v35424_v43 = vld [vmem:[#allocation48_spill] sm:$0xff]  ;;  %v35425_v52 = vld [vmem:[#allocation77_spill] sm:$0xff] }
 0xd0c   : > { %26718 = vmatprep.subr.msk.mxu0 %vm1560_vm4, %v22318_v4 }
 0xd0e   : > { %26624 = vmatmul.mubr.msk.f32.gmra.mrb[68].mxu0 %vm1364_vm5, %v35419_v37  ;;  %v35427_v37 = vld [vmem:[#allocation53_spill] sm:$0xff] }
 0xd0f   : > { %26626 = vmatprep.mubr.msk.f32.mxu0 %vm1364_vm5, %v35420_v6  ;;  %v35428_v6 = vld [vmem:[#allocation54_spill] sm:$0xff] }
 0xd12   : > { %26627 = vmatmul.mubr.msk.f32.gmra.mrb[70].mxu0 %vm1364_vm5, %v35421_v15  ;;  %v35429_v15 = vld [vmem:[#allocation55_spill] sm:$0xff] }
 0xd13   : > { %26629 = vmatprep.mubr.msk.f32.mxu0 %vm1364_vm5, %v35422_v44  ;;  %v35430_v44 = vld [vmem:[#allocation56_spill] sm:$0xff] }
 0xd16   : > { %26630 = vmatmul.mubr.msk.f32.gmra.mrb[72].mxu0 %vm1364_vm5, %v35423_v54  ;;  %v35431_v54 = vld [vmem:[#allocation57_spill] sm:$0xff] }
 0xd17   : > { %26632 = vmatprep.mubr.msk.f32.mxu0 %vm1364_vm5, %v35424_v43  ;;  %v35432_v43 = vld [vmem:[#allocation58_spill] sm:$0xff] }
 0xd1a   : > { %26633 = vmatmul.mubr.msk.f32.gmra.mrb[74].mxu0 %vm1364_vm5, %v35425_v52  ;;  %v35433_v52 = vld [vmem:[#allocation59_spill] sm:$0xff] }
 0xd1b   : > { %26635 = vmatprep.mubr.msk.f32.mxu0 %vm1364_vm5, %v35426_v55  ;;  %v35434_v55 = vld [vmem:[#allocation60_spill] sm:$0xff] }
 0xd1e   : > { %26636 = vmatmul.mubr.msk.f32.gmra.mrb[76].mxu0 %vm1364_vm5, %v35427_v37  ;;  %v35435_v37 = vld [vmem:[#allocation61_spill] sm:$0xff] }
 0xd1f   : > { %26638 = vmatprep.mubr.msk.f32.mxu0 %vm1364_vm5, %v35428_v6  ;;  %v35436_v6 = vld [vmem:[#allocation62_spill] sm:$0xff] }
 0xd22   : > { %26639 = vmatmul.mubr.msk.f32.gmra.mrb[78].mxu0 %vm1364_vm5, %v35429_v15 }
 0xd23   : > { %26641 = vmatprep.mubr.msk.f32.mxu0 %vm1364_vm5, %v35430_v44  ;;  %v35437_v44 = vld [vmem:[#allocation63_spill] sm:$0xff] }
 0xd26   : > { %26642 = vmatmul.mubr.msk.f32.gmra.mrb[80].mxu0 %vm1364_vm5, %v35431_v54  ;;  %v35438_v54 = vld [vmem:[#allocation65_spill] sm:$0xff] }
 0xd27   : > { %26644 = vmatprep.mubr.msk.f32.mxu0 %vm1364_vm5, %v35432_v43  ;;  %v35439_v43 = vld [vmem:[#allocation66_spill] sm:$0xff] }
 0xd2a   : > { %26645 = vmatmul.mubr.msk.f32.gmra.mrb[82].mxu0 %vm1364_vm5, %v35433_v52  ;;  %v35440_v52 = vld [vmem:[#allocation68_spill] sm:$0xff] }
 0xd2b   : > { %26647 = vmatprep.mubr.msk.f32.mxu0 %vm1364_vm5, %v35434_v55  ;;  %v35441_v55 = vld [vmem:[#allocation69_spill] sm:$0xff] }
 0xd2e   : > { %26648 = vmatmul.mubr.msk.f32.gmra.mrb[84].mxu0 %vm1364_vm5, %v35435_v37 }
 0xd2f   : > { %26650 = vmatprep.mubr.msk.f32.mxu0 %vm1364_vm5, %v35436_v6 }
 0xd32   : > { %26651 = vmatmul.mubr.msk.f32.gmra.mrb[86].mxu0 %vm1364_vm5, %v35437_v44 }
 0xd33   : > { %26653 = vmatprep.mubr.msk.f32.mxu0 %vm1364_vm5, %v35438_v54  ;;  %v33281_v54 = vld [vmem:[#allocation3 + $0x182] sm:$0xff] }
 0xd36   : > { %26654 = vmatmul.mubr.msk.f32.gmra.mrb[88].mxu0 %vm1364_vm5, %v35439_v43 }
 0xd37   : > { %26656 = vmatprep.mubr.msk.f32.mxu0 %vm1364_vm5, %v35440_v52  ;;  %v33285_v52 = vld [vmem:[#allocation3 + $0x18a] sm:$0xff] }
 0xd3a   : > { %26657 = vmatmul.mubr.msk.f32.gmra.mrb[90].mxu0 %vm1364_vm5, %v35441_v55 }
 0xd3b   : > { %26659 = vmatprep.mubr.msk.f32.mxu0 %vm1364_vm5, %v33059_v14 }
 0xd3e   : > { %26660 = vmatmul.mubr.msk.f32.gmra.mrb[92].mxu0 %vm1364_vm5, %v33063_v26  ;;  %v22352_v26 = vld [vmem:[%s29694_s16 + $0x20] sm:$0xf]  ;;  %s35534_s16 = sld [smem:[#allocation14_spill]] }
 0xd3f   : > { %26662 = vmatprep.mubr.msk.f32.mxu0 %vm1364_vm5, %v33067_v11 }
 0xd42   : > { %26663 = vmatmul.mubr.msk.f32.gmra.mrb[94].mxu0 %vm1364_vm5, %v33071_v56 }
 0xd43   : > { %26665 = vmatprep.mubr.msk.f32.mxu0 %vm1364_vm5, %v33281_v54 }
 0xd46   : > { %26666 = vmatmul.mubr.msk.f32.gmra.mrb[96].mxu0 %vm1364_vm5, %v33285_v52 }
 0xd47   : > { %26670 = vmatprep.mubr.msk.f32.mxu0 %vm1364_vm5, %v32830_v46  ;;  %v13981_v46 = vld [vmem:[#allocation3 + $0x198] sm:$0xff] }
 0xd4a   : > { %26671 = vmatmul.mubr.msk.f32.vlgmr.msra.gmra.mrb[66].mxu0 %vm1364_vm5, %v32834_v21  ;;  %v13982_v21 = vld [vmem:[#allocation3 + $0x1a0] sm:$0xff] }
 0xd4b   : > { %26673 = vmatprep.mubr.msk.f32.mxu0 %vm1364_vm5, %v32838_v38  ;;  %26719 = vmatpush3.msk.msra.mxu0 %vm1560_vm4, %v22318_v4  ;;  %v14341_v38 = vld [vmem:[#allocation3 + $0x31] sm:$0xff] }
 0xd4c   : > { %26768 = vmatprep.subr.msk.mxu0 %vm1560_vm4, %v22352_v26 }
 0xd4e   : > { %26674 = vmatmul.mubr.msk.f32.gmra.mrb[68].mxu0 %vm1364_vm5, %v32842_v2  ;;  %v22386_v2 = vld [vmem:[%s29699_s29 + $0x40] sm:$0xff] }
 0xd4f   : > { %26676 = vmatprep.mubr.msk.f32.mxu0 %vm1364_vm5, %v32846_v29  ;;  %v22387_v29 = vld [vmem:[%s29699_s29 + $0x48] sm:$0xff] }
 0xd52   : > { %26677 = vmatmul.mubr.msk.f32.gmra.mrb[70].mxu0 %vm1364_vm5, %v32850_v22  ;;  %v22388_v22 = vld [vmem:[%s29699_s29 + $0x50] sm:$0xff] }
 0xd53   : > { %26679 = vmatprep.mubr.msk.f32.mxu0 %vm1364_vm5, %v32854_v23  ;;  %v28088_v23 = vpack.c.bf16 %v22387_v29, %v22386_v2 }
 0xd55   : > { %28089 = vmatprep.subr.bf16.mxu1 %v28088_v23 }
 0xd56   : > { %26680 = vmatmul.mubr.msk.f32.gmra.mrb[72].mxu0 %vm1364_vm5, %v32858_v40  ;;  %v22389_v40 = vld [vmem:[%s29699_s29 + $0x58] sm:$0xff]  ;;  %28091 = vmatpush3.bf16.msra.mxu1 %v28088_v23 }
 0xd57   : > { %26682 = vmatprep.mubr.msk.f32.mxu0 %vm1364_vm5, %v32862_v7  ;;  %v28092_v7 = vpack.c.bf16 %v22389_v40, %v22388_v22 }
 0xd59   : > { %28093 = vmatprep.subr.bf16.mxu1 %v28092_v7 }
 0xd5a   : > { %26683 = vmatmul.mubr.msk.f32.gmra.mrb[74].mxu0 %vm1364_vm5, %v32866_v19  ;;  %v14342_v19 = vld [vmem:[#allocation3 + $0x39] sm:$0xff]  ;;  %28095 = vmatpush3.bf16.msra.mxu1 %v28092_v7 }
 0xd5b   : > { %26685 = vmatprep.mubr.msk.f32.mxu0 %vm1364_vm5, %v32870_v1  ;;  %v14343_v1 = vld [vmem:[#allocation3 + $0x49] sm:$0xff] }
 0xd5e   : > { %26686 = vmatmul.mubr.msk.f32.gmra.mrb[76].mxu0 %vm1364_vm5, %v32874_v10  ;;  %v14344_v10 = vld [vmem:[#allocation3 + $0x51] sm:$0xff] }
 0xd5f   : > { %26688 = vmatprep.mubr.msk.f32.mxu0 %vm1364_vm5, %v32878_v58  ;;  %v14345_v58 = vld [vmem:[#allocation3 + $0x61] sm:$0xff] }
 0xd62   : > { %26689 = vmatmul.mubr.msk.f32.gmra.mrb[78].mxu0 %vm1364_vm5, %v32882_v12  ;;  %v14346_v12 = vld [vmem:[#allocation3 + $0x69] sm:$0xff] }
 0xd63   : > { %26691 = vmatprep.mubr.msk.f32.mxu0 %vm1364_vm5, %v32886_v45  ;;  %v14347_v45 = vld [vmem:[#allocation3 + $0x79] sm:$0xff] }
 0xd66   : > { %26692 = vmatmul.mubr.msk.f32.gmra.mrb[80].mxu0 %vm1364_vm5, %v32890_v32  ;;  %v14348_v32 = vld [vmem:[#allocation3 + $0x81] sm:$0xff] }
 0xd67   : > { %26694 = vmatprep.mubr.msk.f32.mxu0 %vm1364_vm5, %v32894_v18  ;;  %v35458_v18 = vld [vmem:[#allocation60_spill] sm:$0xff] }
 0xd6a   : > { %26695 = vmatmul.mubr.msk.f32.gmra.mrb[82].mxu0 %vm1364_vm5, %v32898_v5  ;;  %v35459_v5 = vld [vmem:[#allocation65_spill] sm:$0xff] }
 0xd6b   : > { %26697 = vmatprep.mubr.msk.f32.mxu0 %vm1364_vm5, %v32902_v53  ;;  %v35460_v53 = vld [vmem:[#allocation68_spill] sm:$0xff] }
 0xd6e   : > { %26698 = vmatmul.mubr.msk.f32.gmra.mrb[84].mxu0 %vm1364_vm5, %v32906_v17  ;;  %v35461_v17 = vld [vmem:[#allocation72_spill] sm:$0xff] }
 0xd6f   : > { %26700 = vmatprep.mubr.msk.f32.mxu0 %vm1364_vm5, %v32910_v30  ;;  %v14761_v30 = vld [vmem:[#allocation3 + $0x19a] sm:$0xff] }
 0xd72   : > { %26701 = vmatmul.mubr.msk.f32.gmra.mrb[86].mxu0 %vm1364_vm5, %v32915_v0  ;;  %v22390_v0 = vld [vmem:[%s29699_s29 + $0x60] sm:$0xff] }
 0xd73   : > { %26703 = vmatprep.mubr.msk.f32.mxu0 %vm1364_vm5, %v32920_v13  ;;  %v22391_v13 = vld [vmem:[%s29699_s29 + $0x68] sm:$0xff] }
 0xd76   : > { %26704 = vmatmul.mubr.msk.f32.gmra.mrb[88].mxu0 %vm1364_vm5, %v32926_v41  ;;  %v28096_v41 = vpack.c.bf16 %v22391_v13, %v22390_v0 }
 0xd77   : > { %26706 = vmatprep.mubr.msk.f32.mxu0 %vm1364_vm5, %v32930_v63  ;;  %v22393_v63 = vld [vmem:[%s29699_s29 + $0x78] sm:$0xff] }
 0xd78   : > { %28097 = vmatprep.subr.bf16.mxu1 %v28096_v41 }
 0xd79   : > { %28099 = vmatpush3.bf16.msra.mxu1 %v28096_v41 }
 0xd7a   : > { %26707 = vmatmul.mubr.msk.f32.gmra.mrb[90].mxu0 %vm1364_vm5, %v32934_v36 }
 0xd7b   : > { %26709 = vmatprep.mubr.msk.f32.mxu0 %vm1364_vm5, %v32938_v33  ;;  %v15225_v33 = vld [vmem:[#allocation4 + $0x1] sm:$0xff] }
 0xd7c   : > { %26834 = vmatprep.mubr.msk.f32.mxu1 %vm4877_vm6, %v15225_v33 }
 0xd7e   : > { %26710 = vmatmul.mubr.msk.f32.gmra.mrb[92].mxu0 %vm1364_vm5, %v32942_v60  ;;  %v15226_v60 = vld [vmem:[#allocation4 + $0x9] sm:$0xff] }
 0xd7f   : > { %26712 = vmatprep.mubr.msk.f32.mxu0 %vm1364_vm5, %v33137_v16 }
 0xd82   : > { %26713 = vmatmul.mubr.msk.f32.gmra.mrb[94].mxu0 %vm1364_vm5, %v33143_v31  ;;  %v15219_v31 = vld [vmem:[%s29699_s29 + $0x10] sm:$0xff] }
 0xd83   : > { %26715 = vmatprep.mubr.msk.f32.mxu0 %vm1364_vm5, %v13981_v46 }
 0xd86   : > { %26716 = vmatmul.mubr.msk.f32.gmra.mrb[96].mxu0 %vm1364_vm5, %v13982_v21 }
 0xd87   : > { %26720 = vmatprep.mubr.msk.f32.mxu0 %vm1364_vm5, %v14341_v38 }
 0xd8a   : > { %26721 = vmatmul.mubr.msk.f32.vlgmr.msra.gmra.mrb[66].mxu0 %vm1364_vm5, %v14342_v19 }
 0xd8b   : > { %26723 = vmatprep.mubr.msk.f32.mxu0 %vm1364_vm5, %v14343_v1  ;;  %26769 = vmatpush3.msk.msra.mxu0 %vm1560_vm4, %v22352_v26  ;;  %v15217_v26 = vld [vmem:[%s29699_s29] sm:$0xff] }
 0xd8e   : > { %26724 = vmatmul.mubr.msk.f32.gmra.mrb[68].mxu0 %vm1364_vm5, %v14344_v10 }
 0xd8f   : > { %26726 = vmatprep.mubr.msk.f32.mxu0 %vm1364_vm5, %v14345_v58 }
 0xd92   : > { %26727 = vmatmul.mubr.msk.f32.gmra.mrb[70].mxu0 %vm1364_vm5, %v14346_v12 }
 0xd93   : > { %26729 = vmatprep.mubr.msk.f32.mxu0 %vm1364_vm5, %v14347_v45 }
 0xd96   : > { %26730 = vmatmul.mubr.msk.f32.gmra.mrb[72].mxu0 %vm1364_vm5, %v14348_v32 }
 0xd97   : > { %26732 = vmatprep.mubr.msk.f32.mxu0 %vm1364_vm5, %v32713_v62  ;;  %v14371_v62 = vld [vmem:[#allocation3 + $0x199] sm:$0xff] }
 0xd9a   : > { %26733 = vmatmul.mubr.msk.f32.gmra.mrb[74].mxu0 %vm1364_vm5, %v32730_v20  ;;  %v14372_v20 = vld [vmem:[#allocation3 + $0x1a1] sm:$0xff] }
 0xd9b   : > { %26735 = vmatprep.mubr.msk.f32.mxu0 %vm1364_vm5, %v32727_v24  ;;  %v35442_v24 = vld [vmem:[#allocation74_spill] sm:$0xff] }
 0xd9e   : > { %26736 = vmatmul.mubr.msk.f32.gmra.mrb[76].mxu0 %vm1364_vm5, %v32742_v49  ;;  %v35444_v49 = vld [vmem:[#allocation73_spill] sm:$0xff] }
 0xd9f   : > { %26738 = vmatprep.mubr.msk.f32.mxu0 %vm1364_vm5, %v32739_v39  ;;  %v35443_v39 = vld [vmem:[#allocation71_spill] sm:$0xff] }
 0xda2   : > { %26739 = vmatmul.mubr.msk.f32.gmra.mrb[78].mxu0 %vm1364_vm5, %v32754_v25  ;;  %v35446_v25 = vld [vmem:[#allocation45_spill] sm:$0xff] }
 0xda3   : > { %26741 = vmatprep.mubr.msk.f32.mxu0 %vm1364_vm5, %v32751_v42  ;;  %v35445_v42 = vld [vmem:[#allocation75_spill] sm:$0xff] }
 0xda6   : > { %26742 = vmatmul.mubr.msk.f32.gmra.mrb[80].mxu0 %vm1364_vm5, %v32763_v34  ;;  %v35448_v34 = vld [vmem:[#allocation47_spill] sm:$0xff] }
 0xda7   : > { %26744 = vmatprep.mubr.msk.f32.mxu0 %vm1364_vm5, %v32761_v28  ;;  %v35447_v28 = vld [vmem:[#allocation46_spill] sm:$0xff] }
 0xdaa   : > { %26745 = vmatmul.mubr.msk.f32.gmra.mrb[82].mxu0 %vm1364_vm5, %v32771_v47  ;;  %v35450_v47 = vld [vmem:[#allocation77_spill] sm:$0xff] }
 0xdab   : > { %26747 = vmatprep.mubr.msk.f32.mxu0 %vm1364_vm5, %v32769_v35  ;;  %v35449_v35 = vld [vmem:[#allocation48_spill] sm:$0xff] }
 0xdae   : > { %26748 = vmatmul.mubr.msk.f32.gmra.mrb[84].mxu0 %vm1364_vm5, %v32779_v59  ;;  %v35452_v59 = vld [vmem:[#allocation53_spill] sm:$0xff] }
 0xdaf   : > { %26750 = vmatprep.mubr.msk.f32.mxu0 %vm1364_vm5, %v32777_v50  ;;  %v35451_v50 = vld [vmem:[#allocation78_spill] sm:$0xff] }
 0xdb2   : > { %26751 = vmatmul.mubr.msk.f32.gmra.mrb[86].mxu0 %vm1364_vm5, %v32787_v3  ;;  %v35454_v3 = vld [vmem:[#allocation56_spill] sm:$0xff] }
 0xdb3   : > { %26753 = vmatprep.mubr.msk.f32.mxu0 %vm1364_vm5, %v32785_v61  ;;  %v35453_v61 = vld [vmem:[#allocation54_spill] sm:$0xff] }
 0xdb6   : > { %26754 = vmatmul.mubr.msk.f32.gmra.mrb[88].mxu0 %vm1364_vm5, %v32795_v9  ;;  %v35456_v9 = vld [vmem:[#allocation58_spill] sm:$0xff] }
 0xdb7   : > { %26756 = vmatprep.mubr.msk.f32.mxu0 %vm1364_vm5, %v32793_v8  ;;  %v35455_v8 = vld [vmem:[#allocation57_spill] sm:$0xff] }
 0xdba   : > { %26757 = vmatmul.mubr.msk.f32.gmra.mrb[90].mxu0 %vm1364_vm5, %v32803_v27  ;;  %v35457_v27 = vld [vmem:[#allocation59_spill] sm:$0xff] }
 0xdbb   : > { %26759 = vmatprep.mubr.msk.f32.mxu0 %vm1364_vm5, %v35413_v51  ;;  %v15220_v51 = vld [vmem:[%s29699_s29 + $0x18] sm:$0xff] }
 0xdbe   : > { %26760 = vmatmul.mubr.msk.f32.gmra.mrb[92].mxu0 %vm1364_vm5, %v35414_v57  ;;  %v28108_v57 = vpack.c.bf16 %v15220_v51, %v15219_v31 }
 0xdbf   : > { %26762 = vmatprep.mubr.msk.f32.mxu0 %vm1364_vm5, %v33210_v48  ;;  %v15221_v48 = vld [vmem:[%s29699_s29 + $0x20] sm:$0xff] }
 0xdc2   : > { %26763 = vmatmul.mubr.msk.f32.gmra.mrb[94].mxu0 %vm1364_vm5, %v35442_v24 }
 0xdc3   : > { %26765 = vmatprep.mubr.msk.f32.mxu0 %vm1364_vm5, %v14371_v62 }
 0xdc6   : > { %26766 = vmatmul.mubr.msk.f32.gmra.mrb[96].mxu0 %vm1364_vm5, %v14372_v20 }
 0xdc7   : > { %26770 = vmatprep.mubr.msk.f32.mxu0 %vm1364_vm5, %v35443_v39 }
 0xdca   : > { %26771 = vmatmul.mubr.msk.f32.vlgmr.msra.gmra.mrb[66].mxu0 %vm1364_vm5, %v35444_v49 }
 0xdcb   : > { %26773 = vmatprep.mubr.msk.f32.mxu0 %vm1364_vm5, %v35445_v42 }
 0xdce   : > { %26774 = vmatmul.mubr.msk.f32.gmra.mrb[68].mxu0 %vm1364_vm5, %v35446_v25 }
 0xdcf   : > { %26776 = vmatprep.mubr.msk.f32.mxu0 %vm1364_vm5, %v35447_v28 }
 0xdd2   : > { %26777 = vmatmul.mubr.msk.f32.gmra.mrb[70].mxu0 %vm1364_vm5, %v35448_v34 }
 0xdd3   : > { %26779 = vmatprep.mubr.msk.f32.mxu0 %vm1364_vm5, %v35449_v35 }
 0xdd6   : > { %26780 = vmatmul.mubr.msk.f32.gmra.mrb[72].mxu0 %vm1364_vm5, %v35450_v47 }
 0xdd7   : > { %26782 = vmatprep.mubr.msk.f32.mxu0 %vm1364_vm5, %v35451_v50 }
 0xdda   : > { %26783 = vmatmul.mubr.msk.f32.gmra.mrb[74].mxu0 %vm1364_vm5, %v35452_v59 }
 0xddb   : > { %26785 = vmatprep.mubr.msk.f32.mxu0 %vm1364_vm5, %v35453_v61 }
 0xdde   : > { %26786 = vmatmul.mubr.msk.f32.gmra.mrb[76].mxu0 %vm1364_vm5, %v35429_v15  ;;  %v22458_v15 = vld [vmem:[%s29699_s29 + $0x80] sm:$0xff] }
 0xddf   : > { %26788 = vmatprep.mubr.msk.f32.mxu0 %vm1364_vm5, %v35454_v3 }
 0xde2   : > { %26789 = vmatmul.mubr.msk.f32.gmra.mrb[78].mxu0 %vm1364_vm5, %v35455_v8 }
 0xde3   : > { %26791 = vmatprep.mubr.msk.f32.mxu0 %vm1364_vm5, %v35456_v9 }
 0xde6   : > { %26792 = vmatmul.mubr.msk.f32.gmra.mrb[80].mxu0 %vm1364_vm5, %v35457_v27 }
 0xde7   : > { %26794 = vmatprep.mubr.msk.f32.mxu0 %vm1364_vm5, %v35458_v18 }
 0xdea   : > { %26795 = vmatmul.mubr.msk.f32.gmra.mrb[82].mxu0 %vm1364_vm5, %v35435_v37  ;;  %v15224_v37 = vld [vmem:[%s29699_s29 + $0x38] sm:$0xff] }
 0xdeb   : > { %26797 = vmatprep.mubr.msk.f32.mxu0 %vm1364_vm5, %v35436_v6 }
 0xdee   : > { %26798 = vmatmul.mubr.msk.f32.gmra.mrb[84].mxu0 %vm1364_vm5, %v35437_v44  ;;  %v22459_v44 = vld [vmem:[%s29699_s29 + $0x88] sm:$0xff] }
 0xdef   : > { %26800 = vmatprep.mubr.msk.f32.mxu0 %vm1364_vm5, %v35459_v5 }
 0xdf2   : > { %26801 = vmatmul.mubr.msk.f32.gmra.mrb[86].mxu0 %vm1364_vm5, %v35439_v43  ;;  %v15223_v43 = vld [vmem:[%s29699_s29 + $0x30] sm:$0xff] }
 0xdf3   : > { %26803 = vmatprep.mubr.msk.f32.mxu0 %vm1364_vm5, %v35460_v53  ;;  %v28116_v6 = vpack.c.bf16 %v15224_v37, %v15223_v43 }
 0xdf6   : > { %26804 = vmatmul.mubr.msk.f32.gmra.mrb[88].mxu0 %vm1364_vm5, %v35441_v55  ;;  %v15222_v55 = vld [vmem:[%s29699_s29 + $0x28] sm:$0xff] }
 0xdf7   : > { %26806 = vmatprep.mubr.msk.f32.mxu0 %vm1364_vm5, %v33059_v14  ;;  %v14762_v14 = vld [vmem:[#allocation3 + $0x1a2] sm:$0xff]  ;;  %v28112_v4 = vpack.c.bf16 %v15222_v55, %v15221_v48 }
 0xdfa   : > { %26807 = vmatmul.mubr.msk.f32.gmra.mrb[90].mxu0 %vm1364_vm5, %v35461_v17 }
 0xdfb   : > { %26809 = vmatprep.mubr.msk.f32.mxu0 %vm1364_vm5, %v33067_v11  ;;  %v15218_v11 = vld [vmem:[%s29699_s29 + $0x8] sm:$0xff] }
 0xdfc   : > { %v28104_v16 = vpack.c.bf16 %v15218_v11, %v15217_v26 }
 0xdfe   : > { %26810 = vmatmul.mubr.msk.f32.gmra.mrb[92].mxu0 %vm1364_vm5, %v33071_v56  ;;  %v22392_v56 = vld [vmem:[%s29699_s29 + $0x70] sm:$0xff] }
 0xdff   : > { %26812 = vmatprep.mubr.msk.f32.mxu0 %vm1364_vm5, %v33281_v54  ;;  %v28100_v36 = vpack.c.bf16 %v22393_v63, %v22392_v56  ;;  %v33491_v54 = vpack.c.bf16 %v22459_v44, %v22458_v15 }
 0xe01   : > { %28101 = vmatprep.subr.bf16.mxu1 %v28100_v36 }
 0xe02   : > { %26813 = vmatmul.mubr.msk.f32.gmra.mrb[94].mxu0 %vm1364_vm5, %v33285_v52  ;;  %28103 = vmatpush3.bf16.msra.mxu1 %v28100_v36 }
 0xe03   : > { %26815 = vmatprep.mubr.msk.f32.mxu0 %vm1364_vm5, %v14761_v30  ;;  %28105 = vmatprep.subr.bf16.mxu1 %v28104_v16 }
 0xe05   : > { %26835 = vmatmul.mubr.msk.f32.vlgmr.msra.gmra.mrb[62].mxu1 %vm4877_vm6, %v15226_v60 }
 0xe06   : > { %26816 = vmatmul.mubr.msk.f32.gmra.mrb[96].mxu0 %vm1364_vm5, %v14762_v14  ;;  %28107 = vmatpush3.bf16.msra.mxu1 %v28104_v16 }
 0xe07   : > { %28109 = vmatprep.subr.bf16.mxu1 %v28108_v57 }
 0xe0a   : > { %28111 = vmatpush3.bf16.msra.mxu1 %v28108_v57 }
 0xe0b   : > { %28113 = vmatprep.subr.bf16.mxu1 %v28112_v4 }
 0xe0e   : > { %28115 = vmatpush3.bf16.msra.mxu1 %v28112_v4 }
 0xe0f   : > { %28117 = vmatprep.subr.bf16.mxu1 %v28116_v6 }
 0xe12   : > { %28119 = vmatpush3.bf16.msra.mxu1 %v28116_v6 }
 0xe13   : > { %28121 = vmatprep.subr.bf16.mxu1 %v33491_v54 }
 0xe9d   : > { %v26772_v52 = vpop.f32.mrb[66].mxu0 }
 0xe9e   : > { %v15122_v46 = vmax.f32 %v26772_v52, 0.0  ;;  %v14930_v21 = vpop.f32.mrb[67].mxu0 }
 0xe9f   : > { %v15121_v38 = vmax.f32 %v14930_v21, 0.0 }
 0xea0   : > { %15154 = vst.msk [vmem:[#allocation4 + $0x21] sm:$0xff] %vm4877_vm6, %v15122_v46 }
 0xea1   : > { %15153 = vst.msk [vmem:[#allocation4 + $0x19] sm:$0xff] %vm4877_vm6, %v15121_v38  ;;  %v26775_v2 = vpop.f32.mrb[68].mxu0 }
 0xea2   : > { %v15124_v29 = vmax.f32 %v26775_v2, 0.0  ;;  %v14940_v22 = vpop.f32.mrb[69].mxu0 }
 0xea3   : > { %v15123_v23 = vmax.f32 %v14940_v22, 0.0 }
 0xea4   : > { %15156 = vst.msk [vmem:[#allocation4 + $0x39] sm:$0xff] %vm4877_vm6, %v15124_v29 }
 0xea5   : > { %15155 = vst.msk [vmem:[#allocation4 + $0x31] sm:$0xff] %vm4877_vm6, %v15123_v23  ;;  %v26778_v40 = vpop.f32.mrb[70].mxu0 }
 0xea6   : > { %v15126_v7 = vmax.f32 %v26778_v40, 0.0  ;;  %v14950_v19 = vpop.f32.mrb[71].mxu0 }
 0xea7   : > { %v15125_v1 = vmax.f32 %v14950_v19, 0.0  ;;  %v33504_v12 = vld [vmem:[#allocation4 + $0x21] sm:$0xff] }
 0xea8   : > { %15158 = vst.msk [vmem:[#allocation4 + $0x51] sm:$0xff] %vm4877_vm6, %v15126_v7  ;;  %v33499_v10 = vld [vmem:[#allocation4 + $0x19] sm:$0xff] }
 0xea9   : > { %15157 = vst.msk [vmem:[#allocation4 + $0x49] sm:$0xff] %vm4877_vm6, %v15125_v1  ;;  %v26781_v58 = vpop.f32.mrb[72].mxu0  ;;  %26837 = vmatprep.mubr.msk.f32.mxu1 %vm4877_vm6, %v33499_v10 }
 0xeaa   : > { %v15128_v45 = vmax.f32 %v26781_v58, 0.0  ;;  %v14960_v32 = vpop.f32.mrb[73].mxu0  ;;  %26838 = vmatmul.mubr.msk.f32.gmra.mrb[64].mxu1 %vm4877_vm6, %v33504_v12 }
 0xeab   : > { %v15127_v62 = vmax.f32 %v14960_v32, 0.0  ;;  %v33514_v39 = vld [vmem:[#allocation4 + $0x39] sm:$0xff] }
 0xeac   : > { %15160 = vst.msk [vmem:[#allocation4 + $0x69] sm:$0xff] %vm4877_vm6, %v15128_v45  ;;  %v33509_v24 = vld [vmem:[#allocation4 + $0x31] sm:$0xff] }
 0xead   : > { %15159 = vst.msk [vmem:[#allocation4 + $0x61] sm:$0xff] %vm4877_vm6, %v15127_v62  ;;  %v26784_v20 = vpop.f32.mrb[74].mxu0  ;;  %26840 = vmatprep.mubr.msk.f32.mxu1 %vm4877_vm6, %v33509_v24 }
 0xeae   : > { %v15130_v49 = vmax.f32 %v26784_v20, 0.0  ;;  %v14970_v42 = vpop.f32.mrb[75].mxu0  ;;  %26841 = vmatmul.mubr.msk.f32.gmra.mrb[66].mxu1 %vm4877_vm6, %v33514_v39 }
 0xeaf   : > { %v15129_v25 = vmax.f32 %v14970_v42, 0.0  ;;  %v33524_v35 = vld [vmem:[#allocation4 + $0x51] sm:$0xff] }
 0xeb0   : > { %15162 = vst.msk [vmem:[#allocation4 + $0x81] sm:$0xff] %vm4877_vm6, %v15130_v49  ;;  %v33519_v28 = vld [vmem:[#allocation4 + $0x49] sm:$0xff] }
 0xeb1   : > { %15161 = vst.msk [vmem:[#allocation4 + $0x79] sm:$0xff] %vm4877_vm6, %v15129_v25  ;;  %v26787_v34 = vpop.f32.mrb[76].mxu0  ;;  %26843 = vmatprep.mubr.msk.f32.mxu1 %vm4877_vm6, %v33519_v28 }
 0xeb2   : > { %v15132_v47 = vmax.f32 %v26787_v34, 0.0  ;;  %v14980_v50 = vpop.f32.mrb[77].mxu0  ;;  %26844 = vmatmul.mubr.msk.f32.gmra.mrb[68].mxu1 %vm4877_vm6, %v33524_v35 }
 0xeb3   : > { %v15131_v59 = vmax.f32 %v14980_v50, 0.0  ;;  %v33534_v8 = vld [vmem:[#allocation4 + $0x69] sm:$0xff] }
 0xeb4   : > { %15164 = vst.msk [vmem:[#allocation4 + $0x99] sm:$0xff] %vm4877_vm6, %v15132_v47  ;;  %v33529_v61 = vld [vmem:[#allocation4 + $0x61] sm:$0xff] }
 0xeb5   : > { %15163 = vst.msk [vmem:[#allocation4 + $0x91] sm:$0xff] %vm4877_vm6, %v15131_v59  ;;  %v26790_v3 = vpop.f32.mrb[78].mxu0  ;;  %26846 = vmatprep.mubr.msk.f32.mxu1 %vm4877_vm6, %v33529_v61 }
 0xeb6   : > { %v15134_v9 = vmax.f32 %v26790_v3, 0.0  ;;  %v14990_v27 = vpop.f32.mrb[79].mxu0  ;;  %26847 = vmatmul.mubr.msk.f32.gmra.mrb[70].mxu1 %vm4877_vm6, %v33534_v8 }
 0xeb7   : > { %v15133_v18 = vmax.f32 %v14990_v27, 0.0  ;;  %v33544_v17 = vld [vmem:[#allocation4 + $0x81] sm:$0xff] }
 0xeb8   : > { %15166 = vst.msk [vmem:[#allocation4 + $0xb1] sm:$0xff] %vm4877_vm6, %v15134_v9  ;;  %v33539_v5 = vld [vmem:[#allocation4 + $0x79] sm:$0xff] }
 0xeb9   : > { %15165 = vst.msk [vmem:[#allocation4 + $0xa9] sm:$0xff] %vm4877_vm6, %v15133_v18  ;;  %v26793_v53 = vpop.f32.mrb[80].mxu0  ;;  %26849 = vmatprep.mubr.msk.f32.mxu1 %vm4877_vm6, %v33539_v5 }
 0xeba   : > { %v15136_v30 = vmax.f32 %v26793_v53, 0.0  ;;  %v15000_v14 = vpop.f32.mrb[81].mxu0  ;;  %26850 = vmatmul.mubr.msk.f32.gmra.mrb[72].mxu1 %vm4877_vm6, %v33544_v17 }
 0xebb   : > { %v15135_v0 = vmax.f32 %v15000_v14, 0.0  ;;  %v33554_v56 = vld [vmem:[#allocation4 + $0x99] sm:$0xff] }
 0xebc   : > { %15168 = vst.msk [vmem:[#allocation4 + $0xc9] sm:$0xff] %vm4877_vm6, %v15136_v30  ;;  %v33549_v13 = vld [vmem:[#allocation4 + $0x91] sm:$0xff]  ;;  %v15185_v14 = vld [vmem:[#allocation4] sm:$0xff] }
 0xebd   : > { %15167 = vst.msk [vmem:[#allocation4 + $0xc1] sm:$0xff] %vm4877_vm6, %v15135_v0  ;;  %v26796_v41 = vpop.f32.mrb[82].mxu0  ;;  %26852 = vmatprep.mubr.msk.f32.mxu1 %vm4877_vm6, %v33549_v13 }
 0xebe   : > { %v15138_v63 = vmax.f32 %v26796_v41, 0.0  ;;  %v15010_v36 = vpop.f32.mrb[83].mxu0  ;;  %26853 = vmatmul.mubr.msk.f32.gmra.mrb[74].mxu1 %vm4877_vm6, %v33554_v56  ;;  %v22460_v41 = vld [vmem:[%s29699_s29 + $0x90] sm:$0xff] }
 0xebf   : > { %v15137_v33 = vmax.f32 %v15010_v36, 0.0  ;;  %v33564_v11 = vld [vmem:[#allocation4 + $0xb1] sm:$0xff]  ;;  %v15186_v36 = vld [vmem:[#allocation4 + $0x8] sm:$0xff] }
 0xec0   : > { %15170 = vst.msk [vmem:[#allocation4 + $0xe1] sm:$0xff] %vm4877_vm6, %v15138_v63  ;;  %v33559_v60 = vld [vmem:[#allocation4 + $0xa9] sm:$0xff] }
 0xec1   : > { %15169 = vst.msk [vmem:[#allocation4 + $0xd9] sm:$0xff] %vm4877_vm6, %v15137_v33  ;;  %v26799_v26 = vpop.f32.mrb[84].mxu0  ;;  %26855 = vmatprep.mubr.msk.f32.mxu1 %vm4877_vm6, %v33559_v60  ;;  %v22461_v63 = vld [vmem:[%s29699_s29 + $0x98] sm:$0xff] }
 0xec2   : > { %v15140_v16 = vmax.f32 %v26799_v26, 0.0  ;;  %v15020_v31 = vpop.f32.mrb[85].mxu0  ;;  %26856 = vmatmul.mubr.msk.f32.gmra.mrb[76].mxu1 %vm4877_vm6, %v33564_v11  ;;  %v28124_v33 = vpack.c.bf16 %v22461_v63, %v22460_v41  ;;  %v22462_v26 = vld [vmem:[%s29699_s29 + $0xa0] sm:$0xff] }
 0xec3   : > { %v15139_v51 = vmax.f32 %v15020_v31, 0.0  ;;  %v33574_v55 = vld [vmem:[#allocation4 + $0xc9] sm:$0xff]  ;;  %v33652_v31 = vld [vmem:[#allocation4 + $0x18] sm:$0xff] }
 0xec4   : > { %15172 = vst.msk [vmem:[#allocation4 + $0xf9] sm:$0xff] %vm4877_vm6, %v15140_v16  ;;  %v33569_v57 = vld [vmem:[#allocation4 + $0xc1] sm:$0xff]  ;;  %v22463_v16 = vld [vmem:[%s29699_s29 + $0xa8] sm:$0xff] }
 0xec5   : > { %15171 = vst.msk [vmem:[#allocation4 + $0xf1] sm:$0xff] %vm4877_vm6, %v15139_v51  ;;  %v26802_v48 = vpop.f32.mrb[86].mxu0  ;;  %26858 = vmatprep.mubr.msk.f32.mxu1 %vm4877_vm6, %v33569_v57  ;;  %v28128_v51 = vpack.c.bf16 %v22463_v16, %v22462_v26 }
 0xec6   : > { %v15142_v4 = vmax.f32 %v26802_v48, 0.0  ;;  %v15030_v43 = vpop.f32.mrb[87].mxu0  ;;  %26859 = vmatmul.mubr.msk.f32.gmra.mrb[78].mxu1 %vm4877_vm6, %v33574_v55  ;;  %v33657_v48 = vld [vmem:[#allocation4 + $0x20] sm:$0xff] }
 0xec7   : > { %v15141_v37 = vmax.f32 %v15030_v43, 0.0  ;;  %v33584_v44 = vld [vmem:[#allocation4 + $0xe1] sm:$0xff] }
 0xec8   : > { %15174 = vst.msk [vmem:[#allocation4 + $0x111] sm:$0xff] %vm4877_vm6, %v15142_v4  ;;  %v33579_v6 = vld [vmem:[#allocation4 + $0xd9] sm:$0xff]  ;;  %v22465_v43 = vld [vmem:[%s29699_s29 + $0xb8] sm:$0xff] }
 0xec9   : > { %15173 = vst.msk [vmem:[#allocation4 + $0x109] sm:$0xff] %vm4877_vm6, %v15141_v37  ;;  %v26805_v15 = vpop.f32.mrb[88].mxu0  ;;  %26861 = vmatprep.mubr.msk.f32.mxu1 %vm4877_vm6, %v33579_v6  ;;  %v22464_v4 = vld [vmem:[%s29699_s29 + $0xb0] sm:$0xff]  ;;  %v33663_v37 = vld [vmem:[#allocation4 + $0x30] sm:$0xff] }
 0xeca   : > { %v15144_v52 = vmax.f32 %v26805_v15, 0.0  ;;  %v15040_v46 = vpop.f32.mrb[89].mxu0  ;;  %26862 = vmatmul.mubr.msk.f32.gmra.mrb[80].mxu1 %vm4877_vm6, %v33584_v44  ;;  %v28132_v15 = vpack.c.bf16 %v22465_v43, %v22464_v4  ;;  %v15908_v43 = vld [vmem:[#allocation4 + $0x2] sm:$0xff] }
 0xecb   : > { %v15143_v21 = vmax.f32 %v15040_v46, 0.0  ;;  %v33594_v29 = vld [vmem:[#allocation4 + $0xf9] sm:$0xff] }
 0xecc   : > { %15176 = vst.msk [vmem:[#allocation4 + $0x129] sm:$0xff] %vm4877_vm6, %v15144_v52  ;;  %v33589_v38 = vld [vmem:[#allocation4 + $0xf1] sm:$0xff] }
 0xecd   : > { %15175 = vst.msk [vmem:[#allocation4 + $0x121] sm:$0xff] %vm4877_vm6, %v15143_v21  ;;  %v26808_v2 = vpop.f32.mrb[90].mxu0  ;;  %26864 = vmatprep.mubr.msk.f32.mxu1 %vm4877_vm6, %v33589_v38  ;;  %v33667_v52 = vld [vmem:[#allocation4 + $0x38] sm:$0xff]  ;;  %v33673_v21 = vld [vmem:[#allocation4 + $0x48] sm:$0xff] }
 0xece   : > { %v15146_v22 = vmax.f32 %v26808_v2, 0.0  ;;  %v15050_v23 = vpop.f32.mrb[91].mxu0  ;;  %26865 = vmatmul.mubr.msk.f32.gmra.mrb[82].mxu1 %vm4877_vm6, %v33594_v29  ;;  %v22499_v46 = vld [vmem:[%s29699_s29 + $0xc8] sm:$0xff] }
 0xecf   : > { %v15145_v40 = vmax.f32 %v15050_v23, 0.0  ;;  %v33604_v1 = vld [vmem:[#allocation4 + $0x111] sm:$0xff]  ;;  %v33683_v23 = vld [vmem:[#allocation4 + $0x60] sm:$0xff] }
 0xed0   : > { %15178 = vst.msk [vmem:[#allocation4 + $0x141] sm:$0xff] %vm4877_vm6, %v15146_v22  ;;  %v33599_v7 = vld [vmem:[#allocation4 + $0x109] sm:$0xff] }
 0xed1   : > { %15177 = vst.msk [vmem:[#allocation4 + $0x139] sm:$0xff] %vm4877_vm6, %v15145_v40  ;;  %v26811_v19 = vpop.f32.mrb[92].mxu0  ;;  %26867 = vmatprep.mubr.msk.f32.mxu1 %vm4877_vm6, %v33599_v7  ;;  %v33679_v22 = vld [vmem:[#allocation4 + $0x50] sm:$0xff]  ;;  %v33688_v40 = vld [vmem:[#allocation4 + $0x68] sm:$0xff] }
 0xed2   : > { %v15148_v58 = vmax.f32 %v26811_v19, 0.0  ;;  %v15060_v45 = vpop.f32.mrb[93].mxu0  ;;  %26868 = vmatmul.mubr.msk.f32.gmra.mrb[84].mxu1 %vm4877_vm6, %v33604_v1  ;;  %v33692_v19 = vld [vmem:[#allocation4 + $0x78] sm:$0xff]  ;;  %v33744_v41 = vld [vmem:[#allocation4 + $0x110] sm:$0xff] }
 0xed3   : > { %v15147_v32 = vmax.f32 %v15060_v45, 0.0  ;;  %v33614_v49 = vld [vmem:[#allocation4 + $0x129] sm:$0xff] }
 0xed4   : > { %15180 = vst.msk [vmem:[#allocation4 + $0x159] sm:$0xff] %vm4877_vm6, %v15148_v58  ;;  %v33609_v62 = vld [vmem:[#allocation4 + $0x121] sm:$0xff]  ;;  %35463 = vst [vmem:[#allocation79_spill] sm:$0xff] %v33614_v49  ;;  %v33700_v45 = vld [vmem:[#allocation4 + $0x90] sm:$0xff] }
 0xed5   : > { %35462 = vst [vmem:[#allocation76_spill] sm:$0xff] %v33609_v62  ;;  %15179 = vst.msk [vmem:[#allocation4 + $0x151] sm:$0xff] %vm4877_vm6, %v15147_v32  ;;  %v26814_v20 = vpop.f32.mrb[94].mxu0  ;;  %26870 = vmatprep.mubr.msk.f32.mxu1 %vm4877_vm6, %v33609_v62  ;;  %v33696_v58 = vld [vmem:[#allocation4 + $0x80] sm:$0xff]  ;;  %v33704_v32 = vld [vmem:[#allocation4 + $0x98] sm:$0xff] }
 0xed6   : > { %v15150_v42 = vmax.f32 %v26814_v20, 0.0  ;;  %v15070_v25 = vpop.f32.mrb[95].mxu0  ;;  %26871 = vmatmul.mubr.msk.f32.gmra.mrb[86].mxu1 %vm4877_vm6, %v33614_v49  ;;  %v33708_v20 = vld [vmem:[#allocation4 + $0xa8] sm:$0xff]  ;;  %v33748_v63 = vld [vmem:[#allocation4 + $0x120] sm:$0xff] }
 0xed7   : > { %v15149_v34 = vmax.f32 %v15070_v25, 0.0  ;;  %v33624_v59 = vld [vmem:[#allocation4 + $0x141] sm:$0xff] }
 0xed8   : > { %15182 = vst.msk [vmem:[#allocation4 + $0x171] sm:$0xff] %vm4877_vm6, %v15150_v42  ;;  %v33619_v47 = vld [vmem:[#allocation4 + $0x139] sm:$0xff]  ;;  %35465 = vst [vmem:[#allocation81_spill] sm:$0xff] %v33624_v59  ;;  %v33712_v42 = vld [vmem:[#allocation4 + $0xb0] sm:$0xff] }
 0xed9   : > { %35464 = vst [vmem:[#allocation80_spill] sm:$0xff] %v33619_v47  ;;  %15181 = vst.msk [vmem:[#allocation4 + $0x169] sm:$0xff] %vm4877_vm6, %v15149_v34  ;;  %v26817_v50 = vpop.f32.mrb[96].mxu0  ;;  %26873 = vmatprep.mubr.msk.f32.mxu1 %vm4877_vm6, %v33619_v47  ;;  %v33716_v25 = vld [vmem:[#allocation4 + $0xc0] sm:$0xff]  ;;  %v33720_v34 = vld [vmem:[#allocation4 + $0xc8] sm:$0xff] }
 0xeda   : > { %v15152_v3 = vmax.f32 %v26817_v50, 0.0  ;;  %v15080_v9 = vpop.f32.mrb[97].mxu0  ;;  %26874 = vmatmul.mubr.msk.f32.gmra.mrb[88].mxu1 %vm4877_vm6, %v33624_v59  ;;  %v33724_v50 = vld [vmem:[#allocation4 + $0xd8] sm:$0xff]  ;;  %v33760_v26 = vld [vmem:[#allocation4 + $0x140] sm:$0xff]  ;;  %v22505_v62 = vld [vmem:[%s29699_s29 + $0xf8] sm:$0xff] }
 0xedb   : > { %v15151_v27 = vmax.f32 %v15080_v9, 0.0  ;;  %v33634_v53 = vld [vmem:[#allocation4 + $0x159] sm:$0xff]  ;;  %v33732_v9 = vld [vmem:[#allocation4 + $0xf0] sm:$0xff]  ;;  %v33791_v49 = vld [vmem:[#allocation4 + $0x22] sm:$0xff] }
 0xedc   : > { %15184 = vst.msk [vmem:[#allocation4 + $0x189] sm:$0xff] %vm4877_vm6, %v15152_v3  ;;  %v33629_v18 = vld [vmem:[#allocation4 + $0x151] sm:$0xff]  ;;  %35467 = vst [vmem:[#allocation51_spill] sm:$0xff] %v33634_v53  ;;  %v33728_v3 = vld [vmem:[#allocation4 + $0xe0] sm:$0xff] }
 0xedd   : > { %35466 = vst [vmem:[#allocation82_spill] sm:$0xff] %v33629_v18  ;;  %15183 = vst.msk [vmem:[#allocation4 + $0x181] sm:$0xff] %vm4877_vm6, %v15151_v27  ;;  %26876 = vmatprep.mubr.msk.f32.mxu1 %vm4877_vm6, %v33629_v18  ;;  %v33736_v27 = vld [vmem:[#allocation4 + $0xf8] sm:$0xff]  ;;  %v33764_v16 = vld [vmem:[#allocation4 + $0x150] sm:$0xff] }
 0xede   : > { %26877 = vmatmul.mubr.msk.f32.gmra.mrb[90].mxu1 %vm4877_vm6, %v33634_v53  ;;  %v22502_v53 = vld [vmem:[%s29699_s29 + $0xe0] sm:$0xff]  ;;  %v22503_v18 = vld [vmem:[%s29699_s29 + $0xe8] sm:$0xff]  ;;  %35471 = vst [vmem:[#allocation25_spill] sm:$0xff] %v33791_v49 }
 0xedf   : > { %v33642_v0 = vld [vmem:[#allocation4 + $0x171] sm:$0xff]  ;;  %v33786_v59 = vld [vmem:[#allocation4 + $0x1a] sm:$0xff]  ;;  %v28144_v47 = vpack.c.bf16 %v22503_v18, %v22502_v53 }
 0xee0   : > { %v33638_v30 = vld [vmem:[#allocation4 + $0x169] sm:$0xff]  ;;  %35469 = vst [vmem:[#allocation26_spill] sm:$0xff] %v33642_v0  ;;  %35470 = vst [vmem:[#allocation15_spill] sm:$0xff] %v33786_v59 }
 0xee1   : > { %35468 = vst [vmem:[#allocation16_spill] sm:$0xff] %v33638_v30  ;;  %26879 = vmatprep.mubr.msk.f32.mxu1 %vm4877_vm6, %v33638_v30  ;;  %v33772_v4 = vld [vmem:[#allocation4 + $0x168] sm:$0xff] }
 0xee2   : > { %26880 = vmatmul.mubr.msk.f32.gmra.mrb[92].mxu1 %vm4877_vm6, %v33642_v0  ;;  %v15909_v0 = vld [vmem:[#allocation4 + $0xa] sm:$0xff] }
 0xee3   : > { %26898 = vmatprep.mubr.msk.f32.mxu1 %vm4877_vm6, %v15185_v14  ;;  %v33740_v14 = vld [vmem:[#allocation4 + $0x108] sm:$0xff] }
 0xee4   : > { %v33807_v18 = vld [vmem:[#allocation4 + $0x4a] sm:$0xff] }
 0xee5   : > { %35472 = vst [vmem:[#allocation18_spill] sm:$0xff] %v33807_v18 }
 0xee6   : > { %26899 = vmatmul.mubr.msk.f32.vlgmr.msra.gmra.mrb[62].mxu1 %vm4877_vm6, %v15186_v36  ;;  %v33752_v36 = vld [vmem:[#allocation4 + $0x128] sm:$0xff] }
 0xee7   : > { %26901 = vmatprep.mubr.msk.f32.mxu1 %vm4877_vm6, %v33652_v31  ;;  %28123 = vmatpush3.bf16.msra.mxu1 %v33491_v54  ;;  %v22498_v54 = vld [vmem:[%s29699_s29 + $0xc0] sm:$0xff] }
 0xee8   : > { %28125 = vmatprep.subr.bf16.mxu1 %v28124_v33  ;;  %v33677_v2 = vpack.c.bf16 %v22499_v46, %v22498_v54  ;;  %v22500_v54 = vld [vmem:[%s29699_s29 + $0xd0] sm:$0xff]  ;;  %v22501_v46 = vld [vmem:[%s29699_s29 + $0xd8] sm:$0xff] }
 0xee9   : > { %v28140_v30 = vpack.c.bf16 %v22501_v46, %v22500_v54  ;;  %v33797_v54 = vld [vmem:[#allocation4 + $0x32] sm:$0xff]  ;;  %v33801_v46 = vld [vmem:[#allocation4 + $0x3a] sm:$0xff] }
 0xeea   : > { %26902 = vmatmul.mubr.msk.f32.gmra.mrb[64].mxu1 %vm4877_vm6, %v33657_v48 }
 0xeeb   : > { %26904 = vmatprep.mubr.msk.f32.mxu1 %vm4877_vm6, %v33663_v37  ;;  %28127 = vmatpush3.bf16.msra.mxu1 %v28124_v33  ;;  %v33756_v33 = vld [vmem:[#allocation4 + $0x138] sm:$0xff] }
 0xeec   : > { %28129 = vmatprep.subr.bf16.mxu1 %v28128_v51 }
 0xeee   : > { %26905 = vmatmul.mubr.msk.f32.gmra.mrb[66].mxu1 %vm4877_vm6, %v33667_v52 }
 0xeef   : > { %26907 = vmatprep.mubr.msk.f32.mxu1 %vm4877_vm6, %v33673_v21  ;;  %28131 = vmatpush3.bf16.msra.mxu1 %v28128_v51  ;;  %v33768_v51 = vld [vmem:[#allocation4 + $0x158] sm:$0xff] }
 0xef0   : > { %28133 = vmatprep.subr.bf16.mxu1 %v28132_v15 }
 0xef2   : > { %26908 = vmatmul.mubr.msk.f32.gmra.mrb[68].mxu1 %vm4877_vm6, %v33679_v22 }
 0xef3   : > { %26910 = vmatprep.mubr.msk.f32.mxu1 %vm4877_vm6, %v33683_v23  ;;  %28135 = vmatpush3.bf16.msra.mxu1 %v28132_v15  ;;  %v33776_v15 = vld [vmem:[#allocation4 + $0x170] sm:$0xff] }
 0xef4   : > { %28137 = vmatprep.subr.bf16.mxu1 %v33677_v2 }
 0xef6   : > { %26911 = vmatmul.mubr.msk.f32.gmra.mrb[70].mxu1 %vm4877_vm6, %v33688_v40 }
 0xef7   : > { %26913 = vmatprep.mubr.msk.f32.mxu1 %vm4877_vm6, %v33692_v19 }
 0xefa   : > { %26914 = vmatmul.mubr.msk.f32.gmra.mrb[72].mxu1 %vm4877_vm6, %v33696_v58 }
 0xefb   : > { %26916 = vmatprep.mubr.msk.f32.mxu1 %vm4877_vm6, %v33700_v45 }
 0xefe   : > { %26917 = vmatmul.mubr.msk.f32.gmra.mrb[74].mxu1 %vm4877_vm6, %v33704_v32 }
 0xeff   : > { %26919 = vmatprep.mubr.msk.f32.mxu1 %vm4877_vm6, %v33708_v20 }
 0xf02   : > { %26920 = vmatmul.mubr.msk.f32.gmra.mrb[76].mxu1 %vm4877_vm6, %v33712_v42 }
 0xf03   : > { %26922 = vmatprep.mubr.msk.f32.mxu1 %vm4877_vm6, %v33716_v25 }
 0xf06   : > { %26923 = vmatmul.mubr.msk.f32.gmra.mrb[78].mxu1 %vm4877_vm6, %v33720_v34 }
 0xf07   : > { %26925 = vmatprep.mubr.msk.f32.mxu1 %vm4877_vm6, %v33724_v50 }
 0xf0a   : > { %26926 = vmatmul.mubr.msk.f32.gmra.mrb[80].mxu1 %vm4877_vm6, %v33728_v3 }
 0xf0b   : > { %26928 = vmatprep.mubr.msk.f32.mxu1 %vm4877_vm6, %v33732_v9 }
 0xf0e   : > { %26929 = vmatmul.mubr.msk.f32.gmra.mrb[82].mxu1 %vm4877_vm6, %v33736_v27 }
 0xf0f   : > { %26931 = vmatprep.mubr.msk.f32.mxu1 %vm4877_vm6, %v33740_v14 }
 0xf12   : > { %26932 = vmatmul.mubr.msk.f32.gmra.mrb[84].mxu1 %vm4877_vm6, %v33744_v41 }
 0xf13   : > { %26934 = vmatprep.mubr.msk.f32.mxu1 %vm4877_vm6, %v33748_v63 }
 0xf16   : > { %26935 = vmatmul.mubr.msk.f32.gmra.mrb[86].mxu1 %vm4877_vm6, %v33752_v36 }
 0xf17   : > { %26937 = vmatprep.mubr.msk.f32.mxu1 %vm4877_vm6, %v33756_v33 }
 0xf1a   : > { %26938 = vmatmul.mubr.msk.f32.gmra.mrb[88].mxu1 %vm4877_vm6, %v33760_v26 }
 0xf1b   : > { %26940 = vmatprep.mubr.msk.f32.mxu1 %vm4877_vm6, %v33764_v16 }
 0xf1e   : > { %26941 = vmatmul.mubr.msk.f32.gmra.mrb[90].mxu1 %vm4877_vm6, %v33768_v51 }
 0xf1f   : > { %26943 = vmatprep.mubr.msk.f32.mxu1 %vm4877_vm6, %v33772_v4 }
 0xf22   : > { %26944 = vmatmul.mubr.msk.f32.gmra.mrb[92].mxu1 %vm4877_vm6, %v33776_v15 }
 0xf23   : > { %26962 = vmatprep.mubr.msk.f32.mxu1 %vm4877_vm6, %v15908_v43  ;;  %v22504_v43 = vld [vmem:[%s29699_s29 + $0xf0] sm:$0xff] }
 0xf26   : > { %26963 = vmatmul.mubr.msk.f32.vlgmr.msra.gmra.mrb[62].mxu1 %vm4877_vm6, %v15909_v0  ;;  %v28148_v0 = vpack.c.bf16 %v22505_v62, %v22504_v43  ;;  %v33815_v62 = vld [vmem:[#allocation4 + $0x62] sm:$0xff]  ;;  %v33831_v43 = vld [vmem:[#allocation4 + $0x92] sm:$0xff] }
 0xf27   : > { %26965 = vmatprep.mubr.msk.f32.mxu1 %vm4877_vm6, %v33786_v59  ;;  %28139 = vmatpush3.bf16.msra.mxu1 %v33677_v2  ;;  %v22538_v2 = vld [vmem:[%s29699_s29 + $0x100] sm:$0xff]  ;;  %v22539_v59 = vld [vmem:[%s29699_s29 + $0x108] sm:$0xff]  ;;  %35474 = vst [vmem:[#allocation17_spill] sm:$0xff] %v33815_v62  ;;  %35478 = vst [vmem:[#allocation19_spill] sm:$0xff] %v33831_v43 }
 0xf28   : > { %28141 = vmatprep.subr.bf16.mxu1 %v28140_v30  ;;  %v28152_v53 = vpack.c.bf16 %v22539_v59, %v22538_v2  ;;  %v33827_v59 = vld [vmem:[#allocation4 + $0x82] sm:$0xff]  ;;  %v33839_v2 = vld [vmem:[#allocation4 + $0xaa] sm:$0xff] }
 0xf29   : > { %35477 = vst [vmem:[#allocation30_spill] sm:$0xff] %v33827_v59  ;;  %35480 = vst [vmem:[#allocation22_spill] sm:$0xff] %v33839_v2 }
 0xf2a   : > { %26966 = vmatmul.mubr.msk.f32.gmra.mrb[64].mxu1 %vm4877_vm6, %v33791_v49  ;;  %v33811_v49 = vld [vmem:[#allocation4 + $0x52] sm:$0xff] }
 0xf2b   : > { %26968 = vmatprep.mubr.msk.f32.mxu1 %vm4877_vm6, %v33797_v54  ;;  %28143 = vmatpush3.bf16.msra.mxu1 %v28140_v30  ;;  %35473 = vst [vmem:[#allocation28_spill] sm:$0xff] %v33811_v49  ;;  %v33819_v30 = vld [vmem:[#allocation4 + $0x6a] sm:$0xff] }
 0xf2c   : > { %28145 = vmatprep.subr.bf16.mxu1 %v28144_v47  ;;  %35475 = vst [vmem:[#allocation27_spill] sm:$0xff] %v33819_v30 }
 0xf2e   : > { %26969 = vmatmul.mubr.msk.f32.gmra.mrb[66].mxu1 %vm4877_vm6, %v33801_v46 }
 0xf2f   : > { %26971 = vmatprep.mubr.msk.f32.mxu1 %vm4877_vm6, %v33807_v18  ;;  %28147 = vmatpush3.bf16.msra.mxu1 %v28144_v47  ;;  %v33823_v47 = vld [vmem:[#allocation4 + $0x7a] sm:$0xff]  ;;  %v22545_v18 = vld [vmem:[%s29699_s29 + $0x138] sm:$0xff] }
 0xf30   : > { %28149 = vmatprep.subr.bf16.mxu1 %v28148_v0  ;;  %35476 = vst [vmem:[#allocation20_spill] sm:$0xff] %v33823_v47 }
 0xf32   : > { %26972 = vmatmul.mubr.msk.f32.gmra.mrb[68].mxu1 %vm4877_vm6, %v33811_v49  ;;  %v22544_v49 = vld [vmem:[%s29699_s29 + $0x130] sm:$0xff] }
 0xf33   : > { %26974 = vmatprep.mubr.msk.f32.mxu1 %vm4877_vm6, %v33815_v62  ;;  %28151 = vmatpush3.bf16.msra.mxu1 %v28148_v0  ;;  %v33835_v0 = vld [vmem:[#allocation4 + $0x9a] sm:$0xff] }
 0xf34   : > { %28153 = vmatprep.subr.bf16.mxu1 %v28152_v53  ;;  %35479 = vst [vmem:[#allocation29_spill] sm:$0xff] %v33835_v0  ;;  %v22543_v62 = vld [vmem:[%s29699_s29 + $0x128] sm:$0xff] }
 0xf36   : > { %26975 = vmatmul.mubr.msk.f32.gmra.mrb[70].mxu1 %vm4877_vm6, %v33819_v30  ;;  %v22541_v30 = vld [vmem:[%s29699_s29 + $0x118] sm:$0xff] }
 0xf37   : > { %26977 = vmatprep.mubr.msk.f32.mxu1 %vm4877_vm6, %v33823_v47  ;;  %v33843_v47 = vld [vmem:[#allocation4 + $0xb2] sm:$0xff] }
 0xf38   : > { %35481 = vst [vmem:[#allocation32_spill] sm:$0xff] %v33843_v47 }
 0xf3a   : > { %26978 = vmatmul.mubr.msk.f32.gmra.mrb[72].mxu1 %vm4877_vm6, %v33827_v59  ;;  %v33847_v59 = vld [vmem:[#allocation4 + $0xc2] sm:$0xff] }
 0xf3b   : > { %26980 = vmatprep.mubr.msk.f32.mxu1 %vm4877_vm6, %v33831_v43  ;;  %35482 = vst [vmem:[#allocation21_spill] sm:$0xff] %v33847_v59  ;;  %v33851_v43 = vld [vmem:[#allocation4 + $0xca] sm:$0xff] }
 0xf3c   : > { %35483 = vst [vmem:[#allocation31_spill] sm:$0xff] %v33851_v43 }
 0xf3e   : > { %26981 = vmatmul.mubr.msk.f32.gmra.mrb[74].mxu1 %vm4877_vm6, %v33835_v0  ;;  %v33855_v0 = vld [vmem:[#allocation4 + $0xda] sm:$0xff] }
 0xf3f   : > { %26983 = vmatprep.mubr.msk.f32.mxu1 %vm4877_vm6, %v33839_v2  ;;  %35484 = vst [vmem:[#allocation24_spill] sm:$0xff] %v33855_v0  ;;  %v33859_v2 = vld [vmem:[#allocation4 + $0xe2] sm:$0xff] }
 0xf40   : > { %35485 = vst [vmem:[#allocation34_spill] sm:$0xff] %v33859_v2 }
 0xf42   : > { %26984 = vmatmul.mubr.msk.f32.gmra.mrb[76].mxu1 %vm4877_vm6, %v33843_v47  ;;  %v33863_v47 = vld [vmem:[#allocation4 + $0xf2] sm:$0xff] }
 0xf43   : > { %26986 = vmatprep.mubr.msk.f32.mxu1 %vm4877_vm6, %v33847_v59  ;;  %35486 = vst [vmem:[#allocation23_spill] sm:$0xff] %v33863_v47  ;;  %v33867_v59 = vld [vmem:[#allocation4 + $0xfa] sm:$0xff] }
 0xf44   : > { %35487 = vst [vmem:[#allocation33_spill] sm:$0xff] %v33867_v59 }
 0xf46   : > { %26987 = vmatmul.mubr.msk.f32.gmra.mrb[78].mxu1 %vm4877_vm6, %v33851_v43  ;;  %v33871_v43 = vld [vmem:[#allocation4 + $0x10a] sm:$0xff] }
 0xf47   : > { %26989 = vmatprep.mubr.msk.f32.mxu1 %vm4877_vm6, %v33855_v0  ;;  %35488 = vst [vmem:[#allocation36_spill] sm:$0xff] %v33871_v43  ;;  %v33875_v0 = vld [vmem:[#allocation4 + $0x112] sm:$0xff] }
 0xf48   : > { %35489 = vst [vmem:[#allocation35_spill] sm:$0xff] %v33875_v0 }
 0xf4a   : > { %26990 = vmatmul.mubr.msk.f32.gmra.mrb[80].mxu1 %vm4877_vm6, %v33859_v2  ;;  %v33879_v2 = vld [vmem:[#allocation4 + $0x122] sm:$0xff] }
 0xf4b   : > { %26992 = vmatprep.mubr.msk.f32.mxu1 %vm4877_vm6, %v33863_v47  ;;  %35490 = vst [vmem:[#allocation38_spill] sm:$0xff] %v33879_v2  ;;  %v33883_v47 = vld [vmem:[#allocation4 + $0x12a] sm:$0xff] }
 0xf4c   : > { %35491 = vst [vmem:[#allocation37_spill] sm:$0xff] %v33883_v47 }
 0xf4e   : > { %26993 = vmatmul.mubr.msk.f32.gmra.mrb[82].mxu1 %vm4877_vm6, %v33867_v59  ;;  %v33887_v59 = vld [vmem:[#allocation4 + $0x13a] sm:$0xff] }
 0xf4f   : > { %26995 = vmatprep.mubr.msk.f32.mxu1 %vm4877_vm6, %v33871_v43  ;;  %35492 = vst [vmem:[#allocation40_spill] sm:$0xff] %v33887_v59  ;;  %v33895_v43 = vld [vmem:[#allocation4 + $0x152] sm:$0xff] }
 0xf50   : > { %35494 = vst [vmem:[#allocation42_spill] sm:$0xff] %v33895_v43 }
 0xf52   : > { %26996 = vmatmul.mubr.msk.f32.gmra.mrb[84].mxu1 %vm4877_vm6, %v33875_v0  ;;  %v33891_v0 = vld [vmem:[#allocation4 + $0x142] sm:$0xff] }
 0xf53   : > { %26998 = vmatprep.mubr.msk.f32.mxu1 %vm4877_vm6, %v33879_v2  ;;  %35493 = vst [vmem:[#allocation39_spill] sm:$0xff] %v33891_v0  ;;  %v33899_v2 = vld [vmem:[#allocation4 + $0x15a] sm:$0xff] }
 0xf54   : > { %35495 = vst [vmem:[#allocation41_spill] sm:$0xff] %v33899_v2 }
 0xf56   : > { %26999 = vmatmul.mubr.msk.f32.gmra.mrb[86].mxu1 %vm4877_vm6, %v33883_v47  ;;  %v33903_v47 = vld [vmem:[#allocation4 + $0x16a] sm:$0xff] }
 0xf57   : > { %27001 = vmatprep.mubr.msk.f32.mxu1 %vm4877_vm6, %v33887_v59  ;;  %35496 = vst [vmem:[#allocation44_spill] sm:$0xff] %v33903_v47  ;;  %v33907_v59 = vld [vmem:[#allocation4 + $0x172] sm:$0xff] }
 0xf58   : > { %35497 = vst [vmem:[#allocation43_spill] sm:$0xff] %v33907_v59 }
 0xf5a   : > { %27002 = vmatmul.mubr.msk.f32.gmra.mrb[88].mxu1 %vm4877_vm6, %v33891_v0  ;;  %v22540_v0 = vld [vmem:[%s29699_s29 + $0x110] sm:$0xff] }
 0xf5b   : > { %27004 = vmatprep.mubr.msk.f32.mxu1 %vm4877_vm6, %v33895_v43  ;;  %v28156_v43 = vpack.c.bf16 %v22541_v30, %v22540_v0  ;;  %v22578_v30 = vld [vmem:[%s29699_s29 + $0x140] sm:$0xff]  ;;  %v22579_v0 = vld [vmem:[%s29699_s29 + $0x148] sm:$0xff] }
 0xf5e   : > { %27005 = vmatmul.mubr.msk.f32.gmra.mrb[90].mxu1 %vm4877_vm6, %v33899_v2  ;;  %v22542_v2 = vld [vmem:[%s29699_s29 + $0x120] sm:$0xff] }
 0xf5f   : > { %27007 = vmatprep.mubr.msk.f32.mxu1 %vm4877_vm6, %v33903_v47  ;;  %v28160_v47 = vpack.c.bf16 %v22543_v62, %v22542_v2  ;;  %v22581_v62 = vld [vmem:[%s29699_s29 + $0x158] sm:$0xff]  ;;  %v22583_v2 = vld [vmem:[%s29699_s29 + $0x168] sm:$0xff] }
 0xf62   : > { %27008 = vmatmul.mubr.msk.f32.gmra.mrb[92].mxu1 %vm4877_vm6, %v33907_v59 }
 0xf63   : > { %27026 = vmatprep.mubr.msk.f32.mxu1 %vm4877_vm6, %v33652_v31  ;;  %v28164_v31 = vpack.c.bf16 %v22545_v18, %v22544_v49  ;;  %v33979_v49 = vld [vmem:[#allocation4 + $0x180] sm:$0xff]  ;;  %v33983_v18 = vld [vmem:[#allocation4 + $0x188] sm:$0xff] }
 0xf66   : > { %27027 = vmatmul.mubr.msk.f32.vlgmr.msra.gmra.mrb[62].mxu1 %vm4877_vm6, %v33657_v48  ;;  %v28168_v48 = vpack.c.bf16 %v22579_v0, %v22578_v30  ;;  %v22584_v30 = vld [vmem:[%s29699_s29 + $0x170] sm:$0xff]  ;;  %v22585_v0 = vld [vmem:[%s29699_s29 + $0x178] sm:$0xff] }
 0xf67   : > { %27029 = vmatprep.mubr.msk.f32.mxu1 %vm4877_vm6, %v33663_v37  ;;  %28155 = vmatpush3.bf16.msra.mxu1 %v28152_v53  ;;  %v22580_v53 = vld [vmem:[%s29699_s29 + $0x150] sm:$0xff] }
 0xf68   : > { %28157 = vmatprep.subr.bf16.mxu1 %v28156_v43 }
 0xf6a   : > { %27030 = vmatmul.mubr.msk.f32.gmra.mrb[64].mxu1 %vm4877_vm6, %v33667_v52 }
 0xf6b   : > { %27032 = vmatprep.mubr.msk.f32.mxu1 %vm4877_vm6, %v33673_v21  ;;  %28159 = vmatpush3.bf16.msra.mxu1 %v28156_v43  ;;  %v22582_v43 = vld [vmem:[%s29699_s29 + $0x160] sm:$0xff] }
 0xf6c   : > { %28161 = vmatprep.subr.bf16.mxu1 %v28160_v47 }
 0xf6e   : > { %27033 = vmatmul.mubr.msk.f32.gmra.mrb[66].mxu1 %vm4877_vm6, %v33679_v22 }
 0xf6f   : > { %27035 = vmatprep.mubr.msk.f32.mxu1 %vm4877_vm6, %v33683_v23  ;;  %28163 = vmatpush3.bf16.msra.mxu1 %v28160_v47  ;;  %v28172_v47 = vpack.c.bf16 %v22581_v62, %v22580_v53  ;;  %v22618_v53 = vld [vmem:[%s29699_s29 + $0x180] sm:$0xff]  ;;  %v22619_v62 = vld [vmem:[%s29699_s29 + $0x188] sm:$0xff] }
 0xf70   : > { %28165 = vmatprep.subr.bf16.mxu1 %v28164_v31 }
 0xf72   : > { %27036 = vmatmul.mubr.msk.f32.gmra.mrb[68].mxu1 %vm4877_vm6, %v33688_v40 }
 0xf73   : > { %27038 = vmatprep.mubr.msk.f32.mxu1 %vm4877_vm6, %v33692_v19  ;;  %28167 = vmatpush3.bf16.msra.mxu1 %v28164_v31  ;;  %v28176_v31 = vpack.c.bf16 %v22583_v2, %v22582_v43  ;;  %v22658_v43 = vld [vmem:[%s29699_s29 + $0x1c0] sm:$0xff]  ;;  %v22659_v2 = vld [vmem:[%s29699_s29 + $0x1c8] sm:$0xff] }
 0xf74   : > { %28169 = vmatprep.subr.bf16.mxu1 %v28168_v48 }
 0xf76   : > { %27039 = vmatmul.mubr.msk.f32.gmra.mrb[70].mxu1 %vm4877_vm6, %v33696_v58 }
 0xf77   : > { %27041 = vmatprep.mubr.msk.f32.mxu1 %vm4877_vm6, %v33700_v45 }
 0xf7a   : > { %27042 = vmatmul.mubr.msk.f32.gmra.mrb[72].mxu1 %vm4877_vm6, %v33704_v32 }
 0xf7b   : > { %27044 = vmatprep.mubr.msk.f32.mxu1 %vm4877_vm6, %v33708_v20 }
 0xf7e   : > { %27045 = vmatmul.mubr.msk.f32.gmra.mrb[74].mxu1 %vm4877_vm6, %v33712_v42 }
 0xf7f   : > { %27047 = vmatprep.mubr.msk.f32.mxu1 %vm4877_vm6, %v33716_v25 }
 0xf82   : > { %27048 = vmatmul.mubr.msk.f32.gmra.mrb[76].mxu1 %vm4877_vm6, %v33720_v34 }
 0xf83   : > { %27050 = vmatprep.mubr.msk.f32.mxu1 %vm4877_vm6, %v33724_v50 }
 0xf86   : > { %27051 = vmatmul.mubr.msk.f32.gmra.mrb[78].mxu1 %vm4877_vm6, %v33728_v3 }
 0xf87   : > { %27053 = vmatprep.mubr.msk.f32.mxu1 %vm4877_vm6, %v33732_v9 }
 0xf8a   : > { %27054 = vmatmul.mubr.msk.f32.gmra.mrb[80].mxu1 %vm4877_vm6, %v33736_v27 }
 0xf8b   : > { %27056 = vmatprep.mubr.msk.f32.mxu1 %vm4877_vm6, %v33740_v14 }
 0xf8e   : > { %27057 = vmatmul.mubr.msk.f32.gmra.mrb[82].mxu1 %vm4877_vm6, %v33744_v41 }
 0xf8f   : > { %27059 = vmatprep.mubr.msk.f32.mxu1 %vm4877_vm6, %v33748_v63 }
 0xf92   : > { %27060 = vmatmul.mubr.msk.f32.gmra.mrb[84].mxu1 %vm4877_vm6, %v33752_v36 }
 0xf93   : > { %27062 = vmatprep.mubr.msk.f32.mxu1 %vm4877_vm6, %v33756_v33 }
 0xf96   : > { %27063 = vmatmul.mubr.msk.f32.gmra.mrb[86].mxu1 %vm4877_vm6, %v33760_v26 }
 0xf97   : > { %27065 = vmatprep.mubr.msk.f32.mxu1 %vm4877_vm6, %v33764_v16 }
 0xf9a   : > { %27066 = vmatmul.mubr.msk.f32.gmra.mrb[88].mxu1 %vm4877_vm6, %v33768_v51 }
 0xf9b   : > { %27068 = vmatprep.mubr.msk.f32.mxu1 %vm4877_vm6, %v33772_v4 }
 0xf9e   : > { %27069 = vmatmul.mubr.msk.f32.gmra.mrb[90].mxu1 %vm4877_vm6, %v33776_v15 }
 0xf9f   : > { %27071 = vmatprep.mubr.msk.f32.mxu1 %vm4877_vm6, %v33979_v49 }
 0xfa2   : > { %27072 = vmatmul.mubr.msk.f32.gmra.mrb[92].mxu1 %vm4877_vm6, %v33983_v18 }
 0xfa3   : > { %27090 = vmatprep.mubr.msk.f32.mxu1 %vm4877_vm6, %v33499_v10  ;;  %v28180_v10 = vpack.c.bf16 %v22585_v0, %v22584_v30  ;;  %v35510_v30 = vld [vmem:[#allocation17_spill] sm:$0xff]  ;;  %v28200_v0 = vpack.c.bf16 %v22659_v2, %v22658_v43  ;;  %v34135_v43 = vld [vmem:[#allocation4 + $0x18a] sm:$0xff] }
 0xfa4   : > { %v22660_v2 = vld [vmem:[%s29699_s29 + $0x1d0] sm:$0xff] }
 0xfa6   : > { %27091 = vmatmul.mubr.msk.f32.vlgmr.msra.gmra.mrb[62].mxu1 %vm4877_vm6, %v33504_v12  ;;  %v28184_v12 = vpack.c.bf16 %v22619_v62, %v22618_v53  ;;  %v35512_v53 = vld [vmem:[#allocation20_spill] sm:$0xff]  ;;  %v35513_v62 = vld [vmem:[#allocation30_spill] sm:$0xff] }
 0xfa7   : > { %27093 = vmatprep.mubr.msk.f32.mxu1 %vm4877_vm6, %v33509_v24  ;;  %28171 = vmatpush3.bf16.msra.mxu1 %v28168_v48  ;;  %v35498_v24 = vld [vmem:[#allocation76_spill] sm:$0xff]  ;;  %v35508_v48 = vld [vmem:[#allocation18_spill] sm:$0xff] }
 0xfa8   : > { %28173 = vmatprep.subr.bf16.mxu1 %v28172_v47 }
 0xfaa   : > { %27094 = vmatmul.mubr.msk.f32.gmra.mrb[64].mxu1 %vm4877_vm6, %v33514_v39  ;;  %v35499_v39 = vld [vmem:[#allocation79_spill] sm:$0xff] }
 0xfab   : > { %27096 = vmatprep.mubr.msk.f32.mxu1 %vm4877_vm6, %v33519_v28  ;;  %28175 = vmatpush3.bf16.msra.mxu1 %v28172_v47  ;;  %v35500_v28 = vld [vmem:[#allocation80_spill] sm:$0xff] }
 0xfac   : > { %28177 = vmatprep.subr.bf16.mxu1 %v28176_v31 }
 0xfae   : > { %27097 = vmatmul.mubr.msk.f32.gmra.mrb[66].mxu1 %vm4877_vm6, %v33524_v35  ;;  %v35501_v35 = vld [vmem:[#allocation81_spill] sm:$0xff] }
 0xfaf   : > { %27099 = vmatprep.mubr.msk.f32.mxu1 %vm4877_vm6, %v33529_v61  ;;  %28179 = vmatpush3.bf16.msra.mxu1 %v28176_v31  ;;  %v35502_v61 = vld [vmem:[#allocation82_spill] sm:$0xff]  ;;  %v35509_v31 = vld [vmem:[#allocation28_spill] sm:$0xff] }
 0xfb0   : > { %28181 = vmatprep.subr.bf16.mxu1 %v28180_v10 }
 0xfb2   : > { %27100 = vmatmul.mubr.msk.f32.gmra.mrb[68].mxu1 %vm4877_vm6, %v33534_v8  ;;  %v35503_v8 = vld [vmem:[#allocation51_spill] sm:$0xff] }
 0xfb3   : > { %27102 = vmatprep.mubr.msk.f32.mxu1 %vm4877_vm6, %v33539_v5  ;;  %28183 = vmatpush3.bf16.msra.mxu1 %v28180_v10  ;;  %v35504_v5 = vld [vmem:[#allocation16_spill] sm:$0xff]  ;;  %v35511_v10 = vld [vmem:[#allocation27_spill] sm:$0xff] }
 0xfb4   : > { %28185 = vmatprep.subr.bf16.mxu1 %v28184_v12 }
 0xfb6   : > { %27103 = vmatmul.mubr.msk.f32.gmra.mrb[70].mxu1 %vm4877_vm6, %v33544_v17  ;;  %v35505_v17 = vld [vmem:[#allocation26_spill] sm:$0xff] }
 0xfb7   : > { %27105 = vmatprep.mubr.msk.f32.mxu1 %vm4877_vm6, %v33549_v13  ;;  %v34055_v13 = vld [vmem:[#allocation4 + $0x181] sm:$0xff] }
 0xfba   : > { %27106 = vmatmul.mubr.msk.f32.gmra.mrb[72].mxu1 %vm4877_vm6, %v33554_v56  ;;  %v34059_v56 = vld [vmem:[#allocation4 + $0x189] sm:$0xff] }
 0xfbb   : > { %27108 = vmatprep.mubr.msk.f32.mxu1 %vm4877_vm6, %v33559_v60  ;;  %v22620_v60 = vld [vmem:[%s29699_s29 + $0x190] sm:$0xff] }
 0xfbe   : > { %27109 = vmatmul.mubr.msk.f32.gmra.mrb[74].mxu1 %vm4877_vm6, %v33564_v11  ;;  %v22621_v11 = vld [vmem:[%s29699_s29 + $0x198] sm:$0xff] }
 0xfbf   : > { %27111 = vmatprep.mubr.msk.f32.mxu1 %vm4877_vm6, %v33569_v57  ;;  %v35506_v57 = vld [vmem:[#allocation15_spill] sm:$0xff] }
 0xfc2   : > { %27112 = vmatmul.mubr.msk.f32.gmra.mrb[76].mxu1 %vm4877_vm6, %v33574_v55  ;;  %v28188_v55 = vpack.c.bf16 %v22621_v11, %v22620_v60  ;;  %v35523_v60 = vld [vmem:[#allocation33_spill] sm:$0xff]  ;;  %v35524_v11 = vld [vmem:[#allocation36_spill] sm:$0xff] }
 0xfc3   : > { %27114 = vmatprep.mubr.msk.f32.mxu1 %vm4877_vm6, %v33579_v6  ;;  %v22622_v6 = vld [vmem:[%s29699_s29 + $0x1a0] sm:$0xff] }
 0xfc6   : > { %27115 = vmatmul.mubr.msk.f32.gmra.mrb[78].mxu1 %vm4877_vm6, %v33584_v44  ;;  %v22623_v44 = vld [vmem:[%s29699_s29 + $0x1a8] sm:$0xff] }
 0xfc7   : > { %27117 = vmatprep.mubr.msk.f32.mxu1 %vm4877_vm6, %v33589_v38  ;;  %v35507_v38 = vld [vmem:[#allocation25_spill] sm:$0xff] }
 0xfca   : > { %27118 = vmatmul.mubr.msk.f32.gmra.mrb[80].mxu1 %vm4877_vm6, %v33594_v29  ;;  %v28192_v29 = vpack.c.bf16 %v22623_v44, %v22622_v6  ;;  %v35527_v6 = vld [vmem:[#allocation37_spill] sm:$0xff]  ;;  %v35528_v44 = vld [vmem:[#allocation40_spill] sm:$0xff] }
 0xfcb   : > { %27120 = vmatprep.mubr.msk.f32.mxu1 %vm4877_vm6, %v33599_v7  ;;  %v22624_v7 = vld [vmem:[%s29699_s29 + $0x1b0] sm:$0xff] }
 0xfce   : > { %27121 = vmatmul.mubr.msk.f32.gmra.mrb[82].mxu1 %vm4877_vm6, %v33604_v1  ;;  %v22625_v1 = vld [vmem:[%s29699_s29 + $0x1b8] sm:$0xff] }
 0xfcf   : > { %27123 = vmatprep.mubr.msk.f32.mxu1 %vm4877_vm6, %v35498_v24  ;;  %v28196_v47 = vpack.c.bf16 %v22625_v1, %v22624_v7  ;;  %v35515_v24 = vld [vmem:[#allocation29_spill] sm:$0xff]  ;;  %v35532_v1 = vld [vmem:[#allocation44_spill] sm:$0xff] }
 0xfd0   : > { %v35531_v7 = vld [vmem:[#allocation41_spill] sm:$0xff] }
 0xfd2   : > { %27124 = vmatmul.mubr.msk.f32.gmra.mrb[84].mxu1 %vm4877_vm6, %v35499_v39  ;;  %v35516_v39 = vld [vmem:[#allocation22_spill] sm:$0xff] }
 0xfd3   : > { %27126 = vmatprep.mubr.msk.f32.mxu1 %vm4877_vm6, %v35500_v28  ;;  %v35517_v28 = vld [vmem:[#allocation32_spill] sm:$0xff] }
 0xfd6   : > { %27127 = vmatmul.mubr.msk.f32.gmra.mrb[86].mxu1 %vm4877_vm6, %v35501_v35  ;;  %v35518_v35 = vld [vmem:[#allocation21_spill] sm:$0xff] }
 0xfd7   : > { %27129 = vmatprep.mubr.msk.f32.mxu1 %vm4877_vm6, %v35502_v61  ;;  %v35519_v61 = vld [vmem:[#allocation31_spill] sm:$0xff] }
 0xfda   : > { %27130 = vmatmul.mubr.msk.f32.gmra.mrb[88].mxu1 %vm4877_vm6, %v35503_v8  ;;  %v35520_v8 = vld [vmem:[#allocation24_spill] sm:$0xff] }
 0xfdb   : > { %27132 = vmatprep.mubr.msk.f32.mxu1 %vm4877_vm6, %v35504_v5  ;;  %v35521_v5 = vld [vmem:[#allocation34_spill] sm:$0xff] }
 0xfde   : > { %27133 = vmatmul.mubr.msk.f32.gmra.mrb[90].mxu1 %vm4877_vm6, %v35505_v17  ;;  %v35522_v17 = vld [vmem:[#allocation23_spill] sm:$0xff] }
 0xfdf   : > { %27135 = vmatprep.mubr.msk.f32.mxu1 %vm4877_vm6, %v34055_v13 }
 0xfe2   : > { %27136 = vmatmul.mubr.msk.f32.gmra.mrb[92].mxu1 %vm4877_vm6, %v34059_v56 }
 0xfe3   : > { %27154 = vmatprep.mubr.msk.f32.mxu1 %vm4877_vm6, %v35506_v57  ;;  %v35525_v57 = vld [vmem:[#allocation35_spill] sm:$0xff] }
 0xfe6   : > { %27155 = vmatmul.mubr.msk.f32.vlgmr.msra.gmra.mrb[62].mxu1 %vm4877_vm6, %v35507_v38  ;;  %v35529_v38 = vld [vmem:[#allocation39_spill] sm:$0xff] }
 0xfe7   : > { %27157 = vmatprep.mubr.msk.f32.mxu1 %vm4877_vm6, %v33797_v54  ;;  %28187 = vmatpush3.bf16.msra.mxu1 %v28184_v12  ;;  %v35514_v12 = vld [vmem:[#allocation19_spill] sm:$0xff] }
 0xfe8   : > { %28189 = vmatprep.subr.bf16.mxu1 %v28188_v55 }
 0xfea   : > { %27158 = vmatmul.mubr.msk.f32.gmra.mrb[64].mxu1 %vm4877_vm6, %v33801_v46 }
 0xfeb   : > { %27160 = vmatprep.mubr.msk.f32.mxu1 %vm4877_vm6, %v35508_v48  ;;  %28191 = vmatpush3.bf16.msra.mxu1 %v28188_v55  ;;  %v35526_v55 = vld [vmem:[#allocation38_spill] sm:$0xff] }
 0xfec   : > { %28193 = vmatprep.subr.bf16.mxu1 %v28192_v29 }
 0xfee   : > { %27161 = vmatmul.mubr.msk.f32.gmra.mrb[66].mxu1 %vm4877_vm6, %v35509_v31 }
 0xfef   : > { %27163 = vmatprep.mubr.msk.f32.mxu1 %vm4877_vm6, %v35510_v30  ;;  %28195 = vmatpush3.bf16.msra.mxu1 %v28192_v29  ;;  %v35530_v29 = vld [vmem:[#allocation42_spill] sm:$0xff] }
 0xff0   : > { %28197 = vmatprep.subr.bf16.mxu1 %v28196_v47 }
 0xff2   : > { %27164 = vmatmul.mubr.msk.f32.gmra.mrb[68].mxu1 %vm4877_vm6, %v35511_v10 }
 0xff3   : > { %27166 = vmatprep.mubr.msk.f32.mxu1 %vm4877_vm6, %v35512_v53  ;;  %28199 = vmatpush3.bf16.msra.mxu1 %v28196_v47  ;;  %v34131_v47 = vld [vmem:[#allocation4 + $0x182] sm:$0xff] }
 0xff4   : > { %28201 = vmatprep.subr.bf16.mxu1 %v28200_v0  ;;  %35533 = vst [vmem:[#allocation50_spill] sm:$0xff] %v34131_v47 }
 0xff6   : > { %27167 = vmatmul.mubr.msk.f32.gmra.mrb[70].mxu1 %vm4877_vm6, %v35513_v62 }
 0xff7   : > { %27169 = vmatprep.mubr.msk.f32.mxu1 %vm4877_vm6, %v35514_v12 }
 0xffa   : > { %27170 = vmatmul.mubr.msk.f32.gmra.mrb[72].mxu1 %vm4877_vm6, %v35515_v24 }
 0xffb   : > { %27172 = vmatprep.mubr.msk.f32.mxu1 %vm4877_vm6, %v35516_v39 }
 0xffe   : > { %27173 = vmatmul.mubr.msk.f32.gmra.mrb[74].mxu1 %vm4877_vm6, %v35517_v28 }
 0xfff   : > { %27175 = vmatprep.mubr.msk.f32.mxu1 %vm4877_vm6, %v35518_v35 }
0x1002   : > { %27176 = vmatmul.mubr.msk.f32.gmra.mrb[76].mxu1 %vm4877_vm6, %v35519_v61 }
0x1003   : > { %27178 = vmatprep.mubr.msk.f32.mxu1 %vm4877_vm6, %v35520_v8 }
0x1006   : > { %27179 = vmatmul.mubr.msk.f32.gmra.mrb[78].mxu1 %vm4877_vm6, %v35521_v5 }
0x1007   : > { %27181 = vmatprep.mubr.msk.f32.mxu1 %vm4877_vm6, %v35522_v17 }
0x100a   : > { %27182 = vmatmul.mubr.msk.f32.gmra.mrb[80].mxu1 %vm4877_vm6, %v35523_v60 }
0x100b   : > { %27184 = vmatprep.mubr.msk.f32.mxu1 %vm4877_vm6, %v35524_v11 }
0x100e   : > { %27185 = vmatmul.mubr.msk.f32.gmra.mrb[82].mxu1 %vm4877_vm6, %v35525_v57 }
0x100f   : > { %27187 = vmatprep.mubr.msk.f32.mxu1 %vm4877_vm6, %v35526_v55 }
0x1012   : > { %27188 = vmatmul.mubr.msk.f32.gmra.mrb[84].mxu1 %vm4877_vm6, %v35527_v6 }
0x1013   : > { %27190 = vmatprep.mubr.msk.f32.mxu1 %vm4877_vm6, %v35528_v44  ;;  %v22665_v44 = vld [vmem:[%s29699_s29 + $0x1f8] sm:$0xff] }
0x1016   : > { %27191 = vmatmul.mubr.msk.f32.gmra.mrb[86].mxu1 %vm4877_vm6, %v35529_v38  ;;  %v22664_v38 = vld [vmem:[%s29699_s29 + $0x1f0] sm:$0xff] }
0x1017   : > { %27193 = vmatprep.mubr.msk.f32.mxu1 %vm4877_vm6, %v35530_v29  ;;  %v22661_v29 = vld [vmem:[%s29699_s29 + $0x1d8] sm:$0xff] }
0x101a   : > { %27194 = vmatmul.mubr.msk.f32.gmra.mrb[88].mxu1 %vm4877_vm6, %v35531_v7  ;;  %v22663_v7 = vld [vmem:[%s29699_s29 + $0x1e8] sm:$0xff] }
0x101b   : > { %27196 = vmatprep.mubr.msk.f32.mxu1 %vm4877_vm6, %v35532_v1  ;;  %v28204_v1 = vpack.c.bf16 %v22661_v29, %v22660_v2  ;;  %v22698_v29 = vld [vmem:[%s29699_s29 + $0x200] sm:$0xff]  ;;  %v22699_v2 = vld [vmem:[%s29699_s29 + $0x208] sm:$0xff] }
0x101e   : > { %27197 = vmatmul.mubr.msk.f32.gmra.mrb[90].mxu1 %vm4877_vm6, %v33907_v59  ;;  %v22662_v59 = vld [vmem:[%s29699_s29 + $0x1e0] sm:$0xff] }
0x101f   : > { %27199 = vmatprep.mubr.msk.f32.mxu1 %vm4877_vm6, %v34131_v47  ;;  %v28208_v47 = vpack.c.bf16 %v22663_v7, %v22662_v59  ;;  %v17892_v59 = vld [vmem:[#allocation4 + $0xd9] sm:$0xff]  ;;  %v17898_v7 = vld [vmem:[#allocation4 + $0x121] sm:$0xff] }
0x1022   : > { %27200 = vmatmul.mubr.msk.f32.gmra.mrb[92].mxu1 %vm4877_vm6, %v34135_v43 }
0x1023   : > { %27218 = vmatprep.mubr.msk.f32.mxu1 %vm4877_vm6, %v33663_v37  ;;  %v28212_v37 = vpack.c.bf16 %v22665_v44, %v22664_v38  ;;  %v17896_v44 = vld [vmem:[#allocation4 + $0x109] sm:$0xff]  ;;  %v17897_v38 = vld [vmem:[#allocation4 + $0x111] sm:$0xff] }
0x1026   : > { %27219 = vmatmul.mubr.msk.f32.vlgmr.msra.gmra.mrb[62].mxu1 %vm4877_vm6, %v33667_v52  ;;  %v28216_v52 = vpack.c.bf16 %v22699_v2, %v22698_v29  ;;  %v17902_v29 = vld [vmem:[#allocation4 + $0x151] sm:$0xff]  ;;  %v17903_v2 = vld [vmem:[#allocation4 + $0x159] sm:$0xff] }
0x1027   : > { %27221 = vmatprep.mubr.msk.f32.mxu1 %vm4877_vm6, %v33673_v21  ;;  %28203 = vmatpush3.bf16.msra.mxu1 %v28200_v0  ;;  %v17514_v21 = vld [vmem:[#allocation4 + $0x198] sm:$0xff] }
0x1028   : > { %28205 = vmatprep.subr.bf16.mxu1 %v28204_v1  ;;  %v17895_v0 = vld [vmem:[#allocation4 + $0xf9] sm:$0xff] }
0x102a   : > { %27222 = vmatmul.mubr.msk.f32.gmra.mrb[64].mxu1 %vm4877_vm6, %v33679_v22  ;;  %v17515_v22 = vld [vmem:[#allocation4 + $0x1a0] sm:$0xff] }
0x102b   : > { %27224 = vmatprep.mubr.msk.f32.mxu1 %vm4877_vm6, %v33683_v23  ;;  %28207 = vmatpush3.bf16.msra.mxu1 %v28204_v1  ;;  %v22700_v23 = vld [vmem:[%s29699_s29 + $0x210] sm:$0xff]  ;;  %v17899_v1 = vld [vmem:[#allocation4 + $0x129] sm:$0xff] }
0x102c   : > { %28209 = vmatprep.subr.bf16.mxu1 %v28208_v47 }
0x102e   : > { %27225 = vmatmul.mubr.msk.f32.gmra.mrb[66].mxu1 %vm4877_vm6, %v33688_v40  ;;  %v22701_v40 = vld [vmem:[%s29699_s29 + $0x218] sm:$0xff] }
0x102f   : > { %27227 = vmatprep.mubr.msk.f32.mxu1 %vm4877_vm6, %v33692_v19  ;;  %28211 = vmatpush3.bf16.msra.mxu1 %v28208_v47  ;;  %v17878_v19 = vld [vmem:[#allocation4 + $0x31] sm:$0xff]  ;;  %v17900_v47 = vld [vmem:[#allocation4 + $0x139] sm:$0xff] }
0x1030   : > { %28213 = vmatprep.subr.bf16.mxu1 %v28212_v37 }
0x1032   : > { %27228 = vmatmul.mubr.msk.f32.gmra.mrb[68].mxu1 %vm4877_vm6, %v33696_v58  ;;  %v18666_v58 = vld [vmem:[%s35534_s16] sm:$0xf] }
0x1033   : > { %27230 = vmatprep.mubr.msk.f32.mxu1 %vm4877_vm6, %v33700_v45  ;;  %28215 = vmatpush3.bf16.msra.mxu1 %v28212_v37  ;;  %v28220_v45 = vpack.c.bf16 %v22701_v40, %v22700_v23  ;;  %v17901_v37 = vld [vmem:[#allocation4 + $0x141] sm:$0xff] }
0x1034   : > { %28217 = vmatprep.subr.bf16.mxu1 %v28216_v52  ;;  %27394 = vmatprep.subr.msk.mxu0 %vm1560_vm4, %v18666_v58  ;;  %v17909_v23 = vld [vmem:[#allocation4 + $0x1a1] sm:$0xff] }
0x1035   : > { %27395 = vmatpush3.msk.msra.mxu0 %vm1560_vm4, %v18666_v58 }
0x1036   : > { %27231 = vmatmul.mubr.msk.f32.gmra.mrb[70].mxu1 %vm4877_vm6, %v33704_v32  ;;  %v17879_v32 = vld [vmem:[#allocation4 + $0x39] sm:$0xff] }
0x1037   : > { %27233 = vmatprep.mubr.msk.f32.mxu1 %vm4877_vm6, %v33708_v20  ;;  %v22702_v20 = vld [vmem:[%s29699_s29 + $0x220] sm:$0xff] }
0x103a   : > { %27234 = vmatmul.mubr.msk.f32.gmra.mrb[72].mxu1 %vm4877_vm6, %v33712_v42  ;;  %v22703_v42 = vld [vmem:[%s29699_s29 + $0x228] sm:$0xff] }
0x103b   : > { %27236 = vmatprep.mubr.msk.f32.mxu1 %vm4877_vm6, %v33716_v25  ;;  %v17880_v25 = vld [vmem:[#allocation4 + $0x49] sm:$0xff] }
0x103e   : > { %27237 = vmatmul.mubr.msk.f32.gmra.mrb[74].mxu1 %vm4877_vm6, %v33720_v34  ;;  %v28224_v34 = vpack.c.bf16 %v22703_v42, %v22702_v20 }
0x103f   : > { %27239 = vmatprep.mubr.msk.f32.mxu1 %vm4877_vm6, %v33724_v50  ;;  %v17881_v50 = vld [vmem:[#allocation4 + $0x51] sm:$0xff] }
0x1042   : > { %27240 = vmatmul.mubr.msk.f32.gmra.mrb[76].mxu1 %vm4877_vm6, %v33728_v3  ;;  %v22704_v3 = vld [vmem:[%s29699_s29 + $0x230] sm:$0xff] }
0x1043   : > { %27242 = vmatprep.mubr.msk.f32.mxu1 %vm4877_vm6, %v33732_v9  ;;  %v22705_v9 = vld [vmem:[%s29699_s29 + $0x238] sm:$0xff] }
0x1046   : > { %27243 = vmatmul.mubr.msk.f32.gmra.mrb[78].mxu1 %vm4877_vm6, %v33736_v27  ;;  %v17882_v27 = vld [vmem:[#allocation4 + $0x61] sm:$0xff] }
0x1047   : > { %27245 = vmatprep.mubr.msk.f32.mxu1 %vm4877_vm6, %v33740_v14  ;;  %v28228_v14 = vpack.c.bf16 %v22705_v9, %v22704_v3 }
0x104a   : > { %27246 = vmatmul.mubr.msk.f32.gmra.mrb[80].mxu1 %vm4877_vm6, %v33744_v41  ;;  %v17883_v41 = vld [vmem:[#allocation4 + $0x69] sm:$0xff] }
0x104b   : > { %27248 = vmatprep.mubr.msk.f32.mxu1 %vm4877_vm6, %v33748_v63  ;;  %v17884_v63 = vld [vmem:[#allocation4 + $0x79] sm:$0xff] }
0x104e   : > { %27249 = vmatmul.mubr.msk.f32.gmra.mrb[82].mxu1 %vm4877_vm6, %v33752_v36  ;;  %v17885_v36 = vld [vmem:[#allocation4 + $0x81] sm:$0xff] }
0x104f   : > { %27251 = vmatprep.mubr.msk.f32.mxu1 %vm4877_vm6, %v33756_v33  ;;  %v17886_v33 = vld [vmem:[#allocation4 + $0x91] sm:$0xff] }
0x1052   : > { %27252 = vmatmul.mubr.msk.f32.gmra.mrb[84].mxu1 %vm4877_vm6, %v33760_v26  ;;  %v17887_v26 = vld [vmem:[#allocation4 + $0x99] sm:$0xff] }
0x1053   : > { %27254 = vmatprep.mubr.msk.f32.mxu1 %vm4877_vm6, %v33764_v16  ;;  %v17888_v16 = vld [vmem:[#allocation4 + $0xa9] sm:$0xff] }
0x1056   : > { %27255 = vmatmul.mubr.msk.f32.gmra.mrb[86].mxu1 %vm4877_vm6, %v33768_v51  ;;  %v17889_v51 = vld [vmem:[#allocation4 + $0xb1] sm:$0xff] }
0x1057   : > { %27257 = vmatprep.mubr.msk.f32.mxu1 %vm4877_vm6, %v33772_v4  ;;  %v17890_v4 = vld [vmem:[#allocation4 + $0xc1] sm:$0xff] }
0x105a   : > { %27258 = vmatmul.mubr.msk.f32.gmra.mrb[88].mxu1 %vm4877_vm6, %v33776_v15  ;;  %v17891_v15 = vld [vmem:[#allocation4 + $0xc9] sm:$0xff] }
0x105b   : > { %27260 = vmatprep.mubr.msk.f32.mxu1 %vm4877_vm6, %v33979_v49  ;;  %v17893_v49 = vld [vmem:[#allocation4 + $0xe1] sm:$0xff] }
0x105e   : > { %27261 = vmatmul.mubr.msk.f32.gmra.mrb[90].mxu1 %vm4877_vm6, %v33983_v18  ;;  %v17894_v18 = vld [vmem:[#allocation4 + $0xf1] sm:$0xff] }
0x105f   : > { %27263 = vmatprep.mubr.msk.f32.mxu1 %vm4877_vm6, %v17514_v21  ;;  %v17905_v21 = vld [vmem:[#allocation4 + $0x171] sm:$0xff] }
0x1062   : > { %27264 = vmatmul.mubr.msk.f32.gmra.mrb[92].mxu1 %vm4877_vm6, %v17515_v22  ;;  %v17908_v22 = vld [vmem:[#allocation4 + $0x199] sm:$0xff] }
0x1063   : > { %27282 = vmatprep.mubr.msk.f32.mxu1 %vm4877_vm6, %v17878_v19 }
0x1066   : > { %27283 = vmatmul.mubr.msk.f32.vlgmr.msra.gmra.mrb[62].mxu1 %vm4877_vm6, %v17879_v32 }
0x1067   : > { %27285 = vmatprep.mubr.msk.f32.mxu1 %vm4877_vm6, %v17880_v25  ;;  %28219 = vmatpush3.bf16.msra.mxu1 %v28216_v52  ;;  %v17904_v52 = vld [vmem:[#allocation4 + $0x169] sm:$0xff] }
0x1068   : > { %28221 = vmatprep.subr.bf16.mxu1 %v28220_v45 }
0x106a   : > { %27286 = vmatmul.mubr.msk.f32.gmra.mrb[64].mxu1 %vm4877_vm6, %v17881_v50 }
0x106b   : > { %27288 = vmatprep.mubr.msk.f32.mxu1 %vm4877_vm6, %v17882_v27  ;;  %28223 = vmatpush3.bf16.msra.mxu1 %v28220_v45 }
0x106c   : > { %28225 = vmatprep.subr.bf16.mxu1 %v28224_v34 }
0x106e   : > { %27289 = vmatmul.mubr.msk.f32.gmra.mrb[66].mxu1 %vm4877_vm6, %v17883_v41 }
0x106f   : > { %27291 = vmatprep.mubr.msk.f32.mxu1 %vm4877_vm6, %v17884_v63  ;;  %28227 = vmatpush3.bf16.msra.mxu1 %v28224_v34 }
0x1070   : > { %28229 = vmatprep.subr.bf16.mxu1 %v28228_v14 }
0x1072   : > { %27292 = vmatmul.mubr.msk.f32.gmra.mrb[68].mxu1 %vm4877_vm6, %v17885_v36 }
0x1073   : > { %27294 = vmatprep.mubr.msk.f32.mxu1 %vm4877_vm6, %v17886_v33  ;;  %28231 = vmatpush3.bf16.msra.mxu1 %v28228_v14 }
0x1076   : > { %27295 = vmatmul.mubr.msk.f32.gmra.mrb[70].mxu1 %vm4877_vm6, %v17887_v26 }
0x1077   : > { %27297 = vmatprep.mubr.msk.f32.mxu1 %vm4877_vm6, %v17888_v16 }
0x107a   : > { %27298 = vmatmul.mubr.msk.f32.gmra.mrb[72].mxu1 %vm4877_vm6, %v17889_v51 }
0x107b   : > { %27300 = vmatprep.mubr.msk.f32.mxu1 %vm4877_vm6, %v17890_v4 }
0x107e   : > { %27301 = vmatmul.mubr.msk.f32.gmra.mrb[74].mxu1 %vm4877_vm6, %v17891_v15 }
0x107f   : > { %27303 = vmatprep.mubr.msk.f32.mxu1 %vm4877_vm6, %v17892_v59 }
0x1082   : > { %27304 = vmatmul.mubr.msk.f32.gmra.mrb[76].mxu1 %vm4877_vm6, %v17893_v49 }
0x1083   : > { %27306 = vmatprep.mubr.msk.f32.mxu1 %vm4877_vm6, %v17894_v18  ;;  %v18673_v18 = vld [vmem:[%s29709_s1 + $0x30] sm:$0xff] }
0x1086   : > { %27307 = vmatmul.mubr.msk.f32.gmra.mrb[78].mxu1 %vm4877_vm6, %v17895_v0  ;;  %v18674_v0 = vld [vmem:[%s29709_s1 + $0x38] sm:$0xff] }
0x1087   : > { %27309 = vmatprep.mubr.msk.f32.mxu1 %vm4877_vm6, %v17896_v44  ;;  %v28244_v44 = vpack.c.bf16 %v18674_v0, %v18673_v18 }
0x108a   : > { %27310 = vmatmul.mubr.msk.f32.gmra.mrb[80].mxu1 %vm4877_vm6, %v17897_v38  ;;  %v19416_v38 = vld [vmem:[%s35542_s22] sm:$0x1] }
0x108b   : > { %27312 = vmatprep.mubr.msk.f32.mxu1 %vm4877_vm6, %v17898_v7  ;;  %27508 = vmatprep.subr.msk.mxu0 %vm19522_vm7, %v19416_v38 }
0x108e   : > { %27313 = vmatmul.mubr.msk.f32.gmra.mrb[82].mxu1 %vm4877_vm6, %v17899_v1 }
0x108f   : > { %27315 = vmatprep.mubr.msk.f32.mxu1 %vm4877_vm6, %v17900_v47 }
0x1092   : > { %27316 = vmatmul.mubr.msk.f32.gmra.mrb[84].mxu1 %vm4877_vm6, %v17901_v37 }
0x1093   : > { %27318 = vmatprep.mubr.msk.f32.mxu1 %vm4877_vm6, %v17902_v29 }
0x1096   : > { %27319 = vmatmul.mubr.msk.f32.gmra.mrb[86].mxu1 %vm4877_vm6, %v17903_v2 }
0x1097   : > { %27321 = vmatprep.mubr.msk.f32.mxu1 %vm4877_vm6, %v17904_v52 }
0x109a   : > { %27322 = vmatmul.mubr.msk.f32.gmra.mrb[88].mxu1 %vm4877_vm6, %v17905_v21 }
0x109b   : > { %27324 = vmatprep.mubr.msk.f32.mxu1 %vm4877_vm6, %v34055_v13  ;;  %v35537_v13 = vld [vmem:[#allocation42_spill] sm:$0xff] }
0x109e   : > { %27325 = vmatmul.mubr.msk.f32.gmra.mrb[90].mxu1 %vm4877_vm6, %v34059_v56  ;;  %v35538_v56 = vld [vmem:[#allocation41_spill] sm:$0xff] }
0x109f   : > { %27327 = vmatprep.mubr.msk.f32.mxu1 %vm4877_vm6, %v17908_v22 }
0x10a2   : > { %27328 = vmatmul.mubr.msk.f32.gmra.mrb[92].mxu1 %vm4877_vm6, %v17909_v23 }
0x10a3   : > { %27346 = vmatprep.mubr.msk.f32.mxu1 %vm4877_vm6, %v33797_v54  ;;  %v35535_v54 = vld [vmem:[#allocation40_spill] sm:$0xff] }
0x10a6   : > { %27347 = vmatmul.mubr.msk.f32.vlgmr.msra.gmra.mrb[62].mxu1 %vm4877_vm6, %v33801_v46  ;;  %v35536_v46 = vld [vmem:[#allocation39_spill] sm:$0xff] }
0x10a7   : > { %27349 = vmatprep.mubr.msk.f32.mxu1 %vm4877_vm6, %v35508_v48  ;;  %v35539_v48 = vld [vmem:[#allocation44_spill] sm:$0xff] }
0x10aa   : > { %27350 = vmatmul.mubr.msk.f32.gmra.mrb[64].mxu1 %vm4877_vm6, %v35509_v31  ;;  %v35540_v31 = vld [vmem:[#allocation43_spill] sm:$0xff] }
0x10ab   : > { %27352 = vmatprep.mubr.msk.f32.mxu1 %vm4877_vm6, %v35510_v30  ;;  %v35541_v30 = vld [vmem:[#allocation50_spill] sm:$0xff] }
0x10ae   : > { %27353 = vmatmul.mubr.msk.f32.gmra.mrb[66].mxu1 %vm4877_vm6, %v35511_v10  ;;  %v18302_v10 = vld [vmem:[#allocation4 + $0x19a] sm:$0xff] }
0x10af   : > { %27355 = vmatprep.mubr.msk.f32.mxu1 %vm4877_vm6, %v35512_v53  ;;  %v18303_v53 = vld [vmem:[#allocation4 + $0x1a2] sm:$0xff] }
0x10b2   : > { %27356 = vmatmul.mubr.msk.f32.gmra.mrb[68].mxu1 %vm4877_vm6, %v35513_v62  ;;  %v18667_v62 = vld [vmem:[%s29709_s1] sm:$0xff] }
0x10b3   : > { %27358 = vmatprep.mubr.msk.f32.mxu1 %vm4877_vm6, %v35514_v12  ;;  %v18668_v12 = vld [vmem:[%s29709_s1 + $0x8] sm:$0xff] }
0x10b6   : > { %27359 = vmatmul.mubr.msk.f32.gmra.mrb[70].mxu1 %vm4877_vm6, %v35515_v24  ;;  %v18669_v24 = vld [vmem:[%s29709_s1 + $0x10] sm:$0xff] }
0x10b7   : > { %27361 = vmatprep.mubr.msk.f32.mxu1 %vm4877_vm6, %v35516_v39  ;;  %v28232_v39 = vpack.c.bf16 %v18668_v12, %v18667_v62 }
0x10b9   : > { %28233 = vmatprep.subr.bf16.mxu1 %v28232_v39 }
0x10ba   : > { %27362 = vmatmul.mubr.msk.f32.gmra.mrb[72].mxu1 %vm4877_vm6, %v35517_v28  ;;  %v18670_v28 = vld [vmem:[%s29709_s1 + $0x18] sm:$0xff] }
0x10bb   : > { %27364 = vmatprep.mubr.msk.f32.mxu1 %vm4877_vm6, %v35518_v35  ;;  %v28236_v35 = vpack.c.bf16 %v18670_v28, %v18669_v24  ;;  %28235 = vmatpush3.bf16.msra.mxu1 %v28232_v39 }
0x10bd   : > { %28237 = vmatprep.subr.bf16.mxu1 %v28236_v35 }
0x10be   : > { %27365 = vmatmul.mubr.msk.f32.gmra.mrb[74].mxu1 %vm4877_vm6, %v35519_v61  ;;  %v18671_v61 = vld [vmem:[%s29709_s1 + $0x20] sm:$0xff] }
0x10bf   : > { %27367 = vmatprep.mubr.msk.f32.mxu1 %vm4877_vm6, %v35520_v8  ;;  %v18672_v8 = vld [vmem:[%s29709_s1 + $0x28] sm:$0xff]  ;;  %28239 = vmatpush3.bf16.msra.mxu1 %v28236_v35  ;;  %s35544_s1 = sld [smem:[#allocation7_spill]] }
0x10c2   : > { %27368 = vmatmul.mubr.msk.f32.gmra.mrb[76].mxu1 %vm4877_vm6, %v35521_v5  ;;  %v28240_v5 = vpack.c.bf16 %v18672_v8, %v18671_v61 }
0x10c3   : > { %27370 = vmatprep.mubr.msk.f32.mxu1 %vm4877_vm6, %v35522_v17 }
0x10c4   : > { %28241 = vmatprep.subr.bf16.mxu1 %v28240_v5 }
0x10c5   : > { %28243 = vmatpush3.bf16.msra.mxu1 %v28240_v5  ;;  %p22933_p8 = scmp.ne.s32.totalorder %s35544_s1, 7 }
0x10c6   : > { %27371 = vmatmul.mubr.msk.f32.gmra.mrb[78].mxu1 %vm4877_vm6, %v35523_v60  ;;  %28245 = vmatprep.subr.bf16.mxu1 %v28244_v44 }
0x10c7   : > { %27373 = vmatprep.mubr.msk.f32.mxu1 %vm4877_vm6, %v35524_v11 }
0x10c9   : > { %28247 = vmatpush3.bf16.msra.mxu1 %v28244_v44 }
0x10ca   : > { %27374 = vmatmul.mubr.msk.f32.gmra.mrb[80].mxu1 %vm4877_vm6, %v35525_v57 }
0x10cb   : > { %27376 = vmatprep.mubr.msk.f32.mxu1 %vm4877_vm6, %v35526_v55 }
0x10ce   : > { %27377 = vmatmul.mubr.msk.f32.gmra.mrb[82].mxu1 %vm4877_vm6, %v35527_v6 }
0x10cf   : > { %27379 = vmatprep.mubr.msk.f32.mxu1 %vm4877_vm6, %v35535_v54 }
0x10d2   : > { %27380 = vmatmul.mubr.msk.f32.gmra.mrb[84].mxu1 %vm4877_vm6, %v35536_v46 }
0x10d3   : > { %27382 = vmatprep.mubr.msk.f32.mxu1 %vm4877_vm6, %v35537_v13 }
0x10d6   : > { %27383 = vmatmul.mubr.msk.f32.gmra.mrb[86].mxu1 %vm4877_vm6, %v35538_v56 }
0x10d7   : > { %27385 = vmatprep.mubr.msk.f32.mxu1 %vm4877_vm6, %v35539_v48 }
0x10da   : > { %27386 = vmatmul.mubr.msk.f32.gmra.mrb[88].mxu1 %vm4877_vm6, %v35540_v31 }
0x10db   : > { %27388 = vmatprep.mubr.msk.f32.mxu1 %vm4877_vm6, %v35541_v30 }
0x10de   : > { %27389 = vmatmul.mubr.msk.f32.gmra.mrb[90].mxu1 %vm4877_vm6, %v34135_v43 }
0x10df   : > { %27391 = vmatprep.mubr.msk.f32.mxu1 %vm4877_vm6, %v18302_v10 }
0x10e2   : > { %27392 = vmatmul.mubr.msk.f32.gmra.mrb[92].mxu1 %vm4877_vm6, %v18303_v53 }
0x1179   : > { %v34320_v17 = vpop.f32.mrb[62].mxu1 }
0x117a   : > { %v34322_v60 = vpop.f32.mrb[63].mxu1 }
0x117b   : > { %27396 = vmatprep.mubr.msk.f32.mxu0 %vm1364_vm5, %v34322_v60 }
0x117c   : > { %27397 = vmatmul.mubr.msk.f32.vlgmr.msra.gmra.mrb[98].mxu0 %vm1364_vm5, %v34320_v17 }
0x117d   : > { %v34328_v11 = vpop.f32.mrb[64].mxu1  ;;  %27509 = vmatpush3.msk.msra.mxu0 %vm19522_vm7, %v19416_v38 }
0x117e   : > { %v34330_v57 = vpop.f32.mrb[65].mxu1 }
0x117f   : > { %27399 = vmatprep.mubr.msk.f32.mxu0 %vm1364_vm5, %v34330_v57 }
0x1180   : > { %27400 = vmatmul.mubr.msk.f32.gmra.mrb[100].mxu0 %vm1364_vm5, %v34328_v11 }
0x1181   : > { %v34336_v55 = vpop.f32.mrb[66].mxu1 }
0x1182   : > { %v34338_v6 = vpop.f32.mrb[67].mxu1 }
0x1183   : > { %27402 = vmatprep.mubr.msk.f32.mxu0 %vm1364_vm5, %v34338_v6 }
0x1184   : > { %27403 = vmatmul.mubr.msk.f32.gmra.mrb[102].mxu0 %vm1364_vm5, %v34336_v55 }
0x1185   : > { %v34344_v43 = vpop.f32.mrb[68].mxu1 }
0x1186   : > { %v34346_v40 = vpop.f32.mrb[69].mxu1 }
0x1187   : > { %27405 = vmatprep.mubr.msk.f32.mxu0 %vm1364_vm5, %v34346_v40 }
0x1188   : > { %27406 = vmatmul.mubr.msk.f32.gmra.mrb[104].mxu0 %vm1364_vm5, %v34344_v43 }
0x1189   : > { %v34352_v19 = vpop.f32.mrb[70].mxu1 }
0x118a   : > { %v34354_v58 = vpop.f32.mrb[71].mxu1 }
0x118b   : > { %27408 = vmatprep.mubr.msk.f32.mxu0 %vm1364_vm5, %v34354_v58 }
0x118c   : > { %27409 = vmatmul.mubr.msk.f32.gmra.mrb[106].mxu0 %vm1364_vm5, %v34352_v19 }
0x118d   : > { %v34360_v45 = vpop.f32.mrb[72].mxu1 }
0x118e   : > { %v34362_v32 = vpop.f32.mrb[73].mxu1 }
0x118f   : > { %27411 = vmatprep.mubr.msk.f32.mxu0 %vm1364_vm5, %v34362_v32 }
0x1190   : > { %27412 = vmatmul.mubr.msk.f32.gmra.mrb[108].mxu0 %vm1364_vm5, %v34360_v45 }
0x1191   : > { %v34368_v20 = vpop.f32.mrb[74].mxu1 }
0x1192   : > { %v34370_v42 = vpop.f32.mrb[75].mxu1 }
0x1193   : > { %27414 = vmatprep.mubr.msk.f32.mxu0 %vm1364_vm5, %v34370_v42 }
0x1194   : > { %27415 = vmatmul.mubr.msk.f32.gmra.mrb[110].mxu0 %vm1364_vm5, %v34368_v20 }
0x1195   : > { %v34376_v25 = vpop.f32.mrb[76].mxu1 }
0x1196   : > { %v34378_v34 = vpop.f32.mrb[77].mxu1 }
0x1197   : > { %27417 = vmatprep.mubr.msk.f32.mxu0 %vm1364_vm5, %v34378_v34 }
0x1198   : > { %27418 = vmatmul.mubr.msk.f32.gmra.mrb[112].mxu0 %vm1364_vm5, %v34376_v25 }
0x1199   : > { %v34384_v50 = vpop.f32.mrb[78].mxu1 }
0x119a   : > { %v34386_v3 = vpop.f32.mrb[79].mxu1 }
0x119b   : > { %27420 = vmatprep.mubr.msk.f32.mxu0 %vm1364_vm5, %v34386_v3 }
0x119c   : > { %27421 = vmatmul.mubr.msk.f32.gmra.mrb[114].mxu0 %vm1364_vm5, %v34384_v50 }
0x119d   : > { %v34392_v9 = vpop.f32.mrb[80].mxu1 }
0x119e   : > { %v34394_v27 = vpop.f32.mrb[81].mxu1 }
0x119f   : > { %27423 = vmatprep.mubr.msk.f32.mxu0 %vm1364_vm5, %v34394_v27 }
0x11a0   : > { %27424 = vmatmul.mubr.msk.f32.gmra.mrb[116].mxu0 %vm1364_vm5, %v34392_v9 }
0x11a1   : > { %v34400_v14 = vpop.f32.mrb[82].mxu1 }
0x11a2   : > { %v34402_v41 = vpop.f32.mrb[83].mxu1 }
0x11a3   : > { %27426 = vmatprep.mubr.msk.f32.mxu0 %vm1364_vm5, %v34402_v41 }
0x11a4   : > { %27427 = vmatmul.mubr.msk.f32.gmra.mrb[118].mxu0 %vm1364_vm5, %v34400_v14 }
0x11a5   : > { %v34408_v63 = vpop.f32.mrb[84].mxu1 }
0x11a6   : > { %v34410_v36 = vpop.f32.mrb[85].mxu1 }
0x11a7   : > { %27429 = vmatprep.mubr.msk.f32.mxu0 %vm1364_vm5, %v34410_v36 }
0x11a8   : > { %27430 = vmatmul.mubr.msk.f32.gmra.mrb[120].mxu0 %vm1364_vm5, %v34408_v63 }
0x11a9   : > { %v34416_v33 = vpop.f32.mrb[86].mxu1 }
0x11aa   : > { %v34418_v26 = vpop.f32.mrb[87].mxu1 }
0x11ab   : > { %27432 = vmatprep.mubr.msk.f32.mxu0 %vm1364_vm5, %v34418_v26 }
0x11ac   : > { %27433 = vmatmul.mubr.msk.f32.gmra.mrb[122].mxu0 %vm1364_vm5, %v34416_v33 }
0x11ad   : > { %v34424_v16 = vpop.f32.mrb[88].mxu1 }
0x11ae   : > { %v34426_v51 = vpop.f32.mrb[89].mxu1 }
0x11af   : > { %27435 = vmatprep.mubr.msk.f32.mxu0 %vm1364_vm5, %v34426_v51 }
0x11b0   : > { %27436 = vmatmul.mubr.msk.f32.gmra.mrb[124].mxu0 %vm1364_vm5, %v34424_v16 }
0x11b1   : > { %v34432_v4 = vpop.f32.mrb[90].mxu1 }
0x11b2   : > { %v34434_v15 = vpop.f32.mrb[91].mxu1 }
0x11b3   : > { %27438 = vmatprep.mubr.msk.f32.mxu0 %vm1364_vm5, %v34434_v15 }
0x11b4   : > { %27439 = vmatmul.mubr.msk.f32.gmra.mrb[126].mxu0 %vm1364_vm5, %v34432_v4 }
0x11b5   : > { %v34440_v59 = vpop.f32.mrb[92].mxu1 }
0x11b6   : > { %v34442_v49 = vpop.f32.mrb[93].mxu1 }
0x11b7   : > { %27441 = vmatprep.mubr.msk.f32.mxu0 %vm1364_vm5, %v34442_v49 }
0x11b8   : > { %27442 = vmatmul.mubr.msk.f32.gmra.mrb[128].mxu0 %vm1364_vm5, %v34440_v59 }
0x124f   : > { %v27398_v7 = vpop.f32.mrb[98].mxu0 }
0x1250   : > { %v18840_v1 = vpop.f32.mrb[99].mxu0  ;;  %v19000_v37 = vmax.f32 %v27398_v7, 0.0 }
0x1251   : > { %v18999_v47 = vmax.f32 %v18840_v1, 0.0 }
0x1253   : > { %v27401_v29 = vpop.f32.mrb[100].mxu0  ;;  %27460 = vmatprep.mubr.msk.f32.mxu1 %vm4877_vm6, %v18999_v47 }
0x1254   : > { %v18850_v2 = vpop.f32.mrb[101].mxu0  ;;  %27461 = vmatmul.mubr.msk.f32.vlgmr.msra.gmra.mrb[94].mxu1 %vm4877_vm6, %v19000_v37  ;;  %v19002_v21 = vmax.f32 %v27401_v29, 0.0 }
0x1255   : > { %v19001_v52 = vmax.f32 %v18850_v2, 0.0 }
0x1257   : > { %v27404_v22 = vpop.f32.mrb[102].mxu0  ;;  %27463 = vmatprep.mubr.msk.f32.mxu1 %vm4877_vm6, %v19001_v52 }
0x1258   : > { %v18860_v23 = vpop.f32.mrb[103].mxu0  ;;  %27464 = vmatmul.mubr.msk.f32.gmra.mrb[96].mxu1 %vm4877_vm6, %v19002_v21  ;;  %v19004_v46 = vmax.f32 %v27404_v22, 0.0 }
0x1259   : > { %v19003_v54 = vmax.f32 %v18860_v23, 0.0 }
0x125b   : > { %v27407_v13 = vpop.f32.mrb[104].mxu0  ;;  %27466 = vmatprep.mubr.msk.f32.mxu1 %vm4877_vm6, %v19003_v54 }
0x125c   : > { %v18870_v56 = vpop.f32.mrb[105].mxu0  ;;  %27467 = vmatmul.mubr.msk.f32.gmra.mrb[98].mxu1 %vm4877_vm6, %v19004_v46  ;;  %v19006_v31 = vmax.f32 %v27407_v13, 0.0 }
0x125d   : > { %v19005_v48 = vmax.f32 %v18870_v56, 0.0 }
0x125f   : > { %v27410_v30 = vpop.f32.mrb[106].mxu0  ;;  %27469 = vmatprep.mubr.msk.f32.mxu1 %vm4877_vm6, %v19005_v48 }
0x1260   : > { %v18880_v10 = vpop.f32.mrb[107].mxu0  ;;  %27470 = vmatmul.mubr.msk.f32.gmra.mrb[100].mxu1 %vm4877_vm6, %v19006_v31  ;;  %v19008_v62 = vmax.f32 %v27410_v30, 0.0 }
0x1261   : > { %v19007_v53 = vmax.f32 %v18880_v10, 0.0 }
0x1263   : > { %v27413_v12 = vpop.f32.mrb[108].mxu0  ;;  %27472 = vmatprep.mubr.msk.f32.mxu1 %vm4877_vm6, %v19007_v53 }
0x1264   : > { %v18890_v24 = vpop.f32.mrb[109].mxu0  ;;  %27473 = vmatmul.mubr.msk.f32.gmra.mrb[102].mxu1 %vm4877_vm6, %v19008_v62  ;;  %v19010_v28 = vmax.f32 %v27413_v12, 0.0 }
0x1265   : > { %v19009_v39 = vmax.f32 %v18890_v24, 0.0 }
0x1267   : > { %v27416_v35 = vpop.f32.mrb[110].mxu0  ;;  %27475 = vmatprep.mubr.msk.f32.mxu1 %vm4877_vm6, %v19009_v39 }
0x1268   : > { %v18900_v61 = vpop.f32.mrb[111].mxu0  ;;  %27476 = vmatmul.mubr.msk.f32.gmra.mrb[104].mxu1 %vm4877_vm6, %v19010_v28  ;;  %v19012_v5 = vmax.f32 %v27416_v35, 0.0 }
0x1269   : > { %v19011_v8 = vmax.f32 %v18900_v61, 0.0 }
0x126b   : > { %v27419_v18 = vpop.f32.mrb[112].mxu0  ;;  %27478 = vmatprep.mubr.msk.f32.mxu1 %vm4877_vm6, %v19011_v8 }
0x126c   : > { %v18910_v0 = vpop.f32.mrb[113].mxu0  ;;  %27479 = vmatmul.mubr.msk.f32.gmra.mrb[106].mxu1 %vm4877_vm6, %v19012_v5  ;;  %v19014_v38 = vmax.f32 %v27419_v18, 0.0 }
0x126d   : > { %v19013_v44 = vmax.f32 %v18910_v0, 0.0 }
0x126f   : > { %v27422_v7 = vpop.f32.mrb[114].mxu0  ;;  %27481 = vmatprep.mubr.msk.f32.mxu1 %vm4877_vm6, %v19013_v44 }
0x1270   : > { %v18920_v1 = vpop.f32.mrb[115].mxu0  ;;  %27482 = vmatmul.mubr.msk.f32.gmra.mrb[108].mxu1 %vm4877_vm6, %v19014_v38  ;;  %v19016_v37 = vmax.f32 %v27422_v7, 0.0  ;;  %v19417_v7 = vld [vmem:[%s29714_s10] sm:$0xff] }
0x1271   : > { %v19015_v47 = vmax.f32 %v18920_v1, 0.0  ;;  %v19418_v1 = vld [vmem:[%s29714_s10 + $0x8] sm:$0xff] }
0x1273   : > { %v27425_v29 = vpop.f32.mrb[116].mxu0  ;;  %27484 = vmatprep.mubr.msk.f32.mxu1 %vm4877_vm6, %v19015_v47  ;;  %v19419_v47 = vld [vmem:[%s29714_s10 + $0x10] sm:$0xff] }
0x1274   : > { %v18930_v2 = vpop.f32.mrb[117].mxu0  ;;  %27485 = vmatmul.mubr.msk.f32.gmra.mrb[110].mxu1 %vm4877_vm6, %v19016_v37  ;;  %v19018_v21 = vmax.f32 %v27425_v29, 0.0  ;;  %v28248_v37 = vpack.c.bf16 %v19418_v1, %v19417_v7  ;;  %v19420_v29 = vld [vmem:[%s29714_s10 + $0x18] sm:$0xff]  ;;  %v19360_v1 = vld [vmem:[%s35543_s28 + $0x40] sm:$0xff] }
0x1275   : > { %v19017_v52 = vmax.f32 %v18930_v2, 0.0  ;;  %v28252_v2 = vpack.c.bf16 %v19420_v29, %v19419_v47 }
0x1276   : > { %28249 = vmatprep.subr.bf16.mxu1 %v28248_v37 }
0x1277   : > { %v27428_v22 = vpop.f32.mrb[118].mxu0  ;;  %27487 = vmatprep.mubr.msk.f32.mxu1 %vm4877_vm6, %v19017_v52  ;;  %v19421_v52 = vld [vmem:[%s29714_s10 + $0x20] sm:$0xff]  ;;  %28251 = vmatpush3.bf16.msra.mxu1 %v28248_v37  ;;  %v19361_v37 = vld [vmem:[%s35543_s28 + $0x48] sm:$0xff] }
0x1278   : > { %v18940_v23 = vpop.f32.mrb[119].mxu0  ;;  %27488 = vmatmul.mubr.msk.f32.gmra.mrb[112].mxu1 %vm4877_vm6, %v19018_v21  ;;  %v19020_v46 = vmax.f32 %v27428_v22, 0.0  ;;  %v19422_v21 = vld [vmem:[%s29714_s10 + $0x28] sm:$0xff]  ;;  %28253 = vmatprep.subr.bf16.mxu1 %v28252_v2 }
0x1279   : > { %v19019_v54 = vmax.f32 %v18940_v23, 0.0  ;;  %v28256_v22 = vpack.c.bf16 %v19422_v21, %v19421_v52  ;;  %v19352_v23 = vld [vmem:[%s35543_s28] sm:$0xff]  ;;  %v19362_v21 = vld [vmem:[%s35543_s28 + $0x50] sm:$0xff] }
0x127b   : > { %v27431_v13 = vpop.f32.mrb[120].mxu0  ;;  %27490 = vmatprep.mubr.msk.f32.mxu1 %vm4877_vm6, %v19019_v54  ;;  %28255 = vmatpush3.bf16.msra.mxu1 %v28252_v2 }
0x127c   : > { %v18950_v56 = vpop.f32.mrb[121].mxu0  ;;  %27491 = vmatmul.mubr.msk.f32.gmra.mrb[114].mxu1 %vm4877_vm6, %v19020_v46  ;;  %v19022_v31 = vmax.f32 %v27431_v13, 0.0  ;;  %28257 = vmatprep.subr.bf16.mxu1 %v28256_v22  ;;  %v19353_v46 = vld [vmem:[%s35543_s28 + $0x8] sm:$0xff] }
0x127d   : > { %v19021_v48 = vmax.f32 %v18950_v56, 0.0 }
0x127f   : > { %v27434_v30 = vpop.f32.mrb[122].mxu0  ;;  %27493 = vmatprep.mubr.msk.f32.mxu1 %vm4877_vm6, %v19021_v48  ;;  %28259 = vmatpush3.bf16.msra.mxu1 %v28256_v22 }
0x1280   : > { %v18960_v10 = vpop.f32.mrb[123].mxu0  ;;  %27494 = vmatmul.mubr.msk.f32.gmra.mrb[116].mxu1 %vm4877_vm6, %v19022_v31  ;;  %v19024_v62 = vmax.f32 %v27434_v30, 0.0  ;;  %v19354_v31 = vld [vmem:[%s35543_s28 + $0x10] sm:$0xff] }
0x1281   : > { %v19023_v53 = vmax.f32 %v18960_v10, 0.0  ;;  %v19355_v10 = vld [vmem:[%s35543_s28 + $0x18] sm:$0xff] }
0x1283   : > { %v27437_v12 = vpop.f32.mrb[124].mxu0  ;;  %27496 = vmatprep.mubr.msk.f32.mxu1 %vm4877_vm6, %v19023_v53 }
0x1284   : > { %v18970_v24 = vpop.f32.mrb[125].mxu0  ;;  %27497 = vmatmul.mubr.msk.f32.gmra.mrb[118].mxu1 %vm4877_vm6, %v19024_v62  ;;  %v19026_v28 = vmax.f32 %v27437_v12, 0.0 }
0x1285   : > { %v19025_v39 = vmax.f32 %v18970_v24, 0.0  ;;  %v19356_v24 = vld [vmem:[%s35543_s28 + $0x20] sm:$0xff] }
0x1287   : > { %v27440_v35 = vpop.f32.mrb[126].mxu0  ;;  %27499 = vmatprep.mubr.msk.f32.mxu1 %vm4877_vm6, %v19025_v39 }
0x1288   : > { %v18980_v61 = vpop.f32.mrb[127].mxu0  ;;  %27500 = vmatmul.mubr.msk.f32.gmra.mrb[120].mxu1 %vm4877_vm6, %v19026_v28  ;;  %v19028_v5 = vmax.f32 %v27440_v35, 0.0  ;;  %v19357_v28 = vld [vmem:[%s35543_s28 + $0x28] sm:$0xff] }
0x1289   : > { %v19027_v8 = vmax.f32 %v18980_v61, 0.0 }
0x128b   : > { %v27443_v18 = vpop.f32.mrb[128].mxu0  ;;  %27502 = vmatprep.mubr.msk.f32.mxu1 %vm4877_vm6, %v19027_v8 }
0x128c   : > { %v18990_v0 = vpop.f32.mrb[129].mxu0  ;;  %27503 = vmatmul.mubr.msk.f32.gmra.mrb[122].mxu1 %vm4877_vm6, %v19028_v5  ;;  %v19030_v38 = vmax.f32 %v27443_v18, 0.0  ;;  %v19358_v5 = vld [vmem:[%s35543_s28 + $0x30] sm:$0xff] }
0x128d   : > { %v19029_v44 = vmax.f32 %v18990_v0, 0.0  ;;  %v19359_v0 = vld [vmem:[%s35543_s28 + $0x38] sm:$0xff] }
0x128f   : > { %27505 = vmatprep.mubr.msk.f32.mxu1 %vm4877_vm6, %v19029_v44 }
0x1290   : > { %27506 = vmatmul.mubr.msk.f32.gmra.mrb[124].mxu1 %vm4877_vm6, %v19030_v38 }
0x1327   : > { %v27462_v54 = vpop.f32.mrb[94].mxu1 }
0x1328   : > { %v19193_v13 = vpop.f32.mrb[95].mxu1  ;;  %v19385_v48 = vsub.f32 %v19353_v46, %v27462_v54 }
0x1329   : > { %v19384_v56 = vsub.f32 %v19352_v23, %v19193_v13  ;;  %v19363_v23 = vld [vmem:[%s35543_s28 + $0x58] sm:$0xff] }
0x132b   : > { %v27465_v30 = vpop.f32.mrb[96].mxu1  ;;  %27510 = vmatprep.mubr.msk.f32.mxu0 %vm19425_vm8, %v19384_v56  ;;  %v19364_v56 = vld [vmem:[%s35543_s28 + $0x60] sm:$0xff] }
0x132c   : > { %v19203_v53 = vpop.f32.mrb[97].mxu1  ;;  %27511 = vmatmul.mubr.msk.f32.vlgmr.msra.gmra.mrb[130].mxu0 %vm19425_vm8, %v19385_v48  ;;  %v19387_v12 = vsub.f32 %v19355_v10, %v27465_v30 }
0x132d   : > { %v19386_v62 = vsub.f32 %v19354_v31, %v19203_v53  ;;  %v19365_v31 = vld [vmem:[%s35543_s28 + $0x68] sm:$0xff] }
0x132f   : > { %v27468_v39 = vpop.f32.mrb[98].mxu1  ;;  %27513 = vmatprep.mubr.msk.f32.mxu0 %vm19425_vm8, %v19386_v62  ;;  %v19366_v62 = vld [vmem:[%s35543_s28 + $0x70] sm:$0xff] }
0x1330   : > { %v19213_v35 = vpop.f32.mrb[99].mxu1  ;;  %27514 = vmatmul.mubr.msk.f32.gmra.mrb[132].mxu0 %vm19425_vm8, %v19387_v12  ;;  %v19389_v8 = vsub.f32 %v19357_v28, %v27468_v39 }
0x1331   : > { %v19388_v61 = vsub.f32 %v19356_v24, %v19213_v35  ;;  %v19367_v24 = vld [vmem:[%s35543_s28 + $0x78] sm:$0xff] }
0x1333   : > { %v27471_v18 = vpop.f32.mrb[100].mxu1  ;;  %27516 = vmatprep.mubr.msk.f32.mxu0 %vm19425_vm8, %v19388_v61  ;;  %v19368_v61 = vld [vmem:[%s35543_s28 + $0x80] sm:$0xff] }
0x1334   : > { %v19223_v44 = vpop.f32.mrb[101].mxu1  ;;  %27517 = vmatmul.mubr.msk.f32.gmra.mrb[134].mxu0 %vm19425_vm8, %v19389_v8  ;;  %v19391_v7 = vsub.f32 %v19359_v0, %v27471_v18 }
0x1335   : > { %v19390_v38 = vsub.f32 %v19358_v5, %v19223_v44  ;;  %v19369_v5 = vld [vmem:[%s35543_s28 + $0x88] sm:$0xff] }
0x1337   : > { %v27474_v47 = vpop.f32.mrb[102].mxu1  ;;  %27519 = vmatprep.mubr.msk.f32.mxu0 %vm19425_vm8, %v19390_v38  ;;  %v19370_v38 = vld [vmem:[%s35543_s28 + $0x90] sm:$0xff] }
0x1338   : > { %v19233_v29 = vpop.f32.mrb[103].mxu1  ;;  %27520 = vmatmul.mubr.msk.f32.gmra.mrb[136].mxu0 %vm19425_vm8, %v19391_v7  ;;  %v19393_v52 = vsub.f32 %v19361_v37, %v27474_v47 }
0x1339   : > { %v19392_v2 = vsub.f32 %v19360_v1, %v19233_v29  ;;  %v19371_v1 = vld [vmem:[%s35543_s28 + $0x98] sm:$0xff] }
0x133b   : > { %v27477_v22 = vpop.f32.mrb[104].mxu1  ;;  %27522 = vmatprep.mubr.msk.f32.mxu0 %vm19425_vm8, %v19392_v2  ;;  %v19372_v2 = vld [vmem:[%s35543_s28 + $0xa0] sm:$0xff] }
0x133c   : > { %v19243_v54 = vpop.f32.mrb[105].mxu1  ;;  %27523 = vmatmul.mubr.msk.f32.gmra.mrb[138].mxu0 %vm19425_vm8, %v19393_v52  ;;  %v19395_v13 = vsub.f32 %v19363_v23, %v27477_v22 }
0x133d   : > { %v19394_v46 = vsub.f32 %v19362_v21, %v19243_v54  ;;  %v19373_v21 = vld [vmem:[%s35543_s28 + $0xa8] sm:$0xff] }
0x133f   : > { %v27480_v48 = vpop.f32.mrb[106].mxu1  ;;  %27525 = vmatprep.mubr.msk.f32.mxu0 %vm19425_vm8, %v19394_v46  ;;  %v19374_v46 = vld [vmem:[%s35543_s28 + $0xb0] sm:$0xff] }
0x1340   : > { %v19253_v30 = vpop.f32.mrb[107].mxu1  ;;  %27526 = vmatmul.mubr.msk.f32.gmra.mrb[140].mxu0 %vm19425_vm8, %v19395_v13  ;;  %v19397_v53 = vsub.f32 %v19365_v31, %v27480_v48 }
0x1341   : > { %v19396_v10 = vsub.f32 %v19364_v56, %v19253_v30  ;;  %v19375_v56 = vld [vmem:[%s35543_s28 + $0xb8] sm:$0xff] }
0x1343   : > { %v27483_v12 = vpop.f32.mrb[108].mxu1  ;;  %27528 = vmatprep.mubr.msk.f32.mxu0 %vm19425_vm8, %v19396_v10  ;;  %v19376_v10 = vld [vmem:[%s35543_s28 + $0xc0] sm:$0xff] }
0x1344   : > { %v19263_v39 = vpop.f32.mrb[109].mxu1  ;;  %27529 = vmatmul.mubr.msk.f32.gmra.mrb[142].mxu0 %vm19425_vm8, %v19397_v53  ;;  %v19399_v35 = vsub.f32 %v19367_v24, %v27483_v12 }
0x1345   : > { %v19398_v28 = vsub.f32 %v19366_v62, %v19263_v39  ;;  %v19377_v62 = vld [vmem:[%s35543_s28 + $0xc8] sm:$0xff] }
0x1347   : > { %v27486_v8 = vpop.f32.mrb[110].mxu1  ;;  %27531 = vmatprep.mubr.msk.f32.mxu0 %vm19425_vm8, %v19398_v28  ;;  %v19378_v28 = vld [vmem:[%s35543_s28 + $0xd0] sm:$0xff] }
0x1348   : > { %v19273_v18 = vpop.f32.mrb[111].mxu1  ;;  %27532 = vmatmul.mubr.msk.f32.gmra.mrb[144].mxu0 %vm19425_vm8, %v19399_v35  ;;  %v19401_v44 = vsub.f32 %v19369_v5, %v27486_v8 }
0x1349   : > { %v19400_v0 = vsub.f32 %v19368_v61, %v19273_v18  ;;  %v19379_v61 = vld [vmem:[%s35543_s28 + $0xd8] sm:$0xff] }
0x134b   : > { %v27489_v7 = vpop.f32.mrb[112].mxu1  ;;  %27534 = vmatprep.mubr.msk.f32.mxu0 %vm19425_vm8, %v19400_v0  ;;  %v19380_v0 = vld [vmem:[%s35543_s28 + $0xe0] sm:$0xff] }
0x134c   : > { %v19283_v47 = vpop.f32.mrb[113].mxu1  ;;  %27535 = vmatmul.mubr.msk.f32.gmra.mrb[146].mxu0 %vm19425_vm8, %v19401_v44  ;;  %v19403_v29 = vsub.f32 %v19371_v1, %v27489_v7 }
0x134d   : > { %v19402_v37 = vsub.f32 %v19370_v38, %v19283_v47  ;;  %v19381_v38 = vld [vmem:[%s35543_s28 + $0xe8] sm:$0xff] }
0x134f   : > { %v27492_v52 = vpop.f32.mrb[114].mxu1  ;;  %27537 = vmatprep.mubr.msk.f32.mxu0 %vm19425_vm8, %v19402_v37  ;;  %v19382_v37 = vld [vmem:[%s35543_s28 + $0xf0] sm:$0xff] }
0x1350   : > { %v19293_v22 = vpop.f32.mrb[115].mxu1  ;;  %27538 = vmatmul.mubr.msk.f32.gmra.mrb[148].mxu0 %vm19425_vm8, %v19403_v29  ;;  %v19405_v54 = vsub.f32 %v19373_v21, %v27492_v52 }
0x1351   : > { %v19404_v23 = vsub.f32 %v19372_v2, %v19293_v22  ;;  %v19383_v2 = vld [vmem:[%s35543_s28 + $0xf8] sm:$0xff] }
0x1353   : > { %v27495_v13 = vpop.f32.mrb[116].mxu1  ;;  %27540 = vmatprep.mubr.msk.f32.mxu0 %vm19425_vm8, %v19404_v23  ;;  %v19423_v23 = vld [vmem:[%s29714_s10 + $0x30] sm:$0xff] }
0x1354   : > { %v19303_v48 = vpop.f32.mrb[117].mxu1  ;;  %27541 = vmatmul.mubr.msk.f32.gmra.mrb[150].mxu0 %vm19425_vm8, %v19405_v54  ;;  %v19407_v30 = vsub.f32 %v19375_v56, %v27495_v13  ;;  %v19424_v54 = vld [vmem:[%s29714_s10 + $0x38] sm:$0xff]  ;;  %v20136_v13 = vld [vmem:[%s29719_s4] sm:$0xf] }
0x1355   : > { %v19406_v31 = vsub.f32 %v19374_v46, %v19303_v48  ;;  %v28260_v46 = vpack.c.bf16 %v19424_v54, %v19423_v23  ;;  %27622 = vmatprep.subr.msk.mxu0 %vm1560_vm4, %v20136_v13 }
0x1356   : > { %27623 = vmatpush3.msk.msra.mxu0 %vm1560_vm4, %v20136_v13 }
0x1357   : > { %v27498_v53 = vpop.f32.mrb[118].mxu1  ;;  %27543 = vmatprep.mubr.msk.f32.mxu0 %vm19425_vm8, %v19406_v31  ;;  %28261 = vmatprep.subr.bf16.mxu1 %v28260_v46 }
0x1358   : > { %v19313_v12 = vpop.f32.mrb[119].mxu1  ;;  %27544 = vmatmul.mubr.msk.f32.gmra.mrb[152].mxu0 %vm19425_vm8, %v19407_v30  ;;  %v19409_v39 = vsub.f32 %v19377_v62, %v27498_v53  ;;  %28263 = vmatpush3.bf16.msra.mxu1 %v28260_v46 }
0x1359   : > { %v19408_v24 = vsub.f32 %v19376_v10, %v19313_v12 }
0x135b   : > { %v27501_v35 = vpop.f32.mrb[120].mxu1  ;;  %27546 = vmatprep.mubr.msk.f32.mxu0 %vm19425_vm8, %v19408_v24 }
0x135c   : > { %v19323_v8 = vpop.f32.mrb[121].mxu1  ;;  %27547 = vmatmul.mubr.msk.f32.gmra.mrb[154].mxu0 %vm19425_vm8, %v19409_v39  ;;  %v19411_v18 = vsub.f32 %v19379_v61, %v27501_v35 }
0x135d   : > { %v19410_v5 = vsub.f32 %v19378_v28, %v19323_v8 }
0x135f   : > { %v27504_v44 = vpop.f32.mrb[122].mxu1  ;;  %27549 = vmatprep.mubr.msk.f32.mxu0 %vm19425_vm8, %v19410_v5 }
0x1360   : > { %v19333_v7 = vpop.f32.mrb[123].mxu1  ;;  %27550 = vmatmul.mubr.msk.f32.gmra.mrb[156].mxu0 %vm19425_vm8, %v19411_v18  ;;  %v19413_v47 = vsub.f32 %v19381_v38, %v27504_v44 }
0x1361   : > { %v19412_v1 = vsub.f32 %v19380_v0, %v19333_v7 }
0x1363   : > { %v27507_v29 = vpop.f32.mrb[124].mxu1  ;;  %27552 = vmatprep.mubr.msk.f32.mxu0 %vm19425_vm8, %v19412_v1 }
0x1364   : > { %v19343_v52 = vpop.f32.mrb[125].mxu1  ;;  %27553 = vmatmul.mubr.msk.f32.gmra.mrb[158].mxu0 %vm19425_vm8, %v19413_v47  ;;  %v19415_v22 = vsub.f32 %v19383_v2, %v27507_v29 }
0x1365   : > { %v19414_v21 = vsub.f32 %v19382_v37, %v19343_v52 }
0x1367   : > { %27555 = vmatprep.mubr.msk.f32.mxu0 %vm19425_vm8, %v19414_v21 }
0x1368   : > { %27556 = vmatmul.mubr.msk.f32.gmra.mrb[160].mxu0 %vm19425_vm8, %v19415_v22 }
0x13ff   : > { %v27512_v56 = vpop.f32.mrb[130].mxu0 }
0x1400   : > { %v19592_v48 = vpop.f32.mrb[131].mxu0  ;;  %v19752_v30 = vmax.f32 %v27512_v56, 0.0 }
0x1401   : > { %v19751_v31 = vmax.f32 %v19592_v48, 0.0 }
0x1403   : > { %v27515_v10 = vpop.f32.mrb[132].mxu0  ;;  %27574 = vmatprep.mubr.msk.f32.mxu1 %vm4877_vm6, %v19751_v31 }
0x1404   : > { %v19602_v53 = vpop.f32.mrb[133].mxu0  ;;  %27575 = vmatmul.mubr.msk.f32.vlgmr.msra.gmra.mrb[126].mxu1 %vm4877_vm6, %v19752_v30  ;;  %v19754_v12 = vmax.f32 %v27515_v10, 0.0 }
0x1405   : > { %v19753_v62 = vmax.f32 %v19602_v53, 0.0 }
0x1407   : > { %v27518_v24 = vpop.f32.mrb[134].mxu0  ;;  %27577 = vmatprep.mubr.msk.f32.mxu1 %vm4877_vm6, %v19753_v62 }
0x1408   : > { %v19612_v39 = vpop.f32.mrb[135].mxu0  ;;  %27578 = vmatmul.mubr.msk.f32.gmra.mrb[128].mxu1 %vm4877_vm6, %v19754_v12  ;;  %v19756_v35 = vmax.f32 %v27518_v24, 0.0 }
0x1409   : > { %v19755_v28 = vmax.f32 %v19612_v39, 0.0 }
0x140b   : > { %v27521_v61 = vpop.f32.mrb[136].mxu0  ;;  %27580 = vmatprep.mubr.msk.f32.mxu1 %vm4877_vm6, %v19755_v28 }
0x140c   : > { %v19622_v8 = vpop.f32.mrb[137].mxu0  ;;  %27581 = vmatmul.mubr.msk.f32.gmra.mrb[130].mxu1 %vm4877_vm6, %v19756_v35  ;;  %v19758_v18 = vmax.f32 %v27521_v61, 0.0 }
0x140d   : > { %v19757_v5 = vmax.f32 %v19622_v8, 0.0 }
0x140f   : > { %v27524_v0 = vpop.f32.mrb[138].mxu0  ;;  %27583 = vmatprep.mubr.msk.f32.mxu1 %vm4877_vm6, %v19757_v5 }
0x1410   : > { %v19632_v44 = vpop.f32.mrb[139].mxu0  ;;  %27584 = vmatmul.mubr.msk.f32.gmra.mrb[132].mxu1 %vm4877_vm6, %v19758_v18  ;;  %v19760_v7 = vmax.f32 %v27524_v0, 0.0 }
0x1411   : > { %v19759_v38 = vmax.f32 %v19632_v44, 0.0 }
0x1413   : > { %v27527_v1 = vpop.f32.mrb[140].mxu0  ;;  %27586 = vmatprep.mubr.msk.f32.mxu1 %vm4877_vm6, %v19759_v38 }
0x1414   : > { %v19642_v47 = vpop.f32.mrb[141].mxu0  ;;  %27587 = vmatmul.mubr.msk.f32.gmra.mrb[134].mxu1 %vm4877_vm6, %v19760_v7  ;;  %v19762_v29 = vmax.f32 %v27527_v1, 0.0 }
0x1415   : > { %v19761_v37 = vmax.f32 %v19642_v47, 0.0 }
0x1417   : > { %v27530_v2 = vpop.f32.mrb[142].mxu0  ;;  %27589 = vmatprep.mubr.msk.f32.mxu1 %vm4877_vm6, %v19761_v37 }
0x1418   : > { %v19652_v52 = vpop.f32.mrb[143].mxu0  ;;  %27590 = vmatmul.mubr.msk.f32.gmra.mrb[136].mxu1 %vm4877_vm6, %v19762_v29  ;;  %v19764_v22 = vmax.f32 %v27530_v2, 0.0 }
0x1419   : > { %v19763_v21 = vmax.f32 %v19652_v52, 0.0 }
0x141b   : > { %v27533_v23 = vpop.f32.mrb[144].mxu0  ;;  %27592 = vmatprep.mubr.msk.f32.mxu1 %vm4877_vm6, %v19763_v21 }
0x141c   : > { %v19662_v54 = vpop.f32.mrb[145].mxu0  ;;  %27593 = vmatmul.mubr.msk.f32.gmra.mrb[138].mxu1 %vm4877_vm6, %v19764_v22  ;;  %v19766_v13 = vmax.f32 %v27533_v23, 0.0 }
0x141d   : > { %v19765_v46 = vmax.f32 %v19662_v54, 0.0 }
0x141f   : > { %v27536_v56 = vpop.f32.mrb[146].mxu0  ;;  %27595 = vmatprep.mubr.msk.f32.mxu1 %vm4877_vm6, %v19765_v46 }
0x1420   : > { %v19672_v48 = vpop.f32.mrb[147].mxu0  ;;  %27596 = vmatmul.mubr.msk.f32.gmra.mrb[140].mxu1 %vm4877_vm6, %v19766_v13  ;;  %v19768_v30 = vmax.f32 %v27536_v56, 0.0  ;;  %v20137_v56 = vld [vmem:[%s29724_s6] sm:$0xff] }
0x1421   : > { %v19767_v31 = vmax.f32 %v19672_v48, 0.0  ;;  %v20138_v48 = vld [vmem:[%s29724_s6 + $0x8] sm:$0xff] }
0x1423   : > { %v27539_v10 = vpop.f32.mrb[148].mxu0  ;;  %27598 = vmatprep.mubr.msk.f32.mxu1 %vm4877_vm6, %v19767_v31  ;;  %v20139_v31 = vld [vmem:[%s29724_s6 + $0x10] sm:$0xff] }
0x1424   : > { %v19682_v53 = vpop.f32.mrb[149].mxu0  ;;  %27599 = vmatmul.mubr.msk.f32.gmra.mrb[142].mxu1 %vm4877_vm6, %v19768_v30  ;;  %v19770_v12 = vmax.f32 %v27539_v10, 0.0  ;;  %v28264_v30 = vpack.c.bf16 %v20138_v48, %v20137_v56  ;;  %v20140_v10 = vld [vmem:[%s29724_s6 + $0x18] sm:$0xff] }
0x1425   : > { %v19769_v62 = vmax.f32 %v19682_v53, 0.0  ;;  %v28268_v53 = vpack.c.bf16 %v20140_v10, %v20139_v31 }
0x1426   : > { %28265 = vmatprep.subr.bf16.mxu1 %v28264_v30 }
0x1427   : > { %v27542_v24 = vpop.f32.mrb[150].mxu0  ;;  %27601 = vmatprep.mubr.msk.f32.mxu1 %vm4877_vm6, %v19769_v62  ;;  %v20141_v62 = vld [vmem:[%s29724_s6 + $0x20] sm:$0xff]  ;;  %28267 = vmatpush3.bf16.msra.mxu1 %v28264_v30 }
0x1428   : > { %v19692_v39 = vpop.f32.mrb[151].mxu0  ;;  %27602 = vmatmul.mubr.msk.f32.gmra.mrb[144].mxu1 %vm4877_vm6, %v19770_v12  ;;  %v19772_v35 = vmax.f32 %v27542_v24, 0.0  ;;  %v20142_v12 = vld [vmem:[%s29724_s6 + $0x28] sm:$0xff]  ;;  %28269 = vmatprep.subr.bf16.mxu1 %v28268_v53 }
0x1429   : > { %v19771_v28 = vmax.f32 %v19692_v39, 0.0  ;;  %v28272_v24 = vpack.c.bf16 %v20142_v12, %v20141_v62 }
0x142b   : > { %v27545_v61 = vpop.f32.mrb[152].mxu0  ;;  %27604 = vmatprep.mubr.msk.f32.mxu1 %vm4877_vm6, %v19771_v28  ;;  %28271 = vmatpush3.bf16.msra.mxu1 %v28268_v53 }
0x142c   : > { %v19702_v8 = vpop.f32.mrb[153].mxu0  ;;  %27605 = vmatmul.mubr.msk.f32.gmra.mrb[146].mxu1 %vm4877_vm6, %v19772_v35  ;;  %v19774_v18 = vmax.f32 %v27545_v61, 0.0  ;;  %28273 = vmatprep.subr.bf16.mxu1 %v28272_v24 }
0x142d   : > { %v19773_v5 = vmax.f32 %v19702_v8, 0.0 }
0x142f   : > { %v27548_v0 = vpop.f32.mrb[154].mxu0  ;;  %27607 = vmatprep.mubr.msk.f32.mxu1 %vm4877_vm6, %v19773_v5  ;;  %28275 = vmatpush3.bf16.msra.mxu1 %v28272_v24 }
0x1430   : > { %v19712_v44 = vpop.f32.mrb[155].mxu0  ;;  %27608 = vmatmul.mubr.msk.f32.gmra.mrb[148].mxu1 %vm4877_vm6, %v19774_v18  ;;  %v19776_v7 = vmax.f32 %v27548_v0, 0.0 }
0x1431   : > { %v19775_v38 = vmax.f32 %v19712_v44, 0.0 }
0x1433   : > { %v27551_v1 = vpop.f32.mrb[156].mxu0  ;;  %27610 = vmatprep.mubr.msk.f32.mxu1 %vm4877_vm6, %v19775_v38 }
0x1434   : > { %v19722_v47 = vpop.f32.mrb[157].mxu0  ;;  %27611 = vmatmul.mubr.msk.f32.gmra.mrb[150].mxu1 %vm4877_vm6, %v19776_v7  ;;  %v19778_v29 = vmax.f32 %v27551_v1, 0.0 }
0x1435   : > { %v19777_v37 = vmax.f32 %v19722_v47, 0.0 }
0x1437   : > { %v27554_v2 = vpop.f32.mrb[158].mxu0  ;;  %27613 = vmatprep.mubr.msk.f32.mxu1 %vm4877_vm6, %v19777_v37 }
0x1438   : > { %v19732_v52 = vpop.f32.mrb[159].mxu0  ;;  %27614 = vmatmul.mubr.msk.f32.gmra.mrb[152].mxu1 %vm4877_vm6, %v19778_v29  ;;  %v19780_v22 = vmax.f32 %v27554_v2, 0.0 }
0x1439   : > { %v19779_v21 = vmax.f32 %v19732_v52, 0.0 }
0x143b   : > { %v27557_v23 = vpop.f32.mrb[160].mxu0  ;;  %27616 = vmatprep.mubr.msk.f32.mxu1 %vm4877_vm6, %v19779_v21 }
0x143c   : > { %v19742_v54 = vpop.f32.mrb[161].mxu0  ;;  %27617 = vmatmul.mubr.msk.f32.gmra.mrb[154].mxu1 %vm4877_vm6, %v19780_v22  ;;  %v19782_v13 = vmax.f32 %v27557_v23, 0.0 }
0x143d   : > { %v19781_v46 = vmax.f32 %v19742_v54, 0.0 }
0x143f   : > { %27619 = vmatprep.mubr.msk.f32.mxu1 %vm4877_vm6, %v19781_v46 }
0x1440   : > { %27620 = vmatmul.mubr.msk.f32.gmra.mrb[156].mxu1 %vm4877_vm6, %v19782_v13 }
0x14d7   : > { %v27576_v39 = vpop.f32.mrb[126].mxu1 }
0x14d8   : > { %v20105_v28 = vadd.f32 %v27576_v39, %v34320_v17  ;;  %v19945_v35 = vpop.f32.mrb[127].mxu1 }
0x14d9   : > { %v20104_v61 = vadd.f32 %v19945_v35, %v34322_v60 }
0x14db   : > { %v27579_v8 = vpop.f32.mrb[128].mxu1  ;;  %27624 = vmatprep.mubr.msk.f32.mxu0 %vm1364_vm5, %v20104_v61 }
0x14dc   : > { %v20107_v5 = vadd.f32 %v27579_v8, %v34328_v11  ;;  %v19955_v18 = vpop.f32.mrb[129].mxu1  ;;  %27625 = vmatmul.mubr.msk.f32.vlgmr.msra.gmra.mrb[162].mxu0 %vm1364_vm5, %v20105_v28  ;;  %v20144_v8 = vld [vmem:[%s29724_s6 + $0x38] sm:$0xff] }
0x14dd   : > { %v20106_v0 = vadd.f32 %v19955_v18, %v34330_v57 }
0x14df   : > { %v27582_v44 = vpop.f32.mrb[130].mxu1  ;;  %27627 = vmatprep.mubr.msk.f32.mxu0 %vm1364_vm5, %v20106_v0 }
0x14e0   : > { %v20109_v38 = vadd.f32 %v27582_v44, %v34336_v55  ;;  %v19965_v7 = vpop.f32.mrb[131].mxu1  ;;  %27628 = vmatmul.mubr.msk.f32.gmra.mrb[164].mxu0 %vm1364_vm5, %v20107_v5 }
0x14e1   : > { %v20108_v17 = vadd.f32 %v19965_v7, %v34338_v6 }
0x14e3   : > { %v27585_v60 = vpop.f32.mrb[132].mxu1  ;;  %27630 = vmatprep.mubr.msk.f32.mxu0 %vm1364_vm5, %v20108_v17 }
0x14e4   : > { %v20111_v11 = vadd.f32 %v27585_v60, %v34344_v43  ;;  %v19975_v1 = vpop.f32.mrb[133].mxu1  ;;  %27631 = vmatmul.mubr.msk.f32.gmra.mrb[166].mxu0 %vm1364_vm5, %v20109_v38 }
0x14e5   : > { %v20110_v57 = vadd.f32 %v19975_v1, %v34346_v40 }
0x14e7   : > { %v27588_v47 = vpop.f32.mrb[134].mxu1  ;;  %27633 = vmatprep.mubr.msk.f32.mxu0 %vm1364_vm5, %v20110_v57 }
0x14e8   : > { %v20113_v55 = vadd.f32 %v27588_v47, %v34352_v19  ;;  %v19985_v37 = vpop.f32.mrb[135].mxu1  ;;  %27634 = vmatmul.mubr.msk.f32.gmra.mrb[168].mxu0 %vm1364_vm5, %v20111_v11 }
0x14e9   : > { %v20112_v6 = vadd.f32 %v19985_v37, %v34354_v58 }
0x14eb   : > { %v27591_v29 = vpop.f32.mrb[136].mxu1  ;;  %27636 = vmatprep.mubr.msk.f32.mxu0 %vm1364_vm5, %v20112_v6 }
0x14ec   : > { %v20115_v43 = vadd.f32 %v27591_v29, %v34360_v45  ;;  %v19995_v2 = vpop.f32.mrb[137].mxu1  ;;  %27637 = vmatmul.mubr.msk.f32.gmra.mrb[170].mxu0 %vm1364_vm5, %v20113_v55 }
0x14ed   : > { %v20114_v40 = vadd.f32 %v19995_v2, %v34362_v32 }
0x14ef   : > { %v27594_v52 = vpop.f32.mrb[138].mxu1  ;;  %27639 = vmatprep.mubr.msk.f32.mxu0 %vm1364_vm5, %v20114_v40 }
0x14f0   : > { %v20117_v19 = vadd.f32 %v27594_v52, %v34368_v20  ;;  %v20005_v21 = vpop.f32.mrb[139].mxu1  ;;  %27640 = vmatmul.mubr.msk.f32.gmra.mrb[172].mxu0 %vm1364_vm5, %v20115_v43 }
0x14f1   : > { %v20116_v58 = vadd.f32 %v20005_v21, %v34370_v42 }
0x14f3   : > { %v27597_v22 = vpop.f32.mrb[140].mxu1  ;;  %27642 = vmatprep.mubr.msk.f32.mxu0 %vm1364_vm5, %v20116_v58 }
0x14f4   : > { %v20119_v45 = vadd.f32 %v27597_v22, %v34376_v25  ;;  %v20015_v23 = vpop.f32.mrb[141].mxu1  ;;  %27643 = vmatmul.mubr.msk.f32.gmra.mrb[174].mxu0 %vm1364_vm5, %v20117_v19 }
0x14f5   : > { %v20118_v32 = vadd.f32 %v20015_v23, %v34378_v34 }
0x14f7   : > { %v27600_v54 = vpop.f32.mrb[142].mxu1  ;;  %27645 = vmatprep.mubr.msk.f32.mxu0 %vm1364_vm5, %v20118_v32 }
0x14f8   : > { %v20121_v20 = vadd.f32 %v27600_v54, %v34384_v50  ;;  %v20025_v46 = vpop.f32.mrb[143].mxu1  ;;  %27646 = vmatmul.mubr.msk.f32.gmra.mrb[176].mxu0 %vm1364_vm5, %v20119_v45 }
0x14f9   : > { %v20120_v42 = vadd.f32 %v20025_v46, %v34386_v3 }
0x14fb   : > { %v27603_v13 = vpop.f32.mrb[144].mxu1  ;;  %27648 = vmatprep.mubr.msk.f32.mxu0 %vm1364_vm5, %v20120_v42 }
0x14fc   : > { %v20123_v25 = vadd.f32 %v27603_v13, %v34392_v9  ;;  %v20035_v56 = vpop.f32.mrb[145].mxu1  ;;  %27649 = vmatmul.mubr.msk.f32.gmra.mrb[178].mxu0 %vm1364_vm5, %v20121_v20 }
0x14fd   : > { %v20122_v34 = vadd.f32 %v20035_v56, %v34394_v27 }
0x14ff   : > { %v27606_v48 = vpop.f32.mrb[146].mxu1  ;;  %27651 = vmatprep.mubr.msk.f32.mxu0 %vm1364_vm5, %v20122_v34 }
0x1500   : > { %v20125_v50 = vadd.f32 %v27606_v48, %v34400_v14  ;;  %v20045_v31 = vpop.f32.mrb[147].mxu1  ;;  %27652 = vmatmul.mubr.msk.f32.gmra.mrb[180].mxu0 %vm1364_vm5, %v20123_v25 }
0x1501   : > { %v20124_v3 = vadd.f32 %v20045_v31, %v34402_v41 }
0x1503   : > { %v27609_v30 = vpop.f32.mrb[148].mxu1  ;;  %27654 = vmatprep.mubr.msk.f32.mxu0 %vm1364_vm5, %v20124_v3 }
0x1504   : > { %v20127_v9 = vadd.f32 %v27609_v30, %v34408_v63  ;;  %v20055_v10 = vpop.f32.mrb[149].mxu1  ;;  %27655 = vmatmul.mubr.msk.f32.gmra.mrb[182].mxu0 %vm1364_vm5, %v20125_v50 }
0x1505   : > { %v20126_v27 = vadd.f32 %v20055_v10, %v34410_v36 }
0x1507   : > { %v27612_v53 = vpop.f32.mrb[150].mxu1  ;;  %27657 = vmatprep.mubr.msk.f32.mxu0 %vm1364_vm5, %v20126_v27 }
0x1508   : > { %v20129_v14 = vadd.f32 %v27612_v53, %v34416_v33  ;;  %v20065_v62 = vpop.f32.mrb[151].mxu1  ;;  %27658 = vmatmul.mubr.msk.f32.gmra.mrb[184].mxu0 %vm1364_vm5, %v20127_v9 }
0x1509   : > { %v20128_v41 = vadd.f32 %v20065_v62, %v34418_v26 }
0x150b   : > { %v27615_v12 = vpop.f32.mrb[152].mxu1  ;;  %27660 = vmatprep.mubr.msk.f32.mxu0 %vm1364_vm5, %v20128_v41 }
0x150c   : > { %v20131_v63 = vadd.f32 %v27615_v12, %v34424_v16  ;;  %v20075_v24 = vpop.f32.mrb[153].mxu1  ;;  %27661 = vmatmul.mubr.msk.f32.gmra.mrb[186].mxu0 %vm1364_vm5, %v20129_v14 }
0x150d   : > { %v20130_v36 = vadd.f32 %v20075_v24, %v34426_v51 }
0x150f   : > { %v27618_v39 = vpop.f32.mrb[154].mxu1  ;;  %27663 = vmatprep.mubr.msk.f32.mxu0 %vm1364_vm5, %v20130_v36 }
0x1510   : > { %v20133_v33 = vadd.f32 %v27618_v39, %v34432_v4  ;;  %v20085_v28 = vpop.f32.mrb[155].mxu1  ;;  %27664 = vmatmul.mubr.msk.f32.gmra.mrb[188].mxu0 %vm1364_vm5, %v20131_v63  ;;  %v20143_v4 = vld [vmem:[%s29724_s6 + $0x30] sm:$0xff] }
0x1511   : > { %v20132_v26 = vadd.f32 %v20085_v28, %v34434_v15  ;;  %v28276_v5 = vpack.c.bf16 %v20144_v8, %v20143_v4 }
0x1513   : > { %v27621_v35 = vpop.f32.mrb[156].mxu1  ;;  %27666 = vmatprep.mubr.msk.f32.mxu0 %vm1364_vm5, %v20132_v26  ;;  %28277 = vmatprep.subr.bf16.mxu1 %v28276_v5 }
0x1514   : > { %v20135_v16 = vadd.f32 %v27621_v35, %v34440_v59  ;;  %v20095_v61 = vpop.f32.mrb[157].mxu1  ;;  %27667 = vmatmul.mubr.msk.f32.gmra.mrb[190].mxu0 %vm1364_vm5, %v20133_v33  ;;  %28279 = vmatpush3.bf16.msra.mxu1 %v28276_v5 }
0x1515   : > { %v20134_v51 = vadd.f32 %v20095_v61, %v34442_v49 }
0x1517   : > { %27669 = vmatprep.mubr.msk.f32.mxu0 %vm1364_vm5, %v20134_v51 }
0x1518   : > { %27670 = vmatmul.mubr.msk.f32.gmra.mrb[192].mxu0 %vm1364_vm5, %v20135_v16 }
0x15af   : > { %v27626_v15 = vpop.f32.mrb[162].mxu0 }
0x15b0   : > { %v20310_v18 = vpop.f32.mrb[163].mxu0  ;;  %v20470_v44 = vmax.f32 %v27626_v15, 0.0 }
0x15b1   : > { %v20469_v0 = vmax.f32 %v20310_v18, 0.0 }
0x15b3   : > { %v27629_v38 = vpop.f32.mrb[164].mxu0  ;;  %27688 = vmatprep.mubr.msk.f32.mxu1 %vm4877_vm6, %v20469_v0 }
0x15b4   : > { %v20320_v59 = vpop.f32.mrb[165].mxu0  ;;  %27689 = vmatmul.mubr.msk.f32.vlgmr.msra.gmra.mrb[158].mxu1 %vm4877_vm6, %v20470_v44  ;;  %v20472_v7 = vmax.f32 %v27629_v38, 0.0 }
0x15b5   : > { %v20471_v49 = vmax.f32 %v20320_v59, 0.0 }
0x15b7   : > { %v27632_v17 = vpop.f32.mrb[166].mxu0  ;;  %27691 = vmatprep.mubr.msk.f32.mxu1 %vm4877_vm6, %v20471_v49 }
0x15b8   : > { %v20330_v60 = vpop.f32.mrb[167].mxu0  ;;  %27692 = vmatmul.mubr.msk.f32.gmra.mrb[160].mxu1 %vm4877_vm6, %v20472_v7  ;;  %v20474_v1 = vmax.f32 %v27632_v17, 0.0 }
0x15b9   : > { %v20473_v11 = vmax.f32 %v20330_v60, 0.0 }
0x15bb   : > { %v27635_v57 = vpop.f32.mrb[168].mxu0  ;;  %27694 = vmatprep.mubr.msk.f32.mxu1 %vm4877_vm6, %v20473_v11 }
0x15bc   : > { %v20340_v47 = vpop.f32.mrb[169].mxu0  ;;  %27695 = vmatmul.mubr.msk.f32.gmra.mrb[162].mxu1 %vm4877_vm6, %v20474_v1  ;;  %v20476_v37 = vmax.f32 %v27635_v57, 0.0 }
0x15bd   : > { %v20475_v55 = vmax.f32 %v20340_v47, 0.0 }
0x15bf   : > { %v27638_v6 = vpop.f32.mrb[170].mxu0  ;;  %27697 = vmatprep.mubr.msk.f32.mxu1 %vm4877_vm6, %v20475_v55 }
0x15c0   : > { %v20350_v29 = vpop.f32.mrb[171].mxu0  ;;  %27698 = vmatmul.mubr.msk.f32.gmra.mrb[164].mxu1 %vm4877_vm6, %v20476_v37  ;;  %v20478_v2 = vmax.f32 %v27638_v6, 0.0 }
0x15c1   : > { %v20477_v43 = vmax.f32 %v20350_v29, 0.0 }
0x15c3   : > { %v27641_v40 = vpop.f32.mrb[172].mxu0  ;;  %27700 = vmatprep.mubr.msk.f32.mxu1 %vm4877_vm6, %v20477_v43 }
0x15c4   : > { %v20360_v52 = vpop.f32.mrb[173].mxu0  ;;  %27701 = vmatmul.mubr.msk.f32.gmra.mrb[166].mxu1 %vm4877_vm6, %v20478_v2  ;;  %v20480_v21 = vmax.f32 %v27641_v40, 0.0 }
0x15c5   : > { %v20479_v19 = vmax.f32 %v20360_v52, 0.0 }
0x15c7   : > { %v27644_v58 = vpop.f32.mrb[174].mxu0  ;;  %27703 = vmatprep.mubr.msk.f32.mxu1 %vm4877_vm6, %v20479_v19 }
0x15c8   : > { %v20370_v22 = vpop.f32.mrb[175].mxu0  ;;  %27704 = vmatmul.mubr.msk.f32.gmra.mrb[168].mxu1 %vm4877_vm6, %v20480_v21  ;;  %v20482_v23 = vmax.f32 %v27644_v58, 0.0 }
0x15c9   : > { %v20481_v45 = vmax.f32 %v20370_v22, 0.0 }
0x15cb   : > { %v27647_v32 = vpop.f32.mrb[176].mxu0  ;;  %27706 = vmatprep.mubr.msk.f32.mxu1 %vm4877_vm6, %v20481_v45 }
0x15cc   : > { %v20380_v54 = vpop.f32.mrb[177].mxu0  ;;  %27707 = vmatmul.mubr.msk.f32.gmra.mrb[170].mxu1 %vm4877_vm6, %v20482_v23  ;;  %v20484_v46 = vmax.f32 %v27647_v32, 0.0 }
0x15cd   : > { %v20483_v20 = vmax.f32 %v20380_v54, 0.0 }
0x15cf   : > { %v27650_v42 = vpop.f32.mrb[178].mxu0  ;;  %27709 = vmatprep.mubr.msk.f32.mxu1 %vm4877_vm6, %v20483_v20 }
0x15d0   : > { %v20390_v13 = vpop.f32.mrb[179].mxu0  ;;  %27710 = vmatmul.mubr.msk.f32.gmra.mrb[172].mxu1 %vm4877_vm6, %v20484_v46  ;;  %v20486_v56 = vmax.f32 %v27650_v42, 0.0 }
0x15d1   : > { %v20485_v25 = vmax.f32 %v20390_v13, 0.0 }
0x15d3   : > { %v27653_v34 = vpop.f32.mrb[180].mxu0  ;;  %27712 = vmatprep.mubr.msk.f32.mxu1 %vm4877_vm6, %v20485_v25 }
0x15d4   : > { %v20400_v48 = vpop.f32.mrb[181].mxu0  ;;  %27713 = vmatmul.mubr.msk.f32.gmra.mrb[174].mxu1 %vm4877_vm6, %v20486_v56  ;;  %v20488_v31 = vmax.f32 %v27653_v34, 0.0 }
0x15d5   : > { %v20487_v50 = vmax.f32 %v20400_v48, 0.0 }
0x15d7   : > { %v27656_v3 = vpop.f32.mrb[182].mxu0  ;;  %27715 = vmatprep.mubr.msk.f32.mxu1 %vm4877_vm6, %v20487_v50 }
0x15d8   : > { %v20410_v30 = vpop.f32.mrb[183].mxu0  ;;  %27716 = vmatmul.mubr.msk.f32.gmra.mrb[176].mxu1 %vm4877_vm6, %v20488_v31  ;;  %v20490_v10 = vmax.f32 %v27656_v3, 0.0 }
0x15d9   : > { %v20489_v9 = vmax.f32 %v20410_v30, 0.0 }
0x15db   : > { %v27659_v27 = vpop.f32.mrb[184].mxu0  ;;  %27718 = vmatprep.mubr.msk.f32.mxu1 %vm4877_vm6, %v20489_v9 }
0x15dc   : > { %v20420_v53 = vpop.f32.mrb[185].mxu0  ;;  %27719 = vmatmul.mubr.msk.f32.gmra.mrb[178].mxu1 %vm4877_vm6, %v20490_v10  ;;  %v20492_v62 = vmax.f32 %v27659_v27, 0.0 }
0x15dd   : > { %v20491_v14 = vmax.f32 %v20420_v53, 0.0 }
0x15df   : > { %v27662_v41 = vpop.f32.mrb[186].mxu0  ;;  %27721 = vmatprep.mubr.msk.f32.mxu1 %vm4877_vm6, %v20491_v14 }
0x15e0   : > { %v20430_v12 = vpop.f32.mrb[187].mxu0  ;;  %27722 = vmatmul.mubr.msk.f32.gmra.mrb[180].mxu1 %vm4877_vm6, %v20492_v62  ;;  %v20494_v24 = vmax.f32 %v27662_v41, 0.0 }
0x15e1   : > { %v20493_v63 = vmax.f32 %v20430_v12, 0.0 }
0x15e3   : > { %v27665_v36 = vpop.f32.mrb[188].mxu0  ;;  %27724 = vmatprep.mubr.msk.f32.mxu1 %vm4877_vm6, %v20493_v63 }
0x15e4   : > { %v20440_v39 = vpop.f32.mrb[189].mxu0  ;;  %27725 = vmatmul.mubr.msk.f32.gmra.mrb[182].mxu1 %vm4877_vm6, %v20494_v24  ;;  %v20496_v28 = vmax.f32 %v27665_v36, 0.0 }
0x15e5   : > { %v20495_v33 = vmax.f32 %v20440_v39, 0.0 }
0x15e7   : > { %v27668_v26 = vpop.f32.mrb[190].mxu0  ;;  %27727 = vmatprep.mubr.msk.f32.mxu1 %vm4877_vm6, %v20495_v33 }
0x15e8   : > { %v20450_v35 = vpop.f32.mrb[191].mxu0  ;;  %27728 = vmatmul.mubr.msk.f32.gmra.mrb[184].mxu1 %vm4877_vm6, %v20496_v28  ;;  %v20498_v61 = vmax.f32 %v27668_v26, 0.0 }
0x15e9   : > { %v20497_v16 = vmax.f32 %v20450_v35, 0.0 }
0x15eb   : > { %v27671_v51 = vpop.f32.mrb[192].mxu0  ;;  %27730 = vmatprep.mubr.msk.f32.mxu1 %vm4877_vm6, %v20497_v16 }
0x15ec   : > { %v20460_v4 = vpop.f32.mrb[193].mxu0  ;;  %27731 = vmatmul.mubr.msk.f32.gmra.mrb[186].mxu1 %vm4877_vm6, %v20498_v61  ;;  %v20500_v5 = vmax.f32 %v27671_v51, 0.0 }
0x15ed   : > { %v20499_v8 = vmax.f32 %v20460_v4, 0.0 }
0x15ef   : > { %27733 = vmatprep.mubr.msk.f32.mxu1 %vm4877_vm6, %v20499_v8 }
0x15f0   : > { %27734 = vmatmul.mubr.msk.f32.gmra.mrb[188].mxu1 %vm4877_vm6, %v20500_v5 }
0x1687   : > { %v34698_v15 = vpop.f32.mrb[158].mxu1 }
0x1688   : > { %20823 = vst.msk [vmem:[#allocation2 + $0x8] sm:$0xff] %vm1364_vm5, %v34698_v15  ;;  %v34702_v18 = vpop.f32.mrb[159].mxu1  ;;  %20859 = vst.msk [vmem:[%s29729_s21 + $0x8] sm:$0xff] (!%p22933_p8), %vm1364_vm5, %v34698_v15 }
0x1689   : > { %20822 = vst.msk [vmem:[#allocation2] sm:$0xff] %vm1364_vm5, %v34702_v18  ;;  %20858 = vst.msk [vmem:[%s29729_s21] sm:$0xff] (!%p22933_p8), %vm1364_vm5, %v34702_v18 }
0x168b   : > { %v34706_v0 = vpop.f32.mrb[160].mxu1 }
0x168c   : > { %20825 = vst.msk [vmem:[#allocation2 + $0x18] sm:$0xff] %vm1364_vm5, %v34706_v0  ;;  %v20673_v44 = vpop.f32.mrb[161].mxu1  ;;  %20861 = vst.msk [vmem:[%s29729_s21 + $0x18] sm:$0xff] (!%p22933_p8), %vm1364_vm5, %v34706_v0 }
0x168d   : > { %20824 = vst.msk [vmem:[#allocation2 + $0x10] sm:$0xff] %vm1364_vm5, %v20673_v44  ;;  %20860 = vst.msk [vmem:[%s29729_s21 + $0x10] sm:$0xff] (!%p22933_p8), %vm1364_vm5, %v20673_v44 }
0x168f   : > { %v34711_v38 = vpop.f32.mrb[162].mxu1 }
0x1690   : > { %20827 = vst.msk [vmem:[#allocation2 + $0x28] sm:$0xff] %vm1364_vm5, %v34711_v38  ;;  %v20683_v59 = vpop.f32.mrb[163].mxu1  ;;  %20863 = vst.msk [vmem:[%s29729_s21 + $0x28] sm:$0xff] (!%p22933_p8), %vm1364_vm5, %v34711_v38 }
0x1691   : > { %20826 = vst.msk [vmem:[#allocation2 + $0x20] sm:$0xff] %vm1364_vm5, %v20683_v59  ;;  %20862 = vst.msk [vmem:[%s29729_s21 + $0x20] sm:$0xff] (!%p22933_p8), %vm1364_vm5, %v20683_v59 }
0x1693   : > { %v27699_v49 = vpop.f32.mrb[164].mxu1 }
0x1694   : > { %20829 = vst.msk [vmem:[#allocation2 + $0x38] sm:$0xff] %vm1364_vm5, %v27699_v49  ;;  %v20693_v7 = vpop.f32.mrb[165].mxu1  ;;  %20865 = vst.msk [vmem:[%s29729_s21 + $0x38] sm:$0xff] (!%p22933_p8), %vm1364_vm5, %v27699_v49 }
0x1695   : > { %20828 = vst.msk [vmem:[#allocation2 + $0x30] sm:$0xff] %vm1364_vm5, %v20693_v7  ;;  %20864 = vst.msk [vmem:[%s29729_s21 + $0x30] sm:$0xff] (!%p22933_p8), %vm1364_vm5, %v20693_v7 }
0x1697   : > { %v27702_v17 = vpop.f32.mrb[166].mxu1 }
0x1698   : > { %20831 = vst.msk [vmem:[#allocation2 + $0x48] sm:$0xff] %vm1364_vm5, %v27702_v17  ;;  %v20703_v60 = vpop.f32.mrb[167].mxu1  ;;  %20867 = vst.msk [vmem:[%s29729_s21 + $0x48] sm:$0xff] (!%p22933_p8), %vm1364_vm5, %v27702_v17 }
0x1699   : > { %20830 = vst.msk [vmem:[#allocation2 + $0x40] sm:$0xff] %vm1364_vm5, %v20703_v60  ;;  %20866 = vst.msk [vmem:[%s29729_s21 + $0x40] sm:$0xff] (!%p22933_p8), %vm1364_vm5, %v20703_v60 }
0x169b   : > { %v27705_v11 = vpop.f32.mrb[168].mxu1 }
0x169c   : > { %20833 = vst.msk [vmem:[#allocation2 + $0x58] sm:$0xff] %vm1364_vm5, %v27705_v11  ;;  %v20713_v1 = vpop.f32.mrb[169].mxu1  ;;  %20869 = vst.msk [vmem:[%s29729_s21 + $0x58] sm:$0xff] (!%p22933_p8), %vm1364_vm5, %v27705_v11 }
0x169d   : > { %20832 = vst.msk [vmem:[#allocation2 + $0x50] sm:$0xff] %vm1364_vm5, %v20713_v1  ;;  %20868 = vst.msk [vmem:[%s29729_s21 + $0x50] sm:$0xff] (!%p22933_p8), %vm1364_vm5, %v20713_v1 }
0x169f   : > { %v27708_v57 = vpop.f32.mrb[170].mxu1 }
0x16a0   : > { %20835 = vst.msk [vmem:[#allocation2 + $0x68] sm:$0xff] %vm1364_vm5, %v27708_v57  ;;  %v20723_v47 = vpop.f32.mrb[171].mxu1  ;;  %20871 = vst.msk [vmem:[%s29729_s21 + $0x68] sm:$0xff] (!%p22933_p8), %vm1364_vm5, %v27708_v57 }
0x16a1   : > { %20834 = vst.msk [vmem:[#allocation2 + $0x60] sm:$0xff] %vm1364_vm5, %v20723_v47  ;;  %20870 = vst.msk [vmem:[%s29729_s21 + $0x60] sm:$0xff] (!%p22933_p8), %vm1364_vm5, %v20723_v47 }
0x16a3   : > { %v27711_v55 = vpop.f32.mrb[172].mxu1 }
0x16a4   : > { %20837 = vst.msk [vmem:[#allocation2 + $0x78] sm:$0xff] %vm1364_vm5, %v27711_v55  ;;  %v20733_v37 = vpop.f32.mrb[173].mxu1  ;;  %20873 = vst.msk [vmem:[%s29729_s21 + $0x78] sm:$0xff] (!%p22933_p8), %vm1364_vm5, %v27711_v55 }
0x16a5   : > { %20836 = vst.msk [vmem:[#allocation2 + $0x70] sm:$0xff] %vm1364_vm5, %v20733_v37  ;;  %20872 = vst.msk [vmem:[%s29729_s21 + $0x70] sm:$0xff] (!%p22933_p8), %vm1364_vm5, %v20733_v37 }
0x16a7   : > { %v27714_v6 = vpop.f32.mrb[174].mxu1 }
0x16a8   : > { %20839 = vst.msk [vmem:[#allocation2 + $0x88] sm:$0xff] %vm1364_vm5, %v27714_v6  ;;  %v20743_v29 = vpop.f32.mrb[175].mxu1  ;;  %20875 = vst.msk [vmem:[%s29729_s21 + $0x88] sm:$0xff] (!%p22933_p8), %vm1364_vm5, %v27714_v6 }
0x16a9   : > { %20838 = vst.msk [vmem:[#allocation2 + $0x80] sm:$0xff] %vm1364_vm5, %v20743_v29  ;;  %20874 = vst.msk [vmem:[%s29729_s21 + $0x80] sm:$0xff] (!%p22933_p8), %vm1364_vm5, %v20743_v29 }
0x16ab   : > { %v27717_v43 = vpop.f32.mrb[176].mxu1 }
0x16ac   : > { %20841 = vst.msk [vmem:[#allocation2 + $0x98] sm:$0xff] %vm1364_vm5, %v27717_v43  ;;  %v20753_v2 = vpop.f32.mrb[177].mxu1  ;;  %20877 = vst.msk [vmem:[%s29729_s21 + $0x98] sm:$0xff] (!%p22933_p8), %vm1364_vm5, %v27717_v43 }
0x16ad   : > { %20840 = vst.msk [vmem:[#allocation2 + $0x90] sm:$0xff] %vm1364_vm5, %v20753_v2  ;;  %20876 = vst.msk [vmem:[%s29729_s21 + $0x90] sm:$0xff] (!%p22933_p8), %vm1364_vm5, %v20753_v2 }
0x16af   : > { %v27720_v40 = vpop.f32.mrb[178].mxu1 }
0x16b0   : > { %20843 = vst.msk [vmem:[#allocation2 + $0xa8] sm:$0xff] %vm1364_vm5, %v27720_v40  ;;  %v20763_v52 = vpop.f32.mrb[179].mxu1  ;;  %20879 = vst.msk [vmem:[%s29729_s21 + $0xa8] sm:$0xff] (!%p22933_p8), %vm1364_vm5, %v27720_v40 }
0x16b1   : > { %20842 = vst.msk [vmem:[#allocation2 + $0xa0] sm:$0xff] %vm1364_vm5, %v20763_v52  ;;  %20878 = vst.msk [vmem:[%s29729_s21 + $0xa0] sm:$0xff] (!%p22933_p8), %vm1364_vm5, %v20763_v52 }
0x16b3   : > { %v27723_v19 = vpop.f32.mrb[180].mxu1 }
0x16b4   : > { %20845 = vst.msk [vmem:[#allocation2 + $0xb8] sm:$0xff] %vm1364_vm5, %v27723_v19  ;;  %v20773_v21 = vpop.f32.mrb[181].mxu1  ;;  %20881 = vst.msk [vmem:[%s29729_s21 + $0xb8] sm:$0xff] (!%p22933_p8), %vm1364_vm5, %v27723_v19 }
0x16b5   : > { %20844 = vst.msk [vmem:[#allocation2 + $0xb0] sm:$0xff] %vm1364_vm5, %v20773_v21  ;;  %20880 = vst.msk [vmem:[%s29729_s21 + $0xb0] sm:$0xff] (!%p22933_p8), %vm1364_vm5, %v20773_v21 }
0x16b7   : > { %v27726_v58 = vpop.f32.mrb[182].mxu1 }
0x16b8   : > { %20847 = vst.msk [vmem:[#allocation2 + $0xc8] sm:$0xff] %vm1364_vm5, %v27726_v58  ;;  %v20783_v22 = vpop.f32.mrb[183].mxu1  ;;  %20883 = vst.msk [vmem:[%s29729_s21 + $0xc8] sm:$0xff] (!%p22933_p8), %vm1364_vm5, %v27726_v58 }
0x16b9   : > { %20846 = vst.msk [vmem:[#allocation2 + $0xc0] sm:$0xff] %vm1364_vm5, %v20783_v22  ;;  %20882 = vst.msk [vmem:[%s29729_s21 + $0xc0] sm:$0xff] (!%p22933_p8), %vm1364_vm5, %v20783_v22 }
0x16bb   : > { %v27729_v45 = vpop.f32.mrb[184].mxu1 }
0x16bc   : > { %20849 = vst.msk [vmem:[#allocation2 + $0xd8] sm:$0xff] %vm1364_vm5, %v27729_v45  ;;  %v20793_v23 = vpop.f32.mrb[185].mxu1  ;;  %20885 = vst.msk [vmem:[%s29729_s21 + $0xd8] sm:$0xff] (!%p22933_p8), %vm1364_vm5, %v27729_v45 }
0x16bd   : > { %20848 = vst.msk [vmem:[#allocation2 + $0xd0] sm:$0xff] %vm1364_vm5, %v20793_v23  ;;  %20884 = vst.msk [vmem:[%s29729_s21 + $0xd0] sm:$0xff] (!%p22933_p8), %vm1364_vm5, %v20793_v23 }
0x16bf   : > { %v27732_v32 = vpop.f32.mrb[186].mxu1  ;;  %20857 = sbr.rel (%p22933_p8) target bundleno = 5830 (0x16c6), region = 92 }
0x16c0   : > { %20851 = vst.msk [vmem:[#allocation2 + $0xe8] sm:$0xff] %vm1364_vm5, %v27732_v32  ;;  %v20803_v54 = vpop.f32.mrb[187].mxu1  ;;  %20887 = vst.msk [vmem:[%s29729_s21 + $0xe8] sm:$0xff] (!%p22933_p8), %vm1364_vm5, %v27732_v32 }
0x16c1   : > { %20850 = vst.msk [vmem:[#allocation2 + $0xe0] sm:$0xff] %vm1364_vm5, %v20803_v54  ;;  %20886 = vst.msk [vmem:[%s29729_s21 + $0xe0] sm:$0xff] (!%p22933_p8), %vm1364_vm5, %v20803_v54 }
0x16c3   : > { %v27735_v20 = vpop.f32.mrb[188].mxu1 }
0x16c4   : > { %20853 = vst.msk [vmem:[#allocation2 + $0xf8] sm:$0xff] %vm1364_vm5, %v27735_v20  ;;  %v20813_v46 = vpop.f32.mrb[189].mxu1  ;;  %20889 = vst.msk [vmem:[%s29729_s21 + $0xf8] sm:$0xff] (!%p22933_p8), %vm1364_vm5, %v27735_v20 }
0x16c5   : > { %20852 = vst.msk [vmem:[#allocation2 + $0xf0] sm:$0xff] %vm1364_vm5, %v20813_v46  ;;  %20888 = vst.msk [vmem:[%s29729_s21 + $0xf0] sm:$0xff] (!%p22933_p8), %vm1364_vm5, %v20813_v46 }
0x16c6 PF: > { %s35545_s10 = sld [smem:[#allocation10_spill]]  ;;  %s35546_s21 = sld [smem:[#allocation8_spill]] }
0x16c7   : > { %s35547_s22 = sld [smem:[#allocation9_spill]]  ;;  %s35548_s23 = sld [smem:[#allocation11_spill]] }
0x16c8   : > { %s35549_s24 = sld [smem:[#allocation12_spill]] }
0x16cc   : > { %s26_s25 = sadd.s32 1, %s35545_s10  }
0x16cd   : > { %p23_p9 = scmp.ge.s32.totalorder %s26_s25, 18  }
0x16cf   :  { %25 = sbr.rel (!%p23_p9) target bundleno = 14 (0xe), region = 217 }

</bundles_post_ra>
